<compile_context>
chip_gen: v5e
topology: v5e:2x2
jax: 0.10.0
libtpu: 0.0.40
codegen_flags: <defaults>
</compile_context>

<pallas_src>
import functools

import jax
import jax.numpy as jnp
from jax import lax
from jax.experimental import pallas as pl
from jax.experimental.pallas import tpu as pltpu


# ----------------------------- Pallas kernel ------------------------------ #

def _chessnet_kernel(x_ref, mask_ref, w_in_ref, b_in_ref,
                     wb_ref, sb_ref, tb_ref, w_out_ref, b_out_ref,
                     o_ref, buf_a, buf_b,
                     *, H, W, guard, layers):
    """Fully fused ChessNet forward for one image.

    x_ref     : (PG, Cin_pad)  bf16  padded-flat input (guard+pad rows = 0)
    mask_ref  : (P, 1)         f32   1.0 at interior board rows, else 0.0
    w_in_ref  : (9, Cin_pad, hidden)        bf16
    b_in_ref  : (1, hidden)                  f32
    wb_ref    : (2L, 9, hidden, hidden)      bf16  block conv weights
    sb_ref    : (2L, 1, hidden)              f32   folded BN scales
    tb_ref    : (2L, 1, hidden)              f32   folded BN shifts
    w_out_ref : (9, hidden, Cout)            bf16
    b_out_ref : (1, Cout)                    f32
    o_ref     : (P, Cout)                    f32   padded-flat output
    buf_a/b   : (PG, hidden)                 f32   VMEM ping-pong activations
    """
    Wp = W + 2
    P = (H + 2) * Wp

    # Zero scratch once so guard rows / pad border start as exact zeros.
    buf_a[...] = jnp.zeros_like(buf_a)
    buf_b[...] = jnp.zeros_like(buf_b)

    mask = mask_ref[...]                                   # (P, 1) f32

    def conv(src_bf, get_w, scale, shift, relu, residual=None):
        """3x3 conv on padded-flat src (PG, Cin) + scale/shift (+res) (+ReLU)."""
        acc = None
        for t in range(9):                                 # 9 taps, unrolled
            dy, dx = t // 3, t % 3
            s = (dy - 1) * Wp + (dx - 1)                   # row shift of tap
            patch = src_bf[guard + s:guard + s + P, :]     # (P, Cin) bf16
            d = jnp.dot(patch, get_w(t),
                        preferred_element_type=jnp.float32)
            acc = d if acc is None else acc + d            # init from 1st dot
        y = acc if scale is None else acc * scale
        y = y + shift
        if residual is not None:
            y = y + residual
        if relu:
            y = jnp.maximum(y, 0.0)
        return y                                           # (P, Cout) f32

    # ---- input conv + ReLU ------------------------------------------------
    y = conv(x_ref[...], lambda t: w_in_ref[t], None, b_in_ref[...], True)
    buf_a[pl.ds(guard, P), :] = y * mask

    # ---- residual blocks: conv-BN-ReLU-conv-BN-(+input)-ReLU --------------
    for li in range(layers):
        a_full = buf_a[...]                                # (PG, hidden) f32
        res = a_full[guard:guard + P, :]                   # block input
        h = conv(a_full.astype(jnp.bfloat16),
                 lambda t: wb_ref[2 * li, t],
                 sb_ref[2 * li], tb_ref[2 * li], True)
        buf_b[pl.ds(guard, P), :] = h * mask

        b_full = buf_b[...]
        o = conv(b_full.astype(jnp.bfloat16),
                 lambda t: wb_ref[2 * li + 1, t],
                 sb_ref[2 * li + 1], tb_ref[2 * li + 1], True, residual=res)
        buf_a[pl.ds(guard, P), :] = o * mask

    # ---- output conv (no activation) --------------------------------------
    a_full = buf_a[...]
    y = conv(a_full.astype(jnp.bfloat16), lambda t: w_out_ref[t],
             None, b_out_ref[...], False)
    o_ref[...] = y.astype(o_ref.dtype)


# --------------------------- parameters / model ---------------------------- #

_EPS = 1e-5


def _fold_bn(bias, gamma, beta, mean, var):
    """Fold eval-mode BatchNorm (after a conv with `bias`) into scale/shift."""
    scale = gamma / jnp.sqrt(var + _EPS)
    shift = (bias - mean) * scale + beta
    return scale.reshape(1, -1), shift.reshape(1, -1)


def init_params(key, hidden, layers):
    def nrm(k, shape, s=0.1):
        return s * jax.random.normal(k, shape, jnp.float32)

    keys = jax.random.split(key, 4 + 12 * layers)
    it = iter(keys)
    p = {
        "w_in": nrm(next(it), (9, 6, hidden)),
        "b_in": nrm(next(it), (hidden,)),
        "w_out": nrm(next(it), (9, hidden, 2)),
        "b_out": nrm(next(it), (2,)),
        "blocks": [],
    }
    for _ in range(layers):
        blk = {}
        for j in (1, 2):
            blk[f"w{j}"] = nrm(next(it), (9, hidden, hidden))
            blk[f"b{j}"] = nrm(next(it), (hidden,))
            blk[f"g{j}"] = 1.0 + nrm(next(it), (hidden,))
            blk[f"bt{j}"] = nrm(next(it), (hidden,))
            blk[f"m{j}"] = nrm(next(it), (hidden,))
            blk[f"v{j}"] = 1.0 + jnp.abs(nrm(next(it), (hidden,)))
        p["blocks"].append(blk)
    return p


def chessnet_forward(x_nchw, params):
    """Fused Pallas forward. Input NCHW (N,6,H,W) -> output NCHW (N,2,H,W)."""
    N, c_in, H, W = x_nchw.shape
    hidden = params["w_in"].shape[-1]
    c_out = params["w_out"].shape[-1]
    layers = len(params["blocks"])
    Hp, Wp = H + 2, W + 2
    P = Hp * Wp
    guard = ((W + 3) + 7) // 8 * 8              # guard rows >= max tap shift
    PG = P + 2 * guard
    c_pad = ((c_in + 7) // 8) * 8               # pad input channels to 8

    # --- input: NCHW -> padded-flat (N, PG, c_pad) bf16, zero border/guards
    x = jnp.transpose(x_nchw, (0, 2, 3, 1))                       # NHWC
    x = jnp.pad(x, ((0, 0), (1, 1), (1, 1), (0, c_pad - c_in)))   # spatial+ch
    x = x.reshape(N, P, c_pad)
    x = jnp.pad(x, ((0, 0), (guard, guard), (0, 0)))
    x = x.astype(jnp.bfloat16)

    # --- interior mask over padded-flat rows (built once, outside kernel)
    ridx = jnp.arange(P, dtype=jnp.int32)
    ry, rx = ridx // Wp, ridx % Wp
    mask = (((ry >= 1) & (ry <= H) & (rx >= 1) & (rx <= W))
            .astype(jnp.float32).reshape(P, 1))

    # --- weights (bf16) and folded BN scale/shift (f32), stacked per layer
    w_in = jnp.pad(params["w_in"], ((0, 0), (0, c_pad - c_in), (0, 0)))
    w_in = w_in.astype(jnp.bfloat16)                              # (9,c_pad,h)
    b_in = params["b_in"].reshape(1, hidden).astype(jnp.float32)
    w_out = params["w_out"].astype(jnp.bfloat16)                  # (9,h,c_out)
    b_out = params["b_out"].reshape(1, c_out).astype(jnp.float32)

    wb, sb, tb = [], [], []
    for blk in params["blocks"]:
        for j in (1, 2):
            s, t = _fold_bn(blk[f"b{j}"], blk[f"g{j}"], blk[f"bt{j}"],
                            blk[f"m{j}"], blk[f"v{j}"])
            wb.append(blk[f"w{j}"]); sb.append(s); tb.append(t)
    wb = jnp.stack(wb).astype(jnp.bfloat16)                       # (2L,9,h,h)
    sb = jnp.stack(sb).astype(jnp.float32)                        # (2L,1,h)
    tb = jnp.stack(tb).astype(jnp.float32)

    in_specs = [
        pl.BlockSpec((None, PG, c_pad), lambda n: (n, 0, 0)),
        pl.BlockSpec((P, 1), lambda n: (0, 0)),
        pl.BlockSpec((9, c_pad, hidden), lambda n: (0, 0, 0)),
        pl.BlockSpec((1, hidden), lambda n: (0, 0)),
        pl.BlockSpec((2 * layers, 9, hidden, hidden), lambda n: (0, 0, 0, 0)),
        pl.BlockSpec((2 * layers, 1, hidden), lambda n: (0, 0, 0)),
        pl.BlockSpec((2 * layers, 1, hidden), lambda n: (0, 0, 0)),
        pl.BlockSpec((9, hidden, c_out), lambda n: (0, 0, 0)),
        pl.BlockSpec((1, c_out), lambda n: (0, 0)),
    ]
    out_spec = pl.BlockSpec((None, P, c_out), lambda n: (n, 0, 0))

    flops = int(2 * N * P * 9 * (c_pad * hidden
                                 + 2 * layers * hidden * hidden
                                 + hidden * c_out))
    bytes_accessed = int(sum(int(a.size) * a.dtype.itemsize
                             for a in (x, mask, w_in, b_in, wb, sb, tb,
                                       w_out, b_out))
                         + N * P * c_out * 4)

    kernel = functools.partial(_chessnet_kernel, H=H, W=W, guard=guard,
                               layers=layers)
    y = pl.pallas_call(
        kernel,
        out_shape=jax.ShapeDtypeStruct((N, P, c_out), jnp.float32),
        grid=(N,),
        in_specs=in_specs,
        out_specs=out_spec,
        scratch_shapes=[pltpu.VMEM((PG, hidden), jnp.float32),
                        pltpu.VMEM((PG, hidden), jnp.float32)],
        compiler_params=pltpu.CompilerParams(
            dimension_semantics=("parallel",)),
        cost_estimate=pl.CostEstimate(flops=flops, transcendentals=0,
                                      bytes_accessed=bytes_accessed),
    )(x, mask, w_in, b_in, wb, sb, tb, w_out, b_out)

    # padded-flat -> NCHW interior
    y = y.reshape(N, Hp, Wp, c_out)[:, 1:H + 1, 1:W + 1, :]
    return jnp.transpose(y, (0, 3, 1, 2))


# ------------------------- pure-JAX reference ------------------------------ #

def _conv_ref(x_nhwc, w9, scale, shift, residual=None, relu=True):
    # Matches the kernel's quantization: bf16 conv operands, f32 accumulation,
    # f32 scale/shift/residual/ReLU epilogue.
    Cin, Cout = w9.shape[1], w9.shape[2]
    w = w9.reshape(3, 3, Cin, Cout)
    y = lax.conv_general_dilated(
        x_nhwc.astype(jnp.bfloat16), w.astype(jnp.bfloat16),
        window_strides=(1, 1), padding="SAME",
        dimension_numbers=("NHWC", "HWIO", "NHWC"),
        preferred_element_type=jnp.float32)
    y = y * scale.reshape(1, 1, 1, -1) + shift.reshape(1, 1, 1, -1)
    if residual is not None:
        y = y + residual
    if relu:
        y = jnp.maximum(y, 0.0)
    return y


def chessnet_ref(x_nchw, params):
    x = jnp.transpose(x_nchw, (0, 2, 3, 1))
    hidden = params["w_in"].shape[-1]
    c_out = params["w_out"].shape[-1]
    x = _conv_ref(x, params["w_in"], jnp.ones((hidden,), jnp.float32),
                  params["b_in"], relu=True)
    for blk in params["blocks"]:
        s1, t1 = _fold_bn(blk["b1"], blk["g1"], blk["bt1"], blk["m1"], blk["v1"])
        s2, t2 = _fold_bn(blk["b2"], blk["g2"], blk["bt2"], blk["m2"], blk["v2"])
        h = _conv_ref(x, blk["w1"], s1, t1, relu=True)
        x = _conv_ref(h, blk["w2"], s2, t2, residual=x, relu=True)
    y = _conv_ref(x, params["w_out"], jnp.ones((c_out,), jnp.float32),
                  params["b_out"], relu=False)
    return jnp.transpose(y, (0, 3, 1, 2))


# --------------------------------- main ------------------------------------ #

if __name__ == "__main__":
    N, C_IN, H, W = 2, 6, 8, 8          # chess board is 8x8, 6 input planes
    HIDDEN, LAYERS = 32, 2              # small hidden_size / hidden_layers

    x = jax.random.normal(jax.random.PRNGKey(0), (N, C_IN, H, W), jnp.float32)
    params = init_params(jax.random.PRNGKey(1), HIDDEN, LAYERS)

    out = jax.block_until_ready(chessnet_forward(x, params))
    ref = jax.block_until_ready(chessnet_ref(x, params))

    assert out.shape == (N, 2, H, W), out.shape
    err = float(jnp.max(jnp.abs(out - ref)))
    assert jnp.allclose(out, ref, atol=3e-2, rtol=3e-2), err
    print("KERNEL_OK")
</pallas_src>

<mosaic_0001>
module attributes {stable_mosaic.version = 11 : i64} {
  func.func @_chessnet_kernel(%arg0: i32, %arg1: memref<1x132x8xbf16, #tpu.memory_space<vmem>>, %arg2: memref<100x1xf32, #tpu.memory_space<vmem>>, %arg3: memref<9x8x32xbf16, #tpu.memory_space<vmem>>, %arg4: memref<1x32xf32, #tpu.memory_space<vmem>>, %arg5: memref<4x9x32x32xbf16, #tpu.memory_space<vmem>>, %arg6: memref<4x1x32xf32, #tpu.memory_space<vmem>>, %arg7: memref<4x1x32xf32, #tpu.memory_space<vmem>>, %arg8: memref<9x32x2xbf16, #tpu.memory_space<vmem>>, %arg9: memref<1x2xf32, #tpu.memory_space<vmem>>, %arg10: memref<1x100x2xf32, #tpu.memory_space<vmem>>, %arg11: memref<132x32xf32, #tpu.memory_space<vmem>>, %arg12: memref<132x32xf32, #tpu.memory_space<vmem>>) attributes {dimension_semantics = [#tpu.dimension_semantics<parallel>], iteration_bounds = array<i64: 2>, scalar_prefetch = 0 : i64, scratch_operands = 2 : i64, tpu.core_type = #tpu.core_type<tc>, window_params = [{transform_indices = @transform_0, window_bounds = array<i64: 1, 132, 8>}, {pipeline_mode = #tpu.pipeline_mode<synchronous>, transform_indices = @transform_1, window_bounds = array<i64: 100, 1>}, {pipeline_mode = #tpu.pipeline_mode<synchronous>, transform_indices = @transform_2, window_bounds = array<i64: 9, 8, 32>}, {pipeline_mode = #tpu.pipeline_mode<synchronous>, transform_indices = @transform_3, window_bounds = array<i64: 1, 32>}, {pipeline_mode = #tpu.pipeline_mode<synchronous>, transform_indices = @transform_4, window_bounds = array<i64: 4, 9, 32, 32>}, {pipeline_mode = #tpu.pipeline_mode<synchronous>, transform_indices = @transform_5, window_bounds = array<i64: 4, 1, 32>}, {pipeline_mode = #tpu.pipeline_mode<synchronous>, transform_indices = @transform_6, window_bounds = array<i64: 4, 1, 32>}, {pipeline_mode = #tpu.pipeline_mode<synchronous>, transform_indices = @transform_7, window_bounds = array<i64: 9, 32, 2>}, {pipeline_mode = #tpu.pipeline_mode<synchronous>, transform_indices = @transform_8, window_bounds = array<i64: 1, 2>}, {transform_indices = @transform_9, window_bounds = array<i64: 1, 100, 2>}]} {
    %cst = arith.constant 0.000000e+00 : f32
    %0 = vector.broadcast %cst : f32 to vector<132x32xf32>
    %c0 = arith.constant 0 : index
    %c0_0 = arith.constant 0 : index
    %1 = vector.load %arg11[%c0, %c0_0] : memref<132x32xf32, #tpu.memory_space<vmem>>, vector<132x32xf32>
    tpu.vector_store %arg11[%c0, %c0_0], %0 {strides = array<i32>} : memref<132x32xf32, #tpu.memory_space<vmem>>, vector<132x32xf32>,
    %cst_1 = arith.constant 0.000000e+00 : f32
    %2 = vector.broadcast %cst_1 : f32 to vector<132x32xf32>
    %c0_2 = arith.constant 0 : index
    %c0_3 = arith.constant 0 : index
    %3 = vector.load %arg12[%c0_2, %c0_3] : memref<132x32xf32, #tpu.memory_space<vmem>>, vector<132x32xf32>
    tpu.vector_store %arg12[%c0_2, %c0_3], %2 {strides = array<i32>} : memref<132x32xf32, #tpu.memory_space<vmem>>, vector<132x32xf32>,
    %c0_4 = arith.constant 0 : index
    %c0_5 = arith.constant 0 : index
    %4 = vector.load %arg2[%c0_4, %c0_5] : memref<100x1xf32, #tpu.memory_space<vmem>>, vector<100x1xf32>
    %c0_6 = arith.constant 0 : index
    %c0_7 = arith.constant 0 : index
    %c0_8 = arith.constant 0 : index
    %5 = vector.load %arg1[%c0_6, %c0_7, %c0_8] : memref<1x132x8xbf16, #tpu.memory_space<vmem>>, vector<1x132x8xbf16>
    %6 = vector.shape_cast %5 : vector<1x132x8xbf16> to vector<132x8xbf16>
    %c0_9 = arith.constant 0 : index
    %c0_10 = arith.constant 0 : index
    %7 = vector.load %arg4[%c0_9, %c0_10] : memref<1x32xf32, #tpu.memory_space<vmem>>, vector<1x32xf32>
    %8 = vector.extract_strided_slice %6 {offsets = [5, 0], sizes = [100, 8], strides = [1, 1]} : vector<132x8xbf16> to vector<100x8xbf16>
    %c0_11 = arith.constant 0 : index
    %c0_12 = arith.constant 0 : index
    %c0_13 = arith.constant 0 : index
    %9 = vector.load %arg3[%c0_11, %c0_12, %c0_13] : memref<9x8x32xbf16, #tpu.memory_space<vmem>>, vector<1x8x32xbf16>
    %10 = vector.shape_cast %9 : vector<1x8x32xbf16> to vector<8x32xbf16>
    %cst_14 = arith.constant dense<0.000000e+00> : vector<100x32xf32>
    %11 = tpu.matmul %8, %10, %cst_14 {dimension_numbers = #tpu.dot_dimension_numbers<[1], [0], [0], [1], [0, 0, 1, 1], [], []>} : vector<100x8xbf16>, vector<8x32xbf16>, vector<100x32xf32> -> vector<100x32xf32>
    %12 = vector.extract_strided_slice %6 {offsets = [6, 0], sizes = [100, 8], strides = [1, 1]} : vector<132x8xbf16> to vector<100x8xbf16>
    %c1 = arith.constant 1 : index
    %c0_15 = arith.constant 0 : index
    %c0_16 = arith.constant 0 : index
    %13 = vector.load %arg3[%c1, %c0_15, %c0_16] : memref<9x8x32xbf16, #tpu.memory_space<vmem>>, vector<1x8x32xbf16>
    %14 = vector.shape_cast %13 : vector<1x8x32xbf16> to vector<8x32xbf16>
    %cst_17 = arith.constant dense<0.000000e+00> : vector<100x32xf32>
    %15 = tpu.matmul %12, %14, %cst_17 {dimension_numbers = #tpu.dot_dimension_numbers<[1], [0], [0], [1], [0, 0, 1, 1], [], []>} : vector<100x8xbf16>, vector<8x32xbf16>, vector<100x32xf32> -> vector<100x32xf32>
    %16 = arith.addf %11, %15 : vector<100x32xf32>
    %17 = vector.extract_strided_slice %6 {offsets = [7, 0], sizes = [100, 8], strides = [1, 1]} : vector<132x8xbf16> to vector<100x8xbf16>
    %c2 = arith.constant 2 : index
    %c0_18 = arith.constant 0 : index
    %c0_19 = arith.constant 0 : index
    %18 = vector.load %arg3[%c2, %c0_18, %c0_19] : memref<9x8x32xbf16, #tpu.memory_space<vmem>>, vector<1x8x32xbf16>
    %19 = vector.shape_cast %18 : vector<1x8x32xbf16> to vector<8x32xbf16>
    %cst_20 = arith.constant dense<0.000000e+00> : vector<100x32xf32>
    %20 = tpu.matmul %17, %19, %cst_20 {dimension_numbers = #tpu.dot_dimension_numbers<[1], [0], [0], [1], [0, 0, 1, 1], [], []>} : vector<100x8xbf16>, vector<8x32xbf16>, vector<100x32xf32> -> vector<100x32xf32>
    %21 = arith.addf %16, %20 : vector<100x32xf32>
    %22 = vector.extract_strided_slice %6 {offsets = [15, 0], sizes = [100, 8], strides = [1, 1]} : vector<132x8xbf16> to vector<100x8xbf16>
    %c3 = arith.constant 3 : index
    %c0_21 = arith.constant 0 : index
    %c0_22 = arith.constant 0 : index
    %23 = vector.load %arg3[%c3, %c0_21, %c0_22] : memref<9x8x32xbf16, #tpu.memory_space<vmem>>, vector<1x8x32xbf16>
    %24 = vector.shape_cast %23 : vector<1x8x32xbf16> to vector<8x32xbf16>
    %cst_23 = arith.constant dense<0.000000e+00> : vector<100x32xf32>
    %25 = tpu.matmul %22, %24, %cst_23 {dimension_numbers = #tpu.dot_dimension_numbers<[1], [0], [0], [1], [0, 0, 1, 1], [], []>} : vector<100x8xbf16>, vector<8x32xbf16>, vector<100x32xf32> -> vector<100x32xf32>
    %26 = arith.addf %21, %25 : vector<100x32xf32>
    %27 = vector.extract_strided_slice %6 {offsets = [16, 0], sizes = [100, 8], strides = [1, 1]} : vector<132x8xbf16> to vector<100x8xbf16>
    %c4 = arith.constant 4 : index
    %c0_24 = arith.constant 0 : index
    %c0_25 = arith.constant 0 : index
    %28 = vector.load %arg3[%c4, %c0_24, %c0_25] : memref<9x8x32xbf16, #tpu.memory_space<vmem>>, vector<1x8x32xbf16>
    %29 = vector.shape_cast %28 : vector<1x8x32xbf16> to vector<8x32xbf16>
    %cst_26 = arith.constant dense<0.000000e+00> : vector<100x32xf32>
    %30 = tpu.matmul %27, %29, %cst_26 {dimension_numbers = #tpu.dot_dimension_numbers<[1], [0], [0], [1], [0, 0, 1, 1], [], []>} : vector<100x8xbf16>, vector<8x32xbf16>, vector<100x32xf32> -> vector<100x32xf32>
    %31 = arith.addf %26, %30 : vector<100x32xf32>
    %32 = vector.extract_strided_slice %6 {offsets = [17, 0], sizes = [100, 8], strides = [1, 1]} : vector<132x8xbf16> to vector<100x8xbf16>
    %c5 = arith.constant 5 : index
    %c0_27 = arith.constant 0 : index
    %c0_28 = arith.constant 0 : index
    %33 = vector.load %arg3[%c5, %c0_27, %c0_28] : memref<9x8x32xbf16, #tpu.memory_space<vmem>>, vector<1x8x32xbf16>
    %34 = vector.shape_cast %33 : vector<1x8x32xbf16> to vector<8x32xbf16>
    %cst_29 = arith.constant dense<0.000000e+00> : vector<100x32xf32>
    %35 = tpu.matmul %32, %34, %cst_29 {dimension_numbers = #tpu.dot_dimension_numbers<[1], [0], [0], [1], [0, 0, 1, 1], [], []>} : vector<100x8xbf16>, vector<8x32xbf16>, vector<100x32xf32> -> vector<100x32xf32>
    %36 = arith.addf %31, %35 : vector<100x32xf32>
    %37 = vector.extract_strided_slice %6 {offsets = [25, 0], sizes = [100, 8], strides = [1, 1]} : vector<132x8xbf16> to vector<100x8xbf16>
    %c6 = arith.constant 6 : index
    %c0_30 = arith.constant 0 : index
    %c0_31 = arith.constant 0 : index
    %38 = vector.load %arg3[%c6, %c0_30, %c0_31] : memref<9x8x32xbf16, #tpu.memory_space<vmem>>, vector<1x8x32xbf16>
    %39 = vector.shape_cast %38 : vector<1x8x32xbf16> to vector<8x32xbf16>
    %cst_32 = arith.constant dense<0.000000e+00> : vector<100x32xf32>
    %40 = tpu.matmul %37, %39, %cst_32 {dimension_numbers = #tpu.dot_dimension_numbers<[1], [0], [0], [1], [0, 0, 1, 1], [], []>} : vector<100x8xbf16>, vector<8x32xbf16>, vector<100x32xf32> -> vector<100x32xf32>
    %41 = arith.addf %36, %40 : vector<100x32xf32>
    %42 = vector.extract_strided_slice %6 {offsets = [26, 0], sizes = [100, 8], strides = [1, 1]} : vector<132x8xbf16> to vector<100x8xbf16>
    %c7 = arith.constant 7 : index
    %c0_33 = arith.constant 0 : index
    %c0_34 = arith.constant 0 : index
    %43 = vector.load %arg3[%c7, %c0_33, %c0_34] : memref<9x8x32xbf16, #tpu.memory_space<vmem>>, vector<1x8x32xbf16>
    %44 = vector.shape_cast %43 : vector<1x8x32xbf16> to vector<8x32xbf16>
    %cst_35 = arith.constant dense<0.000000e+00> : vector<100x32xf32>
    %45 = tpu.matmul %42, %44, %cst_35 {dimension_numbers = #tpu.dot_dimension_numbers<[1], [0], [0], [1], [0, 0, 1, 1], [], []>} : vector<100x8xbf16>, vector<8x32xbf16>, vector<100x32xf32> -> vector<100x32xf32>
    %46 = arith.addf %41, %45 : vector<100x32xf32>
    %47 = vector.extract_strided_slice %6 {offsets = [27, 0], sizes = [100, 8], strides = [1, 1]} : vector<132x8xbf16> to vector<100x8xbf16>
    %c8 = arith.constant 8 : index
    %c0_36 = arith.constant 0 : index
    %c0_37 = arith.constant 0 : index
    %48 = vector.load %arg3[%c8, %c0_36, %c0_37] : memref<9x8x32xbf16, #tpu.memory_space<vmem>>, vector<1x8x32xbf16>
    %49 = vector.shape_cast %48 : vector<1x8x32xbf16> to vector<8x32xbf16>
    %cst_38 = arith.constant dense<0.000000e+00> : vector<100x32xf32>
    %50 = tpu.matmul %47, %49, %cst_38 {dimension_numbers = #tpu.dot_dimension_numbers<[1], [0], [0], [1], [0, 0, 1, 1], [], []>} : vector<100x8xbf16>, vector<8x32xbf16>, vector<100x32xf32> -> vector<100x32xf32>
    %51 = arith.addf %46, %50 : vector<100x32xf32>
    %52 = vector.broadcast %7 : vector<1x32xf32> to vector<100x32xf32>
    %53 = arith.addf %51, %52 : vector<100x32xf32>
    %cst_39 = arith.constant 0.000000e+00 : f32
    %54 = vector.broadcast %cst_39 : f32 to vector<100x32xf32>
    %55 = arith.maximumf %53, %54 : vector<100x32xf32>
    %56 = vector.broadcast %4 : vector<100x1xf32> to vector<100x32xf32>
    %57 = arith.mulf %55, %56 : vector<100x32xf32>
    %c16 = arith.constant 16 : index
    %c0_40 = arith.constant 0 : index
    %58 = vector.load %arg11[%c16, %c0_40] : memref<132x32xf32, #tpu.memory_space<vmem>>, vector<100x32xf32>
    tpu.vector_store %arg11[%c16, %c0_40], %57 {strides = array<i32>} : memref<132x32xf32, #tpu.memory_space<vmem>>, vector<100x32xf32>,
    %c0_41 = arith.constant 0 : index
    %c0_42 = arith.constant 0 : index
    %59 = vector.load %arg11[%c0_41, %c0_42] : memref<132x32xf32, #tpu.memory_space<vmem>>, vector<132x32xf32>
    %60 = vector.extract_strided_slice %59 {offsets = [16, 0], sizes = [100, 32], strides = [1, 1]} : vector<132x32xf32> to vector<100x32xf32>
    %61 = arith.truncf %59 : vector<132x32xf32> to vector<132x32xbf16>
    %c0_43 = arith.constant 0 : index
    %c0_44 = arith.constant 0 : index
    %c0_45 = arith.constant 0 : index
    %62 = vector.load %arg6[%c0_43, %c0_44, %c0_45] : memref<4x1x32xf32, #tpu.memory_space<vmem>>, vector<1x1x32xf32>
    %63 = vector.shape_cast %62 : vector<1x1x32xf32> to vector<1x32xf32>
    %c0_46 = arith.constant 0 : index
    %c0_47 = arith.constant 0 : index
    %c0_48 = arith.constant 0 : index
    %64 = vector.load %arg7[%c0_46, %c0_47, %c0_48] : memref<4x1x32xf32, #tpu.memory_space<vmem>>, vector<1x1x32xf32>
    %65 = vector.shape_cast %64 : vector<1x1x32xf32> to vector<1x32xf32>
    %66 = vector.extract_strided_slice %61 {offsets = [5, 0], sizes = [100, 32], strides = [1, 1]} : vector<132x32xbf16> to vector<100x32xbf16>
    %c0_49 = arith.constant 0 : index
    %c0_50 = arith.constant 0 : index
    %c0_51 = arith.constant 0 : index
    %c0_52 = arith.constant 0 : index
    %67 = vector.load %arg5[%c0_49, %c0_50, %c0_51, %c0_52] : memref<4x9x32x32xbf16, #tpu.memory_space<vmem>>, vector<1x1x32x32xbf16>
    %68 = vector.shape_cast %67 : vector<1x1x32x32xbf16> to vector<32x32xbf16>
    %cst_53 = arith.constant dense<0.000000e+00> : vector<100x32xf32>
    %69 = tpu.matmul %66, %68, %cst_53 {dimension_numbers = #tpu.dot_dimension_numbers<[1], [0], [0], [1], [0, 0, 1, 1], [], []>} : vector<100x32xbf16>, vector<32x32xbf16>, vector<100x32xf32> -> vector<100x32xf32>
    %70 = vector.extract_strided_slice %61 {offsets = [6, 0], sizes = [100, 32], strides = [1, 1]} : vector<132x32xbf16> to vector<100x32xbf16>
    %c0_54 = arith.constant 0 : index
    %c1_55 = arith.constant 1 : index
    %c0_56 = arith.constant 0 : index
    %c0_57 = arith.constant 0 : index
    %71 = vector.load %arg5[%c0_54, %c1_55, %c0_56, %c0_57] : memref<4x9x32x32xbf16, #tpu.memory_space<vmem>>, vector<1x1x32x32xbf16>
    %72 = vector.shape_cast %71 : vector<1x1x32x32xbf16> to vector<32x32xbf16>
    %cst_58 = arith.constant dense<0.000000e+00> : vector<100x32xf32>
    %73 = tpu.matmul %70, %72, %cst_58 {dimension_numbers = #tpu.dot_dimension_numbers<[1], [0], [0], [1], [0, 0, 1, 1], [], []>} : vector<100x32xbf16>, vector<32x32xbf16>, vector<100x32xf32> -> vector<100x32xf32>
    %74 = arith.addf %69, %73 : vector<100x32xf32>
    %75 = vector.extract_strided_slice %61 {offsets = [7, 0], sizes = [100, 32], strides = [1, 1]} : vector<132x32xbf16> to vector<100x32xbf16>
    %c0_59 = arith.constant 0 : index
    %c2_60 = arith.constant 2 : index
    %c0_61 = arith.constant 0 : index
    %c0_62 = arith.constant 0 : index
    %76 = vector.load %arg5[%c0_59, %c2_60, %c0_61, %c0_62] : memref<4x9x32x32xbf16, #tpu.memory_space<vmem>>, vector<1x1x32x32xbf16>
    %77 = vector.shape_cast %76 : vector<1x1x32x32xbf16> to vector<32x32xbf16>
    %cst_63 = arith.constant dense<0.000000e+00> : vector<100x32xf32>
    %78 = tpu.matmul %75, %77, %cst_63 {dimension_numbers = #tpu.dot_dimension_numbers<[1], [0], [0], [1], [0, 0, 1, 1], [], []>} : vector<100x32xbf16>, vector<32x32xbf16>, vector<100x32xf32> -> vector<100x32xf32>
    %79 = arith.addf %74, %78 : vector<100x32xf32>
    %80 = vector.extract_strided_slice %61 {offsets = [15, 0], sizes = [100, 32], strides = [1, 1]} : vector<132x32xbf16> to vector<100x32xbf16>
    %c0_64 = arith.constant 0 : index
    %c3_65 = arith.constant 3 : index
    %c0_66 = arith.constant 0 : index
    %c0_67 = arith.constant 0 : index
    %81 = vector.load %arg5[%c0_64, %c3_65, %c0_66, %c0_67] : memref<4x9x32x32xbf16, #tpu.memory_space<vmem>>, vector<1x1x32x32xbf16>
    %82 = vector.shape_cast %81 : vector<1x1x32x32xbf16> to vector<32x32xbf16>
    %cst_68 = arith.constant dense<0.000000e+00> : vector<100x32xf32>
    %83 = tpu.matmul %80, %82, %cst_68 {dimension_numbers = #tpu.dot_dimension_numbers<[1], [0], [0], [1], [0, 0, 1, 1], [], []>} : vector<100x32xbf16>, vector<32x32xbf16>, vector<100x32xf32> -> vector<100x32xf32>
    %84 = arith.addf %79, %83 : vector<100x32xf32>
    %85 = vector.extract_strided_slice %61 {offsets = [16, 0], sizes = [100, 32], strides = [1, 1]} : vector<132x32xbf16> to vector<100x32xbf16>
    %c0_69 = arith.constant 0 : index
    %c4_70 = arith.constant 4 : index
    %c0_71 = arith.constant 0 : index
    %c0_72 = arith.constant 0 : index
    %86 = vector.load %arg5[%c0_69, %c4_70, %c0_71, %c0_72] : memref<4x9x32x32xbf16, #tpu.memory_space<vmem>>, vector<1x1x32x32xbf16>
    %87 = vector.shape_cast %86 : vector<1x1x32x32xbf16> to vector<32x32xbf16>
    %cst_73 = arith.constant dense<0.000000e+00> : vector<100x32xf32>
    %88 = tpu.matmul %85, %87, %cst_73 {dimension_numbers = #tpu.dot_dimension_numbers<[1], [0], [0], [1], [0, 0, 1, 1], [], []>} : vector<100x32xbf16>, vector<32x32xbf16>, vector<100x32xf32> -> vector<100x32xf32>
    %89 = arith.addf %84, %88 : vector<100x32xf32>
    %90 = vector.extract_strided_slice %61 {offsets = [17, 0], sizes = [100, 32], strides = [1, 1]} : vector<132x32xbf16> to vector<100x32xbf16>
    %c0_74 = arith.constant 0 : index
    %c5_75 = arith.constant 5 : index
    %c0_76 = arith.constant 0 : index
    %c0_77 = arith.constant 0 : index
    %91 = vector.load %arg5[%c0_74, %c5_75, %c0_76, %c0_77] : memref<4x9x32x32xbf16, #tpu.memory_space<vmem>>, vector<1x1x32x32xbf16>
    %92 = vector.shape_cast %91 : vector<1x1x32x32xbf16> to vector<32x32xbf16>
    %cst_78 = arith.constant dense<0.000000e+00> : vector<100x32xf32>
    %93 = tpu.matmul %90, %92, %cst_78 {dimension_numbers = #tpu.dot_dimension_numbers<[1], [0], [0], [1], [0, 0, 1, 1], [], []>} : vector<100x32xbf16>, vector<32x32xbf16>, vector<100x32xf32> -> vector<100x32xf32>
    %94 = arith.addf %89, %93 : vector<100x32xf32>
    %95 = vector.extract_strided_slice %61 {offsets = [25, 0], sizes = [100, 32], strides = [1, 1]} : vector<132x32xbf16> to vector<100x32xbf16>
    %c0_79 = arith.constant 0 : index
    %c6_80 = arith.constant 6 : index
    %c0_81 = arith.constant 0 : index
    %c0_82 = arith.constant 0 : index
    %96 = vector.load %arg5[%c0_79, %c6_80, %c0_81, %c0_82] : memref<4x9x32x32xbf16, #tpu.memory_space<vmem>>, vector<1x1x32x32xbf16>
    %97 = vector.shape_cast %96 : vector<1x1x32x32xbf16> to vector<32x32xbf16>
    %cst_83 = arith.constant dense<0.000000e+00> : vector<100x32xf32>
    %98 = tpu.matmul %95, %97, %cst_83 {dimension_numbers = #tpu.dot_dimension_numbers<[1], [0], [0], [1], [0, 0, 1, 1], [], []>} : vector<100x32xbf16>, vector<32x32xbf16>, vector<100x32xf32> -> vector<100x32xf32>
    %99 = arith.addf %94, %98 : vector<100x32xf32>
    %100 = vector.extract_strided_slice %61 {offsets = [26, 0], sizes = [100, 32], strides = [1, 1]} : vector<132x32xbf16> to vector<100x32xbf16>
    %c0_84 = arith.constant 0 : index
    %c7_85 = arith.constant 7 : index
    %c0_86 = arith.constant 0 : index
    %c0_87 = arith.constant 0 : index
    %101 = vector.load %arg5[%c0_84, %c7_85, %c0_86, %c0_87] : memref<4x9x32x32xbf16, #tpu.memory_space<vmem>>, vector<1x1x32x32xbf16>
    %102 = vector.shape_cast %101 : vector<1x1x32x32xbf16> to vector<32x32xbf16>
    %cst_88 = arith.constant dense<0.000000e+00> : vector<100x32xf32>
    %103 = tpu.matmul %100, %102, %cst_88 {dimension_numbers = #tpu.dot_dimension_numbers<[1], [0], [0], [1], [0, 0, 1, 1], [], []>} : vector<100x32xbf16>, vector<32x32xbf16>, vector<100x32xf32> -> vector<100x32xf32>
    %104 = arith.addf %99, %103 : vector<100x32xf32>
    %105 = vector.extract_strided_slice %61 {offsets = [27, 0], sizes = [100, 32], strides = [1, 1]} : vector<132x32xbf16> to vector<100x32xbf16>
    %c0_89 = arith.constant 0 : index
    %c8_90 = arith.constant 8 : index
    %c0_91 = arith.constant 0 : index
    %c0_92 = arith.constant 0 : index
    %106 = vector.load %arg5[%c0_89, %c8_90, %c0_91, %c0_92] : memref<4x9x32x32xbf16, #tpu.memory_space<vmem>>, vector<1x1x32x32xbf16>
    %107 = vector.shape_cast %106 : vector<1x1x32x32xbf16> to vector<32x32xbf16>
    %cst_93 = arith.constant dense<0.000000e+00> : vector<100x32xf32>
    %108 = tpu.matmul %105, %107, %cst_93 {dimension_numbers = #tpu.dot_dimension_numbers<[1], [0], [0], [1], [0, 0, 1, 1], [], []>} : vector<100x32xbf16>, vector<32x32xbf16>, vector<100x32xf32> -> vector<100x32xf32>
    %109 = arith.addf %104, %108 : vector<100x32xf32>
    %110 = vector.broadcast %63 : vector<1x32xf32> to vector<100x32xf32>
    %111 = arith.mulf %109, %110 : vector<100x32xf32>
    %112 = vector.broadcast %65 : vector<1x32xf32> to vector<100x32xf32>
    %113 = arith.addf %111, %112 : vector<100x32xf32>
    %cst_94 = arith.constant 0.000000e+00 : f32
    %114 = vector.broadcast %cst_94 : f32 to vector<100x32xf32>
    %115 = arith.maximumf %113, %114 : vector<100x32xf32>
    %116 = vector.broadcast %4 : vector<100x1xf32> to vector<100x32xf32>
    %117 = arith.mulf %115, %116 : vector<100x32xf32>
    %c16_95 = arith.constant 16 : index
    %c0_96 = arith.constant 0 : index
    %118 = vector.load %arg12[%c16_95, %c0_96] : memref<132x32xf32, #tpu.memory_space<vmem>>, vector<100x32xf32>
    tpu.vector_store %arg12[%c16_95, %c0_96], %117 {strides = array<i32>} : memref<132x32xf32, #tpu.memory_space<vmem>>, vector<100x32xf32>,
    %c0_97 = arith.constant 0 : index
    %c0_98 = arith.constant 0 : index
    %119 = vector.load %arg12[%c0_97, %c0_98] : memref<132x32xf32, #tpu.memory_space<vmem>>, vector<132x32xf32>
    %120 = arith.truncf %119 : vector<132x32xf32> to vector<132x32xbf16>
    %c1_99 = arith.constant 1 : index
    %c0_100 = arith.constant 0 : index
    %c0_101 = arith.constant 0 : index
    %121 = vector.load %arg6[%c1_99, %c0_100, %c0_101] : memref<4x1x32xf32, #tpu.memory_space<vmem>>, vector<1x1x32xf32>
    %122 = vector.shape_cast %121 : vector<1x1x32xf32> to vector<1x32xf32>
    %c1_102 = arith.constant 1 : index
    %c0_103 = arith.constant 0 : index
    %c0_104 = arith.constant 0 : index
    %123 = vector.load %arg7[%c1_102, %c0_103, %c0_104] : memref<4x1x32xf32, #tpu.memory_space<vmem>>, vector<1x1x32xf32>
    %124 = vector.shape_cast %123 : vector<1x1x32xf32> to vector<1x32xf32>
    %125 = vector.extract_strided_slice %120 {offsets = [5, 0], sizes = [100, 32], strides = [1, 1]} : vector<132x32xbf16> to vector<100x32xbf16>
    %c1_105 = arith.constant 1 : index
    %c0_106 = arith.constant 0 : index
    %c0_107 = arith.constant 0 : index
    %c0_108 = arith.constant 0 : index
    %126 = vector.load %arg5[%c1_105, %c0_106, %c0_107, %c0_108] : memref<4x9x32x32xbf16, #tpu.memory_space<vmem>>, vector<1x1x32x32xbf16>
    %127 = vector.shape_cast %126 : vector<1x1x32x32xbf16> to vector<32x32xbf16>
    %cst_109 = arith.constant dense<0.000000e+00> : vector<100x32xf32>
    %128 = tpu.matmul %125, %127, %cst_109 {dimension_numbers = #tpu.dot_dimension_numbers<[1], [0], [0], [1], [0, 0, 1, 1], [], []>} : vector<100x32xbf16>, vector<32x32xbf16>, vector<100x32xf32> -> vector<100x32xf32>
    %129 = vector.extract_strided_slice %120 {offsets = [6, 0], sizes = [100, 32], strides = [1, 1]} : vector<132x32xbf16> to vector<100x32xbf16>
    %c1_110 = arith.constant 1 : index
    %c1_111 = arith.constant 1 : index
    %c0_112 = arith.constant 0 : index
    %c0_113 = arith.constant 0 : index
    %130 = vector.load %arg5[%c1_110, %c1_111, %c0_112, %c0_113] : memref<4x9x32x32xbf16, #tpu.memory_space<vmem>>, vector<1x1x32x32xbf16>
    %131 = vector.shape_cast %130 : vector<1x1x32x32xbf16> to vector<32x32xbf16>
    %cst_114 = arith.constant dense<0.000000e+00> : vector<100x32xf32>
    %132 = tpu.matmul %129, %131, %cst_114 {dimension_numbers = #tpu.dot_dimension_numbers<[1], [0], [0], [1], [0, 0, 1, 1], [], []>} : vector<100x32xbf16>, vector<32x32xbf16>, vector<100x32xf32> -> vector<100x32xf32>
    %133 = arith.addf %128, %132 : vector<100x32xf32>
    %134 = vector.extract_strided_slice %120 {offsets = [7, 0], sizes = [100, 32], strides = [1, 1]} : vector<132x32xbf16> to vector<100x32xbf16>
    %c1_115 = arith.constant 1 : index
    %c2_116 = arith.constant 2 : index
    %c0_117 = arith.constant 0 : index
    %c0_118 = arith.constant 0 : index
    %135 = vector.load %arg5[%c1_115, %c2_116, %c0_117, %c0_118] : memref<4x9x32x32xbf16, #tpu.memory_space<vmem>>, vector<1x1x32x32xbf16>
    %136 = vector.shape_cast %135 : vector<1x1x32x32xbf16> to vector<32x32xbf16>
    %cst_119 = arith.constant dense<0.000000e+00> : vector<100x32xf32>
    %137 = tpu.matmul %134, %136, %cst_119 {dimension_numbers = #tpu.dot_dimension_numbers<[1], [0], [0], [1], [0, 0, 1, 1], [], []>} : vector<100x32xbf16>, vector<32x32xbf16>, vector<100x32xf32> -> vector<100x32xf32>
    %138 = arith.addf %133, %137 : vector<100x32xf32>
    %139 = vector.extract_strided_slice %120 {offsets = [15, 0], sizes = [100, 32], strides = [1, 1]} : vector<132x32xbf16> to vector<100x32xbf16>
    %c1_120 = arith.constant 1 : index
    %c3_121 = arith.constant 3 : index
    %c0_122 = arith.constant 0 : index
    %c0_123 = arith.constant 0 : index
    %140 = vector.load %arg5[%c1_120, %c3_121, %c0_122, %c0_123] : memref<4x9x32x32xbf16, #tpu.memory_space<vmem>>, vector<1x1x32x32xbf16>
    %141 = vector.shape_cast %140 : vector<1x1x32x32xbf16> to vector<32x32xbf16>
    %cst_124 = arith.constant dense<0.000000e+00> : vector<100x32xf32>
    %142 = tpu.matmul %139, %141, %cst_124 {dimension_numbers = #tpu.dot_dimension_numbers<[1], [0], [0], [1], [0, 0, 1, 1], [], []>} : vector<100x32xbf16>, vector<32x32xbf16>, vector<100x32xf32> -> vector<100x32xf32>
    %143 = arith.addf %138, %142 : vector<100x32xf32>
    %144 = vector.extract_strided_slice %120 {offsets = [16, 0], sizes = [100, 32], strides = [1, 1]} : vector<132x32xbf16> to vector<100x32xbf16>
    %c1_125 = arith.constant 1 : index
    %c4_126 = arith.constant 4 : index
    %c0_127 = arith.constant 0 : index
    %c0_128 = arith.constant 0 : index
    %145 = vector.load %arg5[%c1_125, %c4_126, %c0_127, %c0_128] : memref<4x9x32x32xbf16, #tpu.memory_space<vmem>>, vector<1x1x32x32xbf16>
    %146 = vector.shape_cast %145 : vector<1x1x32x32xbf16> to vector<32x32xbf16>
    %cst_129 = arith.constant dense<0.000000e+00> : vector<100x32xf32>
    %147 = tpu.matmul %144, %146, %cst_129 {dimension_numbers = #tpu.dot_dimension_numbers<[1], [0], [0], [1], [0, 0, 1, 1], [], []>} : vector<100x32xbf16>, vector<32x32xbf16>, vector<100x32xf32> -> vector<100x32xf32>
    %148 = arith.addf %143, %147 : vector<100x32xf32>
    %149 = vector.extract_strided_slice %120 {offsets = [17, 0], sizes = [100, 32], strides = [1, 1]} : vector<132x32xbf16> to vector<100x32xbf16>
    %c1_130 = arith.constant 1 : index
    %c5_131 = arith.constant 5 : index
    %c0_132 = arith.constant 0 : index
    %c0_133 = arith.constant 0 : index
    %150 = vector.load %arg5[%c1_130, %c5_131, %c0_132, %c0_133] : memref<4x9x32x32xbf16, #tpu.memory_space<vmem>>, vector<1x1x32x32xbf16>
    %151 = vector.shape_cast %150 : vector<1x1x32x32xbf16> to vector<32x32xbf16>
    %cst_134 = arith.constant dense<0.000000e+00> : vector<100x32xf32>
    %152 = tpu.matmul %149, %151, %cst_134 {dimension_numbers = #tpu.dot_dimension_numbers<[1], [0], [0], [1], [0, 0, 1, 1], [], []>} : vector<100x32xbf16>, vector<32x32xbf16>, vector<100x32xf32> -> vector<100x32xf32>
    %153 = arith.addf %148, %152 : vector<100x32xf32>
    %154 = vector.extract_strided_slice %120 {offsets = [25, 0], sizes = [100, 32], strides = [1, 1]} : vector<132x32xbf16> to vector<100x32xbf16>
    %c1_135 = arith.constant 1 : index
    %c6_136 = arith.constant 6 : index
    %c0_137 = arith.constant 0 : index
    %c0_138 = arith.constant 0 : index
    %155 = vector.load %arg5[%c1_135, %c6_136, %c0_137, %c0_138] : memref<4x9x32x32xbf16, #tpu.memory_space<vmem>>, vector<1x1x32x32xbf16>
    %156 = vector.shape_cast %155 : vector<1x1x32x32xbf16> to vector<32x32xbf16>
    %cst_139 = arith.constant dense<0.000000e+00> : vector<100x32xf32>
    %157 = tpu.matmul %154, %156, %cst_139 {dimension_numbers = #tpu.dot_dimension_numbers<[1], [0], [0], [1], [0, 0, 1, 1], [], []>} : vector<100x32xbf16>, vector<32x32xbf16>, vector<100x32xf32> -> vector<100x32xf32>
    %158 = arith.addf %153, %157 : vector<100x32xf32>
    %159 = vector.extract_strided_slice %120 {offsets = [26, 0], sizes = [100, 32], strides = [1, 1]} : vector<132x32xbf16> to vector<100x32xbf16>
    %c1_140 = arith.constant 1 : index
    %c7_141 = arith.constant 7 : index
    %c0_142 = arith.constant 0 : index
    %c0_143 = arith.constant 0 : index
    %160 = vector.load %arg5[%c1_140, %c7_141, %c0_142, %c0_143] : memref<4x9x32x32xbf16, #tpu.memory_space<vmem>>, vector<1x1x32x32xbf16>
    %161 = vector.shape_cast %160 : vector<1x1x32x32xbf16> to vector<32x32xbf16>
    %cst_144 = arith.constant dense<0.000000e+00> : vector<100x32xf32>
    %162 = tpu.matmul %159, %161, %cst_144 {dimension_numbers = #tpu.dot_dimension_numbers<[1], [0], [0], [1], [0, 0, 1, 1], [], []>} : vector<100x32xbf16>, vector<32x32xbf16>, vector<100x32xf32> -> vector<100x32xf32>
    %163 = arith.addf %158, %162 : vector<100x32xf32>
    %164 = vector.extract_strided_slice %120 {offsets = [27, 0], sizes = [100, 32], strides = [1, 1]} : vector<132x32xbf16> to vector<100x32xbf16>
    %c1_145 = arith.constant 1 : index
    %c8_146 = arith.constant 8 : index
    %c0_147 = arith.constant 0 : index
    %c0_148 = arith.constant 0 : index
    %165 = vector.load %arg5[%c1_145, %c8_146, %c0_147, %c0_148] : memref<4x9x32x32xbf16, #tpu.memory_space<vmem>>, vector<1x1x32x32xbf16>
    %166 = vector.shape_cast %165 : vector<1x1x32x32xbf16> to vector<32x32xbf16>
    %cst_149 = arith.constant dense<0.000000e+00> : vector<100x32xf32>
    %167 = tpu.matmul %164, %166, %cst_149 {dimension_numbers = #tpu.dot_dimension_numbers<[1], [0], [0], [1], [0, 0, 1, 1], [], []>} : vector<100x32xbf16>, vector<32x32xbf16>, vector<100x32xf32> -> vector<100x32xf32>
    %168 = arith.addf %163, %167 : vector<100x32xf32>
    %169 = vector.broadcast %122 : vector<1x32xf32> to vector<100x32xf32>
    %170 = arith.mulf %168, %169 : vector<100x32xf32>
    %171 = vector.broadcast %124 : vector<1x32xf32> to vector<100x32xf32>
    %172 = arith.addf %170, %171 : vector<100x32xf32>
    %173 = arith.addf %172, %60 : vector<100x32xf32>
    %cst_150 = arith.constant 0.000000e+00 : f32
    %174 = vector.broadcast %cst_150 : f32 to vector<100x32xf32>
    %175 = arith.maximumf %173, %174 : vector<100x32xf32>
    %176 = vector.broadcast %4 : vector<100x1xf32> to vector<100x32xf32>
    %177 = arith.mulf %175, %176 : vector<100x32xf32>
    %c16_151 = arith.constant 16 : index
    %c0_152 = arith.constant 0 : index
    %178 = vector.load %arg11[%c16_151, %c0_152] : memref<132x32xf32, #tpu.memory_space<vmem>>, vector<100x32xf32>
    tpu.vector_store %arg11[%c16_151, %c0_152], %177 {strides = array<i32>} : memref<132x32xf32, #tpu.memory_space<vmem>>, vector<100x32xf32>,
    %c0_153 = arith.constant 0 : index
    %c0_154 = arith.constant 0 : index
    %179 = vector.load %arg11[%c0_153, %c0_154] : memref<132x32xf32, #tpu.memory_space<vmem>>, vector<132x32xf32>
    %180 = vector.extract_strided_slice %179 {offsets = [16, 0], sizes = [100, 32], strides = [1, 1]} : vector<132x32xf32> to vector<100x32xf32>
    %181 = arith.truncf %179 : vector<132x32xf32> to vector<132x32xbf16>
    %c2_155 = arith.constant 2 : index
    %c0_156 = arith.constant 0 : index
    %c0_157 = arith.constant 0 : index
    %182 = vector.load %arg6[%c2_155, %c0_156, %c0_157] : memref<4x1x32xf32, #tpu.memory_space<vmem>>, vector<1x1x32xf32>
    %183 = vector.shape_cast %182 : vector<1x1x32xf32> to vector<1x32xf32>
    %c2_158 = arith.constant 2 : index
    %c0_159 = arith.constant 0 : index
    %c0_160 = arith.constant 0 : index
    %184 = vector.load %arg7[%c2_158, %c0_159, %c0_160] : memref<4x1x32xf32, #tpu.memory_space<vmem>>, vector<1x1x32xf32>
    %185 = vector.shape_cast %184 : vector<1x1x32xf32> to vector<1x32xf32>
    %186 = vector.extract_strided_slice %181 {offsets = [5, 0], sizes = [100, 32], strides = [1, 1]} : vector<132x32xbf16> to vector<100x32xbf16>
    %c2_161 = arith.constant 2 : index
    %c0_162 = arith.constant 0 : index
    %c0_163 = arith.constant 0 : index
    %c0_164 = arith.constant 0 : index
    %187 = vector.load %arg5[%c2_161, %c0_162, %c0_163, %c0_164] : memref<4x9x32x32xbf16, #tpu.memory_space<vmem>>, vector<1x1x32x32xbf16>
    %188 = vector.shape_cast %187 : vector<1x1x32x32xbf16> to vector<32x32xbf16>
    %cst_165 = arith.constant dense<0.000000e+00> : vector<100x32xf32>
    %189 = tpu.matmul %186, %188, %cst_165 {dimension_numbers = #tpu.dot_dimension_numbers<[1], [0], [0], [1], [0, 0, 1, 1], [], []>} : vector<100x32xbf16>, vector<32x32xbf16>, vector<100x32xf32> -> vector<100x32xf32>
    %190 = vector.extract_strided_slice %181 {offsets = [6, 0], sizes = [100, 32], strides = [1, 1]} : vector<132x32xbf16> to vector<100x32xbf16>
    %c2_166 = arith.constant 2 : index
    %c1_167 = arith.constant 1 : index
    %c0_168 = arith.constant 0 : index
    %c0_169 = arith.constant 0 : index
    %191 = vector.load %arg5[%c2_166, %c1_167, %c0_168, %c0_169] : memref<4x9x32x32xbf16, #tpu.memory_space<vmem>>, vector<1x1x32x32xbf16>
    %192 = vector.shape_cast %191 : vector<1x1x32x32xbf16> to vector<32x32xbf16>
    %cst_170 = arith.constant dense<0.000000e+00> : vector<100x32xf32>
    %193 = tpu.matmul %190, %192, %cst_170 {dimension_numbers = #tpu.dot_dimension_numbers<[1], [0], [0], [1], [0, 0, 1, 1], [], []>} : vector<100x32xbf16>, vector<32x32xbf16>, vector<100x32xf32> -> vector<100x32xf32>
    %194 = arith.addf %189, %193 : vector<100x32xf32>
    %195 = vector.extract_strided_slice %181 {offsets = [7, 0], sizes = [100, 32], strides = [1, 1]} : vector<132x32xbf16> to vector<100x32xbf16>
    %c2_171 = arith.constant 2 : index
    %c2_172 = arith.constant 2 : index
    %c0_173 = arith.constant 0 : index
    %c0_174 = arith.constant 0 : index
    %196 = vector.load %arg5[%c2_171, %c2_172, %c0_173, %c0_174] : memref<4x9x32x32xbf16, #tpu.memory_space<vmem>>, vector<1x1x32x32xbf16>
    %197 = vector.shape_cast %196 : vector<1x1x32x32xbf16> to vector<32x32xbf16>
    %cst_175 = arith.constant dense<0.000000e+00> : vector<100x32xf32>
    %198 = tpu.matmul %195, %197, %cst_175 {dimension_numbers = #tpu.dot_dimension_numbers<[1], [0], [0], [1], [0, 0, 1, 1], [], []>} : vector<100x32xbf16>, vector<32x32xbf16>, vector<100x32xf32> -> vector<100x32xf32>
    %199 = arith.addf %194, %198 : vector<100x32xf32>
    %200 = vector.extract_strided_slice %181 {offsets = [15, 0], sizes = [100, 32], strides = [1, 1]} : vector<132x32xbf16> to vector<100x32xbf16>
    %c2_176 = arith.constant 2 : index
    %c3_177 = arith.constant 3 : index
    %c0_178 = arith.constant 0 : index
    %c0_179 = arith.constant 0 : index
    %201 = vector.load %arg5[%c2_176, %c3_177, %c0_178, %c0_179] : memref<4x9x32x32xbf16, #tpu.memory_space<vmem>>, vector<1x1x32x32xbf16>
    %202 = vector.shape_cast %201 : vector<1x1x32x32xbf16> to vector<32x32xbf16>
    %cst_180 = arith.constant dense<0.000000e+00> : vector<100x32xf32>
    %203 = tpu.matmul %200, %202, %cst_180 {dimension_numbers = #tpu.dot_dimension_numbers<[1], [0], [0], [1], [0, 0, 1, 1], [], []>} : vector<100x32xbf16>, vector<32x32xbf16>, vector<100x32xf32> -> vector<100x32xf32>
    %204 = arith.addf %199, %203 : vector<100x32xf32>
    %205 = vector.extract_strided_slice %181 {offsets = [16, 0], sizes = [100, 32], strides = [1, 1]} : vector<132x32xbf16> to vector<100x32xbf16>
    %c2_181 = arith.constant 2 : index
    %c4_182 = arith.constant 4 : index
    %c0_183 = arith.constant 0 : index
    %c0_184 = arith.constant 0 : index
    %206 = vector.load %arg5[%c2_181, %c4_182, %c0_183, %c0_184] : memref<4x9x32x32xbf16, #tpu.memory_space<vmem>>, vector<1x1x32x32xbf16>
    %207 = vector.shape_cast %206 : vector<1x1x32x32xbf16> to vector<32x32xbf16>
    %cst_185 = arith.constant dense<0.000000e+00> : vector<100x32xf32>
    %208 = tpu.matmul %205, %207, %cst_185 {dimension_numbers = #tpu.dot_dimension_numbers<[1], [0], [0], [1], [0, 0, 1, 1], [], []>} : vector<100x32xbf16>, vector<32x32xbf16>, vector<100x32xf32> -> vector<100x32xf32>
    %209 = arith.addf %204, %208 : vector<100x32xf32>
    %210 = vector.extract_strided_slice %181 {offsets = [17, 0], sizes = [100, 32], strides = [1, 1]} : vector<132x32xbf16> to vector<100x32xbf16>
    %c2_186 = arith.constant 2 : index
    %c5_187 = arith.constant 5 : index
    %c0_188 = arith.constant 0 : index
    %c0_189 = arith.constant 0 : index
    %211 = vector.load %arg5[%c2_186, %c5_187, %c0_188, %c0_189] : memref<4x9x32x32xbf16, #tpu.memory_space<vmem>>, vector<1x1x32x32xbf16>
    %212 = vector.shape_cast %211 : vector<1x1x32x32xbf16> to vector<32x32xbf16>
    %cst_190 = arith.constant dense<0.000000e+00> : vector<100x32xf32>
    %213 = tpu.matmul %210, %212, %cst_190 {dimension_numbers = #tpu.dot_dimension_numbers<[1], [0], [0], [1], [0, 0, 1, 1], [], []>} : vector<100x32xbf16>, vector<32x32xbf16>, vector<100x32xf32> -> vector<100x32xf32>
    %214 = arith.addf %209, %213 : vector<100x32xf32>
    %215 = vector.extract_strided_slice %181 {offsets = [25, 0], sizes = [100, 32], strides = [1, 1]} : vector<132x32xbf16> to vector<100x32xbf16>
    %c2_191 = arith.constant 2 : index
    %c6_192 = arith.constant 6 : index
    %c0_193 = arith.constant 0 : index
    %c0_194 = arith.constant 0 : index
    %216 = vector.load %arg5[%c2_191, %c6_192, %c0_193, %c0_194] : memref<4x9x32x32xbf16, #tpu.memory_space<vmem>>, vector<1x1x32x32xbf16>
    %217 = vector.shape_cast %216 : vector<1x1x32x32xbf16> to vector<32x32xbf16>
    %cst_195 = arith.constant dense<0.000000e+00> : vector<100x32xf32>
    %218 = tpu.matmul %215, %217, %cst_195 {dimension_numbers = #tpu.dot_dimension_numbers<[1], [0], [0], [1], [0, 0, 1, 1], [], []>} : vector<100x32xbf16>, vector<32x32xbf16>, vector<100x32xf32> -> vector<100x32xf32>
    %219 = arith.addf %214, %218 : vector<100x32xf32>
    %220 = vector.extract_strided_slice %181 {offsets = [26, 0], sizes = [100, 32], strides = [1, 1]} : vector<132x32xbf16> to vector<100x32xbf16>
    %c2_196 = arith.constant 2 : index
    %c7_197 = arith.constant 7 : index
    %c0_198 = arith.constant 0 : index
    %c0_199 = arith.constant 0 : index
    %221 = vector.load %arg5[%c2_196, %c7_197, %c0_198, %c0_199] : memref<4x9x32x32xbf16, #tpu.memory_space<vmem>>, vector<1x1x32x32xbf16>
    %222 = vector.shape_cast %221 : vector<1x1x32x32xbf16> to vector<32x32xbf16>
    %cst_200 = arith.constant dense<0.000000e+00> : vector<100x32xf32>
    %223 = tpu.matmul %220, %222, %cst_200 {dimension_numbers = #tpu.dot_dimension_numbers<[1], [0], [0], [1], [0, 0, 1, 1], [], []>} : vector<100x32xbf16>, vector<32x32xbf16>, vector<100x32xf32> -> vector<100x32xf32>
    %224 = arith.addf %219, %223 : vector<100x32xf32>
    %225 = vector.extract_strided_slice %181 {offsets = [27, 0], sizes = [100, 32], strides = [1, 1]} : vector<132x32xbf16> to vector<100x32xbf16>
    %c2_201 = arith.constant 2 : index
    %c8_202 = arith.constant 8 : index
    %c0_203 = arith.constant 0 : index
    %c0_204 = arith.constant 0 : index
    %226 = vector.load %arg5[%c2_201, %c8_202, %c0_203, %c0_204] : memref<4x9x32x32xbf16, #tpu.memory_space<vmem>>, vector<1x1x32x32xbf16>
    %227 = vector.shape_cast %226 : vector<1x1x32x32xbf16> to vector<32x32xbf16>
    %cst_205 = arith.constant dense<0.000000e+00> : vector<100x32xf32>
    %228 = tpu.matmul %225, %227, %cst_205 {dimension_numbers = #tpu.dot_dimension_numbers<[1], [0], [0], [1], [0, 0, 1, 1], [], []>} : vector<100x32xbf16>, vector<32x32xbf16>, vector<100x32xf32> -> vector<100x32xf32>
    %229 = arith.addf %224, %228 : vector<100x32xf32>
    %230 = vector.broadcast %183 : vector<1x32xf32> to vector<100x32xf32>
    %231 = arith.mulf %229, %230 : vector<100x32xf32>
    %232 = vector.broadcast %185 : vector<1x32xf32> to vector<100x32xf32>
    %233 = arith.addf %231, %232 : vector<100x32xf32>
    %cst_206 = arith.constant 0.000000e+00 : f32
    %234 = vector.broadcast %cst_206 : f32 to vector<100x32xf32>
    %235 = arith.maximumf %233, %234 : vector<100x32xf32>
    %236 = vector.broadcast %4 : vector<100x1xf32> to vector<100x32xf32>
    %237 = arith.mulf %235, %236 : vector<100x32xf32>
    %c16_207 = arith.constant 16 : index
    %c0_208 = arith.constant 0 : index
    %238 = vector.load %arg12[%c16_207, %c0_208] : memref<132x32xf32, #tpu.memory_space<vmem>>, vector<100x32xf32>
    tpu.vector_store %arg12[%c16_207, %c0_208], %237 {strides = array<i32>} : memref<132x32xf32, #tpu.memory_space<vmem>>, vector<100x32xf32>,
    %c0_209 = arith.constant 0 : index
    %c0_210 = arith.constant 0 : index
    %239 = vector.load %arg12[%c0_209, %c0_210] : memref<132x32xf32, #tpu.memory_space<vmem>>, vector<132x32xf32>
    %240 = arith.truncf %239 : vector<132x32xf32> to vector<132x32xbf16>
    %c3_211 = arith.constant 3 : index
    %c0_212 = arith.constant 0 : index
    %c0_213 = arith.constant 0 : index
    %241 = vector.load %arg6[%c3_211, %c0_212, %c0_213] : memref<4x1x32xf32, #tpu.memory_space<vmem>>, vector<1x1x32xf32>
    %242 = vector.shape_cast %241 : vector<1x1x32xf32> to vector<1x32xf32>
    %c3_214 = arith.constant 3 : index
    %c0_215 = arith.constant 0 : index
    %c0_216 = arith.constant 0 : index
    %243 = vector.load %arg7[%c3_214, %c0_215, %c0_216] : memref<4x1x32xf32, #tpu.memory_space<vmem>>, vector<1x1x32xf32>
    %244 = vector.shape_cast %243 : vector<1x1x32xf32> to vector<1x32xf32>
    %245 = vector.extract_strided_slice %240 {offsets = [5, 0], sizes = [100, 32], strides = [1, 1]} : vector<132x32xbf16> to vector<100x32xbf16>
    %c3_217 = arith.constant 3 : index
    %c0_218 = arith.constant 0 : index
    %c0_219 = arith.constant 0 : index
    %c0_220 = arith.constant 0 : index
    %246 = vector.load %arg5[%c3_217, %c0_218, %c0_219, %c0_220] : memref<4x9x32x32xbf16, #tpu.memory_space<vmem>>, vector<1x1x32x32xbf16>
    %247 = vector.shape_cast %246 : vector<1x1x32x32xbf16> to vector<32x32xbf16>
    %cst_221 = arith.constant dense<0.000000e+00> : vector<100x32xf32>
    %248 = tpu.matmul %245, %247, %cst_221 {dimension_numbers = #tpu.dot_dimension_numbers<[1], [0], [0], [1], [0, 0, 1, 1], [], []>} : vector<100x32xbf16>, vector<32x32xbf16>, vector<100x32xf32> -> vector<100x32xf32>
    %249 = vector.extract_strided_slice %240 {offsets = [6, 0], sizes = [100, 32], strides = [1, 1]} : vector<132x32xbf16> to vector<100x32xbf16>
    %c3_222 = arith.constant 3 : index
    %c1_223 = arith.constant 1 : index
    %c0_224 = arith.constant 0 : index
    %c0_225 = arith.constant 0 : index
    %250 = vector.load %arg5[%c3_222, %c1_223, %c0_224, %c0_225] : memref<4x9x32x32xbf16, #tpu.memory_space<vmem>>, vector<1x1x32x32xbf16>
    %251 = vector.shape_cast %250 : vector<1x1x32x32xbf16> to vector<32x32xbf16>
    %cst_226 = arith.constant dense<0.000000e+00> : vector<100x32xf32>
    %252 = tpu.matmul %249, %251, %cst_226 {dimension_numbers = #tpu.dot_dimension_numbers<[1], [0], [0], [1], [0, 0, 1, 1], [], []>} : vector<100x32xbf16>, vector<32x32xbf16>, vector<100x32xf32> -> vector<100x32xf32>
    %253 = arith.addf %248, %252 : vector<100x32xf32>
    %254 = vector.extract_strided_slice %240 {offsets = [7, 0], sizes = [100, 32], strides = [1, 1]} : vector<132x32xbf16> to vector<100x32xbf16>
    %c3_227 = arith.constant 3 : index
    %c2_228 = arith.constant 2 : index
    %c0_229 = arith.constant 0 : index
    %c0_230 = arith.constant 0 : index
    %255 = vector.load %arg5[%c3_227, %c2_228, %c0_229, %c0_230] : memref<4x9x32x32xbf16, #tpu.memory_space<vmem>>, vector<1x1x32x32xbf16>
    %256 = vector.shape_cast %255 : vector<1x1x32x32xbf16> to vector<32x32xbf16>
    %cst_231 = arith.constant dense<0.000000e+00> : vector<100x32xf32>
    %257 = tpu.matmul %254, %256, %cst_231 {dimension_numbers = #tpu.dot_dimension_numbers<[1], [0], [0], [1], [0, 0, 1, 1], [], []>} : vector<100x32xbf16>, vector<32x32xbf16>, vector<100x32xf32> -> vector<100x32xf32>
    %258 = arith.addf %253, %257 : vector<100x32xf32>
    %259 = vector.extract_strided_slice %240 {offsets = [15, 0], sizes = [100, 32], strides = [1, 1]} : vector<132x32xbf16> to vector<100x32xbf16>
    %c3_232 = arith.constant 3 : index
    %c3_233 = arith.constant 3 : index
    %c0_234 = arith.constant 0 : index
    %c0_235 = arith.constant 0 : index
    %260 = vector.load %arg5[%c3_232, %c3_233, %c0_234, %c0_235] : memref<4x9x32x32xbf16, #tpu.memory_space<vmem>>, vector<1x1x32x32xbf16>
    %261 = vector.shape_cast %260 : vector<1x1x32x32xbf16> to vector<32x32xbf16>
    %cst_236 = arith.constant dense<0.000000e+00> : vector<100x32xf32>
    %262 = tpu.matmul %259, %261, %cst_236 {dimension_numbers = #tpu.dot_dimension_numbers<[1], [0], [0], [1], [0, 0, 1, 1], [], []>} : vector<100x32xbf16>, vector<32x32xbf16>, vector<100x32xf32> -> vector<100x32xf32>
    %263 = arith.addf %258, %262 : vector<100x32xf32>
    %264 = vector.extract_strided_slice %240 {offsets = [16, 0], sizes = [100, 32], strides = [1, 1]} : vector<132x32xbf16> to vector<100x32xbf16>
    %c3_237 = arith.constant 3 : index
    %c4_238 = arith.constant 4 : index
    %c0_239 = arith.constant 0 : index
    %c0_240 = arith.constant 0 : index
    %265 = vector.load %arg5[%c3_237, %c4_238, %c0_239, %c0_240] : memref<4x9x32x32xbf16, #tpu.memory_space<vmem>>, vector<1x1x32x32xbf16>
    %266 = vector.shape_cast %265 : vector<1x1x32x32xbf16> to vector<32x32xbf16>
    %cst_241 = arith.constant dense<0.000000e+00> : vector<100x32xf32>
    %267 = tpu.matmul %264, %266, %cst_241 {dimension_numbers = #tpu.dot_dimension_numbers<[1], [0], [0], [1], [0, 0, 1, 1], [], []>} : vector<100x32xbf16>, vector<32x32xbf16>, vector<100x32xf32> -> vector<100x32xf32>
    %268 = arith.addf %263, %267 : vector<100x32xf32>
    %269 = vector.extract_strided_slice %240 {offsets = [17, 0], sizes = [100, 32], strides = [1, 1]} : vector<132x32xbf16> to vector<100x32xbf16>
    %c3_242 = arith.constant 3 : index
    %c5_243 = arith.constant 5 : index
    %c0_244 = arith.constant 0 : index
    %c0_245 = arith.constant 0 : index
    %270 = vector.load %arg5[%c3_242, %c5_243, %c0_244, %c0_245] : memref<4x9x32x32xbf16, #tpu.memory_space<vmem>>, vector<1x1x32x32xbf16>
    %271 = vector.shape_cast %270 : vector<1x1x32x32xbf16> to vector<32x32xbf16>
    %cst_246 = arith.constant dense<0.000000e+00> : vector<100x32xf32>
    %272 = tpu.matmul %269, %271, %cst_246 {dimension_numbers = #tpu.dot_dimension_numbers<[1], [0], [0], [1], [0, 0, 1, 1], [], []>} : vector<100x32xbf16>, vector<32x32xbf16>, vector<100x32xf32> -> vector<100x32xf32>
    %273 = arith.addf %268, %272 : vector<100x32xf32>
    %274 = vector.extract_strided_slice %240 {offsets = [25, 0], sizes = [100, 32], strides = [1, 1]} : vector<132x32xbf16> to vector<100x32xbf16>
    %c3_247 = arith.constant 3 : index
    %c6_248 = arith.constant 6 : index
    %c0_249 = arith.constant 0 : index
    %c0_250 = arith.constant 0 : index
    %275 = vector.load %arg5[%c3_247, %c6_248, %c0_249, %c0_250] : memref<4x9x32x32xbf16, #tpu.memory_space<vmem>>, vector<1x1x32x32xbf16>
    %276 = vector.shape_cast %275 : vector<1x1x32x32xbf16> to vector<32x32xbf16>
    %cst_251 = arith.constant dense<0.000000e+00> : vector<100x32xf32>
    %277 = tpu.matmul %274, %276, %cst_251 {dimension_numbers = #tpu.dot_dimension_numbers<[1], [0], [0], [1], [0, 0, 1, 1], [], []>} : vector<100x32xbf16>, vector<32x32xbf16>, vector<100x32xf32> -> vector<100x32xf32>
    %278 = arith.addf %273, %277 : vector<100x32xf32>
    %279 = vector.extract_strided_slice %240 {offsets = [26, 0], sizes = [100, 32], strides = [1, 1]} : vector<132x32xbf16> to vector<100x32xbf16>
    %c3_252 = arith.constant 3 : index
    %c7_253 = arith.constant 7 : index
    %c0_254 = arith.constant 0 : index
    %c0_255 = arith.constant 0 : index
    %280 = vector.load %arg5[%c3_252, %c7_253, %c0_254, %c0_255] : memref<4x9x32x32xbf16, #tpu.memory_space<vmem>>, vector<1x1x32x32xbf16>
    %281 = vector.shape_cast %280 : vector<1x1x32x32xbf16> to vector<32x32xbf16>
    %cst_256 = arith.constant dense<0.000000e+00> : vector<100x32xf32>
    %282 = tpu.matmul %279, %281, %cst_256 {dimension_numbers = #tpu.dot_dimension_numbers<[1], [0], [0], [1], [0, 0, 1, 1], [], []>} : vector<100x32xbf16>, vector<32x32xbf16>, vector<100x32xf32> -> vector<100x32xf32>
    %283 = arith.addf %278, %282 : vector<100x32xf32>
    %284 = vector.extract_strided_slice %240 {offsets = [27, 0], sizes = [100, 32], strides = [1, 1]} : vector<132x32xbf16> to vector<100x32xbf16>
    %c3_257 = arith.constant 3 : index
    %c8_258 = arith.constant 8 : index
    %c0_259 = arith.constant 0 : index
    %c0_260 = arith.constant 0 : index
    %285 = vector.load %arg5[%c3_257, %c8_258, %c0_259, %c0_260] : memref<4x9x32x32xbf16, #tpu.memory_space<vmem>>, vector<1x1x32x32xbf16>
    %286 = vector.shape_cast %285 : vector<1x1x32x32xbf16> to vector<32x32xbf16>
    %cst_261 = arith.constant dense<0.000000e+00> : vector<100x32xf32>
    %287 = tpu.matmul %284, %286, %cst_261 {dimension_numbers = #tpu.dot_dimension_numbers<[1], [0], [0], [1], [0, 0, 1, 1], [], []>} : vector<100x32xbf16>, vector<32x32xbf16>, vector<100x32xf32> -> vector<100x32xf32>
    %288 = arith.addf %283, %287 : vector<100x32xf32>
    %289 = vector.broadcast %242 : vector<1x32xf32> to vector<100x32xf32>
    %290 = arith.mulf %288, %289 : vector<100x32xf32>
    %291 = vector.broadcast %244 : vector<1x32xf32> to vector<100x32xf32>
    %292 = arith.addf %290, %291 : vector<100x32xf32>
    %293 = arith.addf %292, %180 : vector<100x32xf32>
    %cst_262 = arith.constant 0.000000e+00 : f32
    %294 = vector.broadcast %cst_262 : f32 to vector<100x32xf32>
    %295 = arith.maximumf %293, %294 : vector<100x32xf32>
    %296 = vector.broadcast %4 : vector<100x1xf32> to vector<100x32xf32>
    %297 = arith.mulf %295, %296 : vector<100x32xf32>
    %c16_263 = arith.constant 16 : index
    %c0_264 = arith.constant 0 : index
    %298 = vector.load %arg11[%c16_263, %c0_264] : memref<132x32xf32, #tpu.memory_space<vmem>>, vector<100x32xf32>
    tpu.vector_store %arg11[%c16_263, %c0_264], %297 {strides = array<i32>} : memref<132x32xf32, #tpu.memory_space<vmem>>, vector<100x32xf32>,
    %c0_265 = arith.constant 0 : index
    %c0_266 = arith.constant 0 : index
    %299 = vector.load %arg11[%c0_265, %c0_266] : memref<132x32xf32, #tpu.memory_space<vmem>>, vector<132x32xf32>
    %300 = arith.truncf %299 : vector<132x32xf32> to vector<132x32xbf16>
    %c0_267 = arith.constant 0 : index
    %c0_268 = arith.constant 0 : index
    %301 = vector.load %arg9[%c0_267, %c0_268] : memref<1x2xf32, #tpu.memory_space<vmem>>, vector<1x2xf32>
    %302 = vector.extract_strided_slice %300 {offsets = [5, 0], sizes = [100, 32], strides = [1, 1]} : vector<132x32xbf16> to vector<100x32xbf16>
    %c0_269 = arith.constant 0 : index
    %c0_270 = arith.constant 0 : index
    %c0_271 = arith.constant 0 : index
    %303 = vector.load %arg8[%c0_269, %c0_270, %c0_271] : memref<9x32x2xbf16, #tpu.memory_space<vmem>>, vector<1x32x2xbf16>
    %304 = vector.shape_cast %303 : vector<1x32x2xbf16> to vector<32x2xbf16>
    %cst_272 = arith.constant dense<0.000000e+00> : vector<100x2xf32>
    %305 = tpu.matmul %302, %304, %cst_272 {dimension_numbers = #tpu.dot_dimension_numbers<[1], [0], [0], [1], [0, 0, 1, 1], [], []>} : vector<100x32xbf16>, vector<32x2xbf16>, vector<100x2xf32> -> vector<100x2xf32>
    %306 = vector.extract_strided_slice %300 {offsets = [6, 0], sizes = [100, 32], strides = [1, 1]} : vector<132x32xbf16> to vector<100x32xbf16>
    %c1_273 = arith.constant 1 : index
    %c0_274 = arith.constant 0 : index
    %c0_275 = arith.constant 0 : index
    %307 = vector.load %arg8[%c1_273, %c0_274, %c0_275] : memref<9x32x2xbf16, #tpu.memory_space<vmem>>, vector<1x32x2xbf16>
    %308 = vector.shape_cast %307 : vector<1x32x2xbf16> to vector<32x2xbf16>
    %cst_276 = arith.constant dense<0.000000e+00> : vector<100x2xf32>
    %309 = tpu.matmul %306, %308, %cst_276 {dimension_numbers = #tpu.dot_dimension_numbers<[1], [0], [0], [1], [0, 0, 1, 1], [], []>} : vector<100x32xbf16>, vector<32x2xbf16>, vector<100x2xf32> -> vector<100x2xf32>
    %310 = arith.addf %305, %309 : vector<100x2xf32>
    %311 = vector.extract_strided_slice %300 {offsets = [7, 0], sizes = [100, 32], strides = [1, 1]} : vector<132x32xbf16> to vector<100x32xbf16>
    %c2_277 = arith.constant 2 : index
    %c0_278 = arith.constant 0 : index
    %c0_279 = arith.constant 0 : index
    %312 = vector.load %arg8[%c2_277, %c0_278, %c0_279] : memref<9x32x2xbf16, #tpu.memory_space<vmem>>, vector<1x32x2xbf16>
    %313 = vector.shape_cast %312 : vector<1x32x2xbf16> to vector<32x2xbf16>
    %cst_280 = arith.constant dense<0.000000e+00> : vector<100x2xf32>
    %314 = tpu.matmul %311, %313, %cst_280 {dimension_numbers = #tpu.dot_dimension_numbers<[1], [0], [0], [1], [0, 0, 1, 1], [], []>} : vector<100x32xbf16>, vector<32x2xbf16>, vector<100x2xf32> -> vector<100x2xf32>
    %315 = arith.addf %310, %314 : vector<100x2xf32>
    %316 = vector.extract_strided_slice %300 {offsets = [15, 0], sizes = [100, 32], strides = [1, 1]} : vector<132x32xbf16> to vector<100x32xbf16>
    %c3_281 = arith.constant 3 : index
    %c0_282 = arith.constant 0 : index
    %c0_283 = arith.constant 0 : index
    %317 = vector.load %arg8[%c3_281, %c0_282, %c0_283] : memref<9x32x2xbf16, #tpu.memory_space<vmem>>, vector<1x32x2xbf16>
    %318 = vector.shape_cast %317 : vector<1x32x2xbf16> to vector<32x2xbf16>
    %cst_284 = arith.constant dense<0.000000e+00> : vector<100x2xf32>
    %319 = tpu.matmul %316, %318, %cst_284 {dimension_numbers = #tpu.dot_dimension_numbers<[1], [0], [0], [1], [0, 0, 1, 1], [], []>} : vector<100x32xbf16>, vector<32x2xbf16>, vector<100x2xf32> -> vector<100x2xf32>
    %320 = arith.addf %315, %319 : vector<100x2xf32>
    %321 = vector.extract_strided_slice %300 {offsets = [16, 0], sizes = [100, 32], strides = [1, 1]} : vector<132x32xbf16> to vector<100x32xbf16>
    %c4_285 = arith.constant 4 : index
    %c0_286 = arith.constant 0 : index
    %c0_287 = arith.constant 0 : index
    %322 = vector.load %arg8[%c4_285, %c0_286, %c0_287] : memref<9x32x2xbf16, #tpu.memory_space<vmem>>, vector<1x32x2xbf16>
    %323 = vector.shape_cast %322 : vector<1x32x2xbf16> to vector<32x2xbf16>
    %cst_288 = arith.constant dense<0.000000e+00> : vector<100x2xf32>
    %324 = tpu.matmul %321, %323, %cst_288 {dimension_numbers = #tpu.dot_dimension_numbers<[1], [0], [0], [1], [0, 0, 1, 1], [], []>} : vector<100x32xbf16>, vector<32x2xbf16>, vector<100x2xf32> -> vector<100x2xf32>
    %325 = arith.addf %320, %324 : vector<100x2xf32>
    %326 = vector.extract_strided_slice %300 {offsets = [17, 0], sizes = [100, 32], strides = [1, 1]} : vector<132x32xbf16> to vector<100x32xbf16>
    %c5_289 = arith.constant 5 : index
    %c0_290 = arith.constant 0 : index
    %c0_291 = arith.constant 0 : index
    %327 = vector.load %arg8[%c5_289, %c0_290, %c0_291] : memref<9x32x2xbf16, #tpu.memory_space<vmem>>, vector<1x32x2xbf16>
    %328 = vector.shape_cast %327 : vector<1x32x2xbf16> to vector<32x2xbf16>
    %cst_292 = arith.constant dense<0.000000e+00> : vector<100x2xf32>
    %329 = tpu.matmul %326, %328, %cst_292 {dimension_numbers = #tpu.dot_dimension_numbers<[1], [0], [0], [1], [0, 0, 1, 1], [], []>} : vector<100x32xbf16>, vector<32x2xbf16>, vector<100x2xf32> -> vector<100x2xf32>
    %330 = arith.addf %325, %329 : vector<100x2xf32>
    %331 = vector.extract_strided_slice %300 {offsets = [25, 0], sizes = [100, 32], strides = [1, 1]} : vector<132x32xbf16> to vector<100x32xbf16>
    %c6_293 = arith.constant 6 : index
    %c0_294 = arith.constant 0 : index
    %c0_295 = arith.constant 0 : index
    %332 = vector.load %arg8[%c6_293, %c0_294, %c0_295] : memref<9x32x2xbf16, #tpu.memory_space<vmem>>, vector<1x32x2xbf16>
    %333 = vector.shape_cast %332 : vector<1x32x2xbf16> to vector<32x2xbf16>
    %cst_296 = arith.constant dense<0.000000e+00> : vector<100x2xf32>
    %334 = tpu.matmul %331, %333, %cst_296 {dimension_numbers = #tpu.dot_dimension_numbers<[1], [0], [0], [1], [0, 0, 1, 1], [], []>} : vector<100x32xbf16>, vector<32x2xbf16>, vector<100x2xf32> -> vector<100x2xf32>
    %335 = arith.addf %330, %334 : vector<100x2xf32>
    %336 = vector.extract_strided_slice %300 {offsets = [26, 0], sizes = [100, 32], strides = [1, 1]} : vector<132x32xbf16> to vector<100x32xbf16>
    %c7_297 = arith.constant 7 : index
    %c0_298 = arith.constant 0 : index
    %c0_299 = arith.constant 0 : index
    %337 = vector.load %arg8[%c7_297, %c0_298, %c0_299] : memref<9x32x2xbf16, #tpu.memory_space<vmem>>, vector<1x32x2xbf16>
    %338 = vector.shape_cast %337 : vector<1x32x2xbf16> to vector<32x2xbf16>
    %cst_300 = arith.constant dense<0.000000e+00> : vector<100x2xf32>
    %339 = tpu.matmul %336, %338, %cst_300 {dimension_numbers = #tpu.dot_dimension_numbers<[1], [0], [0], [1], [0, 0, 1, 1], [], []>} : vector<100x32xbf16>, vector<32x2xbf16>, vector<100x2xf32> -> vector<100x2xf32>
    %340 = arith.addf %335, %339 : vector<100x2xf32>
    %341 = vector.extract_strided_slice %300 {offsets = [27, 0], sizes = [100, 32], strides = [1, 1]} : vector<132x32xbf16> to vector<100x32xbf16>
    %c8_301 = arith.constant 8 : index
    %c0_302 = arith.constant 0 : index
    %c0_303 = arith.constant 0 : index
    %342 = vector.load %arg8[%c8_301, %c0_302, %c0_303] : memref<9x32x2xbf16, #tpu.memory_space<vmem>>, vector<1x32x2xbf16>
    %343 = vector.shape_cast %342 : vector<1x32x2xbf16> to vector<32x2xbf16>
    %cst_304 = arith.constant dense<0.000000e+00> : vector<100x2xf32>
    %344 = tpu.matmul %341, %343, %cst_304 {dimension_numbers = #tpu.dot_dimension_numbers<[1], [0], [0], [1], [0, 0, 1, 1], [], []>} : vector<100x32xbf16>, vector<32x2xbf16>, vector<100x2xf32> -> vector<100x2xf32>
    %345 = arith.addf %340, %344 : vector<100x2xf32>
    %346 = vector.broadcast %301 : vector<1x2xf32> to vector<100x2xf32>
    %347 = arith.addf %345, %346 : vector<100x2xf32>
    %c0_305 = arith.constant 0 : index
    %c0_306 = arith.constant 0 : index
    %c0_307 = arith.constant 0 : index
    %348 = vector.load %arg10[%c0_305, %c0_306, %c0_307] : memref<1x100x2xf32, #tpu.memory_space<vmem>>, vector<1x100x2xf32>
    %349 = vector.shape_cast %348 : vector<1x100x2xf32> to vector<100x2xf32>
    %350 = vector.shape_cast %347 : vector<100x2xf32> to vector<1x100x2xf32>
    tpu.vector_store %arg10[%c0_305, %c0_306, %c0_307], %350 {strides = array<i32>} : memref<1x100x2xf32, #tpu.memory_space<vmem>>, vector<1x100x2xf32>,
    return
  }
  func.func @transform_0(%arg0: i32) -> (i32, i32, i32) {
    %c0_i32 = arith.constant 0 : i32
    %c0_i32_0 = arith.constant 0 : i32
    %c0_i32_1 = arith.constant 0 : i32
    return %arg0, %c0_i32, %c0_i32_0 : i32, i32, i32
  }
  func.func @transform_1(%arg0: i32) -> (i32, i32) {
    %c0_i32 = arith.constant 0 : i32
    %c0_i32_0 = arith.constant 0 : i32
    %c0_i32_1 = arith.constant 0 : i32
    return %c0_i32, %c0_i32_0 : i32, i32
  }
  func.func @transform_2(%arg0: i32) -> (i32, i32, i32) {
    %c0_i32 = arith.constant 0 : i32
    %c0_i32_0 = arith.constant 0 : i32
    %c0_i32_1 = arith.constant 0 : i32
    %c0_i32_2 = arith.constant 0 : i32
    return %c0_i32, %c0_i32_0, %c0_i32_1 : i32, i32, i32
  }
  func.func @transform_3(%arg0: i32) -> (i32, i32) {
    %c0_i32 = arith.constant 0 : i32
    %c0_i32_0 = arith.constant 0 : i32
    %c0_i32_1 = arith.constant 0 : i32
    return %c0_i32, %c0_i32_0 : i32, i32
  }
  func.func @transform_4(%arg0: i32) -> (i32, i32, i32, i32) {
    %c0_i32 = arith.constant 0 : i32
    %c0_i32_0 = arith.constant 0 : i32
    %c0_i32_1 = arith.constant 0 : i32
    %c0_i32_2 = arith.constant 0 : i32
    %c0_i32_3 = arith.constant 0 : i32
    return %c0_i32, %c0_i32_0, %c0_i32_1, %c0_i32_2 : i32, i32, i32, i32
  }
  func.func @transform_5(%arg0: i32) -> (i32, i32, i32) {
    %c0_i32 = arith.constant 0 : i32
    %c0_i32_0 = arith.constant 0 : i32
    %c0_i32_1 = arith.constant 0 : i32
    %c0_i32_2 = arith.constant 0 : i32
    return %c0_i32, %c0_i32_0, %c0_i32_1 : i32, i32, i32
  }
  func.func @transform_6(%arg0: i32) -> (i32, i32, i32) {
    %c0_i32 = arith.constant 0 : i32
    %c0_i32_0 = arith.constant 0 : i32
    %c0_i32_1 = arith.constant 0 : i32
    %c0_i32_2 = arith.constant 0 : i32
    return %c0_i32, %c0_i32_0, %c0_i32_1 : i32, i32, i32
  }
  func.func @transform_7(%arg0: i32) -> (i32, i32, i32) {
    %c0_i32 = arith.constant 0 : i32
    %c0_i32_0 = arith.constant 0 : i32
    %c0_i32_1 = arith.constant 0 : i32
    %c0_i32_2 = arith.constant 0 : i32
    return %c0_i32, %c0_i32_0, %c0_i32_1 : i32, i32, i32
  }
  func.func @transform_8(%arg0: i32) -> (i32, i32) {
    %c0_i32 = arith.constant 0 : i32
    %c0_i32_0 = arith.constant 0 : i32
    %c0_i32_1 = arith.constant 0 : i32
    return %c0_i32, %c0_i32_0 : i32, i32
  }
  func.func @transform_9(%arg0: i32) -> (i32, i32, i32) {
    %c0_i32 = arith.constant 0 : i32
    %c0_i32_0 = arith.constant 0 : i32
    %c0_i32_1 = arith.constant 0 : i32
    return %arg0, %c0_i32, %c0_i32_0 : i32, i32, i32
  }
}

</mosaic_0001>

<bundles_post_ra>
// kernel: tpu_custom_call.1
= control target key start
LH: loop header
LB: loop body
LE: loop exit
PB: predicated region body
PF: predicated region fallthrough
CT: control target
= control target key end

     0   :  { %14 = vsyncpa [#allocation5], 0  ;;  %s8836_s30 = smov 0   ;;  %s12591_s0 = inlined_call_operand.vmem [shape: bf16[2,132,8], index: 0, kind: input, shape index: {}]   ;;  %s12592_s1 = inlined_call_operand.vmem [shape: f32[100,1], index: 1, kind: input, shape index: {}]   ;;  %s12593_s2 = inlined_call_operand.vmem [shape: bf16[9,8,32], index: 2, kind: input, shape index: {}]   ;;  %s12594_s3 = inlined_call_operand.vmem [shape: f32[1,32], index: 3, kind: input, shape index: {}]   ;;  %s12595_s4 = inlined_call_operand.hbm [shape: bf16[4,9,32,32], index: 4, kind: input, shape index: {}]   ;;  %s12596_s5 = inlined_call_operand.vmem [shape: f32[4,1,32], index: 5, kind: input, shape index: {}]   ;;  %s12597_s6 = inlined_call_operand.vmem [shape: f32[4,1,32], index: 6, kind: input, shape index: {}]   ;;  %s12598_s7 = inlined_call_operand.vmem [shape: bf16[9,32,2], index: 7, kind: input, shape index: {}]   ;;  %s12599_s8 = inlined_call_operand.vmem [shape: f32[1,2], index: 8, kind: input, shape index: {}]   ;;  %s12600_s9 = inlined_call_operand.vmem [shape: f32[2,100,2], index: 9, kind: output, shape index: {}]  }
   0x1 LB: > { %s265_s12 = sshll.u32 %s12595_s4, 4  ;;  %s7707_s13 = sadd.s32 4294967295, %s8779_s30   ;;  %s8779_s30 = sphi %s8836_s30, %s20_s30   ;;  %s266_s12 = int_to_ptr.hbm [resolvable:$true] %s265_s12 }
   0x2   : > { %p7709_p0 = scmp.ge.s32.totalorder %s8779_s30, 1  ;;  %p245_p1 = scmp.lt.s32.totalorder %s8779_s30, 3 }
   0x3   : > { %p8685_p2 = scmp.eq.s32.totalorder %s7707_s13, 0  ;;  %s8781_s14 = smov [#allocation4]  }
   0x4   : > { %p246_p3 = pnand %p7709_p0, %p245_p1  ;;  %s267_s15 = sshll.u32 %s8781_s14, 4  ;;  %s268_s15 = int_to_ptr.vmem [resolvable:$true] %s267_s15 }
   0x5   : > { %s8782_s16 = smov 64   ;;  %s8783_s17 = smov 4  }
   0x6   : > { %p8681_p4 = pneg %p246_p3  ;;  %303 = sbr.rel (%p246_p3) target bundleno = 2367 (0x93f), region = 56 }
   0x8   : > { %p8682_p5 = pnand %p8685_p2, %p8681_p4 }
   0xa   : > { %8684 = dma.hbm_to_vmem [thread:$0]  (!%p8682_p5), %s266_s12, 9216, %s268_s15, [#allocation5], %s8782_s16, %s8782_s16, %s8783_s17  }
   0xb   : > { %8774 = dma.done.wait (%p8685_p2), [#allocation5], 9216  }
   0xc   : > { %8776 = vsyncadd (%p8685_p2), [#allocation5], 4294958080  ;;  %p340_p6 = scmp.lt.s32.totalorder %s7707_s13, 1  ;;  %vm491_vm0 = vcmask 1043456   ;;  %vm455_vm1 = vcmask 1044480   ;;  %vm469_vm2 = vcmask 64512  }
   0xd   : > { %v7716_v0 = vld [vmem:[%s12593_s2 + $0x4] sm:$0xf]  ;;  %vm538_vm3 = vsmask.f32 5376  ;;  %v417_v11 = vld [vmem:[%s12593_s2] sm:$0xf] }
   0xe   : > { %s12709_s13 = smov (!%p340_p6, %s7707_s13), 1  ;;  %v493_v3 = vsel %vm491_vm0, %v7716_v0, 0  ;;  %v7747_v12 = vld [vmem:[%s12593_s2 + $0x10] sm:$0xf]  ;;  %v623_v14 = vsel %vm491_vm0, %v417_v11, 0  ;;  %vm1227_vm6 = vcmask 1046528  }
   0xf   : > { %s8675_s18 = smul.u32 68, %s12709_s13  ;;  %502 = vmatpush.bf16.msra.mxu0 %v493_v3  ;;  %8673 = vmatpush.bf16.msra.mxu2 %v493_v3  ;;  %v950_v15 = vsel %vm491_vm0, %v7747_v12, 0  ;;  %v7731_v17 = vld [vmem:[%s12593_s2 + $0x8] sm:$0xf]  ;;  %v7739_v26 = vld [vmem:[%s12593_s2 + $0xc] sm:$0xf] }
  0x10   : > { %632 = vmatpush.bf16.msra.mxu1 %v623_v14  ;;  %8674 = vmatpush.bf16.msra.mxu3 %v623_v14  ;;  %v720_v30 = vsel %vm491_vm0, %v7731_v17, 0  ;;  %v873_v37 = vsel %vm491_vm0, %v7739_v26, 0  ;;  %v7763_v63 = vld [vmem:[%s12593_s2 + $0x18] sm:$0xf]  ;;  %v7771_v0 = vld [vmem:[%s12593_s2 + $0x1c] sm:$0xf] }
  0x11   : > { %s8853_s21 = scalar_lea.vmem %s12591_s0, %s8675_s18  ;;  %v1167_v3 = vsel %vm491_vm0, %v7763_v63, 0  ;;  %v7755_v14 = vld [vmem:[%s12593_s2 + $0x14] sm:$0xf]  ;;  %vm670_vm4 = vsmask.f32 4352  ;;  %vm351_vm8 = vcmask 261120  }
  0x12   : > { %v8859_v1 = vld [vmem:[%s8853_s21] sm:$0xff]   ;;  %v8862_v2 = vld [vmem:[%s8853_s21 + $0x8] sm:$0xff]   ;;  %v8930_v40 = vld [vmem:[%s8853_s21 + $0x10] sm:$0xff]   ;;  %vm1010_vm5 = vsmask.f32 7424  ;;  %vm368_vm9 = vcmask 257024  }
  0x13   : > { %v456_v4 = vrot.slane %v8859_v1, 3  ;;  %v457_v5 = vrot.slane %v8862_v2, 3  ;;  %v8868_v6 = vld [vmem:[%s8853_s21 + $0x20] sm:$0xff]   ;;  %v8871_v7 = vld [vmem:[%s8853_s21 + $0x28] sm:$0xff]   ;;  %v540_v8 = vshrl.u32 %v8859_v1, 16  ;;  %v543_v19 = vshll.u32 %v8859_v1, 16  ;;  %959 = vmatpush.bf16.msrb.mxu0 %v950_v15  ;;  %729 = vmatpush.bf16.msrb.mxu2 %v720_v30 }
  0x14   : > { %v463_v9 = vrot.slane %v8868_v6, 3  ;;  %v465_v10 = vrot.slane %v8871_v7, 3  ;;  %v8895_v20 = vshrl.u32 %v8862_v2, 16  ;;  %v8898_v21 = vshll.u32 %v8862_v2, 16  ;;  %882 = vmatpush.bf16.msrb.mxu3 %v873_v37  ;;  %v8934_v42 = vld [vmem:[%s8853_s21 + $0x30] sm:$0xff]   ;;  %v8965_v60 = vld [vmem:[%s8853_s21 + $0x18] sm:$0xff]  }
  0x15   : > { %v458_v13 = vsel %vm455_vm1, %v456_v4, %v457_v5  ;;  %v542_v16 = vrot.slane %v540_v8, 2  ;;  %v8903_v22 = vshrl.u32 %v8868_v6, 16  ;;  %v8906_v23 = vshll.u32 %v8868_v6, 16  ;;  %v7779_v15 = vld [vmem:[%s12593_s2 + $0x20] sm:$0xf]  ;;  %s8676_s25 = smul.u32 104, %s12709_s13 }
  0x16   : > { %v466_v18 = vsel %vm455_vm1, %v463_v9, %v465_v10  ;;  %7717 = vmatmul.msk.bf16.vlgmr.msra.gmra.mxu0 %vm469_vm2, %v458_v13  ;;  %v8909_v24 = vshrl.u32 %v8871_v7, 16  ;;  %v8912_v25 = vshll.u32 %v8871_v7, 16  ;;  %v545_v27 = vrot.slane %v543_v19, 3 }
  0x17   : > { %7721 = vmatmul.msk.bf16.vlgmr.msra.gmra.mxu2 %vm469_vm2, %v466_v18  ;;  %v550_v28 = vrot.slane %v8895_v20, 2  ;;  %v553_v29 = vrot.slane %v8898_v21, 3  ;;  %v577_v31 = vrot.slane %v8903_v22, 2  ;;  %v580_v32 = vrot.slane %v8906_v23, 3  ;;  %s12551_s10 = scalar_lea.vmem %s12600_s9, %s8676_s25 }
  0x18   : > { %v586_v33 = vrot.slane %v8909_v24, 2  ;;  %v589_v34 = vrot.slane %v8912_v25, 3  ;;  %v546_v35 = vor.u32 %v545_v27, %v542_v16  ;;  %v8941_v44 = vshrl.u32 %v8930_v40, 16  ;;  %1176 = vmatpush.bf16.msra.mxu2 %v1167_v3  ;;  %v8663_v27 = vld [vmem:[%s8853_s21 + $0x4] sm:$0xff]  }
  0x19   : > { %v554_v36 = vor.u32 %v553_v29, %v550_v28  ;;  %v8927_v38 = vor.u32 %v580_v32, %v577_v31  ;;  %v8944_v45 = vshll.u32 %v8930_v40, 16  ;;  %v8947_v46 = vshrl.u32 %v8934_v42, 16  ;;  %v9001_v28 = vld [vmem:[%s8853_s21 + $0xc] sm:$0xff]  }
  0x1a   : > { %v590_v39 = vor.u32 %v589_v34, %v586_v33  ;;  %v8950_v47 = vshll.u32 %v8934_v42, 16  ;;  %v459_v48 = vrot.slane %v8930_v40, 3  ;;  %v467_v49 = vrot.slane %v8934_v42, 3 }
  0x1b   : > { %v555_v41 = vsel %vm538_vm3, %v546_v35, %v554_v36  ;;  %v559_v50 = vrot.slane %v8941_v44, 2  ;;  %v562_v51 = vrot.slane %v8944_v45, 3  ;;  %v595_v52 = vrot.slane %v8947_v46, 2 }
  0x1c   : > { %7724 = vmatmul.msk.bf16.vlgmr.msra.gmra.mxu1 %vm469_vm2, %v555_v41  ;;  %v591_v43 = vsel %vm538_vm3, %v8927_v38, %v590_v39  ;;  %v598_v53 = vrot.slane %v8950_v47, 3  ;;  %v460_v54 = vsel %vm455_vm1, %v457_v5, %v459_v48  ;;  %v468_v55 = vsel %vm455_vm1, %v465_v10, %v467_v49 }
  0x1d   : > { %7728 = vmatmul.msk.bf16.vlgmr.msra.gmra.mxu3 %vm469_vm2, %v591_v43  ;;  %v563_v56 = vor.u32 %v562_v51, %v559_v50  ;;  %v8970_v61 = vshrl.u32 %v8965_v60, 16  ;;  %v8973_v62 = vshll.u32 %v8965_v60, 16  ;;  %v1263_v4 = vsel %vm491_vm0, %v7771_v0, 0 }
  0x1e   : > { %v599_v57 = vor.u32 %v598_v53, %v595_v52  ;;  %v461_v5 = vrot.slane %v8965_v60, 3  ;;  %1272 = vmatpush.bf16.msra.mxu3 %v1263_v4  ;;  %v1057_v16 = vsel %vm491_vm0, %v7755_v14, 0  ;;  %v1373_v17 = vsel %vm491_vm0, %v7779_v15, 0  ;;  %v9030_v52 = vld [vmem:[%s8853_s21 + $0x14] sm:$0xff]   ;;  %v9052_v4 = vld [vmem:[%s8853_s21 + $0x1c] sm:$0xff]  }
  0x1f   : > { %v564_v58 = vsel %vm538_vm3, %v554_v36, %v563_v56  ;;  %v568_v10 = vrot.slane %v8970_v61, 2  ;;  %v571_v11 = vrot.slane %v8973_v62, 3  ;;  %1066 = vmatpush.bf16.msrb.mxu1 %v1057_v16  ;;  %1382 = vmatpush.bf16.msra.mxu0 %v1373_v17  ;;  %v1011_v18 = vrot.slane %v8898_v21, 1 }
  0x20   : > { %v600_v59 = vsel %vm538_vm3, %v590_v39, %v599_v57  ;;  %v462_v12 = vsel %vm455_vm1, %v459_v48, %v461_v5  ;;  %v671_v30 = vrot.slane %v540_v8, 3  ;;  %v672_v31 = vrot.slane %v543_v19, 4 }
  0x21   : > { %v572_v13 = vor.u32 %v571_v11, %v568_v10  ;;  %v1012_v29 = vor.u32 %v1011_v18, %v8895_v20  ;;  %v674_v32 = vrot.slane %v8895_v20, 3  ;;  %v675_v33 = vrot.slane %v8898_v21, 4 }
  0x22   : > { %v790_v34 = vshrl.u32 %v8663_v27, 16  ;;  %v793_v35 = vshll.u32 %v8663_v27, 16  ;;  %v9013_v36 = vshrl.u32 %v9001_v28, 16  ;;  %v9016_v37 = vshll.u32 %v9001_v28, 16  ;;  %v9075_v27 = vld [vmem:[%s8853_s21 + $0x24] sm:$0xff]  }
  0x23   : > { %v573_v26 = vsel %vm538_vm3, %v563_v56, %v572_v13  ;;  %v673_v8 = vor.u32 %v672_v31, %v671_v30  ;;  %v676_v1 = vor.u32 %v675_v33, %v674_v32  ;;  %v464_v41 = vsel %vm455_vm1, %v461_v5, %v463_v9 }
  0x24   : > { %v792_v19 = vrot.slane %v790_v34, 3  ;;  %v795_v20 = vrot.slane %v793_v35, 4  ;;  %v800_v21 = vrot.slane %v9013_v36, 3  ;;  %v803_v39 = vrot.slane %v9016_v37, 4 }
  0x25   : > { %v677_v43 = vsel %vm670_vm4, %v673_v8, %v676_v1  ;;  %v582_v50 = vsel %vm538_vm3, %v572_v13, %v8927_v38  ;;  %v678_v53 = vrot.slane %v8941_v44, 3  ;;  %v9037_v9 = vshrl.u32 %v9030_v52, 16 }
  0x26   : > { %7718 = vmatmul.msk.bf16.gmra.mxu0 %vm469_vm2, %v460_v54  ;;  %v796_v48 = vor.u32 %v795_v20, %v792_v19  ;;  %v679_v54 = vrot.slane %v8944_v45, 4  ;;  %v682_v5 = vrot.slane %v8970_v61, 3  ;;  %v683_v10 = vrot.slane %v8973_v62, 4  ;;  %v9098_v20 = vld [vmem:[%s8853_s21 + $0x2c] sm:$0xff]  }
  0x27   : > { %7722 = vmatmul.msk.bf16.gmra.mxu2 %vm469_vm2, %v468_v55  ;;  %v9040_v55 = vshll.u32 %v9030_v52, 16  ;;  %v809_v56 = vrot.slane %v9037_v9, 3  ;;  %v1016_v16 = vrot.slane %v8973_v62, 1  ;;  %v687_v30 = vrot.slane %v8906_v23, 4 }
  0x28   : > { %v680_v38 = vor.u32 %v679_v54, %v678_v53  ;;  %v684_v11 = vor.u32 %v683_v10, %v682_v5  ;;  %v1019_v35 = vrot.slane %v8906_v23, 1  ;;  %v9105_v23 = vshrl.u32 %v9098_v20, 16 }
  0x29   : > { %v1018_v34 = vor.u32 %v1016_v16, %v8970_v61  ;;  %v8619_v53 = vunpack.c.h.b16 %v8934_v42  ;;  %vm1323_vm7 = vsmask.f32 6400  ;;  %vm7625_vm10 = vcmask 15360  }
  0x2a   : > { %v685_v14 = vsel %vm670_vm4, %v680_v38, %v684_v11  ;;  %vm7638_vm11 = vcmask 11264  }
  0x2c   : > { %7725 = vmatmul.msk.bf16.gmra.mxu1 %vm469_vm2, %v564_v58  ;;  %v681_v58 = vsel %vm670_vm4, %v676_v1, %v680_v38  ;;  %v1020_v1 = vsel %vm1010_vm5, %v1018_v34, %v1019_v35 }
  0x2d   : > { %7729 = vmatmul.msk.bf16.gmra.mxu3 %vm469_vm2, %v600_v59  ;;  %v1013_v59 = vrot.slane %v8944_v45, 1  ;;  %v9059_v45 = vshrl.u32 %v9052_v4, 16 }
  0x2f   : > { %v1014_v0 = vsel %vm1010_vm5, %v1012_v29, %v1013_v59  ;;  %v1015_v15 = vor.u32 %v1013_v59, %v8941_v44  ;;  %v686_v29 = vrot.slane %v8903_v22, 3  ;;  %v9082_v44 = vshrl.u32 %v9075_v27, 16 }
  0x31   : > { %v1017_v18 = vsel %vm1010_vm5, %v1015_v15, %v1016_v16  ;;  %v688_v62 = vor.u32 %v687_v30, %v686_v29  ;;  %v827_v31 = vrot.slane %v9082_v44, 3 }
  0x33   : > { %v689_v33 = vsel %vm670_vm4, %v684_v11, %v688_v62 }
  0x36   : > { %7719 = vmatmul.msk.bf16.gmra.mxu0 %vm469_vm2, %v462_v12  ;;  %v818_v12 = vrot.slane %v9059_v45, 3 }
  0x37   : > { %7723 = vmatmul.msk.bf16.gmra.mxu2 %vm469_vm2, %v467_v49  ;;  %v804_v49 = vor.u32 %v803_v39, %v800_v21  ;;  %v690_v21 = vrot.slane %v8909_v24, 3  ;;  %v691_v39 = vrot.slane %v8912_v25, 4 }
  0x39   : > { %v805_v51 = vsel %vm670_vm4, %v796_v48, %v804_v49  ;;  %v692_v61 = vor.u32 %v691_v39, %v690_v21 }
  0x3b   : > { %v693_v48 = vsel %vm670_vm4, %v688_v62, %v692_v61 }
  0x3c   : > { %7726 = vmatmul.msk.bf16.gmra.mxu1 %vm469_vm2, %v573_v26 }
  0x3d   : > { %7730 = vmatmul.msk.bf16.gmra.mxu3 %vm469_vm2, %v599_v57  ;;  %v812_v57 = vrot.slane %v9040_v55, 4 }
  0x3f   : > { %v813_v63 = vor.u32 %v812_v57, %v809_v56 }
  0x41   : > { %v814_v3 = vsel %vm670_vm4, %v804_v49, %v813_v63  ;;  %v9114_v49 = vld [vmem:[%s8853_s21 + $0x38] sm:$0xff]  }
  0x42   : > { %v8622_v38 = vunpack.c.l.b16 %v9114_v49 }
  0x46   : > { %7720 = vmatmul.msk.bf16.gmra.mxu0 %vm469_vm2, %v464_v41  ;;  %v836_v41 = vrot.slane %v9105_v23, 3 }
  0x47   : > { %7732 = vmatmul.msk.bf16.vlgmr.msrb.gmra.mxu2 %vm469_vm2, %v677_v43 }
  0x4c   : > { %7727 = vmatmul.msk.bf16.gmra.mxu1 %vm469_vm2, %v582_v50  ;;  %v1021_v50 = vor.u32 %v1019_v35, %v8903_v22  ;;  %v694_v22 = vrot.slane %v8947_v46, 3 }
  0x4d   : > { %7740 = vmatmul.msk.bf16.vlgmr.msrb.gmra.mxu3 %vm469_vm2, %v805_v51  ;;  %v1022_v51 = vrot.slane %v8912_v25, 1  ;;  %v695_v25 = vrot.slane %v8950_v47, 4 }
  0x4f   : > { %v1023_v56 = vsel %vm1010_vm5, %v1021_v50, %v1022_v51  ;;  %v1024_v11 = vor.u32 %v1022_v51, %v8909_v24  ;;  %v387_v24 = vld [vmem:[%s12592_s1] sm:$0xff]  ;;  %v1122_v50 = vrot.slane %v9040_v55, 1 }
  0x56   : > { %7748 = vmatmul.msk.bf16.vlgmr.msrb.gmra.mxu0 %vm469_vm2, %v8862_v2  ;;  %v9062_v2 = vshll.u32 %v9052_v4, 16 }
  0x57   : > { %7733 = vmatmul.msk.bf16.gmra.mxu2 %vm469_vm2, %v681_v58  ;;  %v9125_v58 = vpack.c.b16 %v8622_v38, %v8619_v53 }
  0x58   : > { %v821_v13 = vrot.slane %v9062_v2, 4 }
  0x59   : > { %v9132_v59 = vshrl.u32 %v9125_v58, 16 }
  0x5a   : > { %v822_v17 = vor.u32 %v821_v13, %v818_v12  ;;  %v1025_v12 = vrot.slane %v8950_v47, 1 }
  0x5c   : > { %7756 = vmatmul.msk.bf16.vlgmr.msrb.gmra.mxu1 %vm469_vm2, %v1014_v0  ;;  %v823_v26 = vsel %vm670_vm4, %v813_v63, %v822_v17  ;;  %v696_v63 = vor.u32 %v695_v25, %v694_v22  ;;  %v845_v0 = vrot.slane %v9132_v59, 3  ;;  %v1026_v16 = vsel %vm1010_vm5, %v1024_v11, %v1025_v12 }
  0x5d   : > { %7741 = vmatmul.msk.bf16.gmra.mxu3 %vm469_vm2, %v814_v3  ;;  %v1027_v35 = vor.u32 %v1025_v12, %v8947_v46 }
  0x5e   : > { %v697_v10 = vsel %vm670_vm4, %v692_v61, %v696_v63 }
  0x66   : > { %7749 = vmatmul.msk.bf16.gmra.mxu0 %vm469_vm2, %v8930_v40  ;;  %v9085_v40 = vshll.u32 %v9075_v27, 16 }
  0x67   : > { %7734 = vmatmul.msk.bf16.gmra.mxu2 %vm469_vm2, %v685_v14 }
  0x68   : > { %v830_v32 = vrot.slane %v9085_v40, 4 }
  0x6a   : > { %v831_v8 = vor.u32 %v830_v32, %v827_v31 }
  0x6c   : > { %7757 = vmatmul.msk.bf16.gmra.mxu1 %vm469_vm2, %v1017_v18  ;;  %v832_v19 = vsel %vm670_vm4, %v822_v17, %v831_v8 }
  0x6d   : > { %7742 = vmatmul.msk.bf16.gmra.mxu3 %vm469_vm2, %v823_v26  ;;  %v8784_v26 = vmov 0  }
  0x6e   : > { %8700 = vset.pattern.permute.xlu0 %v8784_v26  ;;  %8701 = vset.pattern.permute.xlu1 %v8784_v26 }
  0x6f   : > { %1462 = vperm.xlu0 %8700, %v387_v24   ;;  %8702 = vset.pattern.permute.xlu2 %v8784_v26  ;;  %v1325_v26 = vrot.slane %v9016_v37, 2  ;;  %v1327_v24 = vrot.slane %v9037_v9, 1 }
  0x76   : > { %7750 = vmatmul.msk.bf16.gmra.mxu0 %vm469_vm2, %v8965_v60  ;;  %v9108_v60 = vshll.u32 %v9098_v20, 16 }
  0x77   : > { %7735 = vmatmul.msk.bf16.gmra.mxu2 %vm469_vm2, %v689_v33  ;;  %v388_v33 = vld [vmem:[%s12592_s1 + $0x8] sm:$0xff] }
  0x78   : > { %v839_v43 = vrot.slane %v9108_v60, 4  ;;  %1467 = vperm.xlu0 %8700, %v388_v33  }
  0x7a   : > { %v840_v54 = vor.u32 %v839_v43, %v836_v41  ;;  %v393_v43 = vld [vmem:[%s12592_s1 + $0x30] sm:$0xff] }
  0x7c   : > { %7758 = vmatmul.msk.bf16.gmra.mxu1 %vm469_vm2, %v1020_v1  ;;  %v841_v57 = vsel %vm670_vm4, %v831_v8, %v840_v54 }
  0x7d   : > { %7743 = vmatmul.msk.bf16.gmra.mxu3 %vm469_vm2, %v832_v19 }
  0x80   : > { %1492 = vperm.xlu0 %8700, %v393_v43  }
  0x86   : > { %7751 = vmatmul.msk.bf16.gmra.mxu0 %vm469_vm2, %v8868_v6  ;;  %v9135_v6 = vshll.u32 %v9125_v58, 16 }
  0x87   : > { %7736 = vmatmul.msk.bf16.gmra.mxu2 %vm469_vm2, %v693_v48  ;;  %v1120_v48 = vrot.slane %v9016_v37, 1 }
  0x88   : > { %v848_v3 = vrot.slane %v9135_v6, 4 }
  0x8a   : > { %v849_v13 = vor.u32 %v848_v3, %v845_v0  ;;  %v1228_v0 = vrot.slane %v9001_v28, 1  ;;  %v1229_v3 = vrot.slane %v9030_v52, 1  ;;  %v399_v28 = vld [vmem:[%s12592_s1 + $0x60] sm:$0xf] }
  0x8c   : > { %7759 = vmatmul.msk.bf16.gmra.mxu1 %vm469_vm2, %v1023_v56  ;;  %v850_v18 = vsel %vm670_vm4, %v840_v54, %v849_v13  ;;  %v389_v56 = vld [vmem:[%s12592_s1 + $0x10] sm:$0xff] }
  0x8d   : > { %7744 = vmatmul.msk.bf16.gmra.mxu3 %vm469_vm2, %v841_v57  ;;  %v396_v57 = vld [vmem:[%s12592_s1 + $0x48] sm:$0xff]  ;;  %1472 = vperm.xlu1 %8701, %v389_v56   ;;  %v1331_v56 = vrot.slane %v9059_v45, 1 }
  0x8e   : > { %1507 = vperm.xlu0 %8700, %v396_v57   ;;  %v1332_v57 = vrot.slane %v9062_v2, 2 }
  0x93   : > { %v504_v5 = vpop.f32.mrf.mxu0 }
  0x96   : > { %7752 = vmatmul.msk.bf16.gmra.mxu0 %vm469_vm2, %v8871_v7  ;;  %v933_v7 = vpack.c.b16 %v8622_v38, %v8622_v38  ;;  %1522 = vperm.xlu0 %8700, %v399_v28  }
  0x97   : > { %7737 = vmatmul.msk.bf16.gmra.mxu2 %vm469_vm2, %v697_v10 }
  0x98   : > { %v1028_v32 = vshll.u32 %v933_v7, 16 }
  0x99   : > { %v634_v14 = vpop.f32.mrf.mxu1 }
  0x9a   : > { %v524_v15 = vpop.f32.mrf.mxu2  ;;  %v9146_v17 = vadd.f32 %v634_v14, %v504_v5  ;;  %v1030_v8 = vrot.slane %v1028_v32, 1 }
  0x9b   : > { %v9152_v47 = vpop.f32.mrf.mxu0 }
  0x9c   : > { %7760 = vmatmul.msk.bf16.gmra.mxu1 %vm469_vm2, %v1026_v16  ;;  %v1031_v61 = vsel %vm1010_vm5, %v1027_v35, %v1030_v8  ;;  %v390_v16 = vld [vmem:[%s12592_s1 + $0x18] sm:$0xff] }
  0x9d   : > { %7745 = vmatmul.msk.bf16.gmra.mxu3 %vm469_vm2, %v850_v18  ;;  %v1324_v18 = vrot.slane %v9013_v36, 1  ;;  %1477 = vperm.xlu1 %8701, %v390_v16  }
  0x9f   : > { %v1326_v32 = vor.u32 %v1325_v26, %v1324_v18  ;;  %v8505_v18 = vld [vmem:[#allocation4 + $0x18] sm:$0xff] }
  0xa0   : > { %v654_v29 = vpop.f32.mrf.mxu3  ;;  %1681 = vmatpush.bf16.msra.mxu1 %v8505_v18 }
  0xa1   : > { %v9156_v30 = vadd.f32 %v654_v29, %v524_v15  ;;  %v9158_v62 = vpop.f32.mrf.mxu1  ;;  %v1230_v15 = vsel %vm1227_vm6, %v1228_v0, %v1229_v3  ;;  %v1124_v29 = vor.u32 %v1122_v50, %v9037_v9 }
  0xa2   : > { %v526_v31 = vpop.f32.mrf.mxu2 }
  0xa3   : > { %v509_v34 = vpop.f32.mrf.mxu0 }
  0xa6   : > { %7753 = vmatmul.msk.bf16.gmra.mxu0 %vm469_vm2, %v8934_v42  ;;  %v1121_v42 = vor.u32 %v1120_v48, %v9013_v36 }
  0xa7   : > { %7738 = vmatmul.msk.bf16.gmra.mxu2 %vm469_vm2, %v696_v63  ;;  %v1032_v63 = vshrl.u32 %v933_v7, 16 }
  0xa8   : > { %v656_v1 = vpop.f32.mrf.mxu3  ;;  %v1123_v25 = vsel %vm1010_vm5, %v1121_v42, %v1122_v50 }
  0xa9   : > { %v9167_v19 = vadd.f32 %v656_v1, %v526_v31  ;;  %v639_v21 = vpop.f32.mrf.mxu1  ;;  %v1034_v10 = vor.u32 %v1032_v63, %v1030_v8  ;;  %v1125_v31 = vrot.slane %v9062_v2, 1 }
  0xaa   : > { %v529_v39 = vpop.f32.mrf.mxu2  ;;  %v9170_v41 = vadd.f32 %v639_v21, %v509_v34  ;;  %v1231_v21 = vrot.slane %v9052_v4, 1 }
  0xab   : > { %v9175_v46 = vpop.f32.mrf.mxu0  ;;  %v1126_v1 = vsel %vm1010_vm5, %v1124_v29, %v1125_v31  ;;  %v1127_v4 = vor.u32 %v1125_v31, %v9059_v45  ;;  %v1233_v45 = vrot.slane %v9075_v27, 1  ;;  %v391_v29 = vld [vmem:[%s12592_s1 + $0x20] sm:$0xff]  ;;  %v1336_v27 = vrot.slane %v9085_v40, 2 }
  0xac   : > { %7761 = vmatmul.msk.bf16.gmra.mxu1 %vm469_vm2, %v1031_v61  ;;  %v1232_v50 = vsel %vm1227_vm6, %v1229_v3, %v1231_v21  ;;  %1482 = vperm.xlu2 %8702, %v391_v29  }
  0xad   : > { %7746 = vmatmul.msk.bf16.gmra.mxu3 %vm469_vm2, %v849_v13 }
  0xb0   : > { %v659_v51 = vpop.f32.mrf.mxu3 }
  0xb1   : > { %v9182_v53 = vadd.f32 %v659_v51, %v529_v39  ;;  %v9184_v54 = vpop.f32.mrf.mxu1  ;;  %v397_v51 = vld [vmem:[%s12592_s1 + $0x50] sm:$0xff] }
  0xb2   : > { %v531_v38 = vpop.f32.mrf.mxu2 }
  0xb3   : > { %v514_v22 = vpop.f32.mrf.mxu0 }
  0xb6   : > { %7754 = vmatmul.msk.bf16.gmra.mxu0 %vm469_vm2, %v933_v7  ;;  %v1328_v7 = vrot.slane %v9040_v55, 2  ;;  %v394_v55 = vld [vmem:[%s12592_s1 + $0x38] sm:$0xff] }
  0xb7   : > { %7764 = vmatmul.msk.bf16.vlgmr.msra.gmra.mxu2 %vm469_vm2, %v1123_v25  ;;  %1497 = vperm.xlu1 %8701, %v394_v55   ;;  %v637_v25 = vadd.f32 %v9158_v62, %v9152_v47  ;;  %v642_v55 = vadd.f32 %v9184_v54, %v9175_v46  ;;  %v1235_v46 = vrot.slane %v9098_v20, 1 }
  0xb8   : > { %v661_v5 = vpop.f32.mrf.mxu3  ;;  %v1329_v33 = vor.u32 %v1328_v7, %v1327_v24  ;;  %v1234_v7 = vsel %vm1227_vm6, %v1231_v21, %v1233_v45 }
  0xb9   : > { %v9197_v11 = vadd.f32 %v661_v5, %v531_v38  ;;  %v644_v12 = vpop.f32.mrf.mxu1 }
  0xba   : > { %v534_v13 = vpop.f32.mrf.mxu2  ;;  %v9199_v14 = vadd.f32 %v644_v12, %v514_v22  ;;  %v1330_v9 = vsel %vm1323_vm7, %v1326_v32, %v1329_v33  ;;  %v1128_v22 = vrot.slane %v9085_v40, 1  ;;  %v1335_v32 = vrot.slane %v9082_v44, 1 }
  0xbb   : > { %v9208_v52 = vpop.f32.mrf.mxu0 }
  0xbc   : > { %7762 = vmatmul.msk.bf16.gmra.mxu1 %vm469_vm2, %v1034_v10  ;;  %v1129_v2 = vsel %vm1010_vm5, %v1127_v4, %v1128_v22 }
  0xbd   : > { %7772 = vmatmul.msk.bf16.vlgmr.msra.gmra.mxu3 %vm469_vm2, %v1230_v15 }
  0xbf   : > { %1512 = vperm.xlu1 %8701, %v397_v51  }
  0xc0   : > { %v664_v34 = vpop.f32.mrf.mxu3 }
  0xc1   : > { %v9218_v36 = vadd.f32 %v664_v34, %v534_v13  ;;  %v9220_v37 = vpop.f32.mrf.mxu1  ;;  %v1130_v34 = vor.u32 %v1128_v22, %v9082_v44  ;;  %v1236_v22 = vsel %vm1227_vm6, %v1233_v45, %v1235_v46 }
  0xc2   : > { %v536_v35 = vpop.f32.mrf.mxu2 }
  0xc3   : > { %v519_v8 = vpop.f32.mrf.mxu0  ;;  %v1337_v35 = vor.u32 %v1336_v27, %v1335_v32 }
  0xc6   : > { %7780 = vmatmul.msk.bf16.vlgmr.msra.gmra.mxu0 %vm469_vm2, %v1330_v9 }
  0xc7   : > { %7765 = vmatmul.msk.bf16.gmra.mxu2 %vm469_vm2, %v1126_v1 }
  0xc8   : > { %v666_v39 = vpop.f32.mrf.mxu3 }
  0xc9   : > { %v649_v61 = vpop.f32.mrf.mxu1  ;;  %v392_v39 = vld [vmem:[%s12592_s1 + $0x28] sm:$0xff] }
  0xca   : > { %v731_v43 = vpop.f32.mrf.mxu2  ;;  %v9230_v48 = vadd.f32 %v649_v61, %v519_v8  ;;  %1487 = vperm.xlu2 %8702, %v392_v39  }
  0xcb   : > { %v765_v42 = vadd.f32 %v731_v43, %v9146_v17  ;;  %v9237_v38 = vpop.f32.mrf.mxu0  ;;  %v1333_v17 = vor.u32 %v1332_v57, %v1331_v56 }
  0xcd   : > { %7773 = vmatmul.msk.bf16.gmra.mxu3 %vm469_vm2, %v1232_v50  ;;  %v1334_v13 = vsel %vm1323_vm7, %v1329_v33, %v1333_v17  ;;  %v1338_v44 = vsel %vm1323_vm7, %v1333_v17, %v1337_v35  ;;  %v395_v17 = vld [vmem:[%s12592_s1 + $0x40] sm:$0xff] }
  0xd0   : > { %v884_v63 = vpop.f32.mrf.mxu3 }
  0xd1   : > { %v918_v0 = vadd.f32 %v884_v63, %v765_v42  ;;  %v9246_v3 = vpop.f32.mrf.mxu1  ;;  %v1339_v63 = vrot.slane %v9105_v23, 1 }
  0xd2   : > { %v733_v5 = vpop.f32.mrf.mxu2  ;;  %1502 = vperm.xlu2 %8702, %v395_v17  }
  0xd3   : > { %v766_v10 = vadd.f32 %v733_v5, %v637_v25  ;;  %v961_v12 = vpop.f32.mrf.mxu0 }
  0xd4   : > { %v995_v15 = vadd.f32 %v961_v12, %v918_v0  ;;  %v1340_v0 = vrot.slane %v9108_v60, 2 }
  0xd6   : > { %7781 = vmatmul.msk.bf16.gmra.mxu0 %vm469_vm2, %v1334_v13 }
  0xd7   : > { %7766 = vmatmul.msk.bf16.gmra.mxu2 %vm469_vm2, %v1129_v2 }
  0xd8   : > { %v886_v16 = vpop.f32.mrf.mxu3 }
  0xd9   : > { %v919_v47 = vadd.f32 %v886_v16, %v766_v10  ;;  %v1068_v62 = vpop.f32.mrf.mxu1  ;;  %v1341_v10 = vor.u32 %v1340_v0, %v1339_v63 }
  0xda   : > { %v736_v28 = vpop.f32.mrf.mxu2  ;;  %v9253_v26 = vadd.f32 %v1068_v62, %v995_v15 }
  0xdb   : > { %v767_v24 = vadd.f32 %v736_v28, %v9170_v41  ;;  %v963_v31 = vpop.f32.mrf.mxu0  ;;  %v1131_v41 = vrot.slane %v9108_v60, 1  ;;  %v398_v60 = vld [vmem:[%s12592_s1 + $0x58] sm:$0xff]  ;;  %v1237_v28 = vrot.slane %v9125_v58, 1 }
  0xdc   : > { %v9262_v33 = vadd.f32 %v963_v31, %v919_v47  ;;  %v1342_v47 = vsel %vm1323_vm7, %v1337_v35, %v1341_v10  ;;  %1517 = vperm.xlu2 %8702, %v398_v60   ;;  %v1344_v35 = vrot.slane %v9135_v6, 2 }
  0xdd   : > { %7774 = vmatmul.msk.bf16.gmra.mxu3 %vm469_vm2, %v1234_v7  ;;  %v1132_v43 = vsel %vm1010_vm5, %v1130_v34, %v1131_v41  ;;  %v1133_v5 = vor.u32 %v1131_v41, %v9105_v23  ;;  %v8623_v23 = vunpack.c.h.b16 %v9114_v49  ;;  %v1238_v27 = vsel %vm1227_vm6, %v1235_v46, %v1237_v28 }
  0xde   : > { %v1343_v41 = vrot.slane %v9132_v59, 1 }
  0xdf   : > { %v1119_v18 = vpack.c.b16 %v8623_v23, %v8623_v23 }
  0xe0   : > { %v889_v8 = vpop.f32.mrf.mxu3 }
  0xe1   : > { %v920_v1 = vadd.f32 %v889_v8, %v767_v24  ;;  %v9269_v9 = vpop.f32.mrf.mxu1  ;;  %v1138_v34 = vshll.u32 %v1119_v18, 16  ;;  %v1345_v8 = vor.u32 %v1344_v35, %v1343_v41 }
  0xe2   : > { %v738_v21 = vpop.f32.mrf.mxu2 }
  0xe3   : > { %v768_v40 = vadd.f32 %v738_v21, %v642_v55  ;;  %v966_v61 = vpop.f32.mrf.mxu0  ;;  %v1140_v55 = vrot.slane %v1138_v34, 1  ;;  %v1348_v17 = vrot.slane %v1138_v34, 2  ;;  %v8785_v34 = vmov 0.0  }
  0xe4   : > { %v997_v42 = vadd.f32 %v966_v61, %v920_v1  ;;  %354 = vst.msk [vmem:[#allocation2 + $0x10] sm:$0xff] %vm351_vm8, %v8785_v34 }
  0xe5   : > { %352 = vst.msk [vmem:[#allocation2] sm:$0xff] %vm351_vm8, %v8785_v34 }
  0xe6   : > { %7782 = vmatmul.msk.bf16.gmra.mxu0 %vm469_vm2, %v1338_v44  ;;  %353 = vst.msk [vmem:[#allocation2 + $0x8] sm:$0xff] %vm351_vm8, %v8785_v34 }
  0xe7   : > { %7767 = vmatmul.msk.bf16.gmra.mxu2 %vm469_vm2, %v1132_v43  ;;  %v1346_v43 = vsel %vm1323_vm7, %v1341_v10, %v1345_v8  ;;  %v8504_v10 = vld [vmem:[#allocation4 + $0x10] sm:$0xff]  ;;  %355 = vst.msk [vmem:[#allocation2 + $0x18] sm:$0xff] %vm351_vm8, %v8785_v34 }
  0xe8   : > { %v891_v54 = vpop.f32.mrf.mxu3  ;;  %1682 = vmatpush.bf16.msra.mxu1 %v8504_v10  ;;  %356 = vst.msk [vmem:[#allocation2 + $0x20] sm:$0xff] %vm351_vm8, %v8785_v34  ;;  %v9401_v10 = vld [vmem:[%s12594_s3] ss:$0 sm:$0xff] }
  0xe9   : > { %v921_v50 = vadd.f32 %v891_v54, %v768_v40  ;;  %v1073_v51 = vpop.f32.mrf.mxu1  ;;  %357 = vst.msk [vmem:[#allocation2 + $0x28] sm:$0xff] %vm351_vm8, %v8785_v34 }
  0xea   : > { %v741_v56 = vpop.f32.mrf.mxu2  ;;  %v9279_v57 = vadd.f32 %v1073_v51, %v997_v42  ;;  %358 = vst.msk [vmem:[#allocation2 + $0x30] sm:$0xff] %vm351_vm8, %v8785_v34 }
  0xeb   : > { %v769_v4 = vadd.f32 %v741_v56, %v9199_v14  ;;  %v968_v25 = vpop.f32.mrf.mxu0  ;;  %v1134_v14 = vrot.slane %v9135_v6, 1  ;;  %v1239_v6 = vrot.slane %v1119_v18, 1  ;;  %359 = vst.msk [vmem:[#allocation2 + $0x38] sm:$0xff] %vm351_vm8, %v8785_v34 }
  0xec   : > { %v9288_v20 = vadd.f32 %v968_v25, %v921_v50  ;;  %360 = vst.msk [vmem:[#allocation2 + $0x40] sm:$0xff] %vm351_vm8, %v8785_v34 }
  0xed   : > { %7775 = vmatmul.msk.bf16.gmra.mxu3 %vm469_vm2, %v1236_v22  ;;  %v1135_v16 = vsel %vm1010_vm5, %v1133_v5, %v1134_v14  ;;  %v1136_v58 = vor.u32 %v1134_v14, %v9132_v59  ;;  %v1142_v59 = vshrl.u32 %v1119_v18, 16  ;;  %v1240_v56 = vsel %vm1227_vm6, %v1237_v28, %v1239_v6  ;;  %361 = vst.msk [vmem:[#allocation2 + $0x48] sm:$0xff] %vm351_vm8, %v8785_v34 }
  0xee   : > { %362 = vst.msk [vmem:[#allocation2 + $0x50] sm:$0xff] %vm351_vm8, %v8785_v34 }
  0xef   : > { %v1141_v61 = vsel %vm1010_vm5, %v1136_v58, %v1140_v55  ;;  %v1347_v22 = vrot.slane %v1142_v59, 1  ;;  %363 = vst.msk [vmem:[#allocation2 + $0x58] sm:$0xff] %vm351_vm8, %v8785_v34 }
  0xf0   : > { %v894_v12 = vpop.f32.mrf.mxu3  ;;  %364 = vst.msk [vmem:[#allocation2 + $0x60] sm:$0xff] %vm351_vm8, %v8785_v34 }
  0xf1   : > { %v922_v2 = vadd.f32 %v894_v12, %v769_v4  ;;  %v9293_v13 = vpop.f32.mrf.mxu1  ;;  %v1349_v25 = vor.u32 %v1348_v17, %v1347_v22  ;;  %v1144_v12 = vor.u32 %v1142_v59, %v1140_v55  ;;  %365 = vst.msk [vmem:[#allocation2 + $0x68] sm:$0xff] %vm351_vm8, %v8785_v34 }
  0xf2   : > { %v9295_v15 = vpop.f32.mrf.mxu2  ;;  %366 = vst.msk [vmem:[#allocation2 + $0x70] sm:$0xff] %vm351_vm8, %v8785_v34 }
  0xf3   : > { %v971_v45 = vpop.f32.mrf.mxu0  ;;  %367 = vst.msk [vmem:[#allocation2 + $0x78] sm:$0xff] %vm351_vm8, %v8785_v34 }
  0xf4   : > { %v999_v62 = vadd.f32 %v971_v45, %v922_v2  ;;  %370 = vst.msk [vmem:[#allocation3] sm:$0xff] %vm351_vm8, %v8785_v34 }
  0xf5   : > { %371 = vst.msk [vmem:[#allocation3 + $0x8] sm:$0xff] %vm351_vm8, %v8785_v34 }
  0xf6   : > { %7783 = vmatmul.msk.bf16.gmra.mxu0 %vm469_vm2, %v1342_v47  ;;  %372 = vst.msk [vmem:[#allocation3 + $0x10] sm:$0xff] %vm351_vm8, %v8785_v34 }
  0xf7   : > { %7768 = vmatmul.msk.bf16.gmra.mxu2 %vm469_vm2, %v1135_v16  ;;  %373 = vst.msk [vmem:[#allocation3 + $0x18] sm:$0xff] %vm351_vm8, %v8785_v34 }
  0xf8   : > { %v9306_v24 = vpop.f32.mrf.mxu3  ;;  %374 = vst.msk [vmem:[#allocation3 + $0x20] sm:$0xff] %vm351_vm8, %v8785_v34 }
  0xf9   : > { %v1078_v7 = vpop.f32.mrf.mxu1  ;;  %375 = vst.msk [vmem:[#allocation3 + $0x28] sm:$0xff] %vm351_vm8, %v8785_v34 }
  0xfa   : > { %v746_v29 = vpop.f32.mrf.mxu2  ;;  %v9308_v31 = vadd.f32 %v1078_v7, %v999_v62  ;;  %376 = vst.msk [vmem:[#allocation3 + $0x30] sm:$0xff] %vm351_vm8, %v8785_v34 }
  0xfb   : > { %v771_v32 = vadd.f32 %v746_v29, %v9230_v48  ;;  %v9312_v49 = vpop.f32.mrf.mxu0  ;;  %377 = vst.msk [vmem:[#allocation3 + $0x38] sm:$0xff] %vm351_vm8, %v8785_v34 }
  0xfc   : > { %378 = vst.msk [vmem:[#allocation3 + $0x40] sm:$0xff] %vm351_vm8, %v8785_v34 }
  0xfd   : > { %7776 = vmatmul.msk.bf16.gmra.mxu3 %vm469_vm2, %v1238_v27  ;;  %379 = vst.msk [vmem:[#allocation3 + $0x48] sm:$0xff] %vm351_vm8, %v8785_v34 }
  0xfe   : > { %380 = vst.msk [vmem:[#allocation3 + $0x50] sm:$0xff] %vm351_vm8, %v8785_v34 }
  0xff   : > { %381 = vst.msk [vmem:[#allocation3 + $0x58] sm:$0xff] %vm351_vm8, %v8785_v34 }
 0x100   : > { %v899_v1 = vpop.f32.mrf.mxu3  ;;  %382 = vst.msk [vmem:[#allocation3 + $0x60] sm:$0xff] %vm351_vm8, %v8785_v34 }
 0x101   : > { %v924_v21 = vadd.f32 %v899_v1, %v771_v32  ;;  %v9318_v40 = vpop.f32.mrf.mxu1  ;;  %383 = vst.msk [vmem:[#allocation3 + $0x68] sm:$0xff] %vm351_vm8, %v8785_v34 }
 0x102   : > { %v9320_v48 = vpop.f32.mrf.mxu2  ;;  %384 = vst.msk [vmem:[#allocation3 + $0x70] sm:$0xff] %vm351_vm8, %v8785_v34 }
 0x103   : > { %v976_v39 = vpop.f32.mrf.mxu0  ;;  %385 = vst.msk [vmem:[#allocation3 + $0x78] sm:$0xff] %vm351_vm8, %v8785_v34 }
 0x104   : > { %v1001_v44 = vadd.f32 %v976_v39, %v924_v21 }
 0x106   : > { %7784 = vmatmul.msk.bf16.gmra.mxu0 %vm469_vm2, %v1346_v43 }
 0x107   : > { %7769 = vmatmul.msk.bf16.gmra.mxu2 %vm469_vm2, %v1141_v61 }
 0x108   : > { %v9326_v42 = vpop.f32.mrf.mxu3 }
 0x109   : > { %v1083_v46 = vpop.f32.mrf.mxu1 }
 0x10a   : > { %v751_v54 = vpop.f32.mrf.mxu2  ;;  %v9328_v50 = vadd.f32 %v1083_v46, %v1001_v44 }
 0x10b   : > { %v773_v51 = vadd.f32 %v751_v54, %v9156_v30  ;;  %v9332_v4 = vpop.f32.mrf.mxu0  ;;  %v1350_v30 = vsel %vm1323_vm7, %v1345_v8, %v1349_v25 }
 0x10d   : > { %7777 = vmatmul.msk.bf16.gmra.mxu3 %vm469_vm2, %v1240_v56  ;;  %v8503_v56 = vld [vmem:[#allocation4 + $0x8] sm:$0xff] }
 0x10e   : > { %1819 = vmatpush.bf16.msrb.mxu2 %v8503_v56 }
 0x110   : > { %v904_v63 = vpop.f32.mrf.mxu3 }
 0x111   : > { %v926_v0 = vadd.f32 %v904_v63, %v773_v51  ;;  %v9335_v5 = vpop.f32.mrf.mxu1 }
 0x112   : > { %v9337_v14 = vpop.f32.mrf.mxu2 }
 0x113   : > { %v981_v2 = vpop.f32.mrf.mxu0 }
 0x114   : > { %v1003_v60 = vadd.f32 %v981_v2, %v926_v0 }
 0x116   : > { %7785 = vmatmul.msk.bf16.gmra.mxu0 %vm469_vm2, %v1350_v30  ;;  %v8507_v30 = vld [vmem:[#allocation4 + $0x28] sm:$0xff] }
 0x117   : > { %7770 = vmatmul.msk.bf16.gmra.mxu2 %vm469_vm2, %v1144_v12  ;;  %v1103_v12 = vadd.f32 %v9269_v9, %v9262_v33  ;;  %1927 = vmatpush.bf16.msrb.mxu3 %v8507_v30  ;;  %v647_v30 = vadd.f32 %v9220_v37, %v9208_v52 }
 0x118   : > { %v9342_v45 = vpop.f32.mrf.mxu3 }
 0x119   : > { %v1088_v16 = vpop.f32.mrf.mxu1 }
 0x11a   : > { %v756_v47 = vpop.f32.mrf.mxu2  ;;  %v9344_v23 = vadd.f32 %v1088_v16, %v1003_v60 }
 0x11b   : > { %v775_v62 = vadd.f32 %v756_v47, %v9182_v53  ;;  %v9347_v28 = vpop.f32.mrf.mxu0  ;;  %v9407_v47 = vpop.permute.xlu0 %1462 }
 0x11d   : > { %7778 = vmatmul.msk.bf16.gmra.mxu3 %vm469_vm2, %v1239_v6 }
 0x120   : > { %v909_v18 = vpop.f32.mrf.mxu3 }
 0x121   : > { %v928_v7 = vadd.f32 %v909_v18, %v775_v62  ;;  %v9350_v29 = vpop.f32.mrf.mxu1 }
 0x122   : > { %v9352_v32 = vpop.f32.mrf.mxu2 }
 0x123   : > { %v986_v27 = vpop.f32.mrf.mxu0  ;;  %v9413_v56 = vpop.permute.xlu0 %1467 }
 0x124   : > { %v1005_v41 = vadd.f32 %v986_v27, %v928_v7  ;;  %v8502_v7 = vld [vmem:[#allocation4] sm:$0xff] }
 0x125   : > { %v8506_v27 = vld [vmem:[#allocation4 + $0x20] sm:$0xff]  ;;  %1820 = vmatpush.bf16.msrb.mxu2 %v8502_v7  ;;  %v9423_v7 = vpop.permute.xlu1 %1472 }
 0x126   : > { %7786 = vmatmul.msk.bf16.gmra.mxu0 %vm469_vm2, %v1349_v25  ;;  %1928 = vmatpush.bf16.msrb.mxu3 %v8506_v27 }
 0x128   : > { %v9360_v53 = vpop.f32.mrf.mxu3 }
 0x129   : > { %v1093_v35 = vpop.f32.mrf.mxu1 }
 0x12a   : > { %v761_v58 = vpop.f32.mrf.mxu2  ;;  %v9364_v55 = vadd.f32 %v1093_v35, %v1005_v41 }
 0x12b   : > { %v777_v8 = vadd.f32 %v761_v58, %v9218_v36  ;;  %v9368_v1 = vpop.f32.mrf.mxu0  ;;  %v1551_v58 = vld [vmem:[#allocation2] sm:$0xff] }
 0x130   : > { %v914_v21 = vpop.f32.mrf.mxu3 }
 0x131   : > { %v930_v39 = vadd.f32 %v914_v21, %v777_v8  ;;  %v9376_v61 = vpop.f32.mrf.mxu1  ;;  %v8509_v8 = vld [vmem:[#allocation4 + $0x38] sm:$0xff] }
 0x132   : > { %v763_v36 = vpop.f32.mrf.mxu2  ;;  %v1552_v21 = vld [vmem:[#allocation2 + $0x8] sm:$0xff]  ;;  %2092 = vmatpush.bf16.msrb.mxu0 %v8509_v8 }
 0x133   : > { %v991_v43 = vpop.f32.mrf.mxu0  ;;  %v1567_v36 = vpack.c.bf16 %v1551_v58, %v1551_v58 }
 0x134   : > { %v1007_v44 = vadd.f32 %v991_v43, %v930_v39  ;;  %v8511_v39 = vld [vmem:[#allocation4 + $0x48] sm:$0xff] }
 0x135   : > { %2181 = vmatpush.bf16.msrb.mxu1 %v8511_v39 }
 0x138   : > { %v916_v6 = vpop.f32.mrf.mxu3 }
 0x139   : > { %v1098_v59 = vpop.f32.mrf.mxu1  ;;  %v1568_v6 = vpack.c.bf16 %v1552_v21, %v1552_v21 }
 0x13a   : > { %v1178_v46 = vpop.f32.mrf.mxu2  ;;  %v9387_v54 = vadd.f32 %v1098_v59, %v1007_v44 }
 0x13b   : > { %v993_v51 = vpop.f32.mrf.mxu0  ;;  %v1212_v22 = vadd.f32 %v1178_v46, %v9253_v26 }
 0x13c   : > { %v8508_v51 = vld [vmem:[#allocation4 + $0x30] sm:$0xff] }
 0x13d   : > { %2093 = vmatpush.bf16.msrb.mxu0 %v8508_v51 }
 0x140   : > { %v1274_v17 = vpop.f32.mrf.mxu3 }
 0x141   : > { %v1100_v63 = vpop.f32.mrf.mxu1  ;;  %v1308_v0 = vadd.f32 %v1274_v17, %v1212_v22  ;;  %v1608_v17 = vunpack.c.l.b16 %v1567_v36 }
 0x142   : > { %v1180_v25 = vpop.f32.mrf.mxu2 }
 0x143   : > { %v1384_v26 = vpop.f32.mrf.mxu0  ;;  %v1213_v60 = vadd.f32 %v1180_v25, %v1103_v12 }
 0x144   : > { %v1418_v2 = vadd.f32 %v1384_v26, %v1308_v0  ;;  %v1609_v26 = vunpack.c.l.b16 %v1568_v6 }
 0x146   : > { %v1434_v16 = vadd.f32 %v9401_v10, %v1418_v2 }
 0x148   : > { %v1447_v62 = vmax.f32 %v1434_v16, 0.0  ;;  %v1276_v18 = vpop.f32.mrf.mxu3 }
 0x149   : > { %v1309_v34 = vadd.f32 %v1276_v18, %v1213_v60  ;;  %v1622_v60 = vpack.c.b16 %v1609_v26, %v1608_v17  ;;  %v770_v18 = vadd.f32 %v9295_v15, %v647_v30 }
 0x14a   : > { %v1183_v41 = vpop.f32.mrf.mxu2  ;;  %v1525_v35 = vmul.f32 %v9407_v47, %v1447_v62 }
 0x14b   : > { %v1386_v33 = vpop.f32.mrf.mxu0  ;;  %v1214_v43 = vadd.f32 %v1183_v41, %v9279_v57  ;;  %v1105_v57 = vadd.f32 %v9293_v13, %v9288_v20  ;;  %v1719_v20 = vshrl.u32 %v1622_v60, 16  ;;  %v1722_v13 = vshll.u32 %v1622_v60, 16 }
 0x14c   : > { %1538 = vst.msk [vmem:[#allocation2 + $0x10] sm:$0xff] %vm351_vm8, %v1525_v35  ;;  %v1419_v9 = vadd.f32 %v1386_v33, %v1309_v34 }
 0x14d   : > { %v1721_v36 = vrot.slane %v1719_v20, 2  ;;  %v1862_v51 = vrot.slane %v1722_v13, 4 }
 0x14e   : > { %v1435_v44 = vadd.f32 %v9401_v10, %v1419_v9  ;;  %v923_v9 = vadd.f32 %v9306_v24, %v770_v18 }
 0x150   : > { %v1448_v59 = vmax.f32 %v1435_v44, 0.0  ;;  %v1279_v46 = vpop.f32.mrf.mxu3  ;;  %v1000_v39 = vadd.f32 %v9312_v49, %v923_v9 }
 0x151   : > { %v1310_v63 = vadd.f32 %v1279_v46, %v1214_v43  ;;  %v1724_v43 = vrot.slane %v1722_v13, 3  ;;  %v1861_v46 = vrot.slane %v1719_v20, 3 }
 0x152   : > { %v1185_v22 = vpop.f32.mrf.mxu2  ;;  %v1526_v25 = vmul.f32 %v9413_v56, %v1448_v59  ;;  %v1107_v49 = vadd.f32 %v9318_v40, %v1000_v39 }
 0x153   : > { %v1389_v0 = vpop.f32.mrf.mxu0  ;;  %v1553_v2 = vld [vmem:[#allocation2 + $0x10] sm:$0xff]  ;;  %v1215_v16 = vadd.f32 %v1185_v22, %v1105_v57  ;;  %v9436_v57 = vpop.permute.xlu1 %1477 }
 0x154   : > { %1539 = vst.msk [vmem:[#allocation2 + $0x18] sm:$0xff] %vm351_vm8, %v1526_v25  ;;  %v1420_v12 = vadd.f32 %v1389_v0, %v1310_v63  ;;  %v1569_v27 = vpack.c.bf16 %v1553_v2, %v1553_v2  ;;  %v1629_v63 = vrot.slane %v1622_v60, 3  ;;  %v652_v0 = vadd.f32 %v9246_v3, %v9237_v38 }
 0x156   : > { %v1436_v62 = vadd.f32 %v9401_v10, %v1420_v12  ;;  %v1610_v8 = vunpack.c.l.b16 %v1569_v27  ;;  %v1863_v27 = vor.u32 %v1862_v51, %v1861_v46 }
 0x158   : > { %v1449_v41 = vmax.f32 %v1436_v62, 0.0  ;;  %v1281_v35 = vpop.f32.mrf.mxu3  ;;  %v1984_v22 = vpack.c.b16 %v1610_v8, %v1609_v26 }
 0x159   : > { %v1311_v33 = vadd.f32 %v1281_v35, %v1215_v16 }
 0x15a   : > { %v1188_v34 = vpop.f32.mrf.mxu2  ;;  %v1527_v58 = vmul.f32 %v9423_v7, %v1449_v41  ;;  %v1992_v41 = vshrl.u32 %v1984_v22, 16  ;;  %v1995_v38 = vshll.u32 %v1984_v22, 16 }
 0x15b   : > { %v1391_v52 = vpop.f32.mrf.mxu0  ;;  %v1554_v37 = vld [vmem:[#allocation2 + $0x18] sm:$0xff]  ;;  %v1216_v44 = vadd.f32 %v1188_v34, %v9308_v31  ;;  %v1725_v31 = vor.u32 %v1724_v43, %v1721_v36 }
 0x15c   : > { %1540 = vst.msk [vmem:[#allocation2 + $0x20] sm:$0xff] %vm351_vm8, %v1527_v58  ;;  %v1421_v21 = vadd.f32 %v1391_v52, %v1311_v33  ;;  %v1570_v15 = vpack.c.bf16 %v1554_v37, %v1554_v37 }
 0x15e   : > { %v1437_v6 = vadd.f32 %v9401_v10, %v1421_v21  ;;  %v1611_v59 = vunpack.c.l.b16 %v1570_v15  ;;  %v9449_v21 = vpop.permute.xlu2 %1482 }
 0x160   : > { %v1450_v24 = vmax.f32 %v1437_v6, 0.0  ;;  %v1284_v17 = vpop.f32.mrf.mxu3  ;;  %v9431_v25 = vpack.c.b16 %v1611_v59, %v1610_v8  ;;  %v772_v8 = vadd.f32 %v9320_v48, %v652_v0  ;;  %v1994_v48 = vrot.slane %v1992_v41, 3 }
 0x161   : > { %v1312_v30 = vadd.f32 %v1284_v17, %v1216_v44 }
 0x162   : > { %v1190_v12 = vpop.f32.mrf.mxu2  ;;  %v1528_v2 = vmul.f32 %v9436_v57, %v1450_v24  ;;  %v1630_v16 = vrot.slane %v9431_v25, 3  ;;  %v1727_v26 = vshrl.u32 %v9431_v25, 16  ;;  %v1730_v60 = vshll.u32 %v9431_v25, 16 }
 0x163   : > { %v1394_v62 = vpop.f32.mrf.mxu0  ;;  %v1555_v18 = vld [vmem:[#allocation2 + $0x20] sm:$0xff]  ;;  %v1217_v9 = vadd.f32 %v1190_v12, %v1107_v49  ;;  %v1997_v24 = vrot.slane %v1995_v38, 4  ;;  %v925_v49 = vadd.f32 %v9326_v42, %v772_v8 }
 0x164   : > { %1541 = vst.msk [vmem:[#allocation2 + $0x28] sm:$0xff] %vm351_vm8, %v1528_v2  ;;  %v1422_v3 = vadd.f32 %v1394_v62, %v1312_v30  ;;  %v1571_v40 = vpack.c.bf16 %v1555_v18, %v1555_v18  ;;  %v1631_v35 = vsel %vm455_vm1, %v1629_v63, %v1630_v16  ;;  %v1729_v34 = vrot.slane %v1727_v26, 2 }
 0x165   : > { %7795 = vmatmul.msk.bf16.vlgmr.msra.gmra.mxu1 %vm351_vm8, %v1631_v35  ;;  %v1732_v20 = vrot.slane %v1730_v60, 3  ;;  %v1864_v13 = vrot.slane %v1727_v26, 3  ;;  %v1865_v58 = vrot.slane %v1730_v60, 4  ;;  %v2236_v33 = vrot.slane %v1730_v60, 1 }
 0x166   : > { %v1438_v52 = vadd.f32 %v9401_v10, %v1422_v3  ;;  %v1612_v37 = vunpack.c.l.b16 %v1571_v40  ;;  %v1998_v18 = vor.u32 %v1997_v24, %v1994_v48  ;;  %v1002_v42 = vadd.f32 %v9332_v4, %v925_v49 }
 0x167   : > { %v9451_v15 = vor.u32 %v1732_v20, %v1729_v34  ;;  %v9453_v39 = vor.u32 %v1865_v58, %v1864_v13  ;;  %v9455_v36 = vor.u32 %v2236_v33, %v1727_v26 }
 0x168   : > { %v1451_v43 = vmax.f32 %v1438_v52, 0.0  ;;  %v1286_v44 = vpop.f32.mrf.mxu3  ;;  %v9457_v6 = vpack.c.b16 %v1612_v37, %v1611_v59  ;;  %v9483_v52 = vpop.permute.xlu2 %1487 }
 0x169   : > { %v1734_v51 = vsel %vm538_vm3, %v1725_v31, %v9451_v15  ;;  %v1867_v22 = vsel %vm670_vm4, %v1863_v27, %v9453_v39  ;;  %v1313_v63 = vadd.f32 %v1286_v44, %v1217_v9 }
 0x16a   : > { %v1193_v46 = vpop.f32.mrf.mxu2  ;;  %v1529_v17 = vmul.f32 %v9449_v21, %v1451_v43  ;;  %7810 = vmatmul.msk.bf16.vlgmr.msrb.gmra.mxu2 %vm351_vm8, %v1734_v51  ;;  %7825 = vmatmul.msk.bf16.vlgmr.msrb.gmra.mxu3 %vm351_vm8, %v1867_v22  ;;  %v2000_v0 = vshrl.u32 %v9457_v6, 16  ;;  %v2003_v59 = vshll.u32 %v9457_v6, 16 }
 0x16b   : > { %v1396_v12 = vpop.f32.mrf.mxu0  ;;  %v1556_v31 = vld [vmem:[#allocation2 + $0x28] sm:$0xff]  ;;  %v1218_v38 = vadd.f32 %v1193_v46, %v9328_v50  ;;  %v1109_v46 = vadd.f32 %v9335_v5, %v1002_v42 }
 0x16c   : > { %1542 = vst.msk [vmem:[#allocation2 + $0x30] sm:$0xff] %vm351_vm8, %v1529_v17  ;;  %v1423_v2 = vadd.f32 %v1396_v12, %v1313_v63  ;;  %v2002_v30 = vrot.slane %v2000_v0, 3  ;;  %v2005_v26 = vrot.slane %v2003_v59, 4  ;;  %v1572_v62 = vpack.c.bf16 %v1556_v31, %v1556_v31 }
 0x16d   : > { %v2357_v60 = vrot.slane %v2003_v59, 1  ;;  %v2583_v27 = vrot.slane %v2000_v0, 1  ;;  %v2584_v41 = vrot.slane %v2003_v59, 2 }
 0x16e   : > { %v1439_v3 = vadd.f32 %v9401_v10, %v1423_v2  ;;  %v9472_v40 = vor.u32 %v2005_v26, %v2002_v30  ;;  %v1613_v35 = vunpack.c.l.b16 %v1572_v62 }
 0x16f   : > { %v9475_v34 = vor.u32 %v2357_v60, %v2000_v0  ;;  %v9477_v20 = vor.u32 %v2584_v41, %v2583_v27  ;;  %v9511_v41 = vpop.permute.xlu0 %1492 }
 0x170   : > { %v1452_v13 = vmax.f32 %v1439_v3, 0.0  ;;  %v1289_v58 = vpop.f32.mrf.mxu3  ;;  %v2007_v33 = vsel %vm670_vm4, %v1998_v18, %v9472_v40  ;;  %v9481_v9 = vpack.c.b16 %v1613_v35, %v1612_v37 }
 0x171   : > { %7840 = vmatmul.msk.bf16.vlgmr.msrb.gmra.mxu0 %vm351_vm8, %v2007_v33  ;;  %v1314_v43 = vadd.f32 %v1289_v58, %v1218_v38 }
 0x172   : > { %v1195_v50 = vpop.f32.mrf.mxu2  ;;  %v1530_v8 = vmul.f32 %v9483_v52, %v1452_v13  ;;  %v1632_v4 = vrot.slane %v9481_v9, 3  ;;  %v1736_v44 = vshrl.u32 %v9481_v9, 16  ;;  %v1739_v22 = vshll.u32 %v9481_v9, 16 }
 0x173   : > { %v1399_v51 = vpop.f32.mrf.mxu0  ;;  %v1557_v48 = vld [vmem:[#allocation2 + $0x30] sm:$0xff]  ;;  %v1219_v12 = vadd.f32 %v1195_v50, %v1109_v46 }
 0x174   : > { %1543 = vst.msk [vmem:[#allocation2 + $0x38] sm:$0xff] %vm351_vm8, %v1530_v8  ;;  %v1424_v37 = vadd.f32 %v1399_v51, %v1314_v43  ;;  %v1633_v24 = vsel %vm455_vm1, %v1630_v16, %v1632_v4  ;;  %v1738_v17 = vrot.slane %v1736_v44, 2  ;;  %v1868_v63 = vrot.slane %v1736_v44, 3 }
 0x175   : > { %7796 = vmatmul.msk.bf16.gmra.mxu1 %vm351_vm8, %v1633_v24  ;;  %v1741_v0 = vrot.slane %v1739_v22, 3  ;;  %v1869_v59 = vrot.slane %v1739_v22, 4  ;;  %v1573_v5 = vpack.c.bf16 %v1557_v48, %v1557_v48  ;;  %v2238_v49 = vrot.slane %v1739_v22, 1 }
 0x176   : > { %v1440_v31 = vadd.f32 %v9401_v10, %v1424_v37  ;;  %v774_v16 = vadd.f32 %v9337_v14, %v9167_v19 }
 0x177   : > { %v9499_v2 = vor.u32 %v1741_v0, %v1738_v17  ;;  %v9501_v30 = vor.u32 %v1869_v59, %v1868_v63  ;;  %v1614_v26 = vunpack.c.l.b16 %v1573_v5  ;;  %v9505_v62 = vsel %vm1010_vm5, %v9455_v36, %v2238_v49 }
 0x178   : > { %v1453_v18 = vmax.f32 %v1440_v31, 0.0  ;;  %v1291_v60 = vpop.f32.mrf.mxu3  ;;  %v9509_v27 = vor.u32 %v2238_v49, %v1736_v44  ;;  %v9550_v31 = vpop.permute.xlu1 %1497 }
 0x179   : > { %v1743_v3 = vsel %vm538_vm3, %v9451_v15, %v9499_v2  ;;  %v1871_v42 = vsel %vm670_vm4, %v9453_v39, %v9501_v30  ;;  %v9519_v36 = vpack.c.b16 %v1614_v26, %v1613_v35  ;;  %v1315_v19 = vadd.f32 %v1291_v60, %v1219_v12  ;;  %12626 = vst [vmem:[#allocation7_spill] sm:$0xff] %v9550_v31 }
 0x17a   : > { %v1198_v38 = vpop.f32.mrf.mxu2  ;;  %v1531_v13 = vmul.f32 %v9511_v41, %v1453_v18  ;;  %7811 = vmatmul.msk.bf16.gmra.mxu2 %vm351_vm8, %v1743_v3  ;;  %7826 = vmatmul.msk.bf16.gmra.mxu3 %vm351_vm8, %v1871_v42  ;;  %v2476_v15 = vrot.slane %v9457_v6, 1  ;;  %v927_v39 = vadd.f32 %v9342_v45, %v774_v16 }
 0x17b   : > { %v1401_v14 = vpop.f32.mrf.mxu0  ;;  %v2009_v58 = vshrl.u32 %v9519_v36, 16  ;;  %v2012_v33 = vshll.u32 %v9519_v36, 16  ;;  %v1558_v50 = vld [vmem:[#allocation2 + $0x38] sm:$0xff]  ;;  %v2477_v8 = vrot.slane %v9519_v36, 1  ;;  %v1220_v35 = vadd.f32 %v1198_v38, %v9344_v23 }
 0x17c   : > { %1544 = vst.msk [vmem:[#allocation2 + $0x40] sm:$0xff] %vm351_vm8, %v1531_v13  ;;  %v1425_v43 = vadd.f32 %v1401_v14, %v1315_v19  ;;  %v1574_v44 = vpack.c.bf16 %v1558_v50, %v1558_v50  ;;  %v1004_v45 = vadd.f32 %v9347_v28, %v927_v39 }
 0x17d   : > { %v2011_v46 = vrot.slane %v2009_v58, 3  ;;  %v2014_v51 = vrot.slane %v2012_v33, 4  ;;  %v2359_v22 = vrot.slane %v2012_v33, 1  ;;  %v9534_v48 = vsel %vm1227_vm6, %v2476_v15, %v2477_v8 }
 0x17e   : > { %v1441_v6 = vadd.f32 %v9401_v10, %v1425_v43  ;;  %v1615_v37 = vunpack.c.l.b16 %v1574_v44  ;;  %v2586_v24 = vrot.slane %v2009_v58, 1  ;;  %v2587_v17 = vrot.slane %v2012_v33, 2  ;;  %v8510_v33 = vld [vmem:[#allocation4 + $0x40] sm:$0xff] }
 0x17f   : > { %v9538_v63 = vor.u32 %v2014_v51, %v2011_v46  ;;  %v9542_v23 = vsel %vm1010_vm5, %v9475_v34, %v2359_v22  ;;  %v9544_v0 = vor.u32 %v2359_v22, %v2009_v58  ;;  %2182 = vmatpush.bf16.msrb.mxu1 %v8510_v33 }
 0x180   : > { %v1454_v59 = vmax.f32 %v1441_v6, 0.0  ;;  %v1294_v5 = vpop.f32.mrf.mxu3  ;;  %v9546_v49 = vpack.c.b16 %v1615_v37, %v1614_v26  ;;  %v9548_v12 = vor.u32 %v2587_v17, %v2586_v24  ;;  %v1111_v26 = vadd.f32 %v9350_v29, %v1004_v45  ;;  %v9586_v45 = vpop.permute.xlu2 %1502 }
 0x181   : > { %v2016_v28 = vsel %vm670_vm4, %v9472_v40, %v9538_v63  ;;  %v1316_v60 = vadd.f32 %v1294_v5, %v1220_v35  ;;  %12627 = vst [vmem:[#allocation8_spill] sm:$0xff] %v9586_v45 }
 0x182   : > { %v1200_v16 = vpop.f32.mrf.mxu2  ;;  %v1532_v18 = vmul.f32 %v9550_v31, %v1454_v59  ;;  %7841 = vmatmul.msk.bf16.gmra.mxu0 %vm351_vm8, %v2016_v28  ;;  %v1634_v34 = vrot.slane %v9546_v49, 3  ;;  %v1745_v38 = vshrl.u32 %v9546_v49, 16  ;;  %v1748_v42 = vshll.u32 %v9546_v49, 16 }
 0x183   : > { %v1404_v3 = vpop.f32.mrf.mxu0  ;;  %v1559_v13 = vld [vmem:[#allocation2 + $0x40] sm:$0xff]  ;;  %v9564_v19 = vsel %vm1323_vm7, %v9477_v20, %v9548_v12  ;;  %v1221_v20 = vadd.f32 %v1200_v16, %v1111_v26 }
 0x184   : > { %1545 = vst.msk [vmem:[#allocation2 + $0x48] sm:$0xff] %vm351_vm8, %v1532_v18  ;;  %v1426_v40 = vadd.f32 %v1404_v3, %v1316_v60  ;;  %v1635_v14 = vsel %vm455_vm1, %v1632_v4, %v1634_v34  ;;  %v1747_v58 = vrot.slane %v1745_v38, 2  ;;  %v1872_v29 = vrot.slane %v1745_v38, 3 }
 0x185   : > { %7797 = vmatmul.msk.bf16.gmra.mxu1 %vm351_vm8, %v1635_v14  ;;  %v1750_v50 = vrot.slane %v1748_v42, 3  ;;  %v1873_v15 = vrot.slane %v1748_v42, 4  ;;  %v1575_v39 = vpack.c.bf16 %v1559_v13, %v1559_v13  ;;  %v2241_v43 = vrot.slane %v1748_v42, 1 }
 0x186   : > { %v1442_v35 = vadd.f32 %v9401_v10, %v1426_v40  ;;  %v776_v4 = vadd.f32 %v9352_v32, %v9197_v11 }
 0x187   : > { %v9574_v44 = vor.u32 %v1750_v50, %v1747_v58  ;;  %v9576_v46 = vor.u32 %v1873_v15, %v1872_v29  ;;  %v1616_v51 = vunpack.c.l.b16 %v1575_v39  ;;  %v9582_v24 = vsel %vm1010_vm5, %v9509_v27, %v2241_v43 }
 0x188   : > { %v1455_v22 = vmax.f32 %v1442_v35, 0.0  ;;  %v1296_v6 = vpop.f32.mrf.mxu3  ;;  %v9584_v17 = vor.u32 %v2241_v43, %v1745_v38  ;;  %v929_v26 = vadd.f32 %v9360_v53, %v776_v4  ;;  %v9626_v43 = vpop.permute.xlu0 %1507 }
 0x189   : > { %v1752_v5 = vsel %vm538_vm3, %v9499_v2, %v9574_v44  ;;  %v1875_v16 = vsel %vm670_vm4, %v9501_v30, %v9576_v46  ;;  %v9594_v11 = vpack.c.b16 %v1616_v51, %v1615_v37  ;;  %v1317_v28 = vadd.f32 %v1296_v6, %v1221_v20  ;;  %12628 = vst [vmem:[#allocation9_spill] sm:$0xff] %v9626_v43 }
 0x18a   : > { %v1203_v59 = vpop.f32.mrf.mxu2  ;;  %v1533_v32 = vmul.f32 %v9586_v45, %v1455_v22  ;;  %7812 = vmatmul.msk.bf16.gmra.mxu2 %vm351_vm8, %v1752_v5  ;;  %7827 = vmatmul.msk.bf16.gmra.mxu3 %vm351_vm8, %v1875_v16  ;;  %v1006_v50 = vadd.f32 %v9368_v1, %v929_v26 }
 0x18b   : > { %v1406_v27 = vpop.f32.mrf.mxu0  ;;  %v2018_v18 = vshrl.u32 %v9594_v11, 16  ;;  %v2021_v60 = vshll.u32 %v9594_v11, 16  ;;  %v1560_v38 = vld [vmem:[#allocation2 + $0x48] sm:$0xff]  ;;  %v2479_v2 = vrot.slane %v9594_v11, 1  ;;  %v1222_v30 = vadd.f32 %v1203_v59, %v9364_v55 }
 0x18c   : > { %1546 = vst.msk [vmem:[#allocation2 + $0x50] sm:$0xff] %vm351_vm8, %v1533_v32  ;;  %v1427_v37 = vadd.f32 %v1406_v27, %v1317_v28  ;;  %v1576_v3 = vpack.c.bf16 %v1560_v38, %v1560_v38 }
 0x18d   : > { %v2020_v42 = vrot.slane %v2018_v18, 3  ;;  %v2023_v13 = vrot.slane %v2021_v60, 4  ;;  %v2362_v40 = vrot.slane %v2021_v60, 1  ;;  %v9610_v14 = vsel %vm1227_vm6, %v2477_v8, %v2479_v2 }
 0x18e   : > { %v1443_v58 = vadd.f32 %v9401_v10, %v1427_v37  ;;  %v1617_v29 = vunpack.c.l.b16 %v1576_v3  ;;  %v2590_v53 = vrot.slane %v2018_v18, 1  ;;  %v2591_v33 = vrot.slane %v2021_v60, 2 }
 0x18f   : > { %v9614_v55 = vor.u32 %v2023_v13, %v2020_v42  ;;  %v9618_v15 = vsel %vm1010_vm5, %v9544_v0, %v2362_v40  ;;  %v9620_v39 = vor.u32 %v2362_v40, %v2018_v18 }
 0x190   : > { %v1456_v20 = vmax.f32 %v1443_v58, 0.0  ;;  %v1299_v36 = vpop.f32.mrf.mxu3  ;;  %v9622_v35 = vpack.c.b16 %v1617_v29, %v1616_v51  ;;  %v9624_v8 = vor.u32 %v2591_v33, %v2590_v53  ;;  %v1113_v51 = vadd.f32 %v9376_v61, %v1006_v50  ;;  %v9658_v33 = vpop.permute.xlu1 %1512 }
 0x191   : > { %v2025_v1 = vsel %vm670_vm4, %v9538_v63, %v9614_v55  ;;  %v1318_v6 = vadd.f32 %v1299_v36, %v1222_v30  ;;  %12629 = vst [vmem:[#allocation10_spill] sm:$0xff] %v9658_v33 }
 0x192   : > { %v1205_v4 = vpop.f32.mrf.mxu2  ;;  %v1534_v22 = vmul.f32 %v9626_v43, %v1456_v20  ;;  %7842 = vmatmul.msk.bf16.gmra.mxu0 %vm351_vm8, %v2025_v1  ;;  %v1636_v0 = vrot.slane %v9622_v35, 3  ;;  %v1754_v59 = vshrl.u32 %v9622_v35, 16  ;;  %v1757_v16 = vshll.u32 %v9622_v35, 16 }
 0x193   : > { %v1409_v5 = vpop.f32.mrf.mxu0  ;;  %v1561_v32 = vld [vmem:[#allocation2 + $0x50] sm:$0xff]  ;;  %v9640_v28 = vsel %vm1323_vm7, %v9548_v12, %v9624_v8  ;;  %v1223_v37 = vadd.f32 %v1205_v4, %v1113_v51 }
 0x194   : > { %1547 = vst.msk [vmem:[#allocation2 + $0x58] sm:$0xff] %vm351_vm8, %v1534_v22  ;;  %v1428_v63 = vadd.f32 %v1409_v5, %v1318_v6  ;;  %v1637_v27 = vsel %vm455_vm1, %v1634_v34, %v1636_v0  ;;  %v1756_v18 = vrot.slane %v1754_v59, 2  ;;  %v1876_v61 = vrot.slane %v1754_v59, 3 }
 0x195   : > { %7798 = vmatmul.msk.bf16.gmra.mxu1 %vm351_vm8, %v1637_v27  ;;  %v1759_v60 = vrot.slane %v1757_v16, 3  ;;  %v1877_v38 = vrot.slane %v1757_v16, 4  ;;  %v1577_v26 = vpack.c.bf16 %v1561_v32, %v1561_v32  ;;  %v2244_v30 = vrot.slane %v1757_v16, 1 }
 0x196   : > { %v1444_v12 = vadd.f32 %v9401_v10, %v1428_v63 }
 0x197   : > { %v9650_v3 = vor.u32 %v1759_v60, %v1756_v18  ;;  %v9652_v42 = vor.u32 %v1877_v38, %v1876_v61  ;;  %v1618_v13 = vunpack.c.l.b16 %v1577_v26  ;;  %v9656_v40 = vsel %vm1010_vm5, %v9584_v17, %v2244_v30 }
 0x198   : > { %v1457_v34 = vmax.f32 %v1444_v12, 0.0  ;;  %v1301_v58 = vpop.f32.mrf.mxu3  ;;  %v2246_v53 = vor.u32 %v2244_v30, %v1754_v59 }
 0x199   : > { %v1761_v20 = vsel %vm538_vm3, %v9574_v44, %v9650_v3  ;;  %v1879_v36 = vsel %vm670_vm4, %v9576_v46, %v9652_v42  ;;  %v9666_v4 = vpack.c.b16 %v1618_v13, %v1617_v29  ;;  %v1319_v17 = vadd.f32 %v1301_v58, %v1223_v37 }
 0x19a   : > { %v1208_v50 = vpop.f32.mrf.mxu2  ;;  %v1535_v1 = vmul.f32 %v9658_v33, %v1457_v34  ;;  %7813 = vmatmul.msk.bf16.gmra.mxu2 %vm351_vm8, %v1761_v20  ;;  %7828 = vmatmul.msk.bf16.gmra.mxu3 %vm351_vm8, %v1879_v36  ;;  %v9694_v34 = vpop.permute.xlu2 %1517 }
 0x19b   : > { %v1411_v22 = vpop.f32.mrf.mxu0  ;;  %v2027_v6 = vshrl.u32 %v9666_v4, 16  ;;  %v2030_v59 = vshll.u32 %v9666_v4, 16  ;;  %v1562_v51 = vld [vmem:[#allocation2 + $0x58] sm:$0xff]  ;;  %v2481_v44 = vrot.slane %v9666_v4, 1  ;;  %v1224_v46 = vadd.f32 %v1208_v50, %v9387_v54  ;;  %12630 = vst [vmem:[#allocation11_spill] sm:$0xff] %v9694_v34 }
 0x19c   : > { %1548 = vst.msk [vmem:[#allocation2 + $0x60] sm:$0xff] %vm351_vm8, %v1535_v1  ;;  %v1429_v29 = vadd.f32 %v1411_v22, %v1319_v17  ;;  %v1578_v5 = vpack.c.bf16 %v1562_v51, %v1562_v51 }
 0x19d   : > { %v2029_v16 = vrot.slane %v2027_v6, 3  ;;  %v2032_v32 = vrot.slane %v2030_v59, 4  ;;  %v2365_v63 = vrot.slane %v2030_v59, 1  ;;  %v9681_v27 = vsel %vm1227_vm6, %v2479_v2, %v2481_v44 }
 0x19e   : > { %v1445_v18 = vadd.f32 %v9401_v10, %v1429_v29  ;;  %v1619_v61 = vunpack.c.l.b16 %v1578_v5  ;;  %v2594_v12 = vrot.slane %v2027_v6, 1  ;;  %v2595_v11 = vrot.slane %v2030_v59, 2 }
 0x19f   : > { %v9684_v60 = vor.u32 %v2032_v32, %v2029_v16  ;;  %v9688_v54 = vsel %vm1010_vm5, %v9620_v39, %v2365_v63  ;;  %v9690_v38 = vor.u32 %v2365_v63, %v2027_v6  ;;  %v1566_v32 = vld [vmem:[#allocation2 + $0x78] sm:$0xff] }
 0x1a0   : > { %v1458_v26 = vmax.f32 %v1445_v18, 0.0  ;;  %v1304_v30 = vpop.f32.mrf.mxu3  ;;  %v9692_v37 = vpack.c.b16 %v1619_v61, %v1618_v13  ;;  %v2596_v22 = vor.u32 %v2595_v11, %v2594_v12 }
 0x1a1   : > { %v1320_v2 = vadd.f32 %v1304_v30, %v1224_v46  ;;  %v2034_v58 = vsel %vm670_vm4, %v9614_v55, %v9684_v60 }
 0x1a2   : > { %v1210_v50 = vpop.f32.mrf.mxu2  ;;  %v1536_v20 = vmul.f32 %v9694_v34, %v1458_v26  ;;  %7843 = vmatmul.msk.bf16.gmra.mxu0 %vm351_vm8, %v2034_v58  ;;  %v1638_v39 = vrot.slane %v9692_v37, 3  ;;  %v1763_v36 = vshrl.u32 %v9692_v37, 16  ;;  %v1766_v13 = vshll.u32 %v9692_v37, 16 }
 0x1a3   : > { %v1414_v1 = vpop.f32.mrf.mxu0  ;;  %v1563_v17 = vld [vmem:[#allocation2 + $0x60] sm:$0xff]  ;;  %v9716_v26 = vsel %vm1323_vm7, %v9624_v8, %v2596_v22  ;;  %v1582_v50 = vpack.c.bf16 %v1566_v32, %v1566_v32 }
 0x1a4   : > { %1549 = vst.msk [vmem:[#allocation2 + $0x68] sm:$0xff] %vm351_vm8, %v1536_v20  ;;  %v1430_v6 = vadd.f32 %v1414_v1, %v1320_v2  ;;  %v1639_v55 = vsel %vm455_vm1, %v1636_v0, %v1638_v39  ;;  %v1765_v59 = vrot.slane %v1763_v36, 2  ;;  %v1768_v51 = vrot.slane %v1766_v13, 3  ;;  %v9728_v20 = vpop.permute.xlu0 %1522  ;;  %v8515_v1 = vld [vmem:[#allocation4 + $0x68] sm:$0xff] }
 0x1a5   : > { %7799 = vmatmul.msk.bf16.gmra.mxu1 %vm351_vm8, %v1639_v55  ;;  %v1880_v46 = vrot.slane %v1763_v36, 3  ;;  %v1881_v29 = vrot.slane %v1766_v13, 4  ;;  %v1579_v5 = vpack.c.bf16 %v1563_v17, %v1563_v17  ;;  %v2247_v16 = vrot.slane %v1766_v13, 1  ;;  %12631 = vst [vmem:[#allocation12_spill] sm:$0xff] %v9728_v20  ;;  %2421 = vmatpush.bf16.msra.mxu3 %v8515_v1 }
 0x1a6   : > { %v1446_v63 = vadd.f32 %v9401_v10, %v1430_v6  ;;  %v9712_v18 = vor.u32 %v1768_v51, %v1765_v59 }
 0x1a7   : > { %v9718_v30 = vor.u32 %v1881_v29, %v1880_v46  ;;  %v1620_v0 = vunpack.c.l.b16 %v1579_v5  ;;  %v9721_v12 = vsel %vm1010_vm5, %v2246_v53, %v2247_v16  ;;  %v9723_v11 = vor.u32 %v2247_v16, %v1763_v36  ;;  %v8513_v36 = vld [vmem:[#allocation4 + $0x58] sm:$0xff] }
 0x1a8   : > { %v1459_v2 = vmax.f32 %v1446_v63, 0.0  ;;  %v1770_v58 = vsel %vm538_vm3, %v9650_v3, %v9712_v18  ;;  %v1306_v10 = vpop.f32.mrf.mxu3  ;;  %2299 = vmatpush.bf16.msra.mxu2 %v8513_v36 }
 0x1a9   : > { %v1883_v8 = vsel %vm670_vm4, %v9652_v42, %v9718_v30  ;;  %v9733_v13 = vpack.c.b16 %v1620_v0, %v1619_v61  ;;  %v2355_v61 = vunpack.c.l.b16 %v1582_v50 }
 0x1aa   : > { %v1537_v53 = vmul.f32 %v9728_v20, %v1459_v2  ;;  %7814 = vmatmul.msk.bf16.gmra.mxu2 %vm351_vm8, %v1770_v58  ;;  %7829 = vmatmul.msk.bf16.gmra.mxu3 %vm351_vm8, %v1883_v8 }
 0x1ab   : > { %v2036_v3 = vshrl.u32 %v9733_v13, 16  ;;  %v2039_v17 = vshll.u32 %v9733_v13, 16  ;;  %v1564_v6 = vld [vmem:[#allocation2 + $0x68] sm:$0xff]  ;;  %v1416_v55 = vpop.f32.mrf.mxu0  ;;  %v12601_v59 = vrot.slane %v9733_v13, 1 }
 0x1ac   : > { %1550 = vst.msk [vmem:[#allocation2 + $0x70] sm:$0xf] %vm368_vm9, %v1537_v53  ;;  %v1580_v42 = vpack.c.bf16 %v1564_v6, %v1564_v6  ;;  %v9760_v53 = vpack.c.b16 %v2355_v61, %v2355_v61 }
 0x1ad   : > { %v2038_v51 = vrot.slane %v2036_v3, 3  ;;  %v2041_v46 = vrot.slane %v2039_v17, 4  ;;  %v2368_v29 = vrot.slane %v2039_v17, 1  ;;  %v9747_v5 = vsel %vm1227_vm6, %v2481_v44, %v12601_v59 }
 0x1ae   : > { %v1621_v16 = vunpack.c.l.b16 %v1580_v42  ;;  %v2598_v32 = vrot.slane %v2036_v3, 1  ;;  %v2599_v63 = vrot.slane %v2039_v17, 2 }
 0x1af   : > { %v9749_v2 = vor.u32 %v2041_v46, %v2038_v51  ;;  %v9753_v58 = vsel %vm1010_vm5, %v9690_v38, %v2368_v29  ;;  %v2370_v10 = vor.u32 %v2368_v29, %v2036_v3  ;;  %v8517_v38 = vld [vmem:[#allocation4 + $0x78] sm:$0xff]  ;;  %v8519_v51 = vld [vmem:[#allocation4 + $0x88] sm:$0xff]  ;;  %v8512_v46 = vld [vmem:[#allocation4 + $0x50] sm:$0xff] }
 0x1b0   : > { %v9755_v50 = vpack.c.b16 %v1621_v16, %v1620_v0  ;;  %v2600_v8 = vor.u32 %v2599_v63, %v2598_v32  ;;  %2528 = vmatpush.bf16.msra.mxu0 %v8517_v38  ;;  %v8514_v29 = vld [vmem:[#allocation4 + $0x60] sm:$0xff]  ;;  %2649 = vmatpush.bf16.msra.mxu1 %v8519_v51  ;;  %v12632_v51 = vrot.slane %v9733_v13, 1 }
 0x1b1   : > { %v2043_v4 = vsel %vm670_vm4, %v9684_v60, %v9749_v2  ;;  %2300 = vmatpush.bf16.msra.mxu2 %v8512_v46  ;;  %2422 = vmatpush.bf16.msra.mxu3 %v8514_v29 }
 0x1b2   : > { %7844 = vmatmul.msk.bf16.gmra.mxu0 %vm351_vm8, %v2043_v4  ;;  %v1640_v44 = vrot.slane %v9755_v50, 3  ;;  %v1772_v36 = vshrl.u32 %v9755_v50, 16  ;;  %v1775_v1 = vshll.u32 %v9755_v50, 16  ;;  %v9767_v3 = vsel %vm1323_vm7, %v2596_v22, %v2600_v8 }
 0x1b3   : > { %v1565_v0 = vld [vmem:[#allocation2 + $0x70] sm:$0xff]  ;;  %v12605_v22 = vshll.u32 %v9760_v53, 16  ;;  %v12604_v4 = vshrl.u32 %v9760_v53, 16 }
 0x1b4   : > { %v1641_v17 = vsel %vm455_vm1, %v1638_v39, %v1640_v44  ;;  %v1774_v60 = vrot.slane %v1772_v36, 2  ;;  %v1777_v6 = vrot.slane %v1775_v1, 3  ;;  %v1884_v55 = vrot.slane %v1772_v36, 3 }
 0x1b5   : > { %7800 = vmatmul.msk.bf16.gmra.mxu1 %vm351_vm8, %v1641_v17  ;;  %v1885_v42 = vrot.slane %v1775_v1, 4  ;;  %v1581_v61 = vpack.c.bf16 %v1565_v0, %v1565_v0  ;;  %v2250_v32 = vrot.slane %v1775_v1, 1 }
 0x1b6   : > { %v1778_v63 = vor.u32 %v1777_v6, %v1774_v60  ;;  %v8516_v6 = vld [vmem:[#allocation4 + $0x70] sm:$0xff] }
 0x1b7   : > { %v1886_v59 = vor.u32 %v1885_v42, %v1884_v55  ;;  %v1983_v20 = vunpack.c.l.b16 %v1581_v61  ;;  %v9777_v39 = vsel %vm1010_vm5, %v9723_v11, %v2250_v32  ;;  %v2252_v38 = vor.u32 %v2250_v32, %v1772_v36  ;;  %2529 = vmatpush.bf16.msra.mxu0 %v8516_v6 }
 0x1b8   : > { %v1779_v0 = vsel %vm538_vm3, %v9712_v18, %v1778_v63  ;;  %v2606_v11 = vrot.slane %v12604_v4, 1  ;;  %v2607_v36 = vrot.slane %v12605_v22, 2 }
 0x1b9   : > { %v1887_v1 = vsel %vm670_vm4, %v9718_v30, %v1886_v59  ;;  %v9783_v17 = vpack.c.b16 %v1983_v20, %v1621_v16  ;;  %v9785_v60 = vpack.c.b16 %v1983_v20, %v1983_v20 }
 0x1ba   : > { %7815 = vmatmul.msk.bf16.gmra.mxu2 %vm351_vm8, %v1779_v0  ;;  %7830 = vmatmul.msk.bf16.gmra.mxu3 %vm351_vm8, %v1887_v1  ;;  %v9806_v1 = vor.u32 %v2607_v36, %v2606_v11 }
 0x1bb   : > { %v2045_v18 = vshrl.u32 %v9783_v17, 16  ;;  %v2048_v55 = vshll.u32 %v9783_v17, 16  ;;  %v2485_v30 = vrot.slane %v9783_v17, 1  ;;  %v2253_v20 = vshll.u32 %v9785_v60, 16 }
 0x1bd   : > { %v2047_v16 = vrot.slane %v2045_v18, 3  ;;  %v2050_v42 = vrot.slane %v2048_v55, 4  ;;  %v2371_v61 = vrot.slane %v2048_v55, 1  ;;  %v9802_v46 = vsel %vm1227_vm6, %v12632_v51, %v2485_v30 }
 0x1be   : > { %v9804_v29 = vrot.slane %v2253_v20, 1  ;;  %v2602_v32 = vrot.slane %v2045_v18, 1  ;;  %v2603_v0 = vrot.slane %v2048_v55, 2 }
 0x1bf   : > { %v2051_v4 = vor.u32 %v2050_v42, %v2047_v16  ;;  %v9809_v22 = vsel %vm1010_vm5, %v2370_v10, %v2371_v61  ;;  %v9811_v6 = vor.u32 %v2371_v61, %v2045_v18 }
 0x1c0   : > { %v9815_v34 = vsel %vm1010_vm5, %v2252_v38, %v9804_v29  ;;  %v2604_v13 = vor.u32 %v2603_v0, %v2602_v32 }
 0x1c1   : > { %v2052_v51 = vsel %vm670_vm4, %v9749_v2, %v2051_v4 }
 0x1c2   : > { %7845 = vmatmul.msk.bf16.gmra.mxu0 %vm351_vm8, %v2052_v51  ;;  %v9821_v55 = vsel %vm1323_vm7, %v2600_v8, %v2604_v13  ;;  %v9825_v11 = vsel %vm1323_vm7, %v2604_v13, %v9806_v1 }
 0x1c5   : > { %7801 = vmatmul.msk.bf16.gmra.mxu1 %vm351_vm8, %v1640_v44 }
 0x1ca   : > { %7816 = vmatmul.msk.bf16.gmra.mxu2 %vm351_vm8, %v1778_v63  ;;  %7831 = vmatmul.msk.bf16.gmra.mxu3 %vm351_vm8, %v1886_v59 }
 0x1d2   : > { %7846 = vmatmul.msk.bf16.gmra.mxu0 %vm351_vm8, %v2051_v4 }
 0x1d5   : > { %7855 = vmatmul.msk.bf16.vlgmr.msrb.gmra.mxu1 %vm351_vm8, %v9431_v25 }
 0x1da   : > { %7870 = vmatmul.msk.bf16.vlgmr.msra.gmra.mxu2 %vm351_vm8, %v9505_v62  ;;  %7885 = vmatmul.msk.bf16.vlgmr.msra.gmra.mxu3 %vm351_vm8, %v9542_v23  ;;  %v8518_v23 = vld [vmem:[#allocation4 + $0x80] sm:$0xff] }
 0x1db   : > { %2650 = vmatpush.bf16.msra.mxu1 %v8518_v23 }
 0x1e2   : > { %7900 = vmatmul.msk.bf16.vlgmr.msra.gmra.mxu0 %vm351_vm8, %v9534_v48  ;;  %v1684_v2 = vpop.f32.mrf.mxu1 }
 0x1e5   : > { %7856 = vmatmul.msk.bf16.gmra.mxu1 %vm351_vm8, %v9481_v9 }
 0x1ea   : > { %7871 = vmatmul.msk.bf16.gmra.mxu2 %vm351_vm8, %v9582_v24  ;;  %7886 = vmatmul.msk.bf16.gmra.mxu3 %vm351_vm8, %v9618_v15  ;;  %v1686_v25 = vpop.f32.mrf.mxu1 }
 0x1ed   : > { %v1822_v59 = vpop.f32.mrf.mxu2  ;;  %v1930_v10 = vpop.f32.mrf.mxu3 }
 0x1ee   : > { %v1823_v62 = vadd.f32 %v1822_v59, %v1684_v2  ;;  %v2095_v8 = vpop.f32.mrf.mxu0 }
 0x1f0   : > { %v1964_v44 = vadd.f32 %v1930_v10, %v1823_v62 }
 0x1f2   : > { %v9845_v63 = vadd.f32 %v2095_v8, %v1964_v44  ;;  %7901 = vmatmul.msk.bf16.gmra.mxu0 %vm351_vm8, %v9610_v14  ;;  %v1689_v48 = vpop.f32.mrf.mxu1 }
 0x1f5   : > { %v1824_v9 = vpop.f32.mrf.mxu2  ;;  %v1932_v4 = vpop.f32.mrf.mxu3  ;;  %7857 = vmatmul.msk.bf16.gmra.mxu1 %vm351_vm8, %v9546_v49 }
 0x1f6   : > { %v1825_v24 = vadd.f32 %v1824_v9, %v1686_v25  ;;  %v2097_v15 = vpop.f32.mrf.mxu0 }
 0x1f8   : > { %v1965_v38 = vadd.f32 %v1932_v4, %v1825_v24 }
 0x1fa   : > { %v9851_v36 = vadd.f32 %v2097_v15, %v1965_v38  ;;  %7872 = vmatmul.msk.bf16.gmra.mxu2 %vm351_vm8, %v9656_v40  ;;  %7887 = vmatmul.msk.bf16.gmra.mxu3 %vm351_vm8, %v9688_v54  ;;  %v1691_v18 = vpop.f32.mrf.mxu1 }
 0x1fd   : > { %v1827_v14 = vpop.f32.mrf.mxu2  ;;  %v1935_v20 = vpop.f32.mrf.mxu3 }
 0x1fe   : > { %v1828_v16 = vadd.f32 %v1827_v14, %v1689_v48 }
 0x1ff   : > { %v2100_v42 = vpop.f32.mrf.mxu0 }
 0x200   : > { %v1966_v61 = vadd.f32 %v1935_v20, %v1828_v16 }
 0x202   : > { %v9857_v32 = vadd.f32 %v2100_v42, %v1966_v61  ;;  %7902 = vmatmul.msk.bf16.gmra.mxu0 %vm351_vm8, %v9681_v27  ;;  %v1694_v49 = vpop.f32.mrf.mxu1 }
 0x205   : > { %v1829_v0 = vpop.f32.mrf.mxu2  ;;  %v1937_v13 = vpop.f32.mrf.mxu3  ;;  %7858 = vmatmul.msk.bf16.gmra.mxu1 %vm351_vm8, %v9622_v35 }
 0x206   : > { %v1830_v40 = vadd.f32 %v1829_v0, %v1691_v18 }
 0x207   : > { %v2102_v51 = vpop.f32.mrf.mxu0 }
 0x208   : > { %v1967_v54 = vadd.f32 %v1937_v13, %v1830_v40 }
 0x20a   : > { %v9863_v2 = vadd.f32 %v2102_v51, %v1967_v54  ;;  %7873 = vmatmul.msk.bf16.gmra.mxu2 %vm351_vm8, %v9721_v12  ;;  %7888 = vmatmul.msk.bf16.gmra.mxu3 %vm351_vm8, %v9753_v58  ;;  %v9869_v25 = vpop.f32.mrf.mxu1 }
 0x20d   : > { %v1832_v27 = vpop.f32.mrf.mxu2  ;;  %v1940_v59 = vpop.f32.mrf.mxu3 }
 0x20e   : > { %v1833_v10 = vadd.f32 %v1832_v27, %v1694_v49  ;;  %v2487_v49 = vrot.slane %v9760_v53, 1  ;;  %v2257_v27 = vshrl.u32 %v9785_v60, 16 }
 0x20f   : > { %v2105_v62 = vpop.f32.mrf.mxu0 }
 0x210   : > { %v1968_v8 = vadd.f32 %v1940_v59, %v1833_v10  ;;  %v2488_v40 = vsel %vm1227_vm6, %v2485_v30, %v2487_v49  ;;  %v12634_v59 = vshrl.u32 %v9760_v53, 16  ;;  %v2259_v30 = vor.u32 %v2257_v27, %v9804_v29  ;;  %v8523_v27 = vld [vmem:[#allocation4 + $0xa8] sm:$0xff] }
 0x211   : > { %2903 = vmatpush.bf16.msrb.mxu2 %v8523_v27 }
 0x212   : > { %v9871_v44 = vadd.f32 %v2105_v62, %v1968_v8  ;;  %7903 = vmatmul.msk.bf16.gmra.mxu0 %vm351_vm8, %v9747_v5  ;;  %v1699_v35 = vpop.f32.mrf.mxu1 }
 0x215   : > { %v9875_v23 = vpop.f32.mrf.mxu2  ;;  %v9877_v48 = vpop.f32.mrf.mxu3  ;;  %7859 = vmatmul.msk.bf16.gmra.mxu1 %vm351_vm8, %v9692_v37 }
 0x217   : > { %v9881_v12 = vpop.f32.mrf.mxu0 }
 0x21a   : > { %7874 = vmatmul.msk.bf16.gmra.mxu2 %vm351_vm8, %v9777_v39  ;;  %7889 = vmatmul.msk.bf16.gmra.mxu3 %vm351_vm8, %v9809_v22  ;;  %v9887_v58 = vpop.f32.mrf.mxu1  ;;  %v12633_v22 = vshll.u32 %v9760_v53, 16 }
 0x21c   : > { %v2377_v39 = vrot.slane %v12633_v22, 1 }
 0x21d   : > { %v1837_v9 = vpop.f32.mrf.mxu2  ;;  %v1945_v5 = vpop.f32.mrf.mxu3 }
 0x21e   : > { %v1838_v4 = vadd.f32 %v1837_v9, %v1699_v35  ;;  %v2378_v16 = vsel %vm1010_vm5, %v9811_v6, %v2377_v39  ;;  %v2381_v10 = vor.u32 %v12634_v59, %v2377_v39 }
 0x21f   : > { %v2110_v24 = vpop.f32.mrf.mxu0 }
 0x220   : > { %v1970_v15 = vadd.f32 %v1945_v5, %v1838_v4 }
 0x222   : > { %v9889_v38 = vadd.f32 %v2110_v24, %v1970_v15  ;;  %7904 = vmatmul.msk.bf16.gmra.mxu0 %vm351_vm8, %v9802_v46  ;;  %v1704_v37 = vpop.f32.mrf.mxu1 }
 0x225   : > { %v9893_v18 = vpop.f32.mrf.mxu2  ;;  %v9895_v14 = vpop.f32.mrf.mxu3  ;;  %7860 = vmatmul.msk.bf16.gmra.mxu1 %vm351_vm8, %v9755_v50 }
 0x227   : > { %v9901_v20 = vpop.f32.mrf.mxu0 }
 0x22a   : > { %7875 = vmatmul.msk.bf16.gmra.mxu2 %vm351_vm8, %v9815_v34  ;;  %7890 = vmatmul.msk.bf16.gmra.mxu3 %vm351_vm8, %v2378_v16  ;;  %v9908_v46 = vpop.f32.mrf.mxu1 }
 0x22d   : > { %v1842_v42 = vpop.f32.mrf.mxu2  ;;  %v1950_v61 = vpop.f32.mrf.mxu3 }
 0x22e   : > { %v1843_v50 = vadd.f32 %v1842_v42, %v1704_v37 }
 0x22f   : > { %v2115_v0 = vpop.f32.mrf.mxu0 }
 0x230   : > { %v1972_v13 = vadd.f32 %v1950_v61, %v1843_v50 }
 0x232   : > { %v9914_v51 = vadd.f32 %v2115_v0, %v1972_v13  ;;  %7905 = vmatmul.msk.bf16.gmra.mxu0 %vm351_vm8, %v2488_v40  ;;  %v1709_v34 = vpop.f32.mrf.mxu1 }
 0x235   : > { %v9917_v6 = vpop.f32.mrf.mxu2  ;;  %v9919_v54 = vpop.f32.mrf.mxu3  ;;  %7861 = vmatmul.msk.bf16.gmra.mxu1 %vm351_vm8, %v9785_v60 }
 0x237   : > { %v9926_v17 = vpop.f32.mrf.mxu0 }
 0x23a   : > { %7876 = vmatmul.msk.bf16.gmra.mxu2 %vm351_vm8, %v2259_v30  ;;  %v9930_v62 = vpop.f32.mrf.mxu1  ;;  %7891 = vmatmul.msk.bf16.gmra.mxu3 %vm351_vm8, %v2381_v10 }
 0x23d   : > { %v1847_v8 = vpop.f32.mrf.mxu2  ;;  %v1955_v35 = vpop.f32.mrf.mxu3 }
 0x23e   : > { %v1848_v9 = vadd.f32 %v1847_v8, %v1709_v34 }
 0x23f   : > { %v2120_v5 = vpop.f32.mrf.mxu0 }
 0x240   : > { %v1974_v4 = vadd.f32 %v1955_v35, %v1848_v9 }
 0x242   : > { %v9933_v24 = vadd.f32 %v2120_v5, %v1974_v4  ;;  %v1714_v60 = vpop.f32.mrf.mxu1  ;;  %7906 = vmatmul.msk.bf16.gmra.mxu0 %vm351_vm8, %v2487_v49 }
 0x245   : > { %v9936_v53 = vpop.f32.mrf.mxu2  ;;  %v9938_v15 = vpop.f32.mrf.mxu3  ;;  %7915 = vmatmul.msk.bf16.vlgmr.msra.gmra.mxu1 %vm351_vm8, %v9564_v19 }
 0x246   : > { %12635 = vst [vmem:[#allocation13_spill] sm:$0xff] %v9938_v15 }
 0x247   : > { %v9942_v29 = vpop.f32.mrf.mxu0 }
 0x248   : > { %12636 = vst [vmem:[#allocation14_spill] sm:$0xff] %v9942_v29 }
 0x24a   : > { %v1716_v37 = vpop.f32.mrf.mxu1 }
 0x24d   : > { %v1852_v22 = vpop.f32.mrf.mxu2  ;;  %v1960_v39 = vpop.f32.mrf.mxu3 }
 0x24e   : > { %v1853_v16 = vadd.f32 %v1852_v22, %v1714_v60 }
 0x24f   : > { %v2125_v42 = vpop.f32.mrf.mxu0 }
 0x250   : > { %v1976_v61 = vadd.f32 %v1960_v39, %v1853_v16 }
 0x252   : > { %v9944_v50 = vadd.f32 %v2125_v42, %v1976_v61  ;;  %v2184_v0 = vpop.f32.mrf.mxu1 }
 0x253   : > { %v2218_v49 = vadd.f32 %v2184_v0, %v9845_v63 }
 0x255   : > { %v1854_v13 = vpop.f32.mrf.mxu2  ;;  %v1962_v40 = vpop.f32.mrf.mxu3  ;;  %7916 = vmatmul.msk.bf16.gmra.mxu1 %vm351_vm8, %v9640_v28 }
 0x257   : > { %v2127_v34 = vpop.f32.mrf.mxu0 }
 0x25a   : > { %v2186_v19 = vpop.f32.mrf.mxu1 }
 0x25b   : > { %v9950_v59 = vadd.f32 %v2186_v19, %v9851_v36 }
 0x25d   : > { %v2302_v10 = vpop.f32.mrf.mxu2  ;;  %v2424_v30 = vpop.f32.mrf.mxu3 }
 0x25e   : > { %v2336_v8 = vadd.f32 %v2302_v10, %v2218_v49 }
 0x25f   : > { %v2531_v35 = vpop.f32.mrf.mxu0 }
 0x260   : > { %v2458_v9 = vadd.f32 %v2424_v30, %v2336_v8 }
 0x262   : > { %v9952_v5 = vadd.f32 %v2531_v35, %v2458_v9  ;;  %v2189_v63 = vpop.f32.mrf.mxu1 }
 0x263   : > { %v2220_v4 = vadd.f32 %v2189_v63, %v9857_v32 }
 0x265   : > { %v9955_v60 = vpop.f32.mrf.mxu2  ;;  %v9957_v28 = vpop.f32.mrf.mxu3  ;;  %7917 = vmatmul.msk.bf16.gmra.mxu1 %vm351_vm8, %v9716_v26 }
 0x267   : > { %v9961_v36 = vpop.f32.mrf.mxu0 }
 0x26a   : > { %v2191_v37 = vpop.f32.mrf.mxu1 }
 0x26b   : > { %v9964_v22 = vadd.f32 %v2191_v37, %v9863_v2 }
 0x26d   : > { %v2307_v39 = vpop.f32.mrf.mxu2  ;;  %v2429_v16 = vpop.f32.mrf.mxu3 }
 0x26e   : > { %v2338_v42 = vadd.f32 %v2307_v39, %v2220_v4 }
 0x26f   : > { %v2536_v61 = vpop.f32.mrf.mxu0 }
 0x270   : > { %v2460_v0 = vadd.f32 %v2429_v16, %v2338_v42 }
 0x272   : > { %v9966_v49 = vadd.f32 %v2536_v61, %v2460_v0  ;;  %v2194_v32 = vpop.f32.mrf.mxu1 }
 0x273   : > { %v2222_v13 = vadd.f32 %v2194_v32, %v9871_v44 }
 0x275   : > { %v9969_v40 = vpop.f32.mrf.mxu2  ;;  %v9971_v34 = vpop.f32.mrf.mxu3  ;;  %7918 = vmatmul.msk.bf16.gmra.mxu1 %vm351_vm8, %v9767_v3 }
 0x277   : > { %v9975_v26 = vpop.f32.mrf.mxu0 }
 0x27a   : > { %v9977_v2 = vpop.f32.mrf.mxu1 }
 0x27d   : > { %v2312_v19 = vpop.f32.mrf.mxu2  ;;  %v2434_v27 = vpop.f32.mrf.mxu3 }
 0x27e   : > { %v2340_v10 = vadd.f32 %v2312_v19, %v2222_v13 }
 0x27f   : > { %v2541_v30 = vpop.f32.mrf.mxu0 }
 0x280   : > { %v2462_v8 = vadd.f32 %v2434_v27, %v2340_v10 }
 0x282   : > { %v9979_v35 = vadd.f32 %v2541_v30, %v2462_v8  ;;  %v2199_v9 = vpop.f32.mrf.mxu1 }
 0x283   : > { %v2224_v44 = vadd.f32 %v2199_v9, %v9889_v38  ;;  %v8522_v38 = vld [vmem:[#allocation4 + $0xa0] sm:$0xff] }
 0x284   : > { %2904 = vmatpush.bf16.msrb.mxu2 %v8522_v38 }
 0x285   : > { %v9982_v63 = vpop.f32.mrf.mxu2  ;;  %v9984_v4 = vpop.f32.mrf.mxu3  ;;  %7919 = vmatmul.msk.bf16.gmra.mxu1 %vm351_vm8, %v9821_v55 }
 0x287   : > { %v9988_v3 = vpop.f32.mrf.mxu0 }
 0x28a   : > { %v9990_v37 = vpop.f32.mrf.mxu1 }
 0x28d   : > { %v2317_v39 = vpop.f32.mrf.mxu2  ;;  %v2439_v16 = vpop.f32.mrf.mxu3 }
 0x28e   : > { %v2342_v42 = vadd.f32 %v2317_v39, %v2224_v44 }
 0x28f   : > { %v2546_v61 = vpop.f32.mrf.mxu0 }
 0x290   : > { %v2464_v0 = vadd.f32 %v2439_v16, %v2342_v42 }
 0x292   : > { %v9992_v32 = vadd.f32 %v2546_v61, %v2464_v0  ;;  %v2204_v13 = vpop.f32.mrf.mxu1 }
 0x293   : > { %v2226_v19 = vadd.f32 %v2204_v13, %v9914_v51 }
 0x295   : > { %v9995_v27 = vpop.f32.mrf.mxu2  ;;  %v9997_v10 = vpop.f32.mrf.mxu3  ;;  %7920 = vmatmul.msk.bf16.gmra.mxu1 %vm351_vm8, %v9825_v11 }
 0x297   : > { %v10001_v55 = vpop.f32.mrf.mxu0 }
 0x29a   : > { %v10003_v30 = vpop.f32.mrf.mxu1 }
 0x29d   : > { %v2322_v8 = vpop.f32.mrf.mxu2  ;;  %v2444_v9 = vpop.f32.mrf.mxu3 }
 0x29e   : > { %v2344_v44 = vadd.f32 %v2322_v8, %v2226_v19 }
 0x29f   : > { %v2551_v39 = vpop.f32.mrf.mxu0 }
 0x2a0   : > { %v2466_v16 = vadd.f32 %v2444_v9, %v2344_v44 }
 0x2a2   : > { %v10005_v42 = vadd.f32 %v2551_v39, %v2466_v16  ;;  %v2209_v51 = vpop.f32.mrf.mxu1 }
 0x2a3   : > { %v2228_v61 = vadd.f32 %v2209_v51, %v9933_v24 }
 0x2a5   : > { %v10008_v0 = vpop.f32.mrf.mxu2  ;;  %v10010_v13 = vpop.f32.mrf.mxu3  ;;  %7921 = vmatmul.msk.bf16.gmra.mxu1 %vm351_vm8, %v9806_v1 }
 0x2a6   : > { %12637 = vst [vmem:[#allocation15_spill] sm:$0xff] %v10010_v13 }
 0x2a7   : > { %v10014_v11 = vpop.f32.mrf.mxu0 }
 0x2a8   : > { %12638 = vst [vmem:[#allocation16_spill] sm:$0xff] %v10014_v11 }
 0x2aa   : > { %v10016_v38 = vpop.f32.mrf.mxu1 }
 0x2ab   : > { %12639 = vst [vmem:[#allocation17_spill] sm:$0xff] %v10016_v38 }
 0x2ad   : > { %v2327_v33 = vpop.f32.mrf.mxu2  ;;  %v2449_v19 = vpop.f32.mrf.mxu3 }
 0x2ae   : > { %v2346_v8 = vadd.f32 %v2327_v33, %v2228_v61  ;;  %v2337_v33 = vadd.f32 %v9955_v60, %v9950_v59  ;;  %v10032_v61 = vld [vmem:[%s12596_s5] ss:$0 sm:$0xff]  ;;  %v8521_v60 = vld [vmem:[#allocation4 + $0x98] sm:$0xff] }
 0x2af   : > { %v2556_v9 = vpop.f32.mrf.mxu0  ;;  %3041 = vmatpush.bf16.msrb.mxu3 %v8521_v60  ;;  %v2771_v60 = vld [vmem:[#allocation3 + $0x8] sm:$0xff] }
 0x2b0   : > { %v2468_v44 = vadd.f32 %v2449_v19, %v2346_v8 }
 0x2b2   : > { %v10018_v39 = vadd.f32 %v2556_v9, %v2468_v44  ;;  %v2214_v16 = vpop.f32.mrf.mxu1  ;;  %v10040_v9 = vld [vmem:[%s12597_s6] ss:$0 sm:$0xff] }
 0x2b3   : > { %v2230_v24 = vadd.f32 %v2214_v16, %v9944_v50 }
 0x2b5   : > { %v10021_v51 = vpop.f32.mrf.mxu2  ;;  %v10023_v43 = vpop.f32.mrf.mxu3 }
 0x2b7   : > { %v10025_v45 = vpop.f32.mrf.mxu0 }
 0x2ba   : > { %v2216_v1 = vpop.f32.mrf.mxu1 }
 0x2bd   : > { %v2332_v29 = vpop.f32.mrf.mxu2  ;;  %v2454_v11 = vpop.f32.mrf.mxu3 }
 0x2be   : > { %v2348_v38 = vadd.f32 %v2332_v29, %v2230_v24  ;;  %v2459_v29 = vadd.f32 %v9957_v28, %v2337_v33  ;;  %v8524_v28 = vld [vmem:[#allocation4 + $0xb0] sm:$0xff] }
 0x2bf   : > { %v2561_v15 = vpop.f32.mrf.mxu0 }
 0x2c0   : > { %v2470_v13 = vadd.f32 %v2454_v11, %v2348_v38  ;;  %v2566_v16 = vadd.f32 %v9961_v36, %v2459_v29  ;;  %v8527_v36 = vld [vmem:[#allocation4 + $0xc8] sm:$0xff] }
 0x2c1   : > { %3314 = vmatpush.bf16.msrb.mxu1 %v8527_v36 }
 0x2c2   : > { %v10034_v50 = vadd.f32 %v2561_v15, %v2470_v13  ;;  %v2652_v19 = vpop.f32.mrf.mxu1  ;;  %v8525_v15 = vld [vmem:[#allocation4 + $0xb8] sm:$0xff] }
 0x2c3   : > { %v2686_v8 = vadd.f32 %v2652_v19, %v9952_v5  ;;  %3149 = vmatpush.bf16.msrb.mxu0 %v8525_v15 }
 0x2c4   : > { %12640 = vst [vmem:[#allocation18_spill] sm:$0xff] %v10034_v50  ;;  %v8520_v50 = vld [vmem:[#allocation4 + $0x90] sm:$0xff] }
 0x2c5   : > { %v2702_v11 = vmul.f32 %v10032_v61, %v2686_v8  ;;  %v2334_v59 = vpop.f32.mrf.mxu2  ;;  %v2456_v38 = vpop.f32.mrf.mxu3  ;;  %v2770_v8 = vld [vmem:[#allocation3] sm:$0xff]  ;;  %3042 = vmatpush.bf16.msrb.mxu3 %v8520_v50 }
 0x2c6   : > { %v8529_v59 = vld [vmem:[#allocation4 + $0xd8] sm:$0xff]  ;;  %v2786_v29 = vpack.c.bf16 %v2770_v8, %v2770_v8  ;;  %v2339_v38 = vadd.f32 %v9969_v40, %v9964_v22 }
 0x2c7   : > { %v2718_v44 = vadd.f32 %v10040_v9, %v2702_v11  ;;  %v2563_v13 = vpop.f32.mrf.mxu0  ;;  %3150 = vmatpush.bf16.msrb.mxu0 %v8524_v28  ;;  %3403 = vmatpush.bf16.msra.mxu2 %v8529_v59 }
 0x2c8   : > { %v2787_v13 = vpack.c.bf16 %v2771_v60, %v2771_v60 }
 0x2c9   : > { %v2731_v5 = vmax.f32 %v2718_v44, 0.0 }
 0x2ca   : > { %v2654_v24 = vpop.f32.mrf.mxu1  ;;  %v2831_v22 = vunpack.c.l.b16 %v2787_v13 }
 0x2cb   : > { %v2744_v1 = vmul.f32 %v2731_v5, %v9407_v47  ;;  %v2687_v19 = vadd.f32 %v2654_v24, %v2566_v16  ;;  %v1835_v16 = vadd.f32 %v9875_v23, %v9869_v25  ;;  %v8526_v24 = vld [vmem:[#allocation4 + $0xc0] sm:$0xff] }
 0x2cc   : > { %3315 = vmatpush.bf16.msrb.mxu1 %v8526_v24 }
 0x2cd   : > { %2757 = vst.msk [vmem:[#allocation3 + $0x10] sm:$0xff] %vm351_vm8, %v2744_v1  ;;  %v2703_v33 = vmul.f32 %v10032_v61, %v2687_v19  ;;  %v2830_v1 = vunpack.c.l.b16 %v2786_v29  ;;  %v2461_v19 = vadd.f32 %v9971_v34, %v2339_v38  ;;  %v1969_v40 = vadd.f32 %v9877_v48, %v1835_v16 }
 0x2cf   : > { %v2719_v11 = vadd.f32 %v10040_v9, %v2703_v33  ;;  %v2844_v25 = vpack.c.b16 %v2831_v22, %v2830_v1  ;;  %v2568_v23 = vadd.f32 %v9975_v26, %v2461_v19  ;;  %v2134_v60 = vadd.f32 %v9881_v12, %v1969_v40 }
 0x2d1   : > { %v2732_v44 = vmax.f32 %v2719_v11, 0.0  ;;  %v2941_v38 = vshrl.u32 %v2844_v25, 16 }
 0x2d2   : > { %v2657_v15 = vpop.f32.mrf.mxu1 }
 0x2d3   : > { %v2745_v5 = vmul.f32 %v2732_v44, %v9413_v56  ;;  %v2688_v50 = vadd.f32 %v2657_v15, %v9966_v49  ;;  %v2944_v44 = vshll.u32 %v2844_v25, 16  ;;  %v2223_v15 = vadd.f32 %v9977_v2, %v2134_v60 }
 0x2d4   : > { %v2772_v8 = vld [vmem:[#allocation3 + $0x10] sm:$0xff]  ;;  %v2943_v12 = vrot.slane %v2941_v38, 2  ;;  %v3083_v1 = vrot.slane %v2941_v38, 3  ;;  %v1840_v2 = vadd.f32 %v9893_v18, %v9887_v58 }
 0x2d5   : > { %2758 = vst.msk [vmem:[#allocation3 + $0x18] sm:$0xff] %vm351_vm8, %v2745_v5  ;;  %v2704_v28 = vmul.f32 %v10032_v61, %v2688_v50  ;;  %v2788_v11 = vpack.c.bf16 %v2772_v8, %v2772_v8  ;;  %v2341_v26 = vadd.f32 %v9982_v63, %v2223_v15  ;;  %v2946_v24 = vrot.slane %v2944_v44, 3 }
 0x2d6   : > { %v3084_v19 = vrot.slane %v2944_v44, 4 }
 0x2d7   : > { %v2720_v33 = vadd.f32 %v10040_v9, %v2704_v28  ;;  %v2832_v16 = vunpack.c.l.b16 %v2788_v11  ;;  %v2463_v60 = vadd.f32 %v9984_v4, %v2341_v26 }
 0x2d9   : > { %v2733_v59 = vmax.f32 %v2720_v33, 0.0  ;;  %v2851_v33 = vrot.slane %v2844_v25, 3 }
 0x2da   : > { %v2659_v49 = vpop.f32.mrf.mxu1 }
 0x2db   : > { %v2746_v34 = vmul.f32 %v2733_v59, %v9423_v7  ;;  %v2689_v36 = vadd.f32 %v2659_v49, %v2568_v23  ;;  %v3206_v23 = vpack.c.b16 %v2832_v16, %v2831_v22 }
 0x2dc   : > { %v2773_v29 = vld [vmem:[#allocation3 + $0x18] sm:$0xff] }
 0x2dd   : > { %2759 = vst.msk [vmem:[#allocation3 + $0x20] sm:$0xff] %vm351_vm8, %v2746_v34  ;;  %v2705_v48 = vmul.f32 %v10032_v61, %v2689_v36  ;;  %v2789_v13 = vpack.c.bf16 %v2773_v29, %v2773_v29  ;;  %v2947_v34 = vor.u32 %v2946_v24, %v2943_v12  ;;  %v3085_v29 = vor.u32 %v3084_v19, %v3083_v1 }
 0x2de   : > { %v3217_v26 = vshll.u32 %v3206_v23, 16  ;;  %v2570_v19 = vadd.f32 %v9988_v3, %v2463_v60 }
 0x2df   : > { %v2721_v5 = vadd.f32 %v10040_v9, %v2705_v48  ;;  %v2833_v50 = vunpack.c.l.b16 %v2789_v13  ;;  %v1971_v48 = vadd.f32 %v9895_v14, %v1840_v2 }
 0x2e1   : > { %v2734_v28 = vmax.f32 %v2721_v5, 0.0  ;;  %v10069_v40 = vpack.c.b16 %v2833_v50, %v2832_v16  ;;  %v3214_v16 = vshrl.u32 %v3206_v23, 16  ;;  %v2136_v23 = vadd.f32 %v9901_v20, %v1971_v48 }
 0x2e2   : > { %v2662_v8 = vpop.f32.mrf.mxu1 }
 0x2e3   : > { %v2747_v59 = vmul.f32 %v2734_v28, %v9436_v57  ;;  %v2690_v63 = vadd.f32 %v2662_v8, %v9979_v35  ;;  %v2852_v49 = vrot.slane %v10069_v40, 3  ;;  %v2949_v11 = vshrl.u32 %v10069_v40, 16 }
 0x2e4   : > { %v2952_v36 = vshll.u32 %v10069_v40, 16  ;;  %v2774_v25 = vld [vmem:[#allocation3 + $0x20] sm:$0xff]  ;;  %v3216_v3 = vrot.slane %v3214_v16, 3 }
 0x2e5   : > { %2760 = vst.msk [vmem:[#allocation3 + $0x28] sm:$0xff] %vm351_vm8, %v2747_v59  ;;  %v2706_v58 = vmul.f32 %v10032_v61, %v2690_v63  ;;  %v2853_v18 = vsel %vm455_vm1, %v2851_v33, %v2852_v49  ;;  %v2951_v35 = vrot.slane %v2949_v11, 2  ;;  %v3086_v22 = vrot.slane %v2949_v11, 3 }
 0x2e6   : > { %7932 = vmatmul.msk.bf16.vlgmr.msrb.gmra.mxu2 %vm351_vm8, %v2853_v18  ;;  %v2954_v38 = vrot.slane %v2952_v36, 3  ;;  %v3087_v44 = vrot.slane %v2952_v36, 4  ;;  %v2790_v4 = vpack.c.bf16 %v2774_v25, %v2774_v25  ;;  %v3458_v15 = vrot.slane %v2952_v36, 1 }
 0x2e7   : > { %v2722_v13 = vadd.f32 %v10040_v9, %v2706_v58 }
 0x2e8   : > { %v10087_v5 = vor.u32 %v2954_v38, %v2951_v35  ;;  %v10089_v12 = vor.u32 %v3087_v44, %v3086_v22  ;;  %v2834_v24 = vunpack.c.l.b16 %v2790_v4  ;;  %v3459_v1 = vor.u32 %v3458_v15, %v2949_v11 }
 0x2e9   : > { %v2735_v28 = vmax.f32 %v2722_v13, 0.0  ;;  %v3219_v11 = vrot.slane %v3217_v26, 4 }
 0x2ea   : > { %v2664_v33 = vpop.f32.mrf.mxu1  ;;  %v2956_v8 = vsel %vm538_vm3, %v2947_v34, %v10087_v5  ;;  %v3089_v14 = vsel %vm670_vm4, %v3085_v29, %v10089_v12  ;;  %v10096_v2 = vpack.c.b16 %v2834_v24, %v2833_v50  ;;  %v2225_v29 = vadd.f32 %v9990_v37, %v2136_v23 }
 0x2eb   : > { %v2748_v59 = vmul.f32 %v2735_v28, %v9449_v21  ;;  %v2691_v63 = vadd.f32 %v2664_v33, %v2570_v19  ;;  %7947 = vmatmul.msk.bf16.vlgmr.msrb.gmra.mxu3 %vm351_vm8, %v2956_v8  ;;  %7962 = vmatmul.msk.bf16.vlgmr.msrb.gmra.mxu0 %vm351_vm8, %v3089_v14  ;;  %v3220_v15 = vor.u32 %v3219_v11, %v3216_v3 }
 0x2ec   : > { %v3222_v60 = vshrl.u32 %v10096_v2, 16  ;;  %v3225_v34 = vshll.u32 %v10096_v2, 16  ;;  %v2775_v36 = vld [vmem:[#allocation3 + $0x28] sm:$0xff]  ;;  %v2343_v4 = vadd.f32 %v9995_v27, %v2225_v29  ;;  %v1845_v19 = vadd.f32 %v9917_v6, %v9908_v46 }
 0x2ed   : > { %2761 = vst.msk [vmem:[#allocation3 + $0x30] sm:$0xff] %vm351_vm8, %v2748_v59  ;;  %v2707_v20 = vmul.f32 %v10032_v61, %v2691_v63  ;;  %v2791_v50 = vpack.c.bf16 %v2775_v36, %v2775_v36 }
 0x2ee   : > { %v3224_v25 = vrot.slane %v3222_v60, 3  ;;  %v3227_v58 = vrot.slane %v3225_v34, 4  ;;  %v3579_v18 = vrot.slane %v3225_v34, 1  ;;  %v3805_v35 = vrot.slane %v3222_v60, 1 }
 0x2ef   : > { %v2723_v22 = vadd.f32 %v10040_v9, %v2707_v20  ;;  %v2835_v38 = vunpack.c.l.b16 %v2791_v50  ;;  %v3806_v44 = vrot.slane %v3225_v34, 2  ;;  %v2465_v23 = vadd.f32 %v9997_v10, %v2343_v4 }
 0x2f0   : > { %v10109_v48 = vor.u32 %v3227_v58, %v3224_v25  ;;  %v10111_v13 = vor.u32 %v3579_v18, %v3222_v60  ;;  %v1973_v36 = vadd.f32 %v9919_v54, %v1845_v19 }
 0x2f1   : > { %v2736_v37 = vmax.f32 %v2723_v22, 0.0  ;;  %v10113_v16 = vpack.c.b16 %v2835_v38, %v2834_v24  ;;  %v10115_v26 = vor.u32 %v3806_v44, %v3805_v35 }
 0x2f2   : > { %v2667_v28 = vpop.f32.mrf.mxu1  ;;  %v3229_v33 = vsel %vm670_vm4, %v3220_v15, %v10109_v48  ;;  %v2138_v15 = vadd.f32 %v9926_v17, %v1973_v36 }
 0x2f3   : > { %v2749_v8 = vmul.f32 %v2736_v37, %v9483_v52  ;;  %v2692_v27 = vadd.f32 %v2667_v28, %v9992_v32  ;;  %7977 = vmatmul.msk.bf16.vlgmr.msrb.gmra.mxu1 %vm351_vm8, %v3229_v33  ;;  %v2854_v14 = vrot.slane %v10113_v16, 3  ;;  %v2958_v24 = vshrl.u32 %v10113_v16, 16 }
 0x2f4   : > { %v2961_v59 = vshll.u32 %v10113_v16, 16  ;;  %v2776_v63 = vld [vmem:[#allocation3 + $0x30] sm:$0xff]  ;;  %v3698_v28 = vrot.slane %v10096_v2, 1 }
 0x2f5   : > { %2762 = vst.msk [vmem:[#allocation3 + $0x38] sm:$0xff] %vm351_vm8, %v2749_v8  ;;  %v2708_v46 = vmul.f32 %v10032_v61, %v2692_v27  ;;  %v2855_v6 = vsel %vm455_vm1, %v2852_v49, %v2854_v14  ;;  %v2960_v32 = vrot.slane %v2958_v24, 2  ;;  %v3090_v3 = vrot.slane %v2958_v24, 3 }
 0x2f6   : > { %7933 = vmatmul.msk.bf16.gmra.mxu2 %vm351_vm8, %v2855_v6  ;;  %v2963_v11 = vrot.slane %v2961_v59, 3  ;;  %v3091_v60 = vrot.slane %v2961_v59, 4  ;;  %v2792_v10 = vpack.c.bf16 %v2776_v63, %v2776_v63  ;;  %v3460_v34 = vrot.slane %v2961_v59, 1 }
 0x2f7   : > { %v2724_v29 = vadd.f32 %v10040_v9, %v2708_v46  ;;  %v2572_v49 = vadd.f32 %v10001_v55, %v2465_v23 }
 0x2f8   : > { %v10138_v20 = vor.u32 %v2963_v11, %v2960_v32  ;;  %v10140_v50 = vor.u32 %v3091_v60, %v3090_v3  ;;  %v2836_v25 = vunpack.c.l.b16 %v2792_v10  ;;  %v10143_v58 = vsel %vm1010_vm5, %v3459_v1, %v3460_v34 }
 0x2f9   : > { %v2737_v18 = vmax.f32 %v2724_v29, 0.0  ;;  %v10146_v35 = vor.u32 %v3460_v34, %v2958_v24  ;;  %v1850_v34 = vadd.f32 %v9936_v53, %v9930_v62 }
 0x2fa   : > { %v2669_v22 = vpop.f32.mrf.mxu1  ;;  %v2965_v54 = vsel %vm538_vm3, %v10087_v5, %v10138_v20  ;;  %v3093_v44 = vsel %vm670_vm4, %v10089_v12, %v10140_v50  ;;  %v10154_v4 = vpack.c.b16 %v2836_v25, %v2835_v38  ;;  %v2227_v38 = vadd.f32 %v10003_v30, %v2138_v15 }
 0x2fb   : > { %v2750_v1 = vmul.f32 %v2737_v18, %v9511_v41  ;;  %v2693_v37 = vadd.f32 %v2669_v22, %v2572_v49  ;;  %7948 = vmatmul.msk.bf16.gmra.mxu3 %vm351_vm8, %v2965_v54  ;;  %7963 = vmatmul.msk.bf16.gmra.mxu0 %vm351_vm8, %v3093_v44  ;;  %v12641_v18 = vld [vmem:[#allocation15_spill] sm:$0xff] }
 0x2fc   : > { %v3231_v55 = vshrl.u32 %v10154_v4, 16  ;;  %v3234_v19 = vshll.u32 %v10154_v4, 16  ;;  %v2777_v5 = vld [vmem:[#allocation3 + $0x38] sm:$0xff]  ;;  %v3699_v12 = vrot.slane %v10154_v4, 1  ;;  %v2345_v30 = vadd.f32 %v10008_v0, %v2227_v38 }
 0x2fd   : > { %2763 = vst.msk [vmem:[#allocation3 + $0x40] sm:$0xff] %vm351_vm8, %v2750_v1  ;;  %v2709_v17 = vmul.f32 %v10032_v61, %v2693_v37  ;;  %v2793_v33 = vpack.c.bf16 %v2777_v5, %v2777_v5  ;;  %v8528_v1 = vld [vmem:[#allocation4 + $0xd0] sm:$0xff] }
 0x2fe   : > { %v3233_v8 = vrot.slane %v3231_v55, 3  ;;  %v3236_v27 = vrot.slane %v3234_v19, 4  ;;  %v3581_v24 = vrot.slane %v3234_v19, 1  ;;  %v10170_v23 = vsel %vm1227_vm6, %v3698_v28, %v3699_v12  ;;  %v12642_v5 = vld [vmem:[#allocation13_spill] sm:$0xff]  ;;  %3404 = vmatpush.bf16.msra.mxu2 %v8528_v1 }
 0x2ff   : > { %v2725_v59 = vadd.f32 %v10040_v9, %v2709_v17  ;;  %v2837_v2 = vunpack.c.l.b16 %v2793_v33  ;;  %v3808_v63 = vrot.slane %v3231_v55, 1  ;;  %v3809_v46 = vrot.slane %v3234_v19, 2 }
 0x300   : > { %v10174_v6 = vor.u32 %v3236_v27, %v3233_v8  ;;  %v10178_v32 = vsel %vm1010_vm5, %v10111_v13, %v3581_v24  ;;  %v10180_v3 = vor.u32 %v3581_v24, %v3231_v55  ;;  %v2467_v22 = vadd.f32 %v12641_v18, %v2345_v30  ;;  %v12643_v27 = vld [vmem:[#allocation16_spill] sm:$0xff] }
 0x301   : > { %v2738_v11 = vmax.f32 %v2725_v59, 0.0  ;;  %v10182_v60 = vpack.c.b16 %v2837_v2, %v2836_v25  ;;  %v10184_v10 = vor.u32 %v3809_v46, %v3808_v63  ;;  %v1975_v28 = vadd.f32 %v12642_v5, %v1850_v34 }
 0x302   : > { %v2672_v36 = vpop.f32.mrf.mxu1  ;;  %v3238_v0 = vsel %vm670_vm4, %v10109_v48, %v10174_v6  ;;  %v2574_v24 = vadd.f32 %v12643_v27, %v2467_v22 }
 0x303   : > { %v2751_v29 = vmul.f32 %v2738_v11, %v9550_v31  ;;  %v2694_v13 = vadd.f32 %v2672_v36, %v10005_v42  ;;  %7978 = vmatmul.msk.bf16.gmra.mxu1 %vm351_vm8, %v3238_v0  ;;  %v2856_v49 = vrot.slane %v10182_v60, 3  ;;  %v2967_v25 = vshrl.u32 %v10182_v60, 16  ;;  %v12644_v36 = vld [vmem:[#allocation14_spill] sm:$0xff] }
 0x304   : > { %v2970_v54 = vshll.u32 %v10182_v60, 16  ;;  %v2778_v62 = vld [vmem:[#allocation3 + $0x40] sm:$0xff]  ;;  %v10201_v53 = vsel %vm1323_vm7, %v10115_v26, %v10184_v10  ;;  %v2140_v0 = vadd.f32 %v12644_v36, %v1975_v28 }
 0x305   : > { %2764 = vst.msk [vmem:[#allocation3 + $0x48] sm:$0xff] %vm351_vm8, %v2751_v29  ;;  %v2710_v42 = vmul.f32 %v10032_v61, %v2694_v13  ;;  %v2857_v48 = vsel %vm455_vm1, %v2854_v14, %v2856_v49  ;;  %v2969_v44 = vrot.slane %v2967_v25, 2  ;;  %v3094_v15 = vrot.slane %v2967_v25, 3  ;;  %v12645_v29 = vld [vmem:[#allocation8_spill] sm:$0xff] }
 0x306   : > { %7934 = vmatmul.msk.bf16.gmra.mxu2 %vm351_vm8, %v2857_v48  ;;  %v2972_v37 = vrot.slane %v2970_v54, 3  ;;  %v3095_v55 = vrot.slane %v2970_v54, 4  ;;  %v2794_v19 = vpack.c.bf16 %v2778_v62, %v2778_v62  ;;  %v3463_v26 = vrot.slane %v2970_v54, 1  ;;  %v12646_v54 = vld [vmem:[#allocation17_spill] sm:$0xff] }
 0x307   : > { %v2726_v38 = vadd.f32 %v10040_v9, %v2710_v42 }
 0x308   : > { %v10213_v17 = vor.u32 %v2972_v37, %v2969_v44  ;;  %v10215_v33 = vor.u32 %v3095_v55, %v3094_v15  ;;  %v2838_v8 = vunpack.c.l.b16 %v2794_v19  ;;  %v10219_v14 = vsel %vm1010_vm5, %v10146_v35, %v3463_v26 }
 0x309   : > { %v2739_v59 = vmax.f32 %v2726_v38, 0.0  ;;  %v3465_v63 = vor.u32 %v3463_v26, %v2967_v25 }
 0x30a   : > { %v2674_v46 = vpop.f32.mrf.mxu1  ;;  %v2974_v30 = vsel %vm538_vm3, %v10138_v20, %v10213_v17  ;;  %v3097_v11 = vsel %vm670_vm4, %v10140_v50, %v10215_v33  ;;  %v10228_v34 = vpack.c.b16 %v2838_v8, %v2837_v2  ;;  %v2229_v50 = vadd.f32 %v12646_v54, %v2140_v0 }
 0x30b   : > { %v2752_v35 = vmul.f32 %v2739_v59, %v12645_v29  ;;  %v2695_v13 = vadd.f32 %v2674_v46, %v2574_v24  ;;  %7949 = vmatmul.msk.bf16.gmra.mxu3 %vm351_vm8, %v2974_v30  ;;  %7964 = vmatmul.msk.bf16.gmra.mxu0 %vm351_vm8, %v3097_v11  ;;  %v12647_v46 = vld [vmem:[#allocation9_spill] sm:$0xff] }
 0x30c   : > { %v3240_v25 = vshrl.u32 %v10228_v34, 16  ;;  %v3243_v18 = vshll.u32 %v10228_v34, 16  ;;  %v2779_v20 = vld [vmem:[#allocation3 + $0x48] sm:$0xff]  ;;  %v3701_v22 = vrot.slane %v10228_v34, 1  ;;  %v2347_v26 = vadd.f32 %v10021_v51, %v2229_v50 }
 0x30d   : > { %2765 = vst.msk [vmem:[#allocation3 + $0x50] sm:$0xff] %vm351_vm8, %v2752_v35  ;;  %v2711_v2 = vmul.f32 %v10032_v61, %v2695_v13  ;;  %v2795_v62 = vpack.c.bf16 %v2779_v20, %v2779_v20 }
 0x30e   : > { %v3242_v42 = vrot.slane %v3240_v25, 3  ;;  %v3245_v48 = vrot.slane %v3243_v18, 4  ;;  %v3584_v44 = vrot.slane %v3243_v18, 1  ;;  %v10245_v15 = vsel %vm1227_vm6, %v3699_v12, %v3701_v22 }
 0x30f   : > { %v2727_v1 = vadd.f32 %v10040_v9, %v2711_v2  ;;  %v2839_v37 = vunpack.c.l.b16 %v2795_v62  ;;  %v3812_v55 = vrot.slane %v3240_v25, 1  ;;  %v3813_v19 = vrot.slane %v3243_v18, 2 }
 0x310   : > { %v10249_v5 = vor.u32 %v3245_v48, %v3242_v42  ;;  %v10253_v28 = vsel %vm1010_vm5, %v10180_v3, %v3584_v44  ;;  %v3586_v38 = vor.u32 %v3584_v44, %v3240_v25 }
 0x311   : > { %v2740_v27 = vmax.f32 %v2727_v1, 0.0  ;;  %v10255_v24 = vpack.c.b16 %v2839_v37, %v2838_v8  ;;  %v10257_v4 = vor.u32 %v3813_v19, %v3812_v55  ;;  %v2469_v8 = vadd.f32 %v10023_v43, %v2347_v26 }
 0x312   : > { %v2677_v12 = vpop.f32.mrf.mxu1  ;;  %v3247_v59 = vsel %vm670_vm4, %v10174_v6, %v10249_v5 }
 0x313   : > { %v2753_v30 = vmul.f32 %v2740_v27, %v12647_v46  ;;  %v2696_v51 = vadd.f32 %v2677_v12, %v10018_v39  ;;  %7979 = vmatmul.msk.bf16.gmra.mxu1 %vm351_vm8, %v3247_v59  ;;  %v2858_v3 = vrot.slane %v10255_v24, 3  ;;  %v2976_v11 = vshrl.u32 %v10255_v24, 16  ;;  %v12648_v27 = vld [vmem:[#allocation10_spill] sm:$0xff] }
 0x314   : > { %v2979_v36 = vshll.u32 %v10255_v24, 16  ;;  %v2780_v0 = vld [vmem:[#allocation3 + $0x50] sm:$0xff]  ;;  %v10272_v35 = vsel %vm1323_vm7, %v10184_v10, %v10257_v4 }
 0x315   : > { %2766 = vst.msk [vmem:[#allocation3 + $0x58] sm:$0xff] %vm351_vm8, %v2753_v30  ;;  %v2712_v39 = vmul.f32 %v10032_v61, %v2696_v51  ;;  %v2859_v6 = vsel %vm455_vm1, %v2856_v49, %v2858_v3  ;;  %v2978_v13 = vrot.slane %v2976_v11, 2  ;;  %v3098_v43 = vrot.slane %v2976_v11, 3 }
 0x316   : > { %7935 = vmatmul.msk.bf16.gmra.mxu2 %vm351_vm8, %v2859_v6  ;;  %v2981_v25 = vrot.slane %v2979_v36, 3  ;;  %v3099_v18 = vrot.slane %v2979_v36, 4  ;;  %v2796_v20 = vpack.c.bf16 %v2780_v0, %v2780_v0  ;;  %v3466_v54 = vrot.slane %v2979_v36, 1 }
 0x317   : > { %v2728_v10 = vadd.f32 %v10040_v9, %v2712_v39  ;;  %v2576_v49 = vadd.f32 %v10025_v45, %v2469_v8 }
 0x318   : > { %v10283_v50 = vor.u32 %v2981_v25, %v2978_v13  ;;  %v10285_v2 = vor.u32 %v3099_v18, %v3098_v43  ;;  %v2840_v62 = vunpack.c.l.b16 %v2796_v20  ;;  %v10288_v42 = vsel %vm1010_vm5, %v3465_v63, %v3466_v54 }
 0x319   : > { %v2741_v48 = vmax.f32 %v2728_v10, 0.0  ;;  %v3468_v44 = vor.u32 %v3466_v54, %v2976_v11 }
 0x31a   : > { %v2679_v1 = vpop.f32.mrf.mxu1  ;;  %v2983_v55 = vsel %vm538_vm3, %v10213_v17, %v10283_v50  ;;  %v3101_v19 = vsel %vm670_vm4, %v10215_v33, %v10285_v2  ;;  %v10297_v26 = vpack.c.b16 %v2840_v62, %v2839_v37 }
 0x31b   : > { %v2754_v12 = vmul.f32 %v2741_v48, %v12648_v27  ;;  %v2697_v59 = vadd.f32 %v2679_v1, %v2576_v49  ;;  %7950 = vmatmul.msk.bf16.gmra.mxu3 %vm351_vm8, %v2983_v55  ;;  %7965 = vmatmul.msk.bf16.gmra.mxu0 %vm351_vm8, %v3101_v19  ;;  %v12649_v49 = vld [vmem:[#allocation11_spill] sm:$0xff]  ;;  %v12650_v1 = vld [vmem:[#allocation18_spill] sm:$0xff] }
 0x31c   : > { %v3249_v45 = vshrl.u32 %v10297_v26, 16  ;;  %v3252_v63 = vshll.u32 %v10297_v26, 16  ;;  %v2781_v30 = vld [vmem:[#allocation3 + $0x58] sm:$0xff]  ;;  %v3703_v17 = vrot.slane %v10297_v26, 1 }
 0x31d   : > { %2767 = vst.msk [vmem:[#allocation3 + $0x60] sm:$0xff] %vm351_vm8, %v2754_v12  ;;  %v2713_v33 = vmul.f32 %v10032_v61, %v2697_v59  ;;  %v2797_v37 = vpack.c.bf16 %v2781_v30, %v2781_v30 }
 0x31e   : > { %v3251_v51 = vrot.slane %v3249_v45, 3  ;;  %v3254_v11 = vrot.slane %v3252_v63, 4  ;;  %v3587_v8 = vrot.slane %v3252_v63, 1  ;;  %v10312_v36 = vsel %vm1227_vm6, %v3701_v22, %v3703_v17 }
 0x31f   : > { %v2729_v0 = vadd.f32 %v10040_v9, %v2713_v33  ;;  %v2841_v39 = vunpack.c.l.b16 %v2797_v37  ;;  %v3816_v6 = vrot.slane %v3249_v45, 1  ;;  %v3817_v18 = vrot.slane %v3252_v63, 2 }
 0x320   : > { %v10315_v13 = vor.u32 %v3254_v11, %v3251_v51  ;;  %v10318_v43 = vsel %vm1010_vm5, %v3586_v38, %v3587_v8  ;;  %v3589_v25 = vor.u32 %v3587_v8, %v3249_v45  ;;  %v2785_v8 = vld [vmem:[#allocation3 + $0x78] sm:$0xff] }
 0x321   : > { %v2742_v20 = vmax.f32 %v2729_v0, 0.0  ;;  %v10320_v54 = vpack.c.b16 %v2841_v39, %v2840_v62  ;;  %v10325_v22 = vor.u32 %v3817_v18, %v3816_v6 }
 0x322   : > { %v2682_v10 = vpop.f32.mrf.mxu1  ;;  %v3256_v34 = vsel %vm670_vm4, %v10249_v5, %v10315_v13 }
 0x323   : > { %v2755_v48 = vmul.f32 %v2742_v20, %v12649_v49  ;;  %v2698_v55 = vadd.f32 %v2682_v10, %v12650_v1  ;;  %7980 = vmatmul.msk.bf16.gmra.mxu1 %vm351_vm8, %v3256_v34  ;;  %v2860_v38 = vrot.slane %v10320_v54, 3  ;;  %v2985_v19 = vshrl.u32 %v10320_v54, 16 }
 0x324   : > { %v2988_v62 = vshll.u32 %v10320_v54, 16  ;;  %v2782_v12 = vld [vmem:[#allocation3 + $0x60] sm:$0xff]  ;;  %v10336_v59 = vsel %vm1323_vm7, %v10257_v4, %v10325_v22  ;;  %v2801_v10 = vpack.c.bf16 %v2785_v8, %v2785_v8 }
 0x325   : > { %2768 = vst.msk [vmem:[#allocation3 + $0x68] sm:$0xff] %vm351_vm8, %v2755_v48  ;;  %v2714_v5 = vmul.f32 %v10032_v61, %v2698_v55  ;;  %v2861_v45 = vsel %vm455_vm1, %v2858_v3, %v2860_v38  ;;  %v2987_v63 = vrot.slane %v2985_v19, 2  ;;  %v3102_v30 = vrot.slane %v2985_v19, 3  ;;  %v12651_v55 = vld [vmem:[#allocation12_spill] sm:$0xff] }
 0x326   : > { %7936 = vmatmul.msk.bf16.gmra.mxu2 %vm351_vm8, %v2861_v45  ;;  %v2990_v33 = vrot.slane %v2988_v62, 3  ;;  %v3103_v37 = vrot.slane %v2988_v62, 4  ;;  %v2798_v51 = vpack.c.bf16 %v2782_v12, %v2782_v12  ;;  %v3469_v11 = vrot.slane %v2988_v62, 1 }
 0x327   : > { %v2730_v4 = vadd.f32 %v10040_v9, %v2714_v5 }
 0x328   : > { %v10345_v0 = vor.u32 %v2990_v33, %v2987_v63  ;;  %v10347_v6 = vor.u32 %v3103_v37, %v3102_v30  ;;  %v2842_v61 = vunpack.c.l.b16 %v2798_v51  ;;  %v10350_v18 = vsel %vm1010_vm5, %v3468_v44, %v3469_v11  ;;  %v8531_v44 = vld [vmem:[#allocation4 + $0xe8] sm:$0xff] }
 0x329   : > { %v2743_v3 = vmax.f32 %v2730_v4, 0.0  ;;  %v3471_v20 = vor.u32 %v3469_v11, %v2985_v19  ;;  %3521 = vmatpush.bf16.msra.mxu3 %v8531_v44 }
 0x32a   : > { %v2992_v34 = vsel %vm538_vm3, %v10283_v50, %v10345_v0  ;;  %v3105_v48 = vsel %vm670_vm4, %v10285_v2, %v10347_v6  ;;  %v10358_v9 = vpack.c.b16 %v2842_v61, %v2841_v39  ;;  %v2684_v1 = vpop.f32.mrf.mxu1  ;;  %v3577_v39 = vunpack.c.l.b16 %v2801_v10 }
 0x32b   : > { %v2756_v62 = vmul.f32 %v2743_v3, %v12651_v55  ;;  %7951 = vmatmul.msk.bf16.gmra.mxu3 %vm351_vm8, %v2992_v34  ;;  %7966 = vmatmul.msk.bf16.gmra.mxu0 %vm351_vm8, %v3105_v48 }
 0x32c   : > { %v3258_v19 = vshrl.u32 %v10358_v9, 16  ;;  %v3261_v12 = vshll.u32 %v10358_v9, 16  ;;  %v2783_v5 = vld [vmem:[#allocation3 + $0x68] sm:$0xff]  ;;  %v12614_v50 = vrot.slane %v10358_v9, 1  ;;  %v10386_v48 = vpack.c.b16 %v3577_v39, %v3577_v39 }
 0x32d   : > { %2769 = vst.msk [vmem:[#allocation3 + $0x70] sm:$0xf] %vm368_vm9, %v2756_v62  ;;  %v2799_v2 = vpack.c.bf16 %v2783_v5, %v2783_v5  ;;  %v8533_v62 = vld [vmem:[#allocation4 + $0xf8] sm:$0xff] }
 0x32e   : > { %v3260_v45 = vrot.slane %v3258_v19, 3  ;;  %v3263_v63 = vrot.slane %v3261_v12, 4  ;;  %v3590_v30 = vrot.slane %v3261_v12, 1  ;;  %v10372_v33 = vsel %vm1227_vm6, %v3703_v17, %v12614_v50  ;;  %3643 = vmatpush.bf16.msra.mxu0 %v8533_v62 }
 0x32f   : > { %v2843_v37 = vunpack.c.l.b16 %v2799_v2  ;;  %v3820_v51 = vrot.slane %v3258_v19, 1  ;;  %v3821_v11 = vrot.slane %v3261_v12, 2 }
 0x330   : > { %v10374_v8 = vor.u32 %v3263_v63, %v3260_v45  ;;  %v10377_v4 = vsel %vm1010_vm5, %v3589_v25, %v3590_v30  ;;  %v3592_v3 = vor.u32 %v3590_v30, %v3258_v19  ;;  %v8537_v45 = vld [vmem:[#allocation4 + $0x118] sm:$0xff]  ;;  %v8530_v63 = vld [vmem:[#allocation4 + $0xe0] sm:$0xff]  ;;  %v8532_v30 = vld [vmem:[#allocation4 + $0xf0] sm:$0xff] }
 0x331   : > { %v10379_v10 = vpack.c.b16 %v2843_v37, %v2842_v61  ;;  %v10381_v34 = vor.u32 %v3821_v11, %v3820_v51  ;;  %3871 = vmatpush.bf16.msrb.mxu2 %v8537_v45  ;;  %3522 = vmatpush.bf16.msra.mxu3 %v8530_v63  ;;  %v12652_v63 = vrot.slane %v10358_v9, 1 }
 0x332   : > { %v3265_v26 = vsel %vm670_vm4, %v10315_v13, %v10374_v8  ;;  %3644 = vmatpush.bf16.msra.mxu0 %v8532_v30 }
 0x333   : > { %7981 = vmatmul.msk.bf16.gmra.mxu1 %vm351_vm8, %v3265_v26  ;;  %v2862_v17 = vrot.slane %v10379_v10, 3  ;;  %v2994_v1 = vshrl.u32 %v10379_v10, 16  ;;  %v2997_v25 = vshll.u32 %v10379_v10, 16  ;;  %v10395_v61 = vsel %vm1323_vm7, %v10325_v22, %v10381_v34 }
 0x334   : > { %v2784_v44 = vld [vmem:[#allocation3 + $0x70] sm:$0xff]  ;;  %v12616_v26 = vshll.u32 %v10386_v48, 16  ;;  %v12615_v22 = vshrl.u32 %v10386_v48, 16 }
 0x335   : > { %v2863_v19 = vsel %vm455_vm1, %v2860_v38, %v2862_v17  ;;  %v2996_v13 = vrot.slane %v2994_v1, 2  ;;  %v2999_v12 = vrot.slane %v2997_v25, 3  ;;  %v3106_v5 = vrot.slane %v2994_v1, 3 }
 0x336   : > { %7937 = vmatmul.msk.bf16.gmra.mxu2 %vm351_vm8, %v2863_v19  ;;  %v3107_v2 = vrot.slane %v2997_v25, 4  ;;  %v2800_v39 = vpack.c.bf16 %v2784_v44, %v2784_v44  ;;  %v3472_v51 = vrot.slane %v2997_v25, 1 }
 0x337   : > { %v3000_v11 = vor.u32 %v2999_v12, %v2996_v13  ;;  %v8535_v12 = vld [vmem:[#allocation4 + $0x108] sm:$0xff] }
 0x338   : > { %v3108_v50 = vor.u32 %v3107_v2, %v3106_v5  ;;  %v3205_v55 = vunpack.c.l.b16 %v2800_v39  ;;  %v10402_v38 = vsel %vm1010_vm5, %v3471_v20, %v3472_v51  ;;  %v3474_v62 = vor.u32 %v3472_v51, %v2994_v1  ;;  %3750 = vmatpush.bf16.msra.mxu1 %v8535_v12 }
 0x339   : > { %v3001_v44 = vsel %vm538_vm3, %v10345_v0, %v3000_v11  ;;  %v3828_v20 = vrot.slane %v12615_v22, 1  ;;  %v3829_v1 = vrot.slane %v12616_v26, 2 }
 0x33a   : > { %v3109_v25 = vsel %vm670_vm4, %v10347_v6, %v3108_v50  ;;  %v10408_v19 = vpack.c.b16 %v3205_v55, %v2843_v37  ;;  %v10410_v13 = vpack.c.b16 %v3205_v55, %v3205_v55  ;;  %v8534_v37 = vld [vmem:[#allocation4 + $0x100] sm:$0xff] }
 0x33b   : > { %7952 = vmatmul.msk.bf16.gmra.mxu3 %vm351_vm8, %v3001_v44  ;;  %7967 = vmatmul.msk.bf16.gmra.mxu0 %vm351_vm8, %v3109_v25  ;;  %v10431_v22 = vor.u32 %v3829_v1, %v3828_v20 }
 0x33c   : > { %v3267_v0 = vshrl.u32 %v10408_v19, 16  ;;  %v3270_v5 = vshll.u32 %v10408_v19, 16  ;;  %v3707_v6 = vrot.slane %v10408_v19, 1  ;;  %v3475_v55 = vshll.u32 %v10410_v13, 16  ;;  %3751 = vmatpush.bf16.msra.mxu1 %v8534_v37 }
 0x33e   : > { %v3269_v2 = vrot.slane %v3267_v0, 3  ;;  %v3272_v39 = vrot.slane %v3270_v5, 4  ;;  %v3593_v45 = vrot.slane %v3270_v5, 1  ;;  %v10427_v30 = vsel %vm1227_vm6, %v12652_v63, %v3707_v6 }
 0x33f   : > { %v10429_v51 = vrot.slane %v3475_v55, 1  ;;  %v3824_v44 = vrot.slane %v3267_v0, 1  ;;  %v3825_v25 = vrot.slane %v3270_v5, 2 }
 0x340   : > { %v3273_v26 = vor.u32 %v3272_v39, %v3269_v2  ;;  %v10434_v12 = vsel %vm1010_vm5, %v3592_v3, %v3593_v45  ;;  %v10436_v49 = vor.u32 %v3593_v45, %v3267_v0 }
 0x341   : > { %v10440_v27 = vsel %vm1010_vm5, %v3474_v62, %v10429_v51  ;;  %v3826_v9 = vor.u32 %v3825_v25, %v3824_v44 }
 0x342   : > { %v3274_v55 = vsel %vm670_vm4, %v10374_v8, %v3273_v26 }
 0x343   : > { %7982 = vmatmul.msk.bf16.gmra.mxu1 %vm351_vm8, %v3274_v55  ;;  %v10447_v20 = vsel %vm1323_vm7, %v10381_v34, %v3826_v9  ;;  %v10451_v3 = vsel %vm1323_vm7, %v3826_v9, %v10431_v22 }
 0x346   : > { %7938 = vmatmul.msk.bf16.gmra.mxu2 %vm351_vm8, %v2862_v17 }
 0x34b   : > { %7953 = vmatmul.msk.bf16.gmra.mxu3 %vm351_vm8, %v3000_v11  ;;  %7968 = vmatmul.msk.bf16.gmra.mxu0 %vm351_vm8, %v3108_v50 }
 0x353   : > { %7983 = vmatmul.msk.bf16.gmra.mxu1 %vm351_vm8, %v3273_v26 }
 0x356   : > { %7992 = vmatmul.msk.bf16.vlgmr.msra.gmra.mxu2 %vm351_vm8, %v10069_v40 }
 0x35b   : > { %8007 = vmatmul.msk.bf16.vlgmr.msra.gmra.mxu3 %vm351_vm8, %v10143_v58  ;;  %8022 = vmatmul.msk.bf16.vlgmr.msra.gmra.mxu0 %vm351_vm8, %v10178_v32  ;;  %v8536_v58 = vld [vmem:[#allocation4 + $0x110] sm:$0xff] }
 0x35c   : > { %3872 = vmatpush.bf16.msrb.mxu2 %v8536_v58 }
 0x363   : > { %8037 = vmatmul.msk.bf16.vlgmr.msra.gmra.mxu1 %vm351_vm8, %v10170_v23 }
 0x366   : > { %7993 = vmatmul.msk.bf16.gmra.mxu2 %vm351_vm8, %v10113_v16 }
 0x368   : > { %v3152_v8 = vpop.f32.mrf.mxu0 }
 0x369   : > { %v2906_v34 = vpop.f32.mrf.mxu2 }
 0x36b   : > { %8008 = vmatmul.msk.bf16.gmra.mxu3 %vm351_vm8, %v10219_v14  ;;  %8023 = vmatmul.msk.bf16.gmra.mxu0 %vm351_vm8, %v10253_v28 }
 0x36e   : > { %v3044_v40 = vpop.f32.mrf.mxu3 }
 0x36f   : > { %v3045_v50 = vadd.f32 %v3044_v40, %v2906_v34 }
 0x370   : > { %v3154_v17 = vpop.f32.mrf.mxu0  ;;  %v3317_v11 = vpop.f32.mrf.mxu1 }
 0x371   : > { %v3186_v32 = vadd.f32 %v3152_v8, %v3045_v50  ;;  %v2908_v26 = vpop.f32.mrf.mxu2 }
 0x373   : > { %v10471_v23 = vadd.f32 %v3317_v11, %v3186_v32  ;;  %8038 = vmatmul.msk.bf16.gmra.mxu1 %vm351_vm8, %v10245_v15 }
 0x376   : > { %v3046_v16 = vpop.f32.mrf.mxu3  ;;  %7994 = vmatmul.msk.bf16.gmra.mxu2 %vm351_vm8, %v10182_v60 }
 0x377   : > { %v3047_v14 = vadd.f32 %v3046_v16, %v2908_v26 }
 0x378   : > { %v3157_v62 = vpop.f32.mrf.mxu0  ;;  %v3319_v28 = vpop.f32.mrf.mxu1 }
 0x379   : > { %v3187_v1 = vadd.f32 %v3154_v17, %v3047_v14  ;;  %v2911_v0 = vpop.f32.mrf.mxu2 }
 0x37b   : > { %v10477_v5 = vadd.f32 %v3319_v28, %v3187_v1  ;;  %8009 = vmatmul.msk.bf16.gmra.mxu3 %vm351_vm8, %v10288_v42  ;;  %8024 = vmatmul.msk.bf16.gmra.mxu0 %vm351_vm8, %v10318_v43 }
 0x37e   : > { %v3049_v37 = vpop.f32.mrf.mxu3 }
 0x37f   : > { %v3050_v2 = vadd.f32 %v3049_v37, %v2911_v0 }
 0x380   : > { %v3159_v15 = vpop.f32.mrf.mxu0  ;;  %v3322_v39 = vpop.f32.mrf.mxu1 }
 0x381   : > { %v3188_v45 = vadd.f32 %v3157_v62, %v3050_v2  ;;  %v2913_v63 = vpop.f32.mrf.mxu2 }
 0x383   : > { %v10483_v60 = vadd.f32 %v3322_v39, %v3188_v45  ;;  %8039 = vmatmul.msk.bf16.gmra.mxu1 %vm351_vm8, %v10312_v36  ;;  %v3709_v39 = vrot.slane %v10386_v48, 1 }
 0x386   : > { %v3051_v44 = vpop.f32.mrf.mxu3  ;;  %7995 = vmatmul.msk.bf16.gmra.mxu2 %vm351_vm8, %v10255_v24 }
 0x387   : > { %v3052_v25 = vadd.f32 %v3051_v44, %v2913_v63 }
 0x388   : > { %v3162_v42 = vpop.f32.mrf.mxu0  ;;  %v3324_v9 = vpop.f32.mrf.mxu1 }
 0x389   : > { %v3189_v55 = vadd.f32 %v3159_v15, %v3052_v25  ;;  %v2916_v43 = vpop.f32.mrf.mxu2 }
 0x38b   : > { %v10489_v8 = vadd.f32 %v3324_v9, %v3189_v55  ;;  %8010 = vmatmul.msk.bf16.gmra.mxu3 %vm351_vm8, %v10350_v18  ;;  %8025 = vmatmul.msk.bf16.gmra.mxu0 %vm351_vm8, %v10377_v4  ;;  %v3479_v9 = vshrl.u32 %v10410_v13, 16  ;;  %v12654_v55 = vshrl.u32 %v10386_v48, 16 }
 0x38e   : > { %v3054_v34 = vpop.f32.mrf.mxu3 }
 0x38f   : > { %v3055_v40 = vadd.f32 %v3054_v34, %v2916_v43 }
 0x390   : > { %v10495_v36 = vpop.f32.mrf.mxu0  ;;  %v3327_v50 = vpop.f32.mrf.mxu1 }
 0x391   : > { %v3190_v58 = vadd.f32 %v3162_v42, %v3055_v40  ;;  %v10497_v24 = vpop.f32.mrf.mxu2  ;;  %v3710_v42 = vsel %vm1227_vm6, %v3707_v6, %v3709_v39  ;;  %v3481_v6 = vor.u32 %v3479_v9, %v10429_v51 }
 0x393   : > { %v10499_v17 = vadd.f32 %v3327_v50, %v3190_v58  ;;  %8040 = vmatmul.msk.bf16.gmra.mxu1 %vm351_vm8, %v10372_v33 }
 0x396   : > { %v10503_v11 = vpop.f32.mrf.mxu3  ;;  %7996 = vmatmul.msk.bf16.gmra.mxu2 %vm351_vm8, %v10320_v54 }
 0x398   : > { %v3167_v18 = vpop.f32.mrf.mxu0  ;;  %v10507_v4 = vpop.f32.mrf.mxu1 }
 0x399   : > { %v2921_v32 = vpop.f32.mrf.mxu2 }
 0x39b   : > { %8011 = vmatmul.msk.bf16.gmra.mxu3 %vm351_vm8, %v10402_v38  ;;  %8026 = vmatmul.msk.bf16.gmra.mxu0 %vm351_vm8, %v10434_v12  ;;  %v12653_v38 = vshll.u32 %v10386_v48, 16 }
 0x39d   : > { %v3599_v12 = vrot.slane %v12653_v38, 1 }
 0x39e   : > { %v3059_v26 = vpop.f32.mrf.mxu3 }
 0x39f   : > { %v3060_v16 = vadd.f32 %v3059_v26, %v2921_v32  ;;  %v3600_v15 = vsel %vm1010_vm5, %v10436_v49, %v3599_v12  ;;  %v3603_v43 = vor.u32 %v12654_v55, %v3599_v12 }
 0x3a0   : > { %v10513_v14 = vpop.f32.mrf.mxu0  ;;  %v3332_v33 = vpop.f32.mrf.mxu1 }
 0x3a1   : > { %v3192_v62 = vadd.f32 %v3167_v18, %v3060_v16  ;;  %v10515_v28 = vpop.f32.mrf.mxu2 }
 0x3a3   : > { %v10517_v1 = vadd.f32 %v3332_v33, %v3192_v62  ;;  %8041 = vmatmul.msk.bf16.gmra.mxu1 %vm351_vm8, %v10427_v30 }
 0x3a6   : > { %v10521_v54 = vpop.f32.mrf.mxu3  ;;  %7997 = vmatmul.msk.bf16.gmra.mxu2 %vm351_vm8, %v10379_v10 }
 0x3a8   : > { %v3172_v0 = vpop.f32.mrf.mxu0  ;;  %v10527_v37 = vpop.f32.mrf.mxu1 }
 0x3a9   : > { %v2926_v2 = vpop.f32.mrf.mxu2 }
 0x3ab   : > { %8012 = vmatmul.msk.bf16.gmra.mxu3 %vm351_vm8, %v10440_v27  ;;  %8027 = vmatmul.msk.bf16.gmra.mxu0 %vm351_vm8, %v3600_v15 }
 0x3ae   : > { %v3064_v30 = vpop.f32.mrf.mxu3 }
 0x3af   : > { %v3065_v45 = vadd.f32 %v3064_v30, %v2926_v2 }
 0x3b0   : > { %v10535_v10 = vpop.f32.mrf.mxu0  ;;  %v3337_v63 = vpop.f32.mrf.mxu1 }
 0x3b1   : > { %v3194_v44 = vadd.f32 %v3172_v0, %v3065_v45  ;;  %v10537_v25 = vpop.f32.mrf.mxu2 }
 0x3b3   : > { %v10542_v49 = vadd.f32 %v3337_v63, %v3194_v44  ;;  %8042 = vmatmul.msk.bf16.gmra.mxu1 %vm351_vm8, %v3710_v42 }
 0x3b6   : > { %v10545_v27 = vpop.f32.mrf.mxu3  ;;  %7998 = vmatmul.msk.bf16.gmra.mxu2 %vm351_vm8, %v10410_v13 }
 0x3b8   : > { %v3177_v34 = vpop.f32.mrf.mxu0  ;;  %v10552_v40 = vpop.f32.mrf.mxu1 }
 0x3b9   : > { %v2931_v19 = vpop.f32.mrf.mxu2 }
 0x3bb   : > { %8013 = vmatmul.msk.bf16.gmra.mxu3 %vm351_vm8, %v3481_v6  ;;  %8028 = vmatmul.msk.bf16.gmra.mxu0 %vm351_vm8, %v3603_v43 }
 0x3be   : > { %v3069_v50 = vpop.f32.mrf.mxu3 }
 0x3bf   : > { %v3070_v58 = vadd.f32 %v3069_v50, %v2931_v19 }
 0x3c0   : > { %v10557_v18 = vpop.f32.mrf.mxu0  ;;  %v3342_v32 = vpop.f32.mrf.mxu1 }
 0x3c1   : > { %12655 = vst [vmem:[#allocation15_spill] sm:$0xff] %v10557_v18  ;;  %v3196_v26 = vadd.f32 %v3177_v34, %v3070_v58  ;;  %v10559_v13 = vpop.f32.mrf.mxu2 }
 0x3c3   : > { %v10561_v48 = vadd.f32 %v3342_v32, %v3196_v26  ;;  %8043 = vmatmul.msk.bf16.gmra.mxu1 %vm351_vm8, %v3709_v39  ;;  %v8541_v32 = vld [vmem:[#allocation4 + $0x138] sm:$0xff] }
 0x3c4   : > { %4138 = vmatpush.bf16.msrb.mxu3 %v8541_v32 }
 0x3c6   : > { %v10564_v16 = vpop.f32.mrf.mxu3  ;;  %8052 = vmatmul.msk.bf16.vlgmr.msrb.gmra.mxu2 %vm351_vm8, %v10201_v53 }
 0x3c8   : > { %v3182_v51 = vpop.f32.mrf.mxu0  ;;  %v10568_v33 = vpop.f32.mrf.mxu1 }
 0x3c9   : > { %12656 = vst [vmem:[#allocation13_spill] sm:$0xff] %v10568_v33  ;;  %v2936_v62 = vpop.f32.mrf.mxu2 }
 0x3ce   : > { %v3074_v38 = vpop.f32.mrf.mxu3 }
 0x3cf   : > { %v3075_v12 = vadd.f32 %v3074_v38, %v2936_v62 }
 0x3d0   : > { %v3184_v0 = vpop.f32.mrf.mxu0  ;;  %v3347_v2 = vpop.f32.mrf.mxu1 }
 0x3d1   : > { %v3198_v15 = vadd.f32 %v3182_v51, %v3075_v12  ;;  %v2938_v30 = vpop.f32.mrf.mxu2 }
 0x3d3   : > { %v10570_v45 = vadd.f32 %v3347_v2, %v3198_v15 }
 0x3d6   : > { %v3076_v63 = vpop.f32.mrf.mxu3  ;;  %8053 = vmatmul.msk.bf16.gmra.mxu2 %vm351_vm8, %v10272_v35 }
 0x3d8   : > { %v3349_v39 = vpop.f32.mrf.mxu1  ;;  %v3646_v44 = vpop.f32.mrf.mxu0 }
 0x3d9   : > { %v3406_v42 = vpop.f32.mrf.mxu2 }
 0x3da   : > { %v3440_v53 = vadd.f32 %v3406_v42, %v10471_v23 }
 0x3de   : > { %v3524_v9 = vpop.f32.mrf.mxu3 }
 0x3df   : > { %v3558_v55 = vadd.f32 %v3524_v9, %v3440_v53 }
 0x3e0   : > { %v10575_v43 = vpop.f32.mrf.mxu0  ;;  %v3753_v34 = vpop.f32.mrf.mxu1 }
 0x3e1   : > { %v3680_v19 = vadd.f32 %v3646_v44, %v3558_v55  ;;  %v3408_v6 = vpop.f32.mrf.mxu2 }
 0x3e2   : > { %v10578_v50 = vadd.f32 %v3408_v6, %v10477_v5 }
 0x3e3   : > { %v10580_v58 = vadd.f32 %v3753_v34, %v3680_v19 }
 0x3e6   : > { %v10582_v35 = vpop.f32.mrf.mxu3  ;;  %8054 = vmatmul.msk.bf16.gmra.mxu2 %vm351_vm8, %v10336_v59 }
 0x3e8   : > { %v3651_v23 = vpop.f32.mrf.mxu0  ;;  %v10586_v26 = vpop.f32.mrf.mxu1 }
 0x3e9   : > { %v3411_v51 = vpop.f32.mrf.mxu2 }
 0x3ea   : > { %v3442_v62 = vadd.f32 %v3411_v51, %v10483_v60 }
 0x3ee   : > { %v3529_v38 = vpop.f32.mrf.mxu3 }
 0x3ef   : > { %v3560_v12 = vadd.f32 %v3529_v38, %v3442_v62 }
 0x3f0   : > { %v10589_v0 = vpop.f32.mrf.mxu0  ;;  %v3758_v5 = vpop.f32.mrf.mxu1 }
 0x3f1   : > { %v3682_v2 = vadd.f32 %v3651_v23, %v3560_v12  ;;  %v3413_v15 = vpop.f32.mrf.mxu2 }
 0x3f2   : > { %v10592_v30 = vadd.f32 %v3413_v15, %v10489_v8 }
 0x3f3   : > { %v10594_v63 = vadd.f32 %v3758_v5, %v3682_v2 }
 0x3f6   : > { %v10596_v39 = vpop.f32.mrf.mxu3  ;;  %8055 = vmatmul.msk.bf16.gmra.mxu2 %vm351_vm8, %v10395_v61 }
 0x3f8   : > { %v3656_v59 = vpop.f32.mrf.mxu0  ;;  %v10600_v44 = vpop.f32.mrf.mxu1 }
 0x3f9   : > { %v3416_v60 = vpop.f32.mrf.mxu2 }
 0x3fa   : > { %v3444_v42 = vadd.f32 %v3416_v60, %v10499_v17 }
 0x3fe   : > { %v3534_v53 = vpop.f32.mrf.mxu3 }
 0x3ff   : > { %v3562_v9 = vadd.f32 %v3534_v53, %v3444_v42 }
 0x400   : > { %v10603_v55 = vpop.f32.mrf.mxu0  ;;  %v3763_v34 = vpop.f32.mrf.mxu1 }
 0x401   : > { %v3684_v8 = vadd.f32 %v3656_v59, %v3562_v9  ;;  %v10605_v19 = vpop.f32.mrf.mxu2  ;;  %v8540_v9 = vld [vmem:[#allocation4 + $0x130] sm:$0xff] }
 0x402   : > { %4139 = vmatpush.bf16.msrb.mxu3 %v8540_v9 }
 0x403   : > { %v10607_v6 = vadd.f32 %v3763_v34, %v3684_v8 }
 0x406   : > { %v10609_v32 = vpop.f32.mrf.mxu3  ;;  %8056 = vmatmul.msk.bf16.gmra.mxu2 %vm351_vm8, %v10447_v20 }
 0x408   : > { %v3661_v61 = vpop.f32.mrf.mxu0  ;;  %v10613_v23 = vpop.f32.mrf.mxu1 }
 0x409   : > { %v3421_v51 = vpop.f32.mrf.mxu2 }
 0x40a   : > { %v3446_v17 = vadd.f32 %v3421_v51, %v10517_v1 }
 0x40e   : > { %v3539_v62 = vpop.f32.mrf.mxu3 }
 0x40f   : > { %v3564_v38 = vadd.f32 %v3539_v62, %v3446_v17 }
 0x410   : > { %v10616_v12 = vpop.f32.mrf.mxu0  ;;  %v3768_v5 = vpop.f32.mrf.mxu1 }
 0x411   : > { %v3686_v2 = vadd.f32 %v3661_v61, %v3564_v38  ;;  %v10618_v15 = vpop.f32.mrf.mxu2 }
 0x413   : > { %v10620_v59 = vadd.f32 %v3768_v5, %v3686_v2 }
 0x416   : > { %v10622_v60 = vpop.f32.mrf.mxu3  ;;  %8057 = vmatmul.msk.bf16.gmra.mxu2 %vm351_vm8, %v10451_v3 }
 0x418   : > { %v3666_v20 = vpop.f32.mrf.mxu0  ;;  %v10626_v42 = vpop.f32.mrf.mxu1 }
 0x419   : > { %v3426_v53 = vpop.f32.mrf.mxu2 }
 0x41a   : > { %v3448_v1 = vadd.f32 %v3426_v53, %v10542_v49 }
 0x41e   : > { %v3544_v34 = vpop.f32.mrf.mxu3 }
 0x41f   : > { %v3566_v8 = vadd.f32 %v3544_v34, %v3448_v1 }
 0x420   : > { %v10629_v61 = vpop.f32.mrf.mxu0  ;;  %v3773_v51 = vpop.f32.mrf.mxu1 }
 0x421   : > { %v3688_v17 = vadd.f32 %v3666_v20, %v3566_v8  ;;  %v10631_v62 = vpop.f32.mrf.mxu2 }
 0x423   : > { %v10633_v38 = vadd.f32 %v3773_v51, %v3688_v17 }
 0x426   : > { %v10635_v5 = vpop.f32.mrf.mxu3  ;;  %8058 = vmatmul.msk.bf16.gmra.mxu2 %vm351_vm8, %v10431_v22 }
 0x428   : > { %v3671_v3 = vpop.f32.mrf.mxu0  ;;  %v10639_v2 = vpop.f32.mrf.mxu1 }
 0x429   : > { %12657 = vst [vmem:[#allocation16_spill] sm:$0xff] %v10639_v2  ;;  %v3431_v49 = vpop.f32.mrf.mxu2 }
 0x42a   : > { %v3450_v53 = vadd.f32 %v3431_v49, %v10561_v48 }
 0x42e   : > { %v3549_v1 = vpop.f32.mrf.mxu3 }
 0x42f   : > { %v3568_v9 = vadd.f32 %v3549_v1, %v3450_v53 }
 0x430   : > { %v10642_v34 = vpop.f32.mrf.mxu0  ;;  %v3778_v20 = vpop.f32.mrf.mxu1 }
 0x431   : > { %12658 = vst [vmem:[#allocation14_spill] sm:$0xff] %v10642_v34  ;;  %v3690_v8 = vadd.f32 %v3671_v3, %v3568_v9  ;;  %v10644_v46 = vpop.f32.mrf.mxu2  ;;  %v3559_v9 = vadd.f32 %v10582_v35, %v10578_v50 }
 0x433   : > { %v10646_v51 = vadd.f32 %v3778_v20, %v3690_v8  ;;  %v10660_v20 = vld [vmem:[%s12596_s5 + $0x1] ss:$0 sm:$0xff] }
 0x436   : > { %v10648_v17 = vpop.f32.mrf.mxu3 }
 0x438   : > { %v10650_v29 = vpop.f32.mrf.mxu1  ;;  %v3676_v22 = vpop.f32.mrf.mxu0 }
 0x439   : > { %12659 = vst [vmem:[#allocation17_spill] sm:$0xff] %v10650_v29  ;;  %v3436_v33 = vpop.f32.mrf.mxu2 }
 0x43a   : > { %v3452_v2 = vadd.f32 %v3436_v33, %v10570_v45  ;;  %v3681_v45 = vadd.f32 %v10575_v43, %v3559_v9  ;;  %v8538_v43 = vld [vmem:[#allocation4 + $0x120] sm:$0xff] }
 0x43b   : > { %v8542_v9 = vld [vmem:[#allocation4 + $0x140] sm:$0xff] }
 0x43c   : > { %v3788_v35 = vadd.f32 %v10586_v26, %v3681_v45  ;;  %v8545_v26 = vld [vmem:[#allocation4 + $0x158] sm:$0xff]  ;;  %v8547_v45 = vld [vmem:[#allocation4 + $0x168] sm:$0xff] }
 0x43d   : > { %4549 = vmatpush.bf16.msra.mxu2 %v8545_v26  ;;  %4638 = vmatpush.bf16.msra.mxu3 %v8547_v45 }
 0x43e   : > { %v3554_v18 = vpop.f32.mrf.mxu3 }
 0x43f   : > { %v3570_v48 = vadd.f32 %v3554_v18, %v3452_v2  ;;  %v10666_v18 = vld [vmem:[%s12597_s6 + $0x1] ss:$0 sm:$0xff] }
 0x440   : > { %v3783_v49 = vpop.f32.mrf.mxu1  ;;  %v3678_v53 = vpop.f32.mrf.mxu0 }
 0x441   : > { %v3692_v1 = vadd.f32 %v3676_v22, %v3570_v48  ;;  %v3438_v34 = vpop.f32.mrf.mxu2  ;;  %v8539_v48 = vld [vmem:[#allocation4 + $0x128] sm:$0xff] }
 0x442   : > { %v8713_v34 = vld [vmem:[#allocation2 + $0x10] sm:$0xff]  ;;  %4276 = vmatpush.bf16.msrb.mxu0 %v8539_v48 }
 0x443   : > { %v10653_v31 = vadd.f32 %v3783_v49, %v3692_v1  ;;  %v8543_v49 = vld [vmem:[#allocation4 + $0x148] sm:$0xff] }
 0x444   : > { %4384 = vmatpush.bf16.msrb.mxu1 %v8543_v49 }
 0x446   : > { %v3556_v3 = vpop.f32.mrf.mxu3  ;;  %4277 = vmatpush.bf16.msrb.mxu0 %v8538_v43 }
 0x448   : > { %v3785_v8 = vpop.f32.mrf.mxu1  ;;  %4385 = vmatpush.bf16.msrb.mxu1 %v8542_v9 }
 0x449   : > { %v3874_v29 = vpop.f32.mrf.mxu2 }
 0x44a   : > { %v3908_v33 = vadd.f32 %v3874_v29, %v10580_v58 }
 0x44c   : > { %v3924_v2 = vmul.f32 %v10660_v20, %v3908_v33  ;;  %v4005_v33 = vld [vmem:[#allocation2] sm:$0xff] }
 0x44d   : > { %v4021_v48 = vpack.c.bf16 %v4005_v33, %v4005_v33 }
 0x44e   : > { %v3940_v50 = vadd.f32 %v10666_v18, %v3924_v2  ;;  %v3561_v2 = vadd.f32 %v10596_v39, %v10592_v30  ;;  %v8544_v39 = vld [vmem:[#allocation4 + $0x150] sm:$0xff] }
 0x44f   : > { %v4065_v43 = vunpack.c.l.b16 %v4021_v48  ;;  %4550 = vmatpush.bf16.msra.mxu2 %v8544_v39 }
 0x450   : > { %v3953_v22 = vadd.f32 %v8713_v34, %v3940_v50  ;;  %v8714_v50 = vld [vmem:[#allocation2 + $0x18] sm:$0xff]  ;;  %v4006_v34 = vld [vmem:[#allocation2 + $0x8] sm:$0xff] }
 0x451   : > { %v3876_v53 = vpop.f32.mrf.mxu2 }
 0x452   : > { %v3966_v1 = vmax.f32 %v3953_v22, 0.0  ;;  %v3909_v29 = vadd.f32 %v3876_v53, %v3788_v35 }
 0x454   : > { %v3979_v58 = vmul.f32 %v3966_v1, %v9407_v47  ;;  %v3925_v3 = vmul.f32 %v10660_v20, %v3909_v29  ;;  %v3057_v1 = vadd.f32 %v10503_v11, %v10497_v24  ;;  %v4022_v29 = vpack.c.bf16 %v4006_v34, %v4006_v34  ;;  %v8715_v24 = vld [vmem:[#allocation2 + $0x20] sm:$0xff] }
 0x456   : > { %3992 = vst.msk [vmem:[#allocation2 + $0x10] sm:$0xff] %vm351_vm8, %v3979_v58  ;;  %v3941_v8 = vadd.f32 %v10666_v18, %v3925_v3  ;;  %v3683_v58 = vadd.f32 %v10589_v0, %v3561_v2 }
 0x458   : > { %v3954_v35 = vadd.f32 %v8714_v50, %v3941_v8  ;;  %v3191_v8 = vadd.f32 %v10495_v36, %v3057_v1  ;;  %v3790_v26 = vadd.f32 %v10600_v44, %v3683_v58 }
 0x459   : > { %v3879_v22 = vpop.f32.mrf.mxu2 }
 0x45a   : > { %v3967_v49 = vmax.f32 %v3954_v35, 0.0  ;;  %v3910_v53 = vadd.f32 %v3879_v22, %v10594_v63  ;;  %v4066_v63 = vunpack.c.l.b16 %v4022_v29  ;;  %v3356_v35 = vadd.f32 %v10507_v4, %v3191_v8 }
 0x45b   : > { %v3062_v4 = vadd.f32 %v10521_v54, %v10515_v28 }
 0x45c   : > { %v3980_v3 = vmul.f32 %v3967_v49, %v9413_v56  ;;  %v3926_v30 = vmul.f32 %v10660_v20, %v3910_v53  ;;  %v4079_v45 = vpack.c.b16 %v4066_v63, %v4065_v43  ;;  %v3445_v49 = vadd.f32 %v10605_v19, %v3356_v35 }
 0x45d   : > { %v4007_v33 = vld [vmem:[#allocation2 + $0x10] sm:$0xff] }
 0x45e   : > { %3993 = vst.msk [vmem:[#allocation2 + $0x18] sm:$0xff] %vm351_vm8, %v3980_v3  ;;  %v3942_v9 = vadd.f32 %v10666_v18, %v3926_v30  ;;  %v4023_v34 = vpack.c.bf16 %v4007_v33, %v4007_v33  ;;  %v4176_v53 = vshrl.u32 %v4079_v45, 16  ;;  %v4179_v1 = vshll.u32 %v4079_v45, 16  ;;  %v8716_v30 = vld [vmem:[#allocation2 + $0x28] sm:$0xff] }
 0x45f   : > { %v3563_v58 = vadd.f32 %v10609_v32, %v3445_v49 }
 0x460   : > { %v3955_v11 = vadd.f32 %v8715_v24, %v3942_v9  ;;  %v4067_v3 = vunpack.c.l.b16 %v4023_v34  ;;  %v4178_v8 = vrot.slane %v4176_v53, 2  ;;  %v4181_v19 = vrot.slane %v4179_v1, 3 }
 0x461   : > { %v3881_v0 = vpop.f32.mrf.mxu2  ;;  %v4319_v24 = vrot.slane %v4179_v1, 4  ;;  %v3685_v32 = vadd.f32 %v10603_v55, %v3563_v58 }
 0x462   : > { %v3968_v2 = vmax.f32 %v3955_v11, 0.0  ;;  %v3911_v50 = vadd.f32 %v3881_v0, %v3790_v26  ;;  %v4318_v26 = vrot.slane %v4176_v53, 3 }
 0x463   : > { %v3792_v58 = vadd.f32 %v10613_v23, %v3685_v32 }
 0x464   : > { %v3981_v22 = vmul.f32 %v3968_v2, %v9423_v7  ;;  %v3927_v48 = vmul.f32 %v10660_v20, %v3911_v50  ;;  %v4086_v2 = vrot.slane %v4079_v45, 3  ;;  %v4441_v50 = vpack.c.b16 %v4067_v3, %v4066_v63 }
 0x465   : > { %v4008_v36 = vld [vmem:[#allocation2 + $0x18] sm:$0xff] }
 0x466   : > { %3994 = vst.msk [vmem:[#allocation2 + $0x20] sm:$0xff] %vm351_vm8, %v3981_v22  ;;  %v3943_v44 = vadd.f32 %v10666_v18, %v3927_v48  ;;  %v4024_v29 = vpack.c.bf16 %v4008_v36, %v4008_v36  ;;  %v3193_v22 = vadd.f32 %v10513_v14, %v3062_v4  ;;  %v4182_v48 = vor.u32 %v4181_v19, %v4178_v8 }
 0x468   : > { %v3956_v39 = vadd.f32 %v8716_v30, %v3943_v44  ;;  %v4068_v43 = vunpack.c.l.b16 %v4024_v29  ;;  %v4449_v30 = vshrl.u32 %v4441_v50, 16 }
 0x469   : > { %v3884_v9 = vpop.f32.mrf.mxu2 }
 0x46a   : > { %v3969_v11 = vmax.f32 %v3956_v39, 0.0  ;;  %v3912_v33 = vadd.f32 %v3884_v9, %v10607_v6  ;;  %v10698_v0 = vpack.c.b16 %v4068_v43, %v4067_v3  ;;  %v4320_v6 = vor.u32 %v4319_v24, %v4318_v26  ;;  %v8717_v3 = vld [vmem:[#allocation2 + $0x30] sm:$0xff] }
 0x46b   : > { %v4452_v39 = vshll.u32 %v4441_v50, 16 }
 0x46c   : > { %v3982_v35 = vmul.f32 %v3969_v11, %v9436_v57  ;;  %v3928_v28 = vmul.f32 %v10660_v20, %v3912_v33  ;;  %v4087_v54 = vrot.slane %v10698_v0, 3  ;;  %v4184_v34 = vshrl.u32 %v10698_v0, 16 }
 0x46d   : > { %v4187_v49 = vshll.u32 %v10698_v0, 16  ;;  %v4009_v36 = vld [vmem:[#allocation2 + $0x20] sm:$0xff]  ;;  %v3358_v11 = vadd.f32 %v10527_v37, %v3193_v22  ;;  %v4451_v37 = vrot.slane %v4449_v30, 3 }
 0x46e   : > { %3995 = vst.msk [vmem:[#allocation2 + $0x28] sm:$0xff] %vm351_vm8, %v3982_v35  ;;  %v3944_v55 = vadd.f32 %v10666_v18, %v3928_v28  ;;  %v4088_v63 = vsel %vm455_vm1, %v4086_v2, %v4087_v54  ;;  %v4186_v45 = vrot.slane %v4184_v34, 2  ;;  %v4321_v53 = vrot.slane %v4184_v34, 3 }
 0x46f   : > { %8069 = vmatmul.msk.bf16.vlgmr.msrb.gmra.mxu3 %vm351_vm8, %v4088_v63  ;;  %v4189_v1 = vrot.slane %v4187_v49, 3  ;;  %v4322_v44 = vrot.slane %v4187_v49, 4  ;;  %v4025_v14 = vpack.c.bf16 %v4009_v36, %v4009_v36  ;;  %v4693_v29 = vrot.slane %v4187_v49, 1 }
 0x470   : > { %v3957_v4 = vadd.f32 %v8717_v3, %v3944_v55  ;;  %v3447_v50 = vadd.f32 %v10618_v15, %v3358_v11 }
 0x471   : > { %v3886_v9 = vpop.f32.mrf.mxu2  ;;  %v10714_v8 = vor.u32 %v4189_v1, %v4186_v45  ;;  %v10716_v19 = vor.u32 %v4322_v44, %v4321_v53  ;;  %v4069_v26 = vunpack.c.l.b16 %v4025_v14  ;;  %v10718_v24 = vor.u32 %v4693_v29, %v4184_v34  ;;  %v8718_v1 = vld [vmem:[#allocation2 + $0x38] sm:$0xff] }
 0x472   : > { %v3970_v33 = vmax.f32 %v3957_v4, 0.0  ;;  %v3913_v2 = vadd.f32 %v3886_v9, %v3792_v58  ;;  %v4454_v34 = vrot.slane %v4452_v39, 4  ;;  %v3067_v58 = vadd.f32 %v10545_v27, %v10537_v25 }
 0x473   : > { %v4191_v35 = vsel %vm538_vm3, %v4182_v48, %v10714_v8  ;;  %v4324_v23 = vsel %vm670_vm4, %v4320_v6, %v10716_v19  ;;  %v10725_v32 = vpack.c.b16 %v4069_v26, %v4068_v43  ;;  %v3565_v43 = vadd.f32 %v10622_v60, %v3447_v50 }
 0x474   : > { %v3983_v28 = vmul.f32 %v3970_v33, %v9449_v21  ;;  %v3929_v49 = vmul.f32 %v10660_v20, %v3913_v2  ;;  %8084 = vmatmul.msk.bf16.vlgmr.msrb.gmra.mxu0 %vm351_vm8, %v4191_v35  ;;  %8099 = vmatmul.msk.bf16.vlgmr.msrb.gmra.mxu1 %vm351_vm8, %v4324_v23  ;;  %v4455_v4 = vor.u32 %v4454_v34, %v4451_v37 }
 0x475   : > { %v4457_v22 = vshrl.u32 %v10725_v32, 16  ;;  %v4460_v48 = vshll.u32 %v10725_v32, 16  ;;  %v4010_v36 = vld [vmem:[#allocation2 + $0x28] sm:$0xff]  ;;  %v3687_v2 = vadd.f32 %v10616_v12, %v3565_v43 }
 0x476   : > { %3996 = vst.msk [vmem:[#allocation2 + $0x30] sm:$0xff] %vm351_vm8, %v3983_v28  ;;  %v3945_v15 = vadd.f32 %v10666_v18, %v3929_v49  ;;  %v4026_v6 = vpack.c.bf16 %v4010_v36, %v4010_v36 }
 0x477   : > { %v4459_v55 = vrot.slane %v4457_v22, 3  ;;  %v4462_v63 = vrot.slane %v4460_v48, 4  ;;  %v4814_v45 = vrot.slane %v4460_v48, 1  ;;  %v5040_v53 = vrot.slane %v4457_v22, 1 }
 0x478   : > { %v3958_v44 = vadd.f32 %v8718_v1, %v3945_v15  ;;  %v4070_v14 = vunpack.c.l.b16 %v4026_v6  ;;  %v5041_v29 = vrot.slane %v4460_v48, 2  ;;  %v3794_v43 = vadd.f32 %v10626_v42, %v3687_v2  ;;  %v8719_v15 = vld [vmem:[#allocation2 + $0x40] sm:$0xff] }
 0x479   : > { %v3889_v3 = vpop.f32.mrf.mxu2  ;;  %v10739_v30 = vor.u32 %v4462_v63, %v4459_v55  ;;  %v10741_v60 = vor.u32 %v4814_v45, %v4457_v22 }
 0x47a   : > { %v3971_v39 = vmax.f32 %v3958_v44, 0.0  ;;  %v3914_v9 = vadd.f32 %v3889_v3, %v10620_v59  ;;  %v10744_v11 = vpack.c.b16 %v4070_v14, %v4069_v26  ;;  %v10746_v33 = vor.u32 %v5041_v29, %v5040_v53 }
 0x47b   : > { %v4464_v35 = vsel %vm670_vm4, %v4455_v4, %v10739_v30  ;;  %v3195_v59 = vadd.f32 %v10535_v10, %v3067_v58 }
 0x47c   : > { %v3984_v25 = vmul.f32 %v3971_v39, %v9483_v52  ;;  %v3930_v27 = vmul.f32 %v10660_v20, %v3914_v9  ;;  %8114 = vmatmul.msk.bf16.vlgmr.msra.gmra.mxu2 %vm351_vm8, %v4464_v35  ;;  %v4089_v23 = vrot.slane %v10744_v11, 3  ;;  %v4193_v50 = vshrl.u32 %v10744_v11, 16 }
 0x47d   : > { %v4196_v26 = vshll.u32 %v10744_v11, 16  ;;  %v4011_v28 = vld [vmem:[#allocation2 + $0x30] sm:$0xff]  ;;  %v3360_v1 = vadd.f32 %v10552_v40, %v3195_v59  ;;  %v4933_v35 = vrot.slane %v10725_v32, 1 }
 0x47e   : > { %3997 = vst.msk [vmem:[#allocation2 + $0x38] sm:$0xff] %vm351_vm8, %v3984_v25  ;;  %v3946_v12 = vadd.f32 %v10666_v18, %v3930_v27  ;;  %v4090_v49 = vsel %vm455_vm1, %v4087_v54, %v4089_v23  ;;  %v4195_v37 = vrot.slane %v4193_v50, 2  ;;  %v4325_v34 = vrot.slane %v4193_v50, 3 }
 0x47f   : > { %8070 = vmatmul.msk.bf16.gmra.mxu3 %vm351_vm8, %v4090_v49  ;;  %v4198_v22 = vrot.slane %v4196_v26, 3  ;;  %v4326_v48 = vrot.slane %v4196_v26, 4  ;;  %v4027_v10 = vpack.c.bf16 %v4011_v28, %v4011_v28  ;;  %v4695_v36 = vrot.slane %v4196_v26, 1  ;;  %v8720_v28 = vld [vmem:[#allocation2 + $0x48] sm:$0xff] }
 0x480   : > { %v3959_v6 = vadd.f32 %v8719_v15, %v3946_v12  ;;  %v3449_v39 = vadd.f32 %v10631_v62, %v3360_v1 }
 0x481   : > { %v3891_v55 = vpop.f32.mrf.mxu2  ;;  %v10767_v63 = vor.u32 %v4198_v22, %v4195_v37  ;;  %v10769_v45 = vor.u32 %v4326_v48, %v4325_v34  ;;  %v4071_v53 = vunpack.c.l.b16 %v4027_v10  ;;  %v10773_v54 = vsel %vm1010_vm5, %v10718_v24, %v4695_v36 }
 0x482   : > { %v3972_v44 = vmax.f32 %v3959_v6, 0.0  ;;  %v3915_v29 = vadd.f32 %v3891_v55, %v3794_v43  ;;  %v10776_v58 = vor.u32 %v4695_v36, %v4193_v50 }
 0x483   : > { %v4200_v42 = vsel %vm538_vm3, %v10714_v8, %v10767_v63  ;;  %v4328_v3 = vsel %vm670_vm4, %v10716_v19, %v10769_v45  ;;  %v10784_v4 = vpack.c.b16 %v4071_v53, %v4070_v14  ;;  %v3567_v14 = vadd.f32 %v10635_v5, %v3449_v39 }
 0x484   : > { %v3985_v24 = vmul.f32 %v3972_v44, %v9511_v41  ;;  %v3931_v40 = vmul.f32 %v10660_v20, %v3915_v29  ;;  %8085 = vmatmul.msk.bf16.gmra.mxu0 %vm351_vm8, %v4200_v42  ;;  %8100 = vmatmul.msk.bf16.gmra.mxu1 %vm351_vm8, %v4328_v3  ;;  %v3072_v5 = vadd.f32 %v10564_v16, %v10559_v13  ;;  %v12660_v16 = vld [vmem:[#allocation7_spill] sm:$0xff] }
 0x485   : > { %v4466_v9 = vshrl.u32 %v10784_v4, 16  ;;  %v4469_v8 = vshll.u32 %v10784_v4, 16  ;;  %v4012_v2 = vld [vmem:[#allocation2 + $0x38] sm:$0xff]  ;;  %v4934_v19 = vrot.slane %v10784_v4, 1  ;;  %v3689_v55 = vadd.f32 %v10629_v61, %v3567_v14 }
 0x486   : > { %3998 = vst.msk [vmem:[#allocation2 + $0x40] sm:$0xff] %vm351_vm8, %v3985_v24  ;;  %v3947_v62 = vadd.f32 %v10666_v18, %v3931_v40  ;;  %v4028_v25 = vpack.c.bf16 %v4012_v2, %v4012_v2  ;;  %v12662_v14 = vld [vmem:[#allocation16_spill] sm:$0xff] }
 0x487   : > { %v4468_v27 = vrot.slane %v4466_v9, 3  ;;  %v4471_v50 = vrot.slane %v4469_v8, 4  ;;  %v4816_v59 = vrot.slane %v4469_v8, 1  ;;  %v10801_v26 = vsel %vm1227_vm6, %v4933_v35, %v4934_v19 }
 0x488   : > { %v3960_v12 = vadd.f32 %v8720_v28, %v3947_v62  ;;  %v4072_v32 = vunpack.c.l.b16 %v4028_v25  ;;  %v5043_v49 = vrot.slane %v4466_v9, 1  ;;  %v5044_v37 = vrot.slane %v4469_v8, 2  ;;  %v8721_v25 = vld [vmem:[#allocation2 + $0x50] sm:$0xff] }
 0x489   : > { %v3894_v34 = vpop.f32.mrf.mxu2  ;;  %v10805_v22 = vor.u32 %v4471_v50, %v4468_v27  ;;  %v10809_v48 = vsel %vm1010_vm5, %v10741_v60, %v4816_v59  ;;  %v10811_v10 = vor.u32 %v4816_v59, %v4466_v9  ;;  %v8546_v9 = vld [vmem:[#allocation4 + $0x160] sm:$0xff]  ;;  %v3796_v62 = vadd.f32 %v12662_v14, %v3689_v55 }
 0x48a   : > { %v3973_v36 = vmax.f32 %v3960_v12, 0.0  ;;  %v3916_v43 = vadd.f32 %v3894_v34, %v10633_v38  ;;  %v10814_v15 = vpack.c.b16 %v4072_v32, %v4071_v53  ;;  %v10816_v6 = vor.u32 %v5044_v37, %v5043_v49  ;;  %v12661_v53 = vld [vmem:[#allocation15_spill] sm:$0xff]  ;;  %4639 = vmatpush.bf16.msra.mxu3 %v8546_v9  ;;  %v12663_v49 = vld [vmem:[#allocation13_spill] sm:$0xff] }
 0x48b   : > { %v4473_v13 = vsel %vm670_vm4, %v10739_v30, %v10805_v22  ;;  %v3197_v29 = vadd.f32 %v12661_v53, %v3072_v5 }
 0x48c   : > { %v3986_v1 = vmul.f32 %v3973_v36, %v12660_v16  ;;  %v3932_v60 = vmul.f32 %v10660_v20, %v3916_v43  ;;  %8115 = vmatmul.msk.bf16.gmra.mxu2 %vm351_vm8, %v4473_v13  ;;  %v4091_v44 = vrot.slane %v10814_v15, 3  ;;  %v4202_v38 = vshrl.u32 %v10814_v15, 16 }
 0x48d   : > { %v4205_v42 = vshll.u32 %v10814_v15, 16  ;;  %v4013_v3 = vld [vmem:[#allocation2 + $0x40] sm:$0xff]  ;;  %v10832_v61 = vsel %vm1323_vm7, %v10746_v33, %v10816_v6  ;;  %v3362_v37 = vadd.f32 %v12663_v49, %v3197_v29 }
 0x48e   : > { %3999 = vst.msk [vmem:[#allocation2 + $0x48] sm:$0xff] %vm351_vm8, %v3986_v1  ;;  %v3948_v30 = vadd.f32 %v10666_v18, %v3932_v60  ;;  %v4092_v39 = vsel %vm455_vm1, %v4089_v23, %v4091_v44  ;;  %v4204_v24 = vrot.slane %v4202_v38, 2  ;;  %v4329_v40 = vrot.slane %v4202_v38, 3  ;;  %v12664_v60 = vld [vmem:[#allocation8_spill] sm:$0xff] }
 0x48f   : > { %8071 = vmatmul.msk.bf16.gmra.mxu3 %vm351_vm8, %v4092_v39  ;;  %v4207_v8 = vrot.slane %v4205_v42, 3  ;;  %v4330_v2 = vrot.slane %v4205_v42, 4  ;;  %v4029_v35 = vpack.c.bf16 %v4013_v3, %v4013_v3  ;;  %v4698_v33 = vrot.slane %v4205_v42, 1 }
 0x490   : > { %v3961_v27 = vadd.f32 %v8721_v25, %v3948_v30  ;;  %v3451_v1 = vadd.f32 %v10644_v46, %v3362_v37 }
 0x491   : > { %v3896_v50 = vpop.f32.mrf.mxu2  ;;  %v10843_v59 = vor.u32 %v4207_v8, %v4204_v24  ;;  %v10845_v28 = vor.u32 %v4330_v2, %v4329_v40  ;;  %v4073_v23 = vunpack.c.l.b16 %v4029_v35  ;;  %v10849_v12 = vsel %vm1010_vm5, %v10776_v58, %v4698_v33  ;;  %v8722_v40 = vld [vmem:[#allocation2 + $0x58] sm:$0xff] }
 0x492   : > { %v3974_v5 = vmax.f32 %v3961_v27, 0.0  ;;  %v3917_v34 = vadd.f32 %v3896_v50, %v3796_v62  ;;  %v4700_v36 = vor.u32 %v4698_v33, %v4202_v38  ;;  %v12665_v50 = vld [vmem:[#allocation14_spill] sm:$0xff] }
 0x493   : > { %v4209_v43 = vsel %vm538_vm3, %v10767_v63, %v10843_v59  ;;  %v4332_v55 = vsel %vm670_vm4, %v10769_v45, %v10845_v28  ;;  %v10858_v13 = vpack.c.b16 %v4073_v23, %v4072_v32  ;;  %v3569_v45 = vadd.f32 %v10648_v17, %v3451_v1 }
 0x494   : > { %v3987_v58 = vmul.f32 %v3974_v5, %v12664_v60  ;;  %v3933_v53 = vmul.f32 %v10660_v20, %v3917_v34  ;;  %8086 = vmatmul.msk.bf16.gmra.mxu0 %vm351_vm8, %v4209_v43  ;;  %8101 = vmatmul.msk.bf16.gmra.mxu1 %vm351_vm8, %v4332_v55  ;;  %v12666_v5 = vld [vmem:[#allocation9_spill] sm:$0xff] }
 0x495   : > { %v4475_v38 = vshrl.u32 %v10858_v13, 16  ;;  %v4478_v63 = vshll.u32 %v10858_v13, 16  ;;  %v4014_v29 = vld [vmem:[#allocation2 + $0x48] sm:$0xff]  ;;  %v4936_v42 = vrot.slane %v10858_v13, 1  ;;  %v3691_v49 = vadd.f32 %v12665_v50, %v3569_v45 }
 0x496   : > { %4000 = vst.msk [vmem:[#allocation2 + $0x50] sm:$0xff] %vm351_vm8, %v3987_v58  ;;  %v3949_v46 = vadd.f32 %v10666_v18, %v3933_v53  ;;  %v4030_v32 = vpack.c.bf16 %v4014_v29, %v4014_v29 }
 0x497   : > { %v4477_v3 = vrot.slane %v4475_v38, 3  ;;  %v4480_v30 = vrot.slane %v4478_v63, 4  ;;  %v4819_v39 = vrot.slane %v4478_v63, 1  ;;  %v10876_v24 = vsel %vm1227_vm6, %v4934_v19, %v4936_v42 }
 0x498   : > { %v3962_v9 = vadd.f32 %v8722_v40, %v3949_v46  ;;  %v4074_v8 = vunpack.c.l.b16 %v4030_v32  ;;  %v5047_v2 = vrot.slane %v4475_v38, 1  ;;  %v5048_v17 = vrot.slane %v4478_v63, 2 }
 0x499   : > { %v3899_v35 = vpop.f32.mrf.mxu2  ;;  %v10878_v33 = vor.u32 %v4480_v30, %v4477_v3  ;;  %v10882_v14 = vsel %vm1010_vm5, %v10811_v10, %v4819_v39  ;;  %v4821_v62 = vor.u32 %v4819_v39, %v4475_v38  ;;  %v8723_v3 = vld [vmem:[#allocation2 + $0x60] sm:$0xff] }
 0x49a   : > { %v3975_v25 = vmax.f32 %v3962_v9, 0.0  ;;  %v3918_v27 = vadd.f32 %v3899_v35, %v10646_v51  ;;  %v10885_v4 = vpack.c.b16 %v4074_v8, %v4073_v23  ;;  %v10887_v19 = vor.u32 %v5048_v17, %v5047_v2 }
 0x49b   : > { %v4482_v37 = vsel %vm670_vm4, %v10805_v22, %v10878_v33 }
 0x49c   : > { %v3988_v34 = vmul.f32 %v3975_v25, %v12666_v5  ;;  %v3934_v43 = vmul.f32 %v10660_v20, %v3918_v27  ;;  %8116 = vmatmul.msk.bf16.gmra.mxu2 %vm351_vm8, %v4482_v37  ;;  %v4093_v10 = vrot.slane %v10885_v4, 3  ;;  %v4211_v51 = vshrl.u32 %v10885_v4, 16  ;;  %v12668_v37 = vld [vmem:[#allocation10_spill] sm:$0xff] }
 0x49d   : > { %v4214_v23 = vshll.u32 %v10885_v4, 16  ;;  %v4015_v55 = vld [vmem:[#allocation2 + $0x50] sm:$0xff]  ;;  %v10902_v1 = vsel %vm1323_vm7, %v10816_v6, %v10887_v19  ;;  %v12667_v6 = vld [vmem:[#allocation17_spill] sm:$0xff] }
 0x49e   : > { %4001 = vst.msk [vmem:[#allocation2 + $0x58] sm:$0xff] %vm351_vm8, %v3988_v34  ;;  %v3950_v22 = vadd.f32 %v10666_v18, %v3934_v43  ;;  %v4094_v58 = vsel %vm455_vm1, %v4091_v44, %v4093_v10  ;;  %v4213_v53 = vrot.slane %v4211_v51, 2  ;;  %v4333_v38 = vrot.slane %v4211_v51, 3 }
 0x49f   : > { %8072 = vmatmul.msk.bf16.gmra.mxu3 %vm351_vm8, %v4094_v58  ;;  %v4216_v63 = vrot.slane %v4214_v23, 3  ;;  %v4334_v29 = vrot.slane %v4214_v23, 4  ;;  %v4031_v45 = vpack.c.bf16 %v4015_v55, %v4015_v55  ;;  %v4701_v46 = vrot.slane %v4214_v23, 1 }
 0x4a0   : > { %v3798_v32 = vadd.f32 %v12667_v6, %v3691_v49  ;;  %v3963_v30 = vadd.f32 %v8723_v3, %v3950_v22 }
 0x4a1   : > { %v3901_v39 = vpop.f32.mrf.mxu2  ;;  %v10913_v40 = vor.u32 %v4216_v63, %v4213_v53  ;;  %v10915_v9 = vor.u32 %v4334_v29, %v4333_v38  ;;  %v4075_v2 = vunpack.c.l.b16 %v4031_v45  ;;  %v10918_v44 = vsel %vm1010_vm5, %v4700_v36, %v4701_v46  ;;  %v8724_v38 = vld [vmem:[#allocation2 + $0x68] sm:$0xff] }
 0x4a2   : > { %v3976_v17 = vmax.f32 %v3963_v30, 0.0  ;;  %v3919_v35 = vadd.f32 %v3901_v39, %v3798_v32  ;;  %v4703_v25 = vor.u32 %v4701_v46, %v4211_v51 }
 0x4a3   : > { %v4218_v27 = vsel %vm538_vm3, %v10843_v59, %v10913_v40  ;;  %v4336_v50 = vsel %vm670_vm4, %v10845_v28, %v10915_v9  ;;  %v10926_v49 = vpack.c.b16 %v4075_v2, %v4074_v8 }
 0x4a4   : > { %v3989_v34 = vmul.f32 %v3976_v17, %v12668_v37  ;;  %v3935_v43 = vmul.f32 %v10660_v20, %v3919_v35  ;;  %8087 = vmatmul.msk.bf16.gmra.mxu0 %vm351_vm8, %v4218_v27  ;;  %8102 = vmatmul.msk.bf16.gmra.mxu1 %vm351_vm8, %v4336_v50  ;;  %v12669_v27 = vld [vmem:[#allocation11_spill] sm:$0xff] }
 0x4a5   : > { %v4484_v36 = vshrl.u32 %v10926_v49, 16  ;;  %v4487_v51 = vshll.u32 %v10926_v49, 16  ;;  %v4016_v23 = vld [vmem:[#allocation2 + $0x58] sm:$0xff]  ;;  %v4938_v59 = vrot.slane %v10926_v49, 1 }
 0x4a6   : > { %4002 = vst.msk [vmem:[#allocation2 + $0x60] sm:$0xff] %vm351_vm8, %v3989_v34  ;;  %v3951_v28 = vadd.f32 %v10666_v18, %v3935_v43  ;;  %v4032_v8 = vpack.c.bf16 %v4016_v23, %v4016_v23 }
 0x4a7   : > { %v4486_v55 = vrot.slane %v4484_v36, 3  ;;  %v4489_v22 = vrot.slane %v4487_v51, 4  ;;  %v4822_v58 = vrot.slane %v4487_v51, 1  ;;  %v10942_v53 = vsel %vm1227_vm6, %v4936_v42, %v4938_v59 }
 0x4a8   : > { %v3964_v63 = vadd.f32 %v8724_v38, %v3951_v28  ;;  %v4076_v29 = vunpack.c.l.b16 %v4032_v8  ;;  %v5051_v45 = vrot.slane %v4484_v36, 1  ;;  %v5052_v30 = vrot.slane %v4487_v51, 2 }
 0x4a9   : > { %v3904_v46 = vpop.f32.mrf.mxu2  ;;  %v10944_v6 = vor.u32 %v4489_v22, %v4486_v55  ;;  %v10947_v32 = vsel %vm1010_vm5, %v4821_v62, %v4822_v58  ;;  %v4824_v3 = vor.u32 %v4822_v58, %v4484_v36  ;;  %v8725_v58 = vld [vmem:[#allocation2 + $0x70] sm:$0xff] }
 0x4aa   : > { %v3977_v39 = vmax.f32 %v3964_v63, 0.0  ;;  %v3920_v17 = vadd.f32 %v3904_v46, %v10653_v31  ;;  %v10950_v35 = vpack.c.b16 %v4076_v29, %v4075_v2  ;;  %v10955_v42 = vor.u32 %v5052_v30, %v5051_v45 }
 0x4ab   : > { %v4491_v13 = vsel %vm670_vm4, %v10878_v33, %v10944_v6 }
 0x4ac   : > { %v3990_v50 = vmul.f32 %v3977_v39, %v12669_v27  ;;  %v3936_v34 = vmul.f32 %v10660_v20, %v3920_v17  ;;  %8117 = vmatmul.msk.bf16.gmra.mxu2 %vm351_vm8, %v4491_v13  ;;  %v4095_v62 = vrot.slane %v10950_v35, 3  ;;  %v4220_v43 = vshrl.u32 %v10950_v35, 16 }
 0x4ad   : > { %v4223_v31 = vshll.u32 %v10950_v35, 16  ;;  %v4017_v2 = vld [vmem:[#allocation2 + $0x60] sm:$0xff]  ;;  %v10966_v36 = vsel %vm1323_vm7, %v10887_v19, %v10955_v42  ;;  %v4020_v19 = vld [vmem:[#allocation2 + $0x78] sm:$0xff] }
 0x4ae   : > { %4003 = vst.msk [vmem:[#allocation2 + $0x68] sm:$0xff] %vm351_vm8, %v3990_v50  ;;  %v3952_v33 = vadd.f32 %v10666_v18, %v3936_v34  ;;  %v4096_v20 = vsel %vm455_vm1, %v4093_v10, %v4095_v62  ;;  %v4222_v51 = vrot.slane %v4220_v43, 2  ;;  %v4337_v23 = vrot.slane %v4220_v43, 3 }
 0x4af   : > { %8073 = vmatmul.msk.bf16.gmra.mxu3 %vm351_vm8, %v4096_v20  ;;  %v4225_v28 = vrot.slane %v4223_v31, 3  ;;  %v4338_v8 = vrot.slane %v4223_v31, 4  ;;  %v4033_v55 = vpack.c.bf16 %v4017_v2, %v4017_v2  ;;  %v4704_v22 = vrot.slane %v4223_v31, 1  ;;  %v12670_v31 = vld [vmem:[#allocation12_spill] sm:$0xff] }
 0x4b0   : > { %v3965_v38 = vadd.f32 %v8725_v58, %v3952_v33  ;;  %v4036_v17 = vpack.c.bf16 %v4020_v19, %v4020_v19 }
 0x4b1   : > { %v10976_v63 = vor.u32 %v4225_v28, %v4222_v51  ;;  %v10978_v18 = vor.u32 %v4338_v8, %v4337_v23  ;;  %v4077_v45 = vunpack.c.l.b16 %v4033_v55  ;;  %v3906_v46 = vpop.f32.mrf.mxu2  ;;  %v10981_v30 = vsel %vm1010_vm5, %v4703_v25, %v4704_v22 }
 0x4b2   : > { %v3978_v10 = vmax.f32 %v3965_v38, 0.0  ;;  %v4706_v39 = vor.u32 %v4704_v22, %v4220_v43  ;;  %v4812_v51 = vunpack.c.l.b16 %v4036_v17 }
 0x4b3   : > { %v4227_v13 = vsel %vm538_vm3, %v10913_v40, %v10976_v63  ;;  %v4340_v50 = vsel %vm670_vm4, %v10915_v9, %v10978_v18  ;;  %v10989_v34 = vpack.c.b16 %v4077_v45, %v4076_v29 }
 0x4b4   : > { %v3991_v2 = vmul.f32 %v3978_v10, %v12670_v31  ;;  %8088 = vmatmul.msk.bf16.gmra.mxu0 %vm351_vm8, %v4227_v13  ;;  %8103 = vmatmul.msk.bf16.gmra.mxu1 %vm351_vm8, %v4340_v50  ;;  %v11017_v17 = vpack.c.b16 %v4812_v51, %v4812_v51  ;;  %v8549_v50 = vld [vmem:[#allocation4 + $0x178] sm:$0xff] }
 0x4b5   : > { %v4493_v25 = vshrl.u32 %v10989_v34, 16  ;;  %v4496_v43 = vshll.u32 %v10989_v34, 16  ;;  %v4018_v33 = vld [vmem:[#allocation2 + $0x68] sm:$0xff]  ;;  %v12619_v20 = vrot.slane %v10989_v34, 1  ;;  %4756 = vmatpush.bf16.msra.mxu0 %v8549_v50 }
 0x4b6   : > { %4004 = vst.msk [vmem:[#allocation2 + $0x70] sm:$0xf] %vm368_vm9, %v3991_v2  ;;  %v4034_v40 = vpack.c.bf16 %v4018_v33, %v4018_v33  ;;  %v8551_v2 = vld [vmem:[#allocation4 + $0x188] sm:$0xff]  ;;  %v12621_v31 = vshrl.u32 %v11017_v17, 16 }
 0x4b7   : > { %v4495_v9 = vrot.slane %v4493_v25, 3  ;;  %v4498_v29 = vrot.slane %v4496_v43, 4  ;;  %v4825_v23 = vrot.slane %v4496_v43, 1  ;;  %v11003_v28 = vsel %vm1227_vm6, %v4938_v59, %v12619_v20  ;;  %4878 = vmatpush.bf16.msra.mxu1 %v8551_v2 }
 0x4b8   : > { %v4078_v8 = vunpack.c.l.b16 %v4034_v40  ;;  %v5055_v55 = vrot.slane %v4493_v25, 1  ;;  %v5056_v22 = vrot.slane %v4496_v43, 2  ;;  %v12622_v20 = vshll.u32 %v11017_v17, 16 }
 0x4b9   : > { %v11005_v19 = vor.u32 %v4498_v29, %v4495_v9  ;;  %v11008_v58 = vsel %vm1010_vm5, %v4824_v3, %v4825_v23  ;;  %v4827_v38 = vor.u32 %v4825_v23, %v4493_v25  ;;  %v8555_v23 = vld [vmem:[#allocation4 + $0x1a8] sm:$0xff] }
 0x4ba   : > { %v11010_v46 = vpack.c.b16 %v4078_v8, %v4077_v45  ;;  %v11012_v10 = vor.u32 %v5056_v22, %v5055_v55  ;;  %v8553_v45 = vld [vmem:[#allocation4 + $0x198] sm:$0xff]  ;;  %v8550_v55 = vld [vmem:[#allocation4 + $0x180] sm:$0xff]  ;;  %5106 = vmatpush.bf16.msrb.mxu3 %v8555_v23 }
 0x4bb   : > { %v4500_v49 = vsel %vm670_vm4, %v10944_v6, %v11005_v19  ;;  %4985 = vmatpush.bf16.msrb.mxu2 %v8553_v45  ;;  %4879 = vmatpush.bf16.msra.mxu1 %v8550_v55 }
 0x4bc   : > { %8118 = vmatmul.msk.bf16.gmra.mxu2 %vm351_vm8, %v4500_v49  ;;  %v12620_v59 = vrot.slane %v11010_v46, 3  ;;  %v4229_v13 = vshrl.u32 %v11010_v46, 16  ;;  %v4232_v3 = vshll.u32 %v11010_v46, 16  ;;  %v11026_v25 = vsel %vm1323_vm7, %v10955_v42, %v11012_v10  ;;  %v8548_v42 = vld [vmem:[#allocation4 + $0x170] sm:$0xff] }
 0x4bd   : > { %v4019_v43 = vld [vmem:[#allocation2 + $0x70] sm:$0xff]  ;;  %4757 = vmatpush.bf16.msra.mxu0 %v8548_v42 }
 0x4be   : > { %v4098_v6 = vsel %vm455_vm1, %v4095_v62, %v12620_v59  ;;  %v4231_v33 = vrot.slane %v4229_v13, 2  ;;  %v4234_v40 = vrot.slane %v4232_v3, 3  ;;  %v4341_v51 = vrot.slane %v4229_v13, 3 }
 0x4bf   : > { %8074 = vmatmul.msk.bf16.gmra.mxu3 %vm351_vm8, %v4098_v6  ;;  %v4342_v9 = vrot.slane %v4232_v3, 4  ;;  %v4035_v29 = vpack.c.bf16 %v4019_v43, %v4019_v43  ;;  %v4707_v22 = vrot.slane %v4232_v3, 1 }
 0x4c0   : > { %v4235_v49 = vor.u32 %v4234_v40, %v4231_v33  ;;  %v8552_v33 = vld [vmem:[#allocation4 + $0x190] sm:$0xff] }
 0x4c1   : > { %v4343_v62 = vor.u32 %v4342_v9, %v4341_v51  ;;  %v4440_v59 = vunpack.c.l.b16 %v4035_v29  ;;  %v11037_v50 = vsel %vm1010_vm5, %v4706_v39, %v4707_v22  ;;  %v4709_v2 = vor.u32 %v4707_v22, %v4229_v13  ;;  %4986 = vmatpush.bf16.msrb.mxu2 %v8552_v33 }
 0x4c2   : > { %v4236_v43 = vsel %vm538_vm3, %v10976_v63, %v4235_v49  ;;  %v5063_v39 = vrot.slane %v12621_v31, 1  ;;  %v5064_v63 = vrot.slane %v12622_v20, 2  ;;  %v12671_v29 = vrot.slane %v10989_v34, 1 }
 0x4c3   : > { %v4344_v3 = vsel %vm670_vm4, %v10978_v18, %v4343_v62  ;;  %v11043_v45 = vpack.c.b16 %v4440_v59, %v4078_v8  ;;  %v11045_v6 = vpack.c.b16 %v4440_v59, %v4440_v59 }
 0x4c4   : > { %8089 = vmatmul.msk.bf16.gmra.mxu0 %vm351_vm8, %v4236_v43  ;;  %8104 = vmatmul.msk.bf16.gmra.mxu1 %vm351_vm8, %v4344_v3  ;;  %v11066_v43 = vor.u32 %v5064_v63, %v5063_v39  ;;  %v12672_v63 = vrot.slane %v11010_v46, 3 }
 0x4c5   : > { %v4502_v13 = vshrl.u32 %v11043_v45, 16  ;;  %v4505_v40 = vshll.u32 %v11043_v45, 16  ;;  %v4942_v18 = vrot.slane %v11043_v45, 1  ;;  %v4710_v8 = vshll.u32 %v11045_v6, 16 }
 0x4c7   : > { %v4504_v59 = vrot.slane %v4502_v13, 3  ;;  %v4507_v51 = vrot.slane %v4505_v40, 4  ;;  %v4828_v9 = vrot.slane %v4505_v40, 1  ;;  %v11062_v23 = vsel %vm1227_vm6, %v12671_v29, %v4942_v18 }
 0x4c8   : > { %v11064_v42 = vrot.slane %v4710_v8, 1  ;;  %v5059_v55 = vrot.slane %v4502_v13, 1  ;;  %v5060_v22 = vrot.slane %v4505_v40, 2 }
 0x4c9   : > { %v4508_v3 = vor.u32 %v4507_v51, %v4504_v59  ;;  %v11069_v31 = vsel %vm1010_vm5, %v4827_v38, %v4828_v9  ;;  %v11071_v33 = vor.u32 %v4828_v9, %v4502_v13 }
 0x4ca   : > { %v11075_v20 = vsel %vm1010_vm5, %v4709_v2, %v11064_v42  ;;  %v5061_v34 = vor.u32 %v5060_v22, %v5059_v55 }
 0x4cb   : > { %v4509_v29 = vsel %vm670_vm4, %v11005_v19, %v4508_v3 }
 0x4cc   : > { %8119 = vmatmul.msk.bf16.gmra.mxu2 %vm351_vm8, %v4509_v29  ;;  %v11082_v39 = vsel %vm1323_vm7, %v11012_v10, %v5061_v34  ;;  %v11086_v38 = vsel %vm1323_vm7, %v5061_v34, %v11066_v43 }
 0x4cf   : > { %8075 = vmatmul.msk.bf16.gmra.mxu3 %vm351_vm8, %v12672_v63 }
 0x4d4   : > { %8090 = vmatmul.msk.bf16.gmra.mxu0 %vm351_vm8, %v4235_v49  ;;  %8105 = vmatmul.msk.bf16.gmra.mxu1 %vm351_vm8, %v4343_v62 }
 0x4dc   : > { %8120 = vmatmul.msk.bf16.gmra.mxu2 %vm351_vm8, %v4508_v3 }
 0x4df   : > { %8129 = vmatmul.msk.bf16.vlgmr.msra.gmra.mxu3 %vm351_vm8, %v10698_v0 }
 0x4e4   : > { %8144 = vmatmul.msk.bf16.vlgmr.msra.gmra.mxu0 %vm351_vm8, %v10773_v54  ;;  %8159 = vmatmul.msk.bf16.vlgmr.msra.gmra.mxu1 %vm351_vm8, %v10809_v48  ;;  %v8554_v54 = vld [vmem:[#allocation4 + $0x1a0] sm:$0xff] }
 0x4e5   : > { %5107 = vmatpush.bf16.msrb.mxu3 %v8554_v54 }
 0x4ec   : > { %8174 = vmatmul.msk.bf16.vlgmr.msrb.gmra.mxu2 %vm351_vm8, %v10801_v26 }
 0x4ef   : > { %8130 = vmatmul.msk.bf16.gmra.mxu3 %vm351_vm8, %v10744_v11 }
 0x4f1   : > { %v4279_v19 = vpop.f32.mrf.mxu0  ;;  %v4387_v10 = vpop.f32.mrf.mxu1 }
 0x4f2   : > { %v4141_v49 = vpop.f32.mrf.mxu3 }
 0x4f3   : > { %v4280_v62 = vadd.f32 %v4279_v19, %v4141_v49 }
 0x4f4   : > { %8145 = vmatmul.msk.bf16.gmra.mxu0 %vm351_vm8, %v10849_v12  ;;  %8160 = vmatmul.msk.bf16.gmra.mxu1 %vm351_vm8, %v10882_v14 }
 0x4f5   : > { %v4421_v0 = vadd.f32 %v4387_v10, %v4280_v62 }
 0x4f9   : > { %v4281_v2 = vpop.f32.mrf.mxu0  ;;  %v4389_v48 = vpop.f32.mrf.mxu1 }
 0x4fa   : > { %v4143_v13 = vpop.f32.mrf.mxu3 }
 0x4fb   : > { %v4282_v26 = vadd.f32 %v4281_v2, %v4143_v13 }
 0x4fc   : > { %8175 = vmatmul.msk.bf16.gmra.mxu2 %vm351_vm8, %v10876_v24 }
 0x4fd   : > { %v4422_v11 = vadd.f32 %v4389_v48, %v4282_v26 }
 0x4ff   : > { %v4552_v40 = vpop.f32.mrf.mxu2  ;;  %8131 = vmatmul.msk.bf16.gmra.mxu3 %vm351_vm8, %v10814_v15 }
 0x500   : > { %v11112_v8 = vadd.f32 %v4552_v40, %v4421_v0 }
 0x501   : > { %v4284_v12 = vpop.f32.mrf.mxu0  ;;  %v4392_v59 = vpop.f32.mrf.mxu1 }
 0x502   : > { %v4146_v14 = vpop.f32.mrf.mxu3 }
 0x503   : > { %v4285_v51 = vadd.f32 %v4284_v12, %v4146_v14 }
 0x504   : > { %8146 = vmatmul.msk.bf16.gmra.mxu0 %vm351_vm8, %v10918_v44  ;;  %8161 = vmatmul.msk.bf16.gmra.mxu1 %vm351_vm8, %v10947_v32 }
 0x505   : > { %v4423_v9 = vadd.f32 %v4392_v59, %v4285_v51 }
 0x507   : > { %v4554_v55 = vpop.f32.mrf.mxu2 }
 0x508   : > { %v11118_v24 = vadd.f32 %v4554_v55, %v4422_v11 }
 0x509   : > { %v4286_v22 = vpop.f32.mrf.mxu0  ;;  %v4394_v3 = vpop.f32.mrf.mxu1 }
 0x50a   : > { %v4148_v34 = vpop.f32.mrf.mxu3 }
 0x50b   : > { %v4287_v15 = vadd.f32 %v4286_v22, %v4148_v34 }
 0x50c   : > { %8176 = vmatmul.msk.bf16.gmra.mxu2 %vm351_vm8, %v10942_v53 }
 0x50d   : > { %v4424_v29 = vadd.f32 %v4394_v3, %v4287_v15 }
 0x50f   : > { %v4557_v63 = vpop.f32.mrf.mxu2  ;;  %8132 = vmatmul.msk.bf16.gmra.mxu3 %vm351_vm8, %v10885_v4 }
 0x510   : > { %v11124_v44 = vadd.f32 %v4557_v63, %v4423_v9 }
 0x511   : > { %v4289_v19 = vpop.f32.mrf.mxu0  ;;  %v4397_v32 = vpop.f32.mrf.mxu1 }
 0x512   : > { %v4151_v10 = vpop.f32.mrf.mxu3 }
 0x513   : > { %v4290_v49 = vadd.f32 %v4289_v19, %v4151_v10  ;;  %v4714_v10 = vshrl.u32 %v11045_v6, 16 }
 0x514   : > { %8147 = vmatmul.msk.bf16.gmra.mxu0 %vm351_vm8, %v10981_v30  ;;  %8162 = vmatmul.msk.bf16.gmra.mxu1 %vm351_vm8, %v11008_v58 }
 0x515   : > { %v4425_v62 = vadd.f32 %v4397_v32, %v4290_v49  ;;  %v12674_v49 = vshrl.u32 %v11017_v17, 16  ;;  %v4716_v45 = vor.u32 %v4714_v10, %v11064_v42 }
 0x517   : > { %v4559_v0 = vpop.f32.mrf.mxu2 }
 0x518   : > { %v11130_v53 = vadd.f32 %v4559_v0, %v4424_v29 }
 0x519   : > { %v11132_v54 = vpop.f32.mrf.mxu0  ;;  %v11134_v2 = vpop.f32.mrf.mxu1 }
 0x51a   : > { %v11136_v4 = vpop.f32.mrf.mxu3 }
 0x51c   : > { %8177 = vmatmul.msk.bf16.gmra.mxu2 %vm351_vm8, %v11003_v28 }
 0x51f   : > { %v4562_v48 = vpop.f32.mrf.mxu2  ;;  %8133 = vmatmul.msk.bf16.gmra.mxu3 %vm351_vm8, %v10950_v35 }
 0x520   : > { %v11142_v30 = vadd.f32 %v4562_v48, %v4425_v62 }
 0x521   : > { %v4294_v58 = vpop.f32.mrf.mxu0  ;;  %v4402_v13 = vpop.f32.mrf.mxu1 }
 0x522   : > { %v4156_v26 = vpop.f32.mrf.mxu3 }
 0x523   : > { %v4295_v11 = vadd.f32 %v4294_v58, %v4156_v26 }
 0x524   : > { %8148 = vmatmul.msk.bf16.gmra.mxu0 %vm351_vm8, %v11037_v50  ;;  %8163 = vmatmul.msk.bf16.gmra.mxu1 %vm351_vm8, %v11069_v31  ;;  %v12673_v50 = vshll.u32 %v11017_v17, 16 }
 0x525   : > { %v4427_v40 = vadd.f32 %v4402_v13, %v4295_v11 }
 0x526   : > { %v4834_v51 = vrot.slane %v12673_v50, 1 }
 0x527   : > { %v11148_v12 = vpop.f32.mrf.mxu2 }
 0x528   : > { %v4835_v34 = vsel %vm1010_vm5, %v11071_v33, %v4834_v51  ;;  %v4838_v62 = vor.u32 %v12674_v49, %v4834_v51 }
 0x529   : > { %v11150_v28 = vpop.f32.mrf.mxu0  ;;  %v11152_v59 = vpop.f32.mrf.mxu1 }
 0x52a   : > { %v11154_v35 = vpop.f32.mrf.mxu3 }
 0x52c   : > { %8178 = vmatmul.msk.bf16.gmra.mxu2 %vm351_vm8, %v11062_v23 }
 0x52f   : > { %v4567_v14 = vpop.f32.mrf.mxu2  ;;  %8134 = vmatmul.msk.bf16.gmra.mxu3 %vm351_vm8, %v11010_v46  ;;  %v4944_v46 = vrot.slane %v11017_v17, 1 }
 0x530   : > { %v11162_v31 = vadd.f32 %v4567_v14, %v4427_v40 }
 0x531   : > { %v4299_v9 = vpop.f32.mrf.mxu0  ;;  %v4407_v55 = vpop.f32.mrf.mxu1  ;;  %v4945_v33 = vsel %vm1227_vm6, %v4942_v18, %v4944_v46 }
 0x532   : > { %v4161_v22 = vpop.f32.mrf.mxu3 }
 0x533   : > { %v4300_v3 = vadd.f32 %v4299_v9, %v4161_v22 }
 0x534   : > { %8149 = vmatmul.msk.bf16.gmra.mxu0 %vm351_vm8, %v11075_v20  ;;  %8164 = vmatmul.msk.bf16.gmra.mxu1 %vm351_vm8, %v4835_v34 }
 0x535   : > { %v4429_v23 = vadd.f32 %v4407_v55, %v4300_v3 }
 0x537   : > { %v11169_v15 = vpop.f32.mrf.mxu2 }
 0x539   : > { %v11172_v29 = vpop.f32.mrf.mxu0  ;;  %v11174_v63 = vpop.f32.mrf.mxu1 }
 0x53a   : > { %v11176_v19 = vpop.f32.mrf.mxu3 }
 0x53c   : > { %8179 = vmatmul.msk.bf16.gmra.mxu2 %vm351_vm8, %v4945_v33 }
 0x53f   : > { %v4572_v20 = vpop.f32.mrf.mxu2  ;;  %8135 = vmatmul.msk.bf16.gmra.mxu3 %vm351_vm8, %v11045_v6 }
 0x540   : > { %v11184_v32 = vadd.f32 %v4572_v20, %v4429_v23 }
 0x541   : > { %v4304_v0 = vpop.f32.mrf.mxu0  ;;  %v4412_v48 = vpop.f32.mrf.mxu1 }
 0x542   : > { %v4166_v58 = vpop.f32.mrf.mxu3 }
 0x543   : > { %v4305_v13 = vadd.f32 %v4304_v0, %v4166_v58  ;;  %v8559_v58 = vld [vmem:[#allocation4 + $0x1c8] sm:$0xff] }
 0x544   : > { %8150 = vmatmul.msk.bf16.gmra.mxu0 %vm351_vm8, %v4716_v45  ;;  %8165 = vmatmul.msk.bf16.gmra.mxu1 %vm351_vm8, %v4838_v62 }
 0x545   : > { %v4431_v18 = vadd.f32 %v4412_v48, %v4305_v13  ;;  %5360 = vmatpush.bf16.msrb.mxu0 %v8559_v58 }
 0x547   : > { %v11192_v26 = vpop.f32.mrf.mxu2 }
 0x549   : > { %v11194_v11 = vpop.f32.mrf.mxu0  ;;  %v11196_v40 = vpop.f32.mrf.mxu1 }
 0x54a   : > { %12675 = vst [vmem:[#allocation18_spill] sm:$0xff] %v11196_v40  ;;  %v11198_v6 = vpop.f32.mrf.mxu3 }
 0x54c   : > { %8180 = vmatmul.msk.bf16.gmra.mxu2 %vm351_vm8, %v4944_v46 }
 0x54f   : > { %v4577_v17 = vpop.f32.mrf.mxu2  ;;  %8189 = vmatmul.msk.bf16.vlgmr.msrb.gmra.mxu3 %vm351_vm8, %v10832_v61 }
 0x550   : > { %v11203_v42 = vadd.f32 %v4577_v17, %v4431_v18 }
 0x551   : > { %v4309_v14 = vpop.f32.mrf.mxu0  ;;  %v4417_v50 = vpop.f32.mrf.mxu1 }
 0x552   : > { %v4171_v51 = vpop.f32.mrf.mxu3 }
 0x553   : > { %v4310_v9 = vadd.f32 %v4309_v14, %v4171_v51 }
 0x555   : > { %v4433_v55 = vadd.f32 %v4417_v50, %v4310_v9 }
 0x557   : > { %v11205_v22 = vpop.f32.mrf.mxu2 }
 0x558   : > { %12676 = vst [vmem:[#allocation7_spill] sm:$0xff] %v11205_v22 }
 0x559   : > { %v4311_v3 = vpop.f32.mrf.mxu0  ;;  %v4419_v34 = vpop.f32.mrf.mxu1 }
 0x55a   : > { %v4173_v23 = vpop.f32.mrf.mxu3 }
 0x55f   : > { %v4582_v33 = vpop.f32.mrf.mxu2  ;;  %8190 = vmatmul.msk.bf16.gmra.mxu3 %vm351_vm8, %v10902_v1 }
 0x560   : > { %v11209_v46 = vadd.f32 %v4582_v33, %v4433_v55 }
 0x561   : > { %v4759_v20 = vpop.f32.mrf.mxu0  ;;  %v4881_v61 = vpop.f32.mrf.mxu1 }
 0x562   : > { %v4641_v10 = vpop.f32.mrf.mxu3 }
 0x563   : > { %v4675_v49 = vadd.f32 %v4641_v10, %v11112_v8 }
 0x565   : > { %v4793_v62 = vadd.f32 %v4759_v20, %v4675_v49 }
 0x567   : > { %v4584_v0 = vpop.f32.mrf.mxu2  ;;  %v4915_v48 = vadd.f32 %v4881_v61, %v4793_v62 }
 0x569   : > { %v11212_v45 = vpop.f32.mrf.mxu0  ;;  %v11214_v13 = vpop.f32.mrf.mxu1 }
 0x56a   : > { %v4643_v18 = vpop.f32.mrf.mxu3 }
 0x56b   : > { %v11217_v17 = vadd.f32 %v4643_v18, %v11118_v24 }
 0x56f   : > { %v4988_v1 = vpop.f32.mrf.mxu2  ;;  %8191 = vmatmul.msk.bf16.gmra.mxu3 %vm351_vm8, %v10966_v36 }
 0x570   : > { %v11221_v14 = vadd.f32 %v4988_v1, %v4915_v48 }
 0x571   : > { %v4764_v8 = vpop.f32.mrf.mxu0  ;;  %v4886_v50 = vpop.f32.mrf.mxu1 }
 0x572   : > { %v4646_v51 = vpop.f32.mrf.mxu3 }
 0x573   : > { %v4677_v9 = vadd.f32 %v4646_v51, %v11124_v44 }
 0x575   : > { %v4795_v55 = vadd.f32 %v4764_v8, %v4677_v9 }
 0x577   : > { %v11224_v3 = vpop.f32.mrf.mxu2  ;;  %v4917_v34 = vadd.f32 %v4886_v50, %v4795_v55 }
 0x579   : > { %v11226_v23 = vpop.f32.mrf.mxu0  ;;  %v11228_v33 = vpop.f32.mrf.mxu1 }
 0x57a   : > { %v4648_v24 = vpop.f32.mrf.mxu3 }
 0x57b   : > { %v11231_v20 = vadd.f32 %v4648_v24, %v11130_v53 }
 0x57f   : > { %v4993_v36 = vpop.f32.mrf.mxu2  ;;  %8192 = vmatmul.msk.bf16.gmra.mxu3 %vm351_vm8, %v11026_v25 }
 0x580   : > { %v11235_v61 = vadd.f32 %v4993_v36, %v4917_v34 }
 0x581   : > { %v4769_v10 = vpop.f32.mrf.mxu0  ;;  %v4891_v44 = vpop.f32.mrf.mxu1 }
 0x582   : > { %v4651_v49 = vpop.f32.mrf.mxu3 }
 0x583   : > { %v4679_v62 = vadd.f32 %v4651_v49, %v11142_v30 }
 0x585   : > { %v4797_v0 = vadd.f32 %v4769_v10, %v4679_v62  ;;  %v8558_v62 = vld [vmem:[#allocation4 + $0x1c0] sm:$0xff] }
 0x586   : > { %5361 = vmatpush.bf16.msrb.mxu0 %v8558_v62 }
 0x587   : > { %v11238_v48 = vpop.f32.mrf.mxu2  ;;  %v4919_v58 = vadd.f32 %v4891_v44, %v4797_v0 }
 0x589   : > { %v11240_v18 = vpop.f32.mrf.mxu0  ;;  %v11242_v1 = vpop.f32.mrf.mxu1 }
 0x58a   : > { %v11244_v53 = vpop.f32.mrf.mxu3 }
 0x58f   : > { %v4998_v8 = vpop.f32.mrf.mxu2  ;;  %8193 = vmatmul.msk.bf16.gmra.mxu3 %vm351_vm8, %v11082_v39 }
 0x590   : > { %v11248_v25 = vadd.f32 %v4998_v8, %v4919_v58 }
 0x591   : > { %v4774_v50 = vpop.f32.mrf.mxu0  ;;  %v4896_v51 = vpop.f32.mrf.mxu1 }
 0x592   : > { %v4656_v9 = vpop.f32.mrf.mxu3 }
 0x593   : > { %v4681_v30 = vadd.f32 %v4656_v9, %v11162_v31 }
 0x595   : > { %v4799_v55 = vadd.f32 %v4774_v50, %v4681_v30 }
 0x597   : > { %v11251_v34 = vpop.f32.mrf.mxu2  ;;  %v4921_v24 = vadd.f32 %v4896_v51, %v4799_v55 }
 0x599   : > { %v11253_v36 = vpop.f32.mrf.mxu0  ;;  %v11255_v10 = vpop.f32.mrf.mxu1 }
 0x59a   : > { %v11257_v44 = vpop.f32.mrf.mxu3 }
 0x59f   : > { %v5003_v49 = vpop.f32.mrf.mxu2  ;;  %8194 = vmatmul.msk.bf16.gmra.mxu3 %vm351_vm8, %v11086_v38 }
 0x5a0   : > { %v11261_v39 = vadd.f32 %v5003_v49, %v4921_v24 }
 0x5a1   : > { %v4779_v0 = vpop.f32.mrf.mxu0  ;;  %v4901_v58 = vpop.f32.mrf.mxu1 }
 0x5a2   : > { %v4661_v31 = vpop.f32.mrf.mxu3 }
 0x5a3   : > { %v4683_v8 = vadd.f32 %v4661_v31, %v11184_v32 }
 0x5a5   : > { %v4801_v50 = vadd.f32 %v4779_v0, %v4683_v8 }
 0x5a7   : > { %v11264_v51 = vpop.f32.mrf.mxu2  ;;  %v4923_v9 = vadd.f32 %v4901_v58, %v4801_v50 }
 0x5a9   : > { %v11266_v30 = vpop.f32.mrf.mxu0  ;;  %v11268_v55 = vpop.f32.mrf.mxu1 }
 0x5aa   : > { %12677 = vst [vmem:[#allocation15_spill] sm:$0xff] %v11268_v55  ;;  %v11270_v27 = vpop.f32.mrf.mxu3 }
 0x5af   : > { %v5008_v38 = vpop.f32.mrf.mxu2  ;;  %8195 = vmatmul.msk.bf16.gmra.mxu3 %vm351_vm8, %v11066_v43 }
 0x5b0   : > { %v11274_v24 = vadd.f32 %v5008_v38, %v4923_v9 }
 0x5b1   : > { %v4784_v49 = vpop.f32.mrf.mxu0  ;;  %v4906_v62 = vpop.f32.mrf.mxu1 }
 0x5b2   : > { %v4666_v37 = vpop.f32.mrf.mxu3 }
 0x5b3   : > { %v4685_v32 = vadd.f32 %v4666_v37, %v11203_v42 }
 0x5b5   : > { %v4803_v0 = vadd.f32 %v4784_v49, %v4685_v32 }
 0x5b7   : > { %v11277_v31 = vpop.f32.mrf.mxu2  ;;  %v4925_v58 = vadd.f32 %v4906_v62, %v4803_v0 }
 0x5b9   : > { %v11279_v8 = vpop.f32.mrf.mxu0  ;;  %v11281_v50 = vpop.f32.mrf.mxu1 }
 0x5ba   : > { %12678 = vst [vmem:[#allocation16_spill] sm:$0xff] %v11279_v8  ;;  %v11283_v5 = vpop.f32.mrf.mxu3 }
 0x5bb   : > { %12679 = vst [vmem:[#allocation13_spill] sm:$0xff] %v11281_v50  ;;  %v4794_v50 = vadd.f32 %v11212_v45, %v11217_v17 }
 0x5bf   : > { %v5013_v60 = vpop.f32.mrf.mxu2 }
 0x5c0   : > { %v11285_v22 = vadd.f32 %v5013_v60, %v4925_v58  ;;  %v11295_v60 = vld [vmem:[%s12596_s5 + $0x2] ss:$0 sm:$0xff] }
 0x5c1   : > { %v4789_v43 = vpop.f32.mrf.mxu0  ;;  %v4911_v9 = vpop.f32.mrf.mxu1 }
 0x5c2   : > { %v4671_v38 = vpop.f32.mrf.mxu3 }
 0x5c3   : > { %v4687_v40 = vadd.f32 %v4671_v38, %v11209_v46  ;;  %v11303_v46 = vld [vmem:[%s12597_s6 + $0x2] ss:$0 sm:$0xff]  ;;  %v8557_v38 = vld [vmem:[#allocation4 + $0x1b8] sm:$0xff] }
 0x5c4   : > { %5498 = vmatpush.bf16.msrb.mxu1 %v8557_v38 }
 0x5c5   : > { %v4805_v55 = vadd.f32 %v4789_v43, %v4687_v40  ;;  %v8561_v43 = vld [vmem:[#allocation4 + $0x1d8] sm:$0xff] }
 0x5c6   : > { %5606 = vmatpush.bf16.msra.mxu2 %v8561_v43  ;;  %v5228_v43 = vld [vmem:[#allocation3 + $0x8] sm:$0xff] }
 0x5c7   : > { %v4927_v37 = vadd.f32 %v4911_v9, %v4805_v55  ;;  %v11288_v42 = vpop.f32.mrf.mxu2  ;;  %v8563_v9 = vld [vmem:[#allocation4 + $0x1e8] sm:$0xff] }
 0x5c8   : > { %5771 = vmatpush.bf16.msra.mxu3 %v8563_v9 }
 0x5c9   : > { %v4791_v49 = vpop.f32.mrf.mxu0  ;;  %v4913_v62 = vpop.f32.mrf.mxu1 }
 0x5ca   : > { %v4673_v32 = vpop.f32.mrf.mxu3 }
 0x5cf   : > { %v5018_v0 = vpop.f32.mrf.mxu2 }
 0x5d0   : > { %v11290_v8 = vadd.f32 %v5018_v0, %v4927_v37  ;;  %v4916_v37 = vadd.f32 %v11214_v13, %v4794_v50  ;;  %v5227_v13 = vld [vmem:[#allocation3] sm:$0xff] }
 0x5d1   : > { %v8565_v50 = vld [vmem:[#allocation4 + $0x1f8] sm:$0xff] }
 0x5d2   : > { %12680 = vst [vmem:[#allocation14_spill] sm:$0xff] %v11290_v8  ;;  %v5109_v58 = vpop.f32.mrf.mxu3  ;;  %v5023_v45 = vadd.f32 %v11224_v3, %v4916_v37  ;;  %5860 = vmatpush.bf16.msra.mxu0 %v8565_v50  ;;  %v5243_v3 = vpack.c.bf16 %v5227_v13, %v5227_v13  ;;  %v5244_v37 = vpack.c.bf16 %v5228_v43, %v5228_v43 }
 0x5d3   : > { %v5143_v40 = vadd.f32 %v5109_v58, %v11221_v14  ;;  %v8556_v58 = vld [vmem:[#allocation4 + $0x1b0] sm:$0xff] }
 0x5d4   : > { %5499 = vmatpush.bf16.msrb.mxu1 %v8556_v58 }
 0x5d5   : > { %v5159_v55 = vmul.f32 %v11295_v60, %v5143_v40  ;;  %v8560_v40 = vld [vmem:[#allocation4 + $0x1d0] sm:$0xff] }
 0x5d6   : > { %5607 = vmatpush.bf16.msra.mxu2 %v8560_v40 }
 0x5d7   : > { %v5175_v49 = vadd.f32 %v11303_v46, %v5159_v55  ;;  %v5020_v62 = vpop.f32.mrf.mxu2 }
 0x5d9   : > { %v5188_v17 = vmax.f32 %v5175_v49, 0.0  ;;  %v4796_v49 = vadd.f32 %v11226_v23, %v11231_v20 }
 0x5da   : > { %v5111_v14 = vpop.f32.mrf.mxu3 }
 0x5db   : > { %v5201_v32 = vmul.f32 %v5188_v17, %v9407_v47  ;;  %v5144_v0 = vadd.f32 %v5111_v14, %v5023_v45  ;;  %v8562_v17 = vld [vmem:[#allocation4 + $0x1e0] sm:$0xff]  ;;  %v5287_v14 = vunpack.c.l.b16 %v5243_v3  ;;  %v4918_v58 = vadd.f32 %v11228_v33, %v4796_v49 }
 0x5dc   : > { %5772 = vmatpush.bf16.msra.mxu3 %v8562_v17 }
 0x5dd   : > { %5214 = vst.msk [vmem:[#allocation3 + $0x10] sm:$0xff] %vm351_vm8, %v5201_v32  ;;  %v5160_v8 = vmul.f32 %v11295_v60, %v5144_v0  ;;  %v5288_v0 = vunpack.c.l.b16 %v5244_v37  ;;  %v5025_v13 = vadd.f32 %v11238_v48, %v4918_v58 }
 0x5df   : > { %v5176_v55 = vadd.f32 %v11303_v46, %v5160_v8  ;;  %v4292_v8 = vadd.f32 %v11132_v54, %v11136_v4  ;;  %v5301_v20 = vpack.c.b16 %v5288_v0, %v5287_v14 }
 0x5e1   : > { %v5189_v9 = vmax.f32 %v5176_v55, 0.0  ;;  %v4426_v50 = vadd.f32 %v11134_v2, %v4292_v8  ;;  %v5398_v4 = vshrl.u32 %v5301_v20, 16  ;;  %v5401_v37 = vshll.u32 %v5301_v20, 16 }
 0x5e2   : > { %v5114_v38 = vpop.f32.mrf.mxu3 }
 0x5e3   : > { %v5202_v62 = vmul.f32 %v5189_v9, %v9413_v56  ;;  %v5145_v45 = vadd.f32 %v5114_v38, %v11235_v61  ;;  %v4591_v38 = vadd.f32 %v11148_v12, %v4426_v50  ;;  %v5400_v17 = vrot.slane %v5398_v4, 2 }
 0x5e4   : > { %v5229_v23 = vld [vmem:[#allocation3 + $0x10] sm:$0xff]  ;;  %v5403_v14 = vrot.slane %v5401_v37, 3  ;;  %v5541_v8 = vrot.slane %v5401_v37, 4 }
 0x5e5   : > { %5215 = vst.msk [vmem:[#allocation3 + $0x18] sm:$0xff] %vm351_vm8, %v5202_v62  ;;  %v5161_v32 = vmul.f32 %v11295_v60, %v5145_v45  ;;  %v5245_v43 = vpack.c.bf16 %v5229_v23, %v5229_v23  ;;  %v4680_v48 = vadd.f32 %v11244_v53, %v4591_v38 }
 0x5e7   : > { %v5177_v40 = vadd.f32 %v11303_v46, %v5161_v32  ;;  %v5289_v62 = vunpack.c.l.b16 %v5245_v43  ;;  %v5540_v32 = vrot.slane %v5398_v4, 3  ;;  %v4798_v23 = vadd.f32 %v11240_v18, %v4680_v48 }
 0x5e9   : > { %v5190_v61 = vmax.f32 %v5177_v40, 0.0  ;;  %v5308_v40 = vrot.slane %v5301_v20, 3 }
 0x5ea   : > { %v5116_v55 = vpop.f32.mrf.mxu3 }
 0x5eb   : > { %v5203_v3 = vmul.f32 %v5190_v61, %v9423_v7  ;;  %v5146_v9 = vadd.f32 %v5116_v55, %v5025_v13  ;;  %v5663_v61 = vpack.c.b16 %v5289_v62, %v5288_v0 }
 0x5ec   : > { %v5230_v54 = vld [vmem:[#allocation3 + $0x18] sm:$0xff] }
 0x5ed   : > { %5216 = vst.msk [vmem:[#allocation3 + $0x20] sm:$0xff] %vm351_vm8, %v5203_v3  ;;  %v5162_v33 = vmul.f32 %v11295_v60, %v5146_v9  ;;  %v5246_v49 = vpack.c.bf16 %v5230_v54, %v5230_v54  ;;  %v4297_v3 = vadd.f32 %v11150_v28, %v11154_v35  ;;  %v5404_v9 = vor.u32 %v5403_v14, %v5400_v17 }
 0x5ee   : > { %v5542_v54 = vor.u32 %v5541_v8, %v5540_v32 }
 0x5ef   : > { %v5178_v2 = vadd.f32 %v11303_v46, %v5162_v33  ;;  %v5290_v45 = vunpack.c.l.b16 %v5246_v49  ;;  %v4920_v49 = vadd.f32 %v11242_v1, %v4798_v23 }
 0x5f1   : > { %v5191_v58 = vmax.f32 %v5178_v2, 0.0  ;;  %v11331_v12 = vpack.c.b16 %v5290_v45, %v5289_v62  ;;  %v5671_v62 = vshrl.u32 %v5663_v61, 16  ;;  %v5674_v2 = vshll.u32 %v5663_v61, 16 }
 0x5f2   : > { %v5119_v13 = vpop.f32.mrf.mxu3 }
 0x5f3   : > { %v5204_v50 = vmul.f32 %v5191_v58, %v9436_v57  ;;  %v5147_v53 = vadd.f32 %v5119_v13, %v11248_v25  ;;  %v5309_v55 = vrot.slane %v11331_v12, 3  ;;  %v5406_v43 = vshrl.u32 %v11331_v12, 16 }
 0x5f4   : > { %v5409_v38 = vshll.u32 %v11331_v12, 16  ;;  %v5231_v20 = vld [vmem:[#allocation3 + $0x20] sm:$0xff]  ;;  %v4428_v58 = vadd.f32 %v11152_v59, %v4297_v3  ;;  %v5673_v59 = vrot.slane %v5671_v62, 3 }
 0x5f5   : > { %5217 = vst.msk [vmem:[#allocation3 + $0x28] sm:$0xff] %vm351_vm8, %v5204_v50  ;;  %v5163_v18 = vmul.f32 %v11295_v60, %v5147_v53  ;;  %v5310_v25 = vsel %vm455_vm1, %v5308_v40, %v5309_v55  ;;  %v5408_v0 = vrot.slane %v5406_v43, 2  ;;  %v5543_v4 = vrot.slane %v5406_v43, 3 }
 0x5f6   : > { %8206 = vmatmul.msk.bf16.vlgmr.msrb.gmra.mxu0 %vm351_vm8, %v5310_v25  ;;  %v5411_v37 = vrot.slane %v5409_v38, 3  ;;  %v5544_v33 = vrot.slane %v5409_v38, 4  ;;  %v5247_v28 = vpack.c.bf16 %v5231_v20, %v5231_v20  ;;  %v5915_v35 = vrot.slane %v5409_v38, 1 }
 0x5f7   : > { %v5179_v48 = vadd.f32 %v11303_v46, %v5163_v18  ;;  %v5027_v40 = vadd.f32 %v11251_v34, %v4920_v49  ;;  %v4593_v61 = vadd.f32 %v11169_v15, %v4428_v58  ;;  %v5676_v34 = vrot.slane %v5674_v2, 4 }
 0x5f8   : > { %v11349_v17 = vor.u32 %v5411_v37, %v5408_v0  ;;  %v11351_v14 = vor.u32 %v5544_v33, %v5543_v4  ;;  %v5291_v32 = vunpack.c.l.b16 %v5247_v28  ;;  %v5916_v8 = vor.u32 %v5915_v35, %v5406_v43 }
 0x5f9   : > { %v5192_v13 = vmax.f32 %v5179_v48, 0.0  ;;  %v5677_v35 = vor.u32 %v5676_v34, %v5673_v59 }
 0x5fa   : > { %v5121_v50 = vpop.f32.mrf.mxu3  ;;  %v5413_v53 = vsel %vm538_vm3, %v5404_v9, %v11349_v17  ;;  %v5546_v1 = vsel %vm670_vm4, %v5542_v54, %v11351_v14  ;;  %v11359_v23 = vpack.c.b16 %v5291_v32, %v5290_v45  ;;  %v4682_v54 = vadd.f32 %v11257_v44, %v4593_v61 }
 0x5fb   : > { %v5205_v38 = vmul.f32 %v5192_v13, %v9449_v21  ;;  %v5148_v20 = vadd.f32 %v5121_v50, %v5027_v40  ;;  %8221 = vmatmul.msk.bf16.vlgmr.msrb.gmra.mxu1 %vm351_vm8, %v5413_v53  ;;  %8236 = vmatmul.msk.bf16.vlgmr.msra.gmra.mxu2 %vm351_vm8, %v5546_v1 }
 0x5fc   : > { %v5679_v43 = vshrl.u32 %v11359_v23, 16  ;;  %v5682_v3 = vshll.u32 %v11359_v23, 16  ;;  %v5232_v9 = vld [vmem:[#allocation3 + $0x28] sm:$0xff]  ;;  %v4800_v58 = vadd.f32 %v11253_v36, %v4682_v54 }
 0x5fd   : > { %5218 = vst.msk [vmem:[#allocation3 + $0x30] sm:$0xff] %vm351_vm8, %v5205_v38  ;;  %v5164_v15 = vmul.f32 %v11295_v60, %v5148_v20  ;;  %v5248_v45 = vpack.c.bf16 %v5232_v9, %v5232_v9 }
 0x5fe   : > { %v5681_v18 = vrot.slane %v5679_v43, 3  ;;  %v5684_v25 = vrot.slane %v5682_v3, 4  ;;  %v6036_v0 = vrot.slane %v5682_v3, 1  ;;  %v6262_v4 = vrot.slane %v5679_v43, 1 }
 0x5ff   : > { %v5180_v37 = vadd.f32 %v11303_v46, %v5164_v15  ;;  %v5292_v33 = vunpack.c.l.b16 %v5248_v45  ;;  %v6263_v28 = vrot.slane %v5682_v3, 2  ;;  %v4922_v9 = vadd.f32 %v11255_v10, %v4800_v58 }
 0x600   : > { %v11371_v49 = vor.u32 %v5684_v25, %v5681_v18  ;;  %v11373_v48 = vor.u32 %v6036_v0, %v5679_v43 }
 0x601   : > { %v5193_v62 = vmax.f32 %v5180_v37, 0.0  ;;  %v11375_v44 = vpack.c.b16 %v5292_v33, %v5291_v32  ;;  %v11377_v2 = vor.u32 %v6263_v28, %v6262_v4  ;;  %v4302_v32 = vadd.f32 %v11172_v29, %v11176_v19 }
 0x602   : > { %v5124_v40 = vpop.f32.mrf.mxu3  ;;  %v5686_v13 = vsel %vm670_vm4, %v5677_v35, %v11371_v49  ;;  %v5029_v0 = vadd.f32 %v11264_v51, %v4922_v9 }
 0x603   : > { %v5206_v50 = vmul.f32 %v5193_v62, %v9483_v52  ;;  %v5149_v53 = vadd.f32 %v5124_v40, %v11261_v39  ;;  %8251 = vmatmul.msk.bf16.vlgmr.msra.gmra.mxu3 %vm351_vm8, %v5686_v13  ;;  %v5311_v1 = vrot.slane %v11375_v44, 3  ;;  %v5415_v61 = vshrl.u32 %v11375_v44, 16 }
 0x604   : > { %v5418_v38 = vshll.u32 %v11375_v44, 16  ;;  %v5233_v36 = vld [vmem:[#allocation3 + $0x30] sm:$0xff]  ;;  %v6155_v13 = vrot.slane %v11359_v23, 1 }
 0x605   : > { %5219 = vst.msk [vmem:[#allocation3 + $0x38] sm:$0xff] %vm351_vm8, %v5206_v50  ;;  %v5165_v20 = vmul.f32 %v11295_v60, %v5149_v53  ;;  %v5312_v39 = vsel %vm455_vm1, %v5309_v55, %v5311_v1  ;;  %v5417_v59 = vrot.slane %v5415_v61, 2  ;;  %v5547_v34 = vrot.slane %v5415_v61, 3 }
 0x606   : > { %8207 = vmatmul.msk.bf16.gmra.mxu0 %vm351_vm8, %v5312_v39  ;;  %v5420_v43 = vrot.slane %v5418_v38, 3  ;;  %v5548_v3 = vrot.slane %v5418_v38, 4  ;;  %v5249_v29 = vpack.c.bf16 %v5233_v36, %v5233_v36  ;;  %v5917_v19 = vrot.slane %v5418_v38, 1 }
 0x607   : > { %v5181_v54 = vadd.f32 %v11303_v46, %v5165_v20  ;;  %v4430_v55 = vadd.f32 %v11174_v63, %v4302_v32 }
 0x608   : > { %v11400_v15 = vor.u32 %v5420_v43, %v5417_v59  ;;  %v11402_v45 = vor.u32 %v5548_v3, %v5547_v34  ;;  %v5293_v18 = vunpack.c.l.b16 %v5249_v29  ;;  %v11405_v25 = vsel %vm1010_vm5, %v5916_v8, %v5917_v19 }
 0x609   : > { %v5194_v4 = vmax.f32 %v5181_v54, 0.0  ;;  %v11409_v37 = vor.u32 %v5917_v19, %v5415_v61  ;;  %v4595_v8 = vadd.f32 %v11192_v26, %v4430_v55 }
 0x60a   : > { %v5126_v28 = vpop.f32.mrf.mxu3  ;;  %v5422_v10 = vsel %vm538_vm3, %v11349_v17, %v11400_v15  ;;  %v5550_v35 = vsel %vm670_vm4, %v11351_v14, %v11402_v45  ;;  %v11417_v62 = vpack.c.b16 %v5293_v18, %v5292_v33 }
 0x60b   : > { %v5207_v63 = vmul.f32 %v5194_v4, %v9511_v41  ;;  %v5150_v58 = vadd.f32 %v5126_v28, %v5029_v0  ;;  %8222 = vmatmul.msk.bf16.gmra.mxu1 %vm351_vm8, %v5422_v10  ;;  %8237 = vmatmul.msk.bf16.gmra.mxu2 %vm351_vm8, %v5550_v35  ;;  %v4684_v33 = vadd.f32 %v11270_v27, %v4595_v8 }
 0x60c   : > { %v5688_v51 = vshrl.u32 %v11417_v62, 16  ;;  %v5691_v40 = vshll.u32 %v11417_v62, 16  ;;  %v5234_v17 = vld [vmem:[#allocation3 + $0x38] sm:$0xff]  ;;  %v6156_v14 = vrot.slane %v11417_v62, 1  ;;  %v4307_v4 = vadd.f32 %v11194_v11, %v11198_v6  ;;  %v12685_v62 = vld [vmem:[#allocation16_spill] sm:$0xff] }
 0x60d   : > { %5220 = vst.msk [vmem:[#allocation3 + $0x40] sm:$0xff] %vm351_vm8, %v5207_v63  ;;  %v5166_v26 = vmul.f32 %v11295_v60, %v5150_v58  ;;  %v5250_v50 = vpack.c.bf16 %v5234_v17, %v5234_v17  ;;  %v4802_v19 = vadd.f32 %v11266_v30, %v4684_v33  ;;  %v8564_v6 = vld [vmem:[#allocation4 + $0x1f0] sm:$0xff] }
 0x60e   : > { %v5690_v53 = vrot.slane %v5688_v51, 3  ;;  %v5693_v61 = vrot.slane %v5691_v40, 4  ;;  %v6038_v32 = vrot.slane %v5691_v40, 1  ;;  %v11433_v38 = vsel %vm1227_vm6, %v6155_v13, %v6156_v14  ;;  %5861 = vmatpush.bf16.msra.mxu0 %v8564_v6 }
 0x60f   : > { %v5182_v36 = vadd.f32 %v11303_v46, %v5166_v26  ;;  %v5294_v23 = vunpack.c.l.b16 %v5250_v50  ;;  %v6265_v20 = vrot.slane %v5688_v51, 1  ;;  %v6266_v39 = vrot.slane %v5691_v40, 2  ;;  %v12682_v50 = vld [vmem:[#allocation18_spill] sm:$0xff] }
 0x610   : > { %v11436_v59 = vor.u32 %v5693_v61, %v5690_v53  ;;  %v11440_v27 = vsel %vm1010_vm5, %v11373_v48, %v6038_v32  ;;  %v11442_v34 = vor.u32 %v6038_v32, %v5688_v51  ;;  %v12681_v51 = vld [vmem:[#allocation15_spill] sm:$0xff]  ;;  %v4432_v53 = vadd.f32 %v12682_v50, %v4307_v4 }
 0x611   : > { %v5195_v43 = vmax.f32 %v5182_v36, 0.0  ;;  %v11444_v3 = vpack.c.b16 %v5294_v23, %v5293_v18  ;;  %v11446_v29 = vor.u32 %v6266_v39, %v6265_v20  ;;  %v4924_v40 = vadd.f32 %v12681_v51, %v4802_v19 }
 0x612   : > { %v5129_v9 = vpop.f32.mrf.mxu3  ;;  %v5695_v54 = vsel %vm670_vm4, %v11371_v49, %v11436_v59 }
 0x613   : > { %v5208_v55 = vmul.f32 %v5195_v43, %v12660_v16  ;;  %v5151_v0 = vadd.f32 %v5129_v9, %v11274_v24  ;;  %8252 = vmatmul.msk.bf16.gmra.mxu3 %vm351_vm8, %v5695_v54  ;;  %v5313_v48 = vrot.slane %v11444_v3, 3  ;;  %v5424_v18 = vshrl.u32 %v11444_v3, 16  ;;  %v12683_v9 = vld [vmem:[#allocation7_spill] sm:$0xff]  ;;  %v12684_v54 = vld [vmem:[#allocation8_spill] sm:$0xff] }
 0x614   : > { %v5427_v30 = vshll.u32 %v11444_v3, 16  ;;  %v5235_v28 = vld [vmem:[#allocation3 + $0x40] sm:$0xff]  ;;  %v11463_v49 = vsel %vm1323_vm7, %v11377_v2, %v11446_v29  ;;  %v5031_v61 = vadd.f32 %v11277_v31, %v4924_v40 }
 0x615   : > { %5221 = vst.msk [vmem:[#allocation3 + $0x48] sm:$0xff] %vm351_vm8, %v5208_v55  ;;  %v5167_v24 = vmul.f32 %v11295_v60, %v5151_v0  ;;  %v5314_v10 = vsel %vm455_vm1, %v5311_v1, %v5313_v48  ;;  %v5426_v35 = vrot.slane %v5424_v18, 2  ;;  %v5551_v11 = vrot.slane %v5424_v18, 3 }
 0x616   : > { %8208 = vmatmul.msk.bf16.gmra.mxu0 %vm351_vm8, %v5314_v10  ;;  %v5429_v8 = vrot.slane %v5427_v30, 3  ;;  %v5552_v63 = vrot.slane %v5427_v30, 4  ;;  %v5251_v58 = vpack.c.bf16 %v5235_v28, %v5235_v28  ;;  %v5920_v2 = vrot.slane %v5427_v30, 1 }
 0x617   : > { %v5183_v17 = vadd.f32 %v11303_v46, %v5167_v24 }
 0x618   : > { %v11475_v13 = vor.u32 %v5429_v8, %v5426_v35  ;;  %v11477_v33 = vor.u32 %v5552_v63, %v5551_v11  ;;  %v5295_v26 = vunpack.c.l.b16 %v5251_v58  ;;  %v11481_v1 = vsel %vm1010_vm5, %v11409_v37, %v5920_v2 }
 0x619   : > { %v5196_v32 = vmax.f32 %v5183_v17, 0.0  ;;  %v5922_v36 = vor.u32 %v5920_v2, %v5424_v18  ;;  %v4597_v37 = vadd.f32 %v12683_v9, %v4432_v53 }
 0x61a   : > { %v5131_v20 = vpop.f32.mrf.mxu3  ;;  %v5431_v39 = vsel %vm538_vm3, %v11400_v15, %v11475_v13  ;;  %v5554_v43 = vsel %vm670_vm4, %v11402_v45, %v11477_v33  ;;  %v11491_v19 = vpack.c.b16 %v5295_v26, %v5294_v23 }
 0x61b   : > { %v5209_v55 = vmul.f32 %v5196_v32, %v12684_v54  ;;  %v5152_v0 = vadd.f32 %v5131_v20, %v5031_v61  ;;  %8223 = vmatmul.msk.bf16.gmra.mxu1 %vm351_vm8, %v5431_v39  ;;  %8238 = vmatmul.msk.bf16.gmra.mxu2 %vm351_vm8, %v5554_v43  ;;  %v4686_v45 = vadd.f32 %v11283_v5, %v4597_v37  ;;  %v12686_v61 = vld [vmem:[#allocation9_spill] sm:$0xff] }
 0x61c   : > { %v5697_v31 = vshrl.u32 %v11491_v19, 16  ;;  %v5700_v18 = vshll.u32 %v11491_v19, 16  ;;  %v5236_v15 = vld [vmem:[#allocation3 + $0x48] sm:$0xff]  ;;  %v6158_v4 = vrot.slane %v11491_v19, 1 }
 0x61d   : > { %5222 = vst.msk [vmem:[#allocation3 + $0x50] sm:$0xff] %vm351_vm8, %v5209_v55  ;;  %v5168_v23 = vmul.f32 %v11295_v60, %v5152_v0  ;;  %v5252_v30 = vpack.c.bf16 %v5236_v15, %v5236_v15 }
 0x61e   : > { %v5699_v28 = vrot.slane %v5697_v31, 3  ;;  %v5702_v24 = vrot.slane %v5700_v18, 4  ;;  %v6041_v10 = vrot.slane %v5700_v18, 1  ;;  %v11508_v35 = vsel %vm1227_vm6, %v6156_v14, %v6158_v4 }
 0x61f   : > { %v5184_v11 = vadd.f32 %v11303_v46, %v5168_v23  ;;  %v5296_v6 = vunpack.c.l.b16 %v5252_v30  ;;  %v6269_v8 = vrot.slane %v5697_v31, 1  ;;  %v6270_v5 = vrot.slane %v5700_v18, 2 }
 0x620   : > { %v11511_v63 = vor.u32 %v5702_v24, %v5699_v28  ;;  %v11515_v58 = vsel %vm1010_vm5, %v11442_v34, %v6041_v10  ;;  %v6043_v2 = vor.u32 %v6041_v10, %v5697_v31  ;;  %v4804_v14 = vadd.f32 %v12685_v62, %v4686_v45 }
 0x621   : > { %v5197_v51 = vmax.f32 %v5184_v11, 0.0  ;;  %v11517_v40 = vpack.c.b16 %v5296_v6, %v5295_v26  ;;  %v11519_v17 = vor.u32 %v6270_v5, %v6269_v8 }
 0x622   : > { %v5134_v50 = vpop.f32.mrf.mxu3  ;;  %v5704_v53 = vsel %vm670_vm4, %v11436_v59, %v11511_v63 }
 0x623   : > { %v5210_v32 = vmul.f32 %v5197_v51, %v12686_v61  ;;  %v5153_v20 = vadd.f32 %v5134_v50, %v11285_v22  ;;  %8253 = vmatmul.msk.bf16.gmra.mxu3 %vm351_vm8, %v5704_v53  ;;  %v5315_v34 = vrot.slane %v11517_v40, 3  ;;  %v5433_v26 = vshrl.u32 %v11517_v40, 16  ;;  %v12688_v50 = vld [vmem:[#allocation10_spill] sm:$0xff] }
 0x624   : > { %v5436_v39 = vshll.u32 %v11517_v40, 16  ;;  %v5237_v43 = vld [vmem:[#allocation3 + $0x50] sm:$0xff]  ;;  %v11534_v9 = vsel %vm1323_vm7, %v11446_v29, %v11519_v17  ;;  %v12687_v29 = vld [vmem:[#allocation13_spill] sm:$0xff] }
 0x625   : > { %5223 = vst.msk [vmem:[#allocation3 + $0x58] sm:$0xff] %vm351_vm8, %v5210_v32  ;;  %v5169_v59 = vmul.f32 %v11295_v60, %v5153_v20  ;;  %v5316_v22 = vsel %vm455_vm1, %v5313_v48, %v5315_v34  ;;  %v5435_v37 = vrot.slane %v5433_v26, 2  ;;  %v5555_v55 = vrot.slane %v5433_v26, 3 }
 0x626   : > { %8209 = vmatmul.msk.bf16.gmra.mxu0 %vm351_vm8, %v5316_v22  ;;  %v5438_v0 = vrot.slane %v5436_v39, 3  ;;  %v5556_v31 = vrot.slane %v5436_v39, 4  ;;  %v5253_v18 = vpack.c.bf16 %v5237_v43, %v5237_v43  ;;  %v5923_v15 = vrot.slane %v5436_v39, 1 }
 0x627   : > { %v4926_v45 = vadd.f32 %v12687_v29, %v4804_v14  ;;  %v5185_v23 = vadd.f32 %v11303_v46, %v5169_v59 }
 0x628   : > { %v11546_v30 = vor.u32 %v5438_v0, %v5435_v37  ;;  %v11548_v28 = vor.u32 %v5556_v31, %v5555_v55  ;;  %v5297_v24 = vunpack.c.l.b16 %v5253_v18  ;;  %v11551_v10 = vsel %vm1010_vm5, %v5922_v36, %v5923_v15 }
 0x629   : > { %v5033_v48 = vadd.f32 %v11288_v42, %v4926_v45  ;;  %v5198_v11 = vmax.f32 %v5185_v23, 0.0  ;;  %v5925_v8 = vor.u32 %v5923_v15, %v5433_v26 }
 0x62a   : > { %v5136_v5 = vpop.f32.mrf.mxu3  ;;  %v5440_v51 = vsel %vm538_vm3, %v11475_v13, %v11546_v30  ;;  %v5558_v62 = vsel %vm670_vm4, %v11477_v33, %v11548_v28  ;;  %v11560_v14 = vpack.c.b16 %v5297_v24, %v5296_v6 }
 0x62b   : > { %v5211_v53 = vmul.f32 %v5198_v11, %v12688_v50  ;;  %v5154_v32 = vadd.f32 %v5136_v5, %v5033_v48  ;;  %8224 = vmatmul.msk.bf16.gmra.mxu1 %vm351_vm8, %v5440_v51  ;;  %8239 = vmatmul.msk.bf16.gmra.mxu2 %vm351_vm8, %v5558_v62  ;;  %v12689_v48 = vld [vmem:[#allocation11_spill] sm:$0xff]  ;;  %v12690_v5 = vld [vmem:[#allocation14_spill] sm:$0xff] }
 0x62c   : > { %v5706_v42 = vshrl.u32 %v11560_v14, 16  ;;  %v5709_v36 = vshll.u32 %v11560_v14, 16  ;;  %v5238_v20 = vld [vmem:[#allocation3 + $0x58] sm:$0xff]  ;;  %v6160_v13 = vrot.slane %v11560_v14, 1 }
 0x62d   : > { %5224 = vst.msk [vmem:[#allocation3 + $0x60] sm:$0xff] %vm351_vm8, %v5211_v53  ;;  %v5170_v33 = vmul.f32 %v11295_v60, %v5154_v32  ;;  %v5254_v6 = vpack.c.bf16 %v5238_v20, %v5238_v20 }
 0x62e   : > { %v5708_v26 = vrot.slane %v5706_v42, 3  ;;  %v5711_v39 = vrot.slane %v5709_v36, 4  ;;  %v6044_v43 = vrot.slane %v5709_v36, 1  ;;  %v11575_v59 = vsel %vm1227_vm6, %v6158_v4, %v6160_v13 }
 0x62f   : > { %v5186_v22 = vadd.f32 %v11303_v46, %v5170_v33  ;;  %v5298_v37 = vunpack.c.l.b16 %v5254_v6  ;;  %v6273_v55 = vrot.slane %v5706_v42, 1  ;;  %v6274_v15 = vrot.slane %v5709_v36, 2 }
 0x630   : > { %v11578_v0 = vor.u32 %v5711_v39, %v5708_v26  ;;  %v11581_v31 = vsel %vm1010_vm5, %v6043_v2, %v6044_v43  ;;  %v11583_v18 = vor.u32 %v6044_v43, %v5706_v42 }
 0x631   : > { %v5199_v29 = vmax.f32 %v5186_v22, 0.0  ;;  %v11585_v45 = vpack.c.b16 %v5298_v37, %v5297_v24  ;;  %v11590_v4 = vor.u32 %v6274_v15, %v6273_v55 }
 0x632   : > { %v5139_v23 = vpop.f32.mrf.mxu3  ;;  %v5713_v19 = vsel %vm670_vm4, %v11511_v63, %v11578_v0 }
 0x633   : > { %v5212_v11 = vmul.f32 %v5199_v29, %v12689_v48  ;;  %v5155_v51 = vadd.f32 %v5139_v23, %v12690_v5  ;;  %8254 = vmatmul.msk.bf16.gmra.mxu3 %vm351_vm8, %v5713_v19  ;;  %v5317_v2 = vrot.slane %v11585_v45, 3  ;;  %v5442_v62 = vshrl.u32 %v11585_v45, 16 }
 0x634   : > { %v5445_v24 = vshll.u32 %v11585_v45, 16  ;;  %v5239_v53 = vld [vmem:[#allocation3 + $0x60] sm:$0xff]  ;;  %v11601_v32 = vsel %vm1323_vm7, %v11519_v17, %v11590_v4  ;;  %v5242_v17 = vld [vmem:[#allocation3 + $0x78] sm:$0xff] }
 0x635   : > { %5225 = vst.msk [vmem:[#allocation3 + $0x68] sm:$0xff] %vm351_vm8, %v5212_v11  ;;  %v5171_v63 = vmul.f32 %v11295_v60, %v5155_v51  ;;  %v5318_v42 = vsel %vm455_vm1, %v5315_v34, %v5317_v2  ;;  %v5444_v36 = vrot.slane %v5442_v62, 2  ;;  %v5559_v20 = vrot.slane %v5442_v62, 3  ;;  %v12691_v51 = vld [vmem:[#allocation12_spill] sm:$0xff] }
 0x636   : > { %8210 = vmatmul.msk.bf16.gmra.mxu0 %vm351_vm8, %v5318_v42  ;;  %v5447_v33 = vrot.slane %v5445_v24, 3  ;;  %v5560_v6 = vrot.slane %v5445_v24, 4  ;;  %v5255_v26 = vpack.c.bf16 %v5239_v53, %v5239_v53  ;;  %v5926_v39 = vrot.slane %v5445_v24, 1  ;;  %v8567_v53 = vld [vmem:[#allocation4 + $0x208] sm:$0xff] }
 0x637   : > { %v5187_v43 = vadd.f32 %v11303_v46, %v5171_v63  ;;  %v5258_v23 = vpack.c.bf16 %v5242_v17, %v5242_v17  ;;  %5978 = vmatpush.bf16.msra.mxu1 %v8567_v53 }
 0x638   : > { %v11612_v22 = vor.u32 %v5447_v33, %v5444_v36  ;;  %v11614_v60 = vor.u32 %v5560_v6, %v5559_v20  ;;  %v5299_v55 = vunpack.c.l.b16 %v5255_v26  ;;  %v11617_v15 = vsel %vm1010_vm5, %v5925_v8, %v5926_v39  ;;  %v8569_v8 = vld [vmem:[#allocation4 + $0x218] sm:$0xff] }
 0x639   : > { %v5200_v34 = vmax.f32 %v5187_v43, 0.0  ;;  %v5928_v29 = vor.u32 %v5926_v39, %v5442_v62  ;;  %v8571_v62 = vld [vmem:[#allocation4 + $0x228] sm:$0xff]  ;;  %6100 = vmatpush.bf16.msrb.mxu2 %v8569_v8 }
 0x63a   : > { %v5449_v19 = vsel %vm538_vm3, %v11546_v30, %v11612_v22  ;;  %v5562_v11 = vsel %vm670_vm4, %v11548_v28, %v11614_v60  ;;  %v11625_v46 = vpack.c.b16 %v5299_v55, %v5298_v37  ;;  %v5141_v5 = vpop.f32.mrf.mxu3  ;;  %6207 = vmatpush.bf16.msrb.mxu3 %v8571_v62  ;;  %v6034_v37 = vunpack.c.l.b16 %v5258_v23 }
 0x63b   : > { %v5213_v24 = vmul.f32 %v5200_v34, %v12691_v51  ;;  %8225 = vmatmul.msk.bf16.gmra.mxu1 %vm351_vm8, %v5449_v19  ;;  %8240 = vmatmul.msk.bf16.gmra.mxu2 %vm351_vm8, %v5562_v11 }
 0x63c   : > { %v5715_v63 = vshrl.u32 %v11625_v46, 16  ;;  %v5718_v30 = vshll.u32 %v11625_v46, 16  ;;  %v5240_v42 = vld [vmem:[#allocation3 + $0x68] sm:$0xff]  ;;  %v12623_v36 = vrot.slane %v11625_v46, 1  ;;  %v11649_v8 = vpack.c.b16 %v6034_v37, %v6034_v37  ;;  %v8573_v37 = vld [vmem:[#allocation4 + $0x238] sm:$0xff] }
 0x63d   : > { %5226 = vst.msk [vmem:[#allocation3 + $0x70] sm:$0xf] %vm368_vm9, %v5213_v24  ;;  %v5256_v28 = vpack.c.bf16 %v5240_v42, %v5240_v42  ;;  %6328 = vmatpush.bf16.msrb.mxu0 %v8573_v37  ;;  %v12692_v37 = vrot.slane %v11625_v46, 1 }
 0x63e   : > { %v5717_v20 = vrot.slane %v5715_v63, 3  ;;  %v5720_v33 = vrot.slane %v5718_v30, 4  ;;  %v6047_v6 = vrot.slane %v5718_v30, 1  ;;  %v11639_v26 = vsel %vm1227_vm6, %v6160_v13, %v12623_v36 }
 0x63f   : > { %v5300_v39 = vunpack.c.l.b16 %v5256_v28  ;;  %v6277_v17 = vrot.slane %v5715_v63, 1  ;;  %v6278_v43 = vrot.slane %v5718_v30, 2 }
 0x640   : > { %v5721_v34 = vor.u32 %v5720_v33, %v5717_v20  ;;  %v11643_v19 = vsel %vm1010_vm5, %v11583_v18, %v6047_v6  ;;  %v6049_v23 = vor.u32 %v6047_v6, %v5715_v63  ;;  %v8566_v20 = vld [vmem:[#allocation4 + $0x200] sm:$0xff]  ;;  %v8568_v33 = vld [vmem:[#allocation4 + $0x210] sm:$0xff] }
 0x641   : > { %v11645_v11 = vpack.c.b16 %v5300_v39, %v5299_v55  ;;  %v6279_v5 = vor.u32 %v6278_v43, %v6277_v17  ;;  %v12624_v43 = vshrl.u32 %v11649_v8, 16  ;;  %5979 = vmatpush.bf16.msra.mxu1 %v8566_v20  ;;  %6101 = vmatpush.bf16.msrb.mxu2 %v8568_v33 }
 0x642   : > { %v5722_v24 = vsel %vm670_vm4, %v11578_v0, %v5721_v34 }
 0x643   : > { %8255 = vmatmul.msk.bf16.gmra.mxu3 %vm351_vm8, %v5722_v24  ;;  %v5319_v14 = vrot.slane %v11645_v11, 3  ;;  %v5451_v13 = vshrl.u32 %v11645_v11, 16  ;;  %v5454_v62 = vshll.u32 %v11645_v11, 16  ;;  %v11657_v18 = vsel %vm1323_vm7, %v11590_v4, %v6279_v5 }
 0x644   : > { %v5241_v55 = vld [vmem:[#allocation3 + $0x70] sm:$0xff]  ;;  %v12625_v4 = vshll.u32 %v11649_v8, 16 }
 0x645   : > { %v5320_v53 = vsel %vm455_vm1, %v5317_v2, %v5319_v14  ;;  %v5453_v0 = vrot.slane %v5451_v13, 2  ;;  %v5456_v63 = vrot.slane %v5454_v62, 3  ;;  %v5563_v30 = vrot.slane %v5451_v13, 3 }
 0x646   : > { %8211 = vmatmul.msk.bf16.gmra.mxu0 %vm351_vm8, %v5320_v53  ;;  %v5564_v42 = vrot.slane %v5454_v62, 4  ;;  %v5257_v28 = vpack.c.bf16 %v5241_v55, %v5241_v55  ;;  %v5929_v6 = vrot.slane %v5454_v62, 1 }
 0x647   : > { %v5457_v17 = vor.u32 %v5456_v63, %v5453_v0  ;;  %v8570_v63 = vld [vmem:[#allocation4 + $0x220] sm:$0xff] }
 0x648   : > { %v5565_v24 = vor.u32 %v5564_v42, %v5563_v30  ;;  %v5662_v36 = vunpack.c.l.b16 %v5257_v28  ;;  %v11666_v2 = vsel %vm1010_vm5, %v5928_v29, %v5929_v6  ;;  %v5931_v51 = vor.u32 %v5929_v6, %v5451_v13  ;;  %6208 = vmatpush.bf16.msrb.mxu3 %v8570_v63 }
 0x649   : > { %v5458_v55 = vsel %vm538_vm3, %v11612_v22, %v5457_v17  ;;  %v6285_v29 = vrot.slane %v12624_v43, 1  ;;  %v6286_v13 = vrot.slane %v12625_v4, 2 }
 0x64a   : > { %v5566_v62 = vsel %vm670_vm4, %v11614_v60, %v5565_v24  ;;  %v11672_v53 = vpack.c.b16 %v5662_v36, %v5300_v39  ;;  %v11674_v0 = vpack.c.b16 %v5662_v36, %v5662_v36 }
 0x64b   : > { %8226 = vmatmul.msk.bf16.gmra.mxu1 %vm351_vm8, %v5458_v55  ;;  %8241 = vmatmul.msk.bf16.gmra.mxu2 %vm351_vm8, %v5566_v62  ;;  %v11695_v62 = vor.u32 %v6286_v13, %v6285_v29 }
 0x64c   : > { %v5724_v22 = vshrl.u32 %v11672_v53, 16  ;;  %v5727_v30 = vshll.u32 %v11672_v53, 16  ;;  %v6164_v60 = vrot.slane %v11672_v53, 1  ;;  %v5932_v36 = vshll.u32 %v11674_v0, 16 }
 0x64e   : > { %v5726_v39 = vrot.slane %v5724_v22, 3  ;;  %v5729_v42 = vrot.slane %v5727_v30, 4  ;;  %v6050_v28 = vrot.slane %v5727_v30, 1  ;;  %v11691_v20 = vsel %vm1227_vm6, %v12692_v37, %v6164_v60 }
 0x64f   : > { %v11693_v33 = vrot.slane %v5932_v36, 1  ;;  %v6281_v6 = vrot.slane %v5724_v22, 1  ;;  %v6282_v55 = vrot.slane %v5727_v30, 2 }
 0x650   : > { %v5730_v43 = vor.u32 %v5729_v42, %v5726_v39  ;;  %v11698_v4 = vsel %vm1010_vm5, %v6049_v23, %v6050_v28  ;;  %v11700_v63 = vor.u32 %v6050_v28, %v5724_v22 }
 0x651   : > { %v11704_v48 = vsel %vm1010_vm5, %v5931_v51, %v11693_v33  ;;  %v6283_v46 = vor.u32 %v6282_v55, %v6281_v6 }
 0x652   : > { %v5731_v37 = vsel %vm670_vm4, %v5721_v34, %v5730_v43 }
 0x653   : > { %8256 = vmatmul.msk.bf16.gmra.mxu3 %vm351_vm8, %v5731_v37  ;;  %v11709_v36 = vsel %vm1323_vm7, %v6279_v5, %v6283_v46  ;;  %v11713_v29 = vsel %vm1323_vm7, %v6283_v46, %v11695_v62 }
 0x656   : > { %8212 = vmatmul.msk.bf16.gmra.mxu0 %vm351_vm8, %v5319_v14  ;;  %v8572_v14 = vld [vmem:[#allocation4 + $0x230] sm:$0xff] }
 0x657   : > { %6329 = vmatpush.bf16.msrb.mxu0 %v8572_v14 }
 0x65b   : > { %8227 = vmatmul.msk.bf16.gmra.mxu1 %vm351_vm8, %v5457_v17  ;;  %8242 = vmatmul.msk.bf16.gmra.mxu2 %vm351_vm8, %v5565_v24 }
 0x663   : > { %8257 = vmatmul.msk.bf16.gmra.mxu3 %vm351_vm8, %v5730_v43 }
 0x666   : > { %8266 = vmatmul.msk.bf16.vlgmr.msra.gmra.mxu0 %vm351_vm8, %v11331_v12 }
 0x66b   : > { %8281 = vmatmul.msk.bf16.vlgmr.msra.gmra.mxu1 %vm351_vm8, %v11405_v25  ;;  %8296 = vmatmul.msk.bf16.vlgmr.msrb.gmra.mxu2 %vm351_vm8, %v11440_v27 }
 0x673   : > { %8311 = vmatmul.msk.bf16.vlgmr.msrb.gmra.mxu3 %vm351_vm8, %v11433_v38  ;;  %v5363_v51 = vpop.f32.mrf.mxu0 }
 0x676   : > { %8267 = vmatmul.msk.bf16.gmra.mxu0 %vm351_vm8, %v11375_v44 }
 0x678   : > { %v5501_v34 = vpop.f32.mrf.mxu1 }
 0x679   : > { %v5502_v23 = vadd.f32 %v5501_v34, %v5363_v51 }
 0x67b   : > { %8282 = vmatmul.msk.bf16.gmra.mxu1 %vm351_vm8, %v11481_v1  ;;  %8297 = vmatmul.msk.bf16.gmra.mxu2 %vm351_vm8, %v11515_v58  ;;  %v5365_v12 = vpop.f32.mrf.mxu0 }
 0x67e   : > { %v5609_v25 = vpop.f32.mrf.mxu2 }
 0x67f   : > { %v5643_v5 = vadd.f32 %v5609_v25, %v5502_v23 }
 0x680   : > { %v5503_v27 = vpop.f32.mrf.mxu1 }
 0x681   : > { %v5504_v17 = vadd.f32 %v5503_v27, %v5365_v12 }
 0x683   : > { %8312 = vmatmul.msk.bf16.gmra.mxu3 %vm351_vm8, %v11508_v35  ;;  %v5368_v38 = vpop.f32.mrf.mxu0 }
 0x686   : > { %v5611_v44 = vpop.f32.mrf.mxu2  ;;  %v5774_v43 = vpop.f32.mrf.mxu3  ;;  %8268 = vmatmul.msk.bf16.gmra.mxu0 %vm351_vm8, %v11444_v3 }
 0x687   : > { %v5644_v1 = vadd.f32 %v5611_v44, %v5504_v17  ;;  %v11737_v24 = vadd.f32 %v5774_v43, %v5643_v5 }
 0x688   : > { %v5506_v58 = vpop.f32.mrf.mxu1 }
 0x689   : > { %v5507_v13 = vadd.f32 %v5506_v58, %v5368_v38 }
 0x68b   : > { %8283 = vmatmul.msk.bf16.gmra.mxu1 %vm351_vm8, %v11551_v10  ;;  %8298 = vmatmul.msk.bf16.gmra.mxu2 %vm351_vm8, %v11581_v31  ;;  %v5370_v22 = vpop.f32.mrf.mxu0 }
 0x68e   : > { %v5614_v30 = vpop.f32.mrf.mxu2  ;;  %v5776_v35 = vpop.f32.mrf.mxu3 }
 0x68f   : > { %v5645_v39 = vadd.f32 %v5614_v30, %v5507_v13  ;;  %v11743_v42 = vadd.f32 %v5776_v35, %v5644_v1 }
 0x690   : > { %v5508_v28 = vpop.f32.mrf.mxu1 }
 0x691   : > { %v5509_v6 = vadd.f32 %v5508_v28, %v5370_v22 }
 0x693   : > { %8313 = vmatmul.msk.bf16.gmra.mxu3 %vm351_vm8, %v11575_v59  ;;  %v5373_v3 = vpop.f32.mrf.mxu0 }
 0x696   : > { %v5616_v55 = vpop.f32.mrf.mxu2  ;;  %v5779_v46 = vpop.f32.mrf.mxu3  ;;  %8269 = vmatmul.msk.bf16.gmra.mxu0 %vm351_vm8, %v11517_v40 }
 0x697   : > { %v5646_v10 = vadd.f32 %v5616_v55, %v5509_v6  ;;  %v11749_v37 = vadd.f32 %v5779_v46, %v5645_v39 }
 0x698   : > { %v5511_v31 = vpop.f32.mrf.mxu1 }
 0x699   : > { %v5512_v51 = vadd.f32 %v5511_v31, %v5373_v3 }
 0x69b   : > { %8284 = vmatmul.msk.bf16.gmra.mxu1 %vm351_vm8, %v11617_v15  ;;  %8299 = vmatmul.msk.bf16.gmra.mxu2 %vm351_vm8, %v11643_v19  ;;  %v11755_v34 = vpop.f32.mrf.mxu0 }
 0x69e   : > { %v5619_v59 = vpop.f32.mrf.mxu2  ;;  %v5781_v23 = vpop.f32.mrf.mxu3 }
 0x69f   : > { %v5647_v12 = vadd.f32 %v5619_v59, %v5512_v51  ;;  %v11757_v25 = vadd.f32 %v5781_v23, %v5646_v10  ;;  %v5936_v51 = vshrl.u32 %v11674_v0, 16  ;;  %v12694_v59 = vshrl.u32 %v11649_v8, 16 }
 0x6a0   : > { %v11759_v5 = vpop.f32.mrf.mxu1 }
 0x6a3   : > { %8314 = vmatmul.msk.bf16.gmra.mxu3 %vm351_vm8, %v11639_v26  ;;  %v5378_v40 = vpop.f32.mrf.mxu0 }
 0x6a6   : > { %v11763_v14 = vpop.f32.mrf.mxu2  ;;  %v5784_v27 = vpop.f32.mrf.mxu3  ;;  %8270 = vmatmul.msk.bf16.gmra.mxu0 %vm351_vm8, %v11585_v45 }
 0x6a7   : > { %v11767_v15 = vadd.f32 %v5784_v27, %v5647_v12 }
 0x6a8   : > { %v5516_v19 = vpop.f32.mrf.mxu1 }
 0x6a9   : > { %v5517_v17 = vadd.f32 %v5516_v19, %v5378_v40 }
 0x6ab   : > { %8285 = vmatmul.msk.bf16.gmra.mxu1 %vm351_vm8, %v11666_v2  ;;  %8300 = vmatmul.msk.bf16.gmra.mxu2 %vm351_vm8, %v11698_v4  ;;  %v11773_v38 = vpop.f32.mrf.mxu0  ;;  %v12693_v4 = vshll.u32 %v11649_v8, 16 }
 0x6ad   : > { %v6056_v2 = vrot.slane %v12693_v4, 1 }
 0x6ae   : > { %v5624_v26 = vpop.f32.mrf.mxu2  ;;  %v11775_v44 = vpop.f32.mrf.mxu3 }
 0x6af   : > { %v5649_v43 = vadd.f32 %v5624_v26, %v5517_v17  ;;  %v6057_v39 = vsel %vm1010_vm5, %v11700_v63, %v6056_v2  ;;  %v6060_v23 = vor.u32 %v12694_v59, %v6056_v2 }
 0x6b0   : > { %v11777_v1 = vpop.f32.mrf.mxu1 }
 0x6b3   : > { %8315 = vmatmul.msk.bf16.gmra.mxu3 %vm351_vm8, %v11691_v20  ;;  %v5383_v45 = vpop.f32.mrf.mxu0 }
 0x6b6   : > { %v11781_v58 = vpop.f32.mrf.mxu2  ;;  %v5789_v13 = vpop.f32.mrf.mxu3  ;;  %8271 = vmatmul.msk.bf16.gmra.mxu0 %vm351_vm8, %v11645_v11  ;;  %v6166_v11 = vrot.slane %v11649_v8, 1 }
 0x6b7   : > { %v11787_v22 = vadd.f32 %v5789_v13, %v5649_v43 }
 0x6b8   : > { %v5521_v30 = vpop.f32.mrf.mxu1  ;;  %v6167_v46 = vsel %vm1227_vm6, %v6164_v60, %v6166_v11  ;;  %v5938_v60 = vor.u32 %v5936_v51, %v11693_v33  ;;  %v8577_v51 = vld [vmem:[%s12598_s7 + $0x18] sm:$0xff] }
 0x6b9   : > { %v5522_v35 = vadd.f32 %v5521_v30, %v5383_v45  ;;  %6591 = vmatpush.bf16.msrb.mxu1 %v8577_v51 }
 0x6bb   : > { %8286 = vmatmul.msk.bf16.gmra.mxu1 %vm351_vm8, %v11704_v48  ;;  %8301 = vmatmul.msk.bf16.gmra.mxu2 %vm351_vm8, %v6057_v39  ;;  %v11794_v20 = vpop.f32.mrf.mxu0 }
 0x6be   : > { %v5629_v28 = vpop.f32.mrf.mxu2  ;;  %v11796_v6 = vpop.f32.mrf.mxu3 }
 0x6bf   : > { %v5651_v3 = vadd.f32 %v5629_v28, %v5522_v35 }
 0x6c0   : > { %v11799_v55 = vpop.f32.mrf.mxu1 }
 0x6c3   : > { %8316 = vmatmul.msk.bf16.gmra.mxu3 %vm351_vm8, %v6167_v46  ;;  %v5388_v63 = vpop.f32.mrf.mxu0 }
 0x6c6   : > { %v11805_v48 = vpop.f32.mrf.mxu2  ;;  %v5794_v10 = vpop.f32.mrf.mxu3  ;;  %8272 = vmatmul.msk.bf16.gmra.mxu0 %vm351_vm8, %v11674_v0 }
 0x6c7   : > { %v11809_v31 = vadd.f32 %v5794_v10, %v5651_v3 }
 0x6c8   : > { %v5526_v12 = vpop.f32.mrf.mxu1 }
 0x6c9   : > { %v5527_v53 = vadd.f32 %v5526_v12, %v5388_v63 }
 0x6cb   : > { %8287 = vmatmul.msk.bf16.gmra.mxu1 %vm351_vm8, %v5938_v60  ;;  %8302 = vmatmul.msk.bf16.gmra.mxu2 %vm351_vm8, %v6060_v23  ;;  %v11817_v40 = vpop.f32.mrf.mxu0 }
 0x6ce   : > { %v5634_v27 = vpop.f32.mrf.mxu2  ;;  %v11819_v19 = vpop.f32.mrf.mxu3 }
 0x6cf   : > { %v5653_v17 = vadd.f32 %v5634_v27, %v5527_v53 }
 0x6d0   : > { %v11821_v26 = vpop.f32.mrf.mxu1 }
 0x6d3   : > { %8317 = vmatmul.msk.bf16.gmra.mxu3 %vm351_vm8, %v6166_v11  ;;  %v5393_v8 = vpop.f32.mrf.mxu0 }
 0x6d6   : > { %v11824_v0 = vpop.f32.mrf.mxu2  ;;  %v5799_v43 = vpop.f32.mrf.mxu3  ;;  %8326 = vmatmul.msk.bf16.vlgmr.msrb.gmra.mxu0 %vm351_vm8, %v11463_v49 }
 0x6d7   : > { %12695 = vst [vmem:[#allocation17_spill] sm:$0xff] %v11824_v0  ;;  %v11828_v33 = vadd.f32 %v5799_v43, %v5653_v17 }
 0x6d8   : > { %v5531_v45 = vpop.f32.mrf.mxu1 }
 0x6d9   : > { %v5532_v13 = vadd.f32 %v5531_v45, %v5393_v8 }
 0x6db   : > { %v5395_v4 = vpop.f32.mrf.mxu0 }
 0x6de   : > { %v5639_v2 = vpop.f32.mrf.mxu2  ;;  %v11830_v30 = vpop.f32.mrf.mxu3 }
 0x6df   : > { %12696 = vst [vmem:[#allocation15_spill] sm:$0xff] %v11830_v30  ;;  %v5655_v35 = vadd.f32 %v5639_v2, %v5532_v13 }
 0x6e0   : > { %v5533_v39 = vpop.f32.mrf.mxu1 }
 0x6e3   : > { %v5863_v28 = vpop.f32.mrf.mxu0 }
 0x6e4   : > { %v5897_v11 = vadd.f32 %v5863_v28, %v11737_v24 }
 0x6e6   : > { %v5641_v3 = vpop.f32.mrf.mxu2  ;;  %v5804_v46 = vpop.f32.mrf.mxu3  ;;  %8327 = vmatmul.msk.bf16.gmra.mxu0 %vm351_vm8, %v11534_v9 }
 0x6e7   : > { %v11835_v63 = vadd.f32 %v5804_v46, %v5655_v35 }
 0x6e8   : > { %v5981_v49 = vpop.f32.mrf.mxu1 }
 0x6e9   : > { %v6015_v10 = vadd.f32 %v5981_v49, %v5897_v11 }
 0x6eb   : > { %v5865_v59 = vpop.f32.mrf.mxu0 }
 0x6ec   : > { %v11841_v23 = vadd.f32 %v5865_v59, %v11743_v42 }
 0x6ee   : > { %v5806_v12 = vpop.f32.mrf.mxu3  ;;  %v6103_v24 = vpop.f32.mrf.mxu2 }
 0x6ef   : > { %v6137_v53 = vadd.f32 %v6103_v24, %v6015_v10 }
 0x6f0   : > { %v11843_v60 = vpop.f32.mrf.mxu1 }
 0x6f3   : > { %v5868_v27 = vpop.f32.mrf.mxu0 }
 0x6f4   : > { %v5899_v9 = vadd.f32 %v5868_v27, %v11749_v37 }
 0x6f6   : > { %v11846_v17 = vpop.f32.mrf.mxu2  ;;  %v6210_v8 = vpop.f32.mrf.mxu3  ;;  %8328 = vmatmul.msk.bf16.gmra.mxu0 %vm351_vm8, %v11601_v32 }
 0x6f7   : > { %v11850_v43 = vadd.f32 %v6210_v8, %v6137_v53 }
 0x6f8   : > { %v5986_v45 = vpop.f32.mrf.mxu1 }
 0x6f9   : > { %v6017_v13 = vadd.f32 %v5986_v45, %v5899_v9 }
 0x6fb   : > { %v5870_v42 = vpop.f32.mrf.mxu0 }
 0x6fc   : > { %v11853_v4 = vadd.f32 %v5870_v42, %v11757_v25 }
 0x6fe   : > { %v6108_v2 = vpop.f32.mrf.mxu2  ;;  %v11855_v35 = vpop.f32.mrf.mxu3 }
 0x6ff   : > { %v6139_v39 = vadd.f32 %v6108_v2, %v6017_v13 }
 0x700   : > { %v11857_v28 = vpop.f32.mrf.mxu1 }
 0x703   : > { %v5873_v37 = vpop.f32.mrf.mxu0 }
 0x704   : > { %v5901_v11 = vadd.f32 %v5873_v37, %v11767_v15 }
 0x706   : > { %v11860_v3 = vpop.f32.mrf.mxu2  ;;  %v6215_v32 = vpop.f32.mrf.mxu3  ;;  %8329 = vmatmul.msk.bf16.gmra.mxu0 %vm351_vm8, %v11657_v18 }
 0x707   : > { %v11864_v46 = vadd.f32 %v6215_v32, %v6139_v39 }
 0x708   : > { %v5991_v49 = vpop.f32.mrf.mxu1 }
 0x709   : > { %v6019_v25 = vadd.f32 %v5991_v49, %v5901_v11 }
 0x70b   : > { %v11866_v10 = vpop.f32.mrf.mxu0 }
 0x70e   : > { %v6113_v51 = vpop.f32.mrf.mxu2  ;;  %v11868_v59 = vpop.f32.mrf.mxu3 }
 0x70f   : > { %v6141_v12 = vadd.f32 %v6113_v51, %v6019_v25 }
 0x710   : > { %v11870_v24 = vpop.f32.mrf.mxu1 }
 0x713   : > { %v5878_v53 = vpop.f32.mrf.mxu0 }
 0x714   : > { %v5903_v15 = vadd.f32 %v5878_v53, %v11787_v22  ;;  %v8576_v22 = vld [vmem:[%s12598_s7 + $0x10] sm:$0xff] }
 0x715   : > { %6592 = vmatpush.bf16.msrb.mxu1 %v8576_v22 }
 0x716   : > { %v11873_v27 = vpop.f32.mrf.mxu2  ;;  %v6220_v9 = vpop.f32.mrf.mxu3  ;;  %8330 = vmatmul.msk.bf16.gmra.mxu0 %vm351_vm8, %v11709_v36 }
 0x717   : > { %v11877_v18 = vadd.f32 %v6220_v9, %v6141_v12 }
 0x718   : > { %v5996_v8 = vpop.f32.mrf.mxu1 }
 0x719   : > { %v6021_v45 = vadd.f32 %v5996_v8, %v5903_v15 }
 0x71b   : > { %v11879_v13 = vpop.f32.mrf.mxu0 }
 0x71e   : > { %v6118_v42 = vpop.f32.mrf.mxu2  ;;  %v11881_v2 = vpop.f32.mrf.mxu3 }
 0x71f   : > { %v6143_v39 = vadd.f32 %v6118_v42, %v6021_v45 }
 0x720   : > { %v11883_v37 = vpop.f32.mrf.mxu1 }
 0x723   : > { %v5883_v11 = vpop.f32.mrf.mxu0 }
 0x724   : > { %v5905_v36 = vadd.f32 %v5883_v11, %v11809_v31 }
 0x726   : > { %v11889_v32 = vpop.f32.mrf.mxu2  ;;  %v6225_v49 = vpop.f32.mrf.mxu3  ;;  %8331 = vmatmul.msk.bf16.gmra.mxu0 %vm351_vm8, %v11713_v29 }
 0x727   : > { %v11893_v25 = vadd.f32 %v6225_v49, %v6143_v39 }
 0x728   : > { %v6001_v51 = vpop.f32.mrf.mxu1 }
 0x729   : > { %v6023_v12 = vadd.f32 %v6001_v51, %v5905_v36 }
 0x72b   : > { %v11895_v53 = vpop.f32.mrf.mxu0 }
 0x72e   : > { %v6123_v15 = vpop.f32.mrf.mxu2  ;;  %v11897_v9 = vpop.f32.mrf.mxu3 }
 0x72f   : > { %v6145_v8 = vadd.f32 %v6123_v15, %v6023_v12 }
 0x730   : > { %v11899_v45 = vpop.f32.mrf.mxu1 }
 0x733   : > { %v5888_v42 = vpop.f32.mrf.mxu0 }
 0x734   : > { %v5907_v31 = vadd.f32 %v5888_v42, %v11828_v33 }
 0x736   : > { %v11902_v22 = vpop.f32.mrf.mxu2  ;;  %v6230_v11 = vpop.f32.mrf.mxu3  ;;  %8332 = vmatmul.msk.bf16.gmra.mxu0 %vm351_vm8, %v11695_v62 }
 0x737   : > { %v11906_v29 = vadd.f32 %v6230_v11, %v6145_v8 }
 0x738   : > { %v6006_v39 = vpop.f32.mrf.mxu1 }
 0x739   : > { %v6025_v36 = vadd.f32 %v6006_v39, %v5907_v31 }
 0x73b   : > { %v11908_v49 = vpop.f32.mrf.mxu0 }
 0x73c   : > { %12697 = vst [vmem:[#allocation18_spill] sm:$0xff] %v11908_v49 }
 0x73e   : > { %v6128_v51 = vpop.f32.mrf.mxu2  ;;  %v11910_v50 = vpop.f32.mrf.mxu3 }
 0x73f   : > { %v6147_v12 = vadd.f32 %v6128_v51, %v6025_v36  ;;  %v11924_v36 = vld [vmem:[%s12596_s5 + $0x3] ss:$0 sm:$0xff] }
 0x740   : > { %v11912_v15 = vpop.f32.mrf.mxu1 }
 0x743   : > { %v5893_v61 = vpop.f32.mrf.mxu0 }
 0x744   : > { %v5909_v33 = vadd.f32 %v5893_v61, %v11835_v63  ;;  %v6016_v63 = vadd.f32 %v11843_v60, %v11841_v23  ;;  %v8726_v60 = vld [vmem:[#allocation2 + $0x10] sm:$0xff] }
 0x746   : > { %v11915_v42 = vpop.f32.mrf.mxu2  ;;  %v6235_v30 = vpop.f32.mrf.mxu3 }
 0x747   : > { %v11917_v54 = vadd.f32 %v6235_v30, %v6147_v12  ;;  %v11930_v30 = vld [vmem:[%s12597_s6 + $0x3] ss:$0 sm:$0xff] }
 0x748   : > { %v6011_v62 = vpop.f32.mrf.mxu1 }
 0x749   : > { %v6027_v8 = vadd.f32 %v6011_v62, %v5909_v33 }
 0x74b   : > { %v5895_v11 = vpop.f32.mrf.mxu0 }
 0x74e   : > { %v6133_v31 = vpop.f32.mrf.mxu2  ;;  %v11919_v39 = vpop.f32.mrf.mxu3 }
 0x74f   : > { %v6149_v49 = vadd.f32 %v6133_v31, %v6027_v8  ;;  %v6138_v8 = vadd.f32 %v11846_v17, %v6016_v63  ;;  %v8579_v31 = vld [vmem:[%s12598_s7 + $0x28] sm:$0xff] }
 0x750   : > { %v6013_v0 = vpop.f32.mrf.mxu1  ;;  %6837 = vmatpush.bf16.msra.mxu3 %v8579_v31  ;;  %v8727_v31 = vld [vmem:[#allocation2 + $0x18] sm:$0xff] }
 0x751   : > { %v6245_v23 = vadd.f32 %v11855_v35, %v6138_v8 }
 0x753   : > { %v6331_v51 = vpop.f32.mrf.mxu0 }
 0x754   : > { %v6365_v61 = vadd.f32 %v6331_v51, %v11850_v43  ;;  %v8575_v43 = vld [vmem:[%s12598_s7 + $0x8] sm:$0xff] }
 0x755   : > { %6729 = vmatpush.bf16.msra.mxu2 %v8575_v43  ;;  %v8583_v43 = vld [vmem:[%s12598_s7 + $0x48] sm:$0xff] }
 0x756   : > { %v6381_v12 = vmul.f32 %v11924_v36, %v6365_v61  ;;  %v6240_v33 = vpop.f32.mrf.mxu3  ;;  %v6135_v0 = vpop.f32.mrf.mxu2  ;;  %7091 = vmatpush.bf16.msra.mxu1 %v8583_v43 }
 0x757   : > { %v11935_v62 = vadd.f32 %v6240_v33, %v6149_v49  ;;  %v8578_v0 = vld [vmem:[%s12598_s7 + $0x20] sm:$0xff] }
 0x758   : > { %v6397_v11 = vadd.f32 %v11930_v30, %v6381_v12  ;;  %v8574_v12 = vld [vmem:[%s12598_s7] sm:$0xff]  ;;  %6838 = vmatpush.bf16.msra.mxu3 %v8578_v0 }
 0x759   : > { %12698 = vst [vmem:[#allocation7_spill] sm:$0xff] %v11935_v62  ;;  %6730 = vmatpush.bf16.msra.mxu2 %v8574_v12  ;;  %v8580_v12 = vld [vmem:[%s12598_s7 + $0x30] sm:$0xff] }
 0x75a   : > { %v6410_v51 = vadd.f32 %v8726_v60, %v6397_v11  ;;  %v6462_v11 = vld [vmem:[#allocation2] sm:$0xff]  ;;  %v6463_v60 = vld [vmem:[#allocation2 + $0x8] sm:$0xff] }
 0x75b   : > { %v6333_v49 = vpop.f32.mrf.mxu0 }
 0x75c   : > { %v6423_v61 = vmax.f32 %v6410_v51, 0.0  ;;  %v6366_v33 = vadd.f32 %v6333_v49, %v6245_v23  ;;  %v6478_v49 = vpack.c.bf16 %v6462_v11, %v6462_v11 }
 0x75e   : > { %v6436_v17 = vmul.f32 %v6423_v61, %v9407_v47  ;;  %v6382_v63 = vmul.f32 %v11924_v36, %v6366_v33  ;;  %v6242_v35 = vpop.f32.mrf.mxu3  ;;  %v8581_v47 = vld [vmem:[%s12598_s7 + $0x38] sm:$0xff]  ;;  %v6518_v0 = vunpack.c.l.b16 %v6478_v49 }
 0x75f   : > { %7002 = vmatpush.bf16.msra.mxu0 %v8581_v47 }
 0x760   : > { %6449 = vst.msk [vmem:[#allocation2 + $0x10] sm:$0xff] %vm351_vm8, %v6436_v17  ;;  %v6398_v8 = vadd.f32 %v11930_v30, %v6382_v63  ;;  %v6479_v17 = vpack.c.bf16 %v6463_v60, %v6463_v60  ;;  %v6018_v63 = vadd.f32 %v11857_v28, %v11853_v4  ;;  %v8728_v4 = vld [vmem:[#allocation2 + $0x20] sm:$0xff] }
 0x762   : > { %v6411_v23 = vadd.f32 %v8727_v31, %v6398_v8  ;;  %v6140_v8 = vadd.f32 %v11860_v3, %v6018_v63 }
 0x763   : > { %v6336_v51 = vpop.f32.mrf.mxu0  ;;  %7003 = vmatpush.bf16.msra.mxu0 %v8580_v12 }
 0x764   : > { %v6424_v61 = vmax.f32 %v6411_v23, 0.0  ;;  %v6367_v33 = vadd.f32 %v6336_v51, %v11864_v46  ;;  %v6519_v46 = vunpack.c.l.b16 %v6479_v17  ;;  %v6247_v47 = vadd.f32 %v11868_v59, %v6140_v8 }
 0x765   : > { %v5514_v23 = vadd.f32 %v11759_v5, %v11755_v34 }
 0x766   : > { %v6437_v35 = vmul.f32 %v6424_v61, %v9413_v56  ;;  %v6383_v62 = vmul.f32 %v11924_v36, %v6367_v33  ;;  %v6532_v31 = vpack.c.b16 %v6519_v46, %v6518_v0  ;;  %v8729_v0 = vld [vmem:[#allocation2 + $0x28] sm:$0xff] }
 0x767   : > { %v6464_v56 = vld [vmem:[#allocation2 + $0x10] sm:$0xff]  ;;  %v5648_v3 = vadd.f32 %v11763_v14, %v5514_v23 }
 0x768   : > { %6450 = vst.msk [vmem:[#allocation2 + $0x18] sm:$0xff] %vm351_vm8, %v6437_v35  ;;  %v6399_v11 = vadd.f32 %v11930_v30, %v6383_v62  ;;  %v6480_v49 = vpack.c.bf16 %v6464_v56, %v6464_v56  ;;  %v6629_v17 = vshrl.u32 %v6532_v31, 16  ;;  %v6632_v59 = vshll.u32 %v6532_v31, 16 }
 0x769   : > { %v5813_v63 = vadd.f32 %v11775_v44, %v5648_v3  ;;  %v6539_v23 = vrot.slane %v6532_v31, 3 }
 0x76a   : > { %v6412_v28 = vadd.f32 %v8728_v4, %v6399_v11  ;;  %v6520_v34 = vunpack.c.l.b16 %v6480_v49  ;;  %v6771_v4 = vrot.slane %v6629_v17, 3 }
 0x76b   : > { %v6338_v43 = vpop.f32.mrf.mxu0  ;;  %v5902_v5 = vadd.f32 %v11866_v10, %v5813_v63 }
 0x76c   : > { %v6425_v60 = vmax.f32 %v6412_v28, 0.0  ;;  %v6368_v51 = vadd.f32 %v6338_v43, %v6247_v47  ;;  %v6634_v47 = vrot.slane %v6632_v59, 3  ;;  %v6772_v28 = vrot.slane %v6632_v59, 4 }
 0x76e   : > { %v6438_v61 = vmul.f32 %v6425_v60, %v9423_v7  ;;  %v6384_v62 = vmul.f32 %v11924_v36, %v6368_v51  ;;  %v6631_v7 = vrot.slane %v6629_v17, 2  ;;  %v6020_v60 = vadd.f32 %v11870_v24, %v5902_v5  ;;  %v8730_v5 = vld [vmem:[#allocation2 + $0x30] sm:$0xff] }
 0x76f   : > { %v6465_v33 = vld [vmem:[#allocation2 + $0x18] sm:$0xff]  ;;  %v6894_v51 = vpack.c.b16 %v6520_v34, %v6519_v46 }
 0x770   : > { %6451 = vst.msk [vmem:[#allocation2 + $0x20] sm:$0xff] %vm351_vm8, %v6438_v61  ;;  %v6400_v35 = vadd.f32 %v11930_v30, %v6384_v62  ;;  %v6481_v12 = vpack.c.bf16 %v6465_v33, %v6465_v33  ;;  %v6142_v62 = vadd.f32 %v11873_v27, %v6020_v60  ;;  %v6635_v33 = vor.u32 %v6634_v47, %v6631_v7 }
 0x772   : > { %v6413_v8 = vadd.f32 %v8729_v0, %v6400_v35  ;;  %v6521_v14 = vunpack.c.l.b16 %v6481_v12 }
 0x773   : > { %v6341_v11 = vpop.f32.mrf.mxu0 }
 0x774   : > { %v6426_v56 = vmax.f32 %v6413_v8, 0.0  ;;  %v6369_v43 = vadd.f32 %v6341_v11, %v11877_v18  ;;  %v11984_v44 = vpack.c.b16 %v6521_v14, %v6520_v34  ;;  %v6773_v18 = vor.u32 %v6772_v28, %v6771_v4 }
 0x775   : > { %v6249_v34 = vadd.f32 %v11881_v2, %v6142_v62  ;;  %v6902_v8 = vshrl.u32 %v6894_v51, 16  ;;  %v6905_v11 = vshll.u32 %v6894_v51, 16 }
 0x776   : > { %v6439_v49 = vmul.f32 %v6426_v56, %v9436_v57  ;;  %v6385_v10 = vmul.f32 %v11924_v36, %v6369_v43  ;;  %v6540_v3 = vrot.slane %v11984_v44, 3  ;;  %v6637_v61 = vshrl.u32 %v11984_v44, 16 }
 0x777   : > { %v6640_v17 = vshll.u32 %v11984_v44, 16  ;;  %v6466_v59 = vld [vmem:[#allocation2 + $0x20] sm:$0xff]  ;;  %v5519_v43 = vadd.f32 %v11777_v1, %v11773_v38  ;;  %v6904_v38 = vrot.slane %v6902_v8, 3  ;;  %v6907_v1 = vrot.slane %v6905_v11, 4 }
 0x778   : > { %6452 = vst.msk [vmem:[#allocation2 + $0x28] sm:$0xff] %vm351_vm8, %v6439_v49  ;;  %v6401_v24 = vadd.f32 %v11930_v30, %v6385_v10  ;;  %v6541_v57 = vsel %vm455_vm1, %v6539_v23, %v6540_v3  ;;  %v6639_v46 = vrot.slane %v6637_v61, 2  ;;  %v6774_v31 = vrot.slane %v6637_v61, 3 }
 0x779   : > { %8345 = vmatmul.msk.bf16.vlgmr.msrb.gmra.mxu1 %vm351_vm8, %v6541_v57  ;;  %v6642_v63 = vrot.slane %v6640_v17, 3  ;;  %v6775_v35 = vrot.slane %v6640_v17, 4  ;;  %v6482_v27 = vpack.c.bf16 %v6466_v59, %v6466_v59  ;;  %v7146_v12 = vrot.slane %v6640_v17, 1 }
 0x77a   : > { %v6414_v0 = vadd.f32 %v8730_v5, %v6401_v24  ;;  %v5650_v10 = vadd.f32 %v11781_v58, %v5519_v43  ;;  %v6908_v5 = vor.u32 %v6907_v1, %v6904_v38 }
 0x77b   : > { %v6343_v7 = vpop.f32.mrf.mxu0  ;;  %v12000_v47 = vor.u32 %v6642_v63, %v6639_v46  ;;  %v12002_v4 = vor.u32 %v6775_v35, %v6774_v31  ;;  %v6522_v28 = vunpack.c.l.b16 %v6482_v27  ;;  %v12004_v56 = vor.u32 %v7146_v12, %v6637_v61  ;;  %v8731_v31 = vld [vmem:[#allocation2 + $0x38] sm:$0xff] }
 0x77c   : > { %v6427_v23 = vmax.f32 %v6414_v0, 0.0  ;;  %v6370_v60 = vadd.f32 %v6343_v7, %v6249_v34 }
 0x77d   : > { %v6644_v2 = vsel %vm538_vm3, %v6635_v33, %v12000_v47  ;;  %v6777_v49 = vsel %vm670_vm4, %v6773_v18, %v12002_v4  ;;  %v12012_v51 = vpack.c.b16 %v6522_v28, %v6521_v14  ;;  %v5815_v14 = vadd.f32 %v11796_v6, %v5650_v10 }
 0x77e   : > { %v6440_v62 = vmul.f32 %v6427_v23, %v9449_v21  ;;  %v6386_v61 = vmul.f32 %v11924_v36, %v6370_v60  ;;  %8360 = vmatmul.msk.bf16.vlgmr.msra.gmra.mxu2 %vm351_vm8, %v6644_v2  ;;  %8379 = vmatmul.msk.bf16.vlgmr.msra.gmra.mxu3 %vm351_vm8, %v6777_v49 }
 0x77f   : > { %v6910_v17 = vshrl.u32 %v12012_v51, 16  ;;  %v6913_v33 = vshll.u32 %v12012_v51, 16  ;;  %v6467_v59 = vld [vmem:[#allocation2 + $0x28] sm:$0xff]  ;;  %v5904_v12 = vadd.f32 %v11879_v13, %v5815_v14  ;;  %v8732_v14 = vld [vmem:[#allocation2 + $0x40] sm:$0xff] }
 0x780   : > { %6453 = vst.msk [vmem:[#allocation2 + $0x30] sm:$0xff] %vm351_vm8, %v6440_v62  ;;  %v6402_v58 = vadd.f32 %v11930_v30, %v6386_v61  ;;  %v6483_v21 = vpack.c.bf16 %v6467_v59, %v6467_v59 }
 0x781   : > { %v6912_v18 = vrot.slane %v6910_v17, 3  ;;  %v6915_v24 = vrot.slane %v6913_v33, 4  ;;  %v7267_v57 = vrot.slane %v6913_v33, 1  ;;  %v7493_v46 = vrot.slane %v6910_v17, 1 }
 0x782   : > { %v6415_v63 = vadd.f32 %v8731_v31, %v6402_v58  ;;  %v6523_v35 = vunpack.c.l.b16 %v6483_v21  ;;  %v7494_v27 = vrot.slane %v6913_v33, 2  ;;  %v6022_v23 = vadd.f32 %v11883_v37, %v5904_v12 }
 0x783   : > { %v6346_v34 = vpop.f32.mrf.mxu0  ;;  %v12025_v0 = vor.u32 %v6915_v24, %v6912_v18  ;;  %v12027_v6 = vor.u32 %v7267_v57, %v6910_v17 }
 0x784   : > { %v6428_v8 = vmax.f32 %v6415_v63, 0.0  ;;  %v6371_v11 = vadd.f32 %v6346_v34, %v11893_v25  ;;  %v12030_v7 = vpack.c.b16 %v6523_v35, %v6522_v28  ;;  %v12032_v43 = vor.u32 %v7494_v27, %v7493_v46 }
 0x785   : > { %v6917_v60 = vsel %vm670_vm4, %v6908_v5, %v12025_v0  ;;  %v6144_v25 = vadd.f32 %v11889_v32, %v6022_v23  ;;  %v5524_v46 = vadd.f32 %v11799_v55, %v11794_v20 }
 0x786   : > { %v6441_v13 = vmul.f32 %v6428_v8, %v9483_v52  ;;  %v6387_v2 = vmul.f32 %v11924_v36, %v6371_v11  ;;  %8398 = vmatmul.msk.bf16.vlgmr.msra.gmra.mxu0 %vm351_vm8, %v6917_v60  ;;  %v6542_v49 = vrot.slane %v12030_v7, 3  ;;  %v6646_v10 = vshrl.u32 %v12030_v7, 16 }
 0x787   : > { %v6649_v28 = vshll.u32 %v12030_v7, 16  ;;  %v6468_v62 = vld [vmem:[#allocation2 + $0x30] sm:$0xff]  ;;  %v6251_v59 = vadd.f32 %v11897_v9, %v6144_v25  ;;  %v7386_v11 = vrot.slane %v12012_v51, 1 }
 0x788   : > { %6454 = vst.msk [vmem:[#allocation2 + $0x38] sm:$0xff] %vm351_vm8, %v6441_v13  ;;  %v6403_v37 = vadd.f32 %v11930_v30, %v6387_v2  ;;  %v6543_v52 = vsel %vm455_vm1, %v6540_v3, %v6542_v49  ;;  %v6648_v61 = vrot.slane %v6646_v10, 2  ;;  %v6778_v38 = vrot.slane %v6646_v10, 3 }
 0x789   : > { %8346 = vmatmul.msk.bf16.gmra.mxu1 %vm351_vm8, %v6543_v52  ;;  %v6651_v1 = vrot.slane %v6649_v28, 3  ;;  %v6779_v17 = vrot.slane %v6649_v28, 4  ;;  %v6484_v32 = vpack.c.bf16 %v6468_v62, %v6468_v62  ;;  %v7148_v33 = vrot.slane %v6649_v28, 1 }
 0x78a   : > { %v6416_v58 = vadd.f32 %v8732_v14, %v6403_v37 }
 0x78b   : > { %v6348_v21 = vpop.f32.mrf.mxu0  ;;  %v12053_v18 = vor.u32 %v6651_v1, %v6648_v61  ;;  %v12055_v24 = vor.u32 %v6779_v17, %v6778_v38  ;;  %v6524_v57 = vunpack.c.l.b16 %v6484_v32  ;;  %v12059_v3 = vsel %vm1010_vm5, %v12004_v56, %v7148_v33 }
 0x78c   : > { %v6429_v31 = vmax.f32 %v6416_v58, 0.0  ;;  %v6372_v63 = vadd.f32 %v6348_v21, %v6251_v59  ;;  %v12063_v27 = vor.u32 %v7148_v33, %v6646_v10  ;;  %v5652_v56 = vadd.f32 %v11805_v48, %v5524_v46  ;;  %v8733_v10 = vld [vmem:[#allocation2 + $0x48] sm:$0xff] }
 0x78d   : > { %v6653_v9 = vsel %vm538_vm3, %v12000_v47, %v12053_v18  ;;  %v6781_v12 = vsel %vm670_vm4, %v12002_v4, %v12055_v24  ;;  %v12071_v34 = vpack.c.b16 %v6524_v57, %v6523_v35 }
 0x78e   : > { %v6442_v5 = vmul.f32 %v6429_v31, %v9511_v41  ;;  %v6388_v20 = vmul.f32 %v11924_v36, %v6372_v63  ;;  %8361 = vmatmul.msk.bf16.gmra.mxu2 %vm351_vm8, %v6653_v9  ;;  %8380 = vmatmul.msk.bf16.gmra.mxu3 %vm351_vm8, %v6781_v12  ;;  %v5817_v35 = vadd.f32 %v11819_v19, %v5652_v56  ;;  %v8582_v63 = vld [vmem:[%s12598_s7 + $0x40] sm:$0xff] }
 0x78f   : > { %v6919_v55 = vshrl.u32 %v12071_v34, 16  ;;  %v6922_v47 = vshll.u32 %v12071_v34, 16  ;;  %v6469_v8 = vld [vmem:[#allocation2 + $0x38] sm:$0xff]  ;;  %v7387_v4 = vrot.slane %v12071_v34, 1  ;;  %7092 = vmatpush.bf16.msra.mxu1 %v8582_v63 }
 0x790   : > { %6455 = vst.msk [vmem:[#allocation2 + $0x40] sm:$0xff] %vm351_vm8, %v6442_v5  ;;  %v6404_v41 = vadd.f32 %v11930_v30, %v6388_v20  ;;  %v6485_v48 = vpack.c.bf16 %v6469_v8, %v6469_v8  ;;  %v5906_v19 = vadd.f32 %v11895_v53, %v5817_v35  ;;  %v8734_v20 = vld [vmem:[#allocation2 + $0x50] sm:$0xff] }
 0x791   : > { %v6921_v23 = vrot.slane %v6919_v55, 3  ;;  %v6924_v60 = vrot.slane %v6922_v47, 4  ;;  %v7269_v13 = vrot.slane %v6922_v47, 1  ;;  %v12088_v2 = vsel %vm1227_vm6, %v7386_v11, %v7387_v4 }
 0x792   : > { %v6417_v25 = vadd.f32 %v8733_v10, %v6404_v41  ;;  %v6525_v51 = vunpack.c.l.b16 %v6485_v48  ;;  %v7496_v28 = vrot.slane %v6919_v55, 1  ;;  %v7497_v62 = vrot.slane %v6922_v47, 2 }
 0x793   : > { %v6351_v37 = vpop.f32.mrf.mxu0  ;;  %v12091_v52 = vor.u32 %v6924_v60, %v6921_v23  ;;  %v12095_v61 = vsel %vm1010_vm5, %v12027_v6, %v7269_v13  ;;  %v12097_v38 = vor.u32 %v7269_v13, %v6919_v55  ;;  %v6024_v59 = vadd.f32 %v11899_v45, %v5906_v19 }
 0x794   : > { %v6430_v1 = vmax.f32 %v6417_v25, 0.0  ;;  %v6373_v17 = vadd.f32 %v6351_v37, %v11906_v29  ;;  %v12100_v32 = vpack.c.b16 %v6525_v51, %v6524_v57  ;;  %v12102_v33 = vor.u32 %v7497_v62, %v7496_v28  ;;  %v12699_v25 = vld [vmem:[#allocation17_spill] sm:$0xff]  ;;  %v12700_v28 = vld [vmem:[#allocation8_spill] sm:$0xff] }
 0x795   : > { %v6926_v53 = vsel %vm670_vm4, %v12025_v0, %v12091_v52  ;;  %v6146_v21 = vadd.f32 %v11902_v22, %v6024_v59  ;;  %v5529_v41 = vadd.f32 %v11821_v26, %v11817_v40 }
 0x796   : > { %v6443_v14 = vmul.f32 %v6430_v1, %v12660_v16  ;;  %v6389_v6 = vmul.f32 %v11924_v36, %v6373_v17  ;;  %8399 = vmatmul.msk.bf16.gmra.mxu0 %vm351_vm8, %v6926_v53  ;;  %v6544_v58 = vrot.slane %v12100_v32, 3  ;;  %v6655_v29 = vshrl.u32 %v12100_v32, 16 }
 0x797   : > { %v6658_v57 = vshll.u32 %v12100_v32, 16  ;;  %v6470_v46 = vld [vmem:[#allocation2 + $0x40] sm:$0xff]  ;;  %v12118_v45 = vsel %vm1323_vm7, %v12032_v43, %v12102_v33  ;;  %v6253_v5 = vadd.f32 %v11910_v50, %v6146_v21 }
 0x798   : > { %6456 = vst.msk [vmem:[#allocation2 + $0x48] sm:$0xff] %vm351_vm8, %v6443_v14  ;;  %v6405_v16 = vadd.f32 %v11930_v30, %v6389_v6  ;;  %v6545_v0 = vsel %vm455_vm1, %v6542_v49, %v6544_v58  ;;  %v6657_v31 = vrot.slane %v6655_v29, 2  ;;  %v6782_v22 = vrot.slane %v6655_v29, 3 }
 0x799   : > { %8347 = vmatmul.msk.bf16.gmra.mxu1 %vm351_vm8, %v6545_v0  ;;  %v6660_v43 = vrot.slane %v6658_v57, 3  ;;  %v6783_v9 = vrot.slane %v6658_v57, 4  ;;  %v6486_v12 = vpack.c.bf16 %v6470_v46, %v6470_v46  ;;  %v7151_v56 = vrot.slane %v6658_v57, 1  ;;  %v12702_v0 = vld [vmem:[#allocation18_spill] sm:$0xff] }
 0x79a   : > { %v6418_v55 = vadd.f32 %v8734_v20, %v6405_v16 }
 0x79b   : > { %v6353_v47 = vpop.f32.mrf.mxu0  ;;  %v12132_v8 = vor.u32 %v6660_v43, %v6657_v31  ;;  %v12134_v49 = vor.u32 %v6783_v9, %v6782_v22  ;;  %v6526_v11 = vunpack.c.l.b16 %v6486_v12  ;;  %v12138_v35 = vsel %vm1010_vm5, %v12063_v27, %v7151_v56 }
 0x79c   : > { %v6431_v48 = vmax.f32 %v6418_v55, 0.0  ;;  %v6374_v23 = vadd.f32 %v6353_v47, %v6253_v5  ;;  %v12142_v60 = vor.u32 %v7151_v56, %v6655_v29  ;;  %v5654_v27 = vadd.f32 %v12699_v25, %v5529_v41  ;;  %v8735_v29 = vld [vmem:[#allocation2 + $0x58] sm:$0xff]  ;;  %v12703_v55 = vld [vmem:[#allocation9_spill] sm:$0xff] }
 0x79d   : > { %v6662_v50 = vsel %vm538_vm3, %v12053_v18, %v12132_v8  ;;  %v6785_v13 = vsel %vm670_vm4, %v12055_v24, %v12134_v49  ;;  %v12150_v10 = vpack.c.b16 %v6526_v11, %v6525_v51  ;;  %v12701_v24 = vld [vmem:[#allocation15_spill] sm:$0xff] }
 0x79e   : > { %v6444_v62 = vmul.f32 %v6431_v48, %v12700_v28  ;;  %v6390_v40 = vmul.f32 %v11924_v36, %v6374_v23  ;;  %8362 = vmatmul.msk.bf16.gmra.mxu2 %vm351_vm8, %v6662_v50  ;;  %8381 = vmatmul.msk.bf16.gmra.mxu3 %vm351_vm8, %v6785_v13  ;;  %v5819_v51 = vadd.f32 %v12701_v24, %v5654_v27 }
 0x79f   : > { %v6928_v26 = vshrl.u32 %v12150_v10, 16  ;;  %v6931_v18 = vshll.u32 %v12150_v10, 16  ;;  %v6471_v19 = vld [vmem:[#allocation2 + $0x48] sm:$0xff]  ;;  %v7389_v37 = vrot.slane %v12150_v10, 1 }
 0x7a0   : > { %6457 = vst.msk [vmem:[#allocation2 + $0x50] sm:$0xff] %vm351_vm8, %v6444_v62  ;;  %v6406_v1 = vadd.f32 %v11930_v30, %v6390_v40  ;;  %v6487_v17 = vpack.c.bf16 %v6471_v19, %v6471_v19  ;;  %v5908_v31 = vadd.f32 %v12702_v0, %v5819_v51  ;;  %v8736_v40 = vld [vmem:[#allocation2 + $0x60] sm:$0xff] }
 0x7a1   : > { %v6930_v59 = vrot.slane %v6928_v26, 3  ;;  %v6933_v53 = vrot.slane %v6931_v18, 4  ;;  %v7272_v14 = vrot.slane %v6931_v18, 1  ;;  %v12168_v6 = vsel %vm1227_vm6, %v7387_v4, %v7389_v37 }
 0x7a2   : > { %v6419_v21 = vadd.f32 %v8735_v29, %v6406_v1  ;;  %v6527_v57 = vunpack.c.l.b16 %v6487_v17  ;;  %v7500_v46 = vrot.slane %v6928_v26, 1  ;;  %v7501_v16 = vrot.slane %v6931_v18, 2  ;;  %v12704_v29 = vld [vmem:[#allocation10_spill] sm:$0xff] }
 0x7a3   : > { %v6356_v22 = vpop.f32.mrf.mxu0  ;;  %v12171_v63 = vor.u32 %v6933_v53, %v6930_v59  ;;  %v12175_v43 = vsel %vm1010_vm5, %v12097_v38, %v7272_v14  ;;  %v7274_v9 = vor.u32 %v7272_v14, %v6928_v26  ;;  %v6026_v5 = vadd.f32 %v11912_v15, %v5908_v31 }
 0x7a4   : > { %v6432_v12 = vmax.f32 %v6419_v21, 0.0  ;;  %v6375_v34 = vadd.f32 %v6356_v22, %v11917_v54  ;;  %v12178_v4 = vpack.c.b16 %v6527_v57, %v6526_v11  ;;  %v12180_v56 = vor.u32 %v7501_v16, %v7500_v46 }
 0x7a5   : > { %v6935_v20 = vsel %vm670_vm4, %v12091_v52, %v12171_v63  ;;  %v6148_v11 = vadd.f32 %v11915_v42, %v6026_v5  ;;  %v8737_v5 = vld [vmem:[#allocation2 + $0x68] sm:$0xff] }
 0x7a6   : > { %v6445_v47 = vmul.f32 %v6432_v12, %v12703_v55  ;;  %v6391_v41 = vmul.f32 %v11924_v36, %v6375_v34  ;;  %8400 = vmatmul.msk.bf16.gmra.mxu0 %vm351_vm8, %v6935_v20  ;;  %v6546_v38 = vrot.slane %v12178_v4, 3  ;;  %v6664_v54 = vshrl.u32 %v12178_v4, 16 }
 0x7a7   : > { %v6667_v48 = vshll.u32 %v12178_v4, 16  ;;  %v6472_v23 = vld [vmem:[#allocation2 + $0x50] sm:$0xff]  ;;  %v12196_v15 = vsel %vm1323_vm7, %v12102_v33, %v12180_v56  ;;  %v6255_v33 = vadd.f32 %v11919_v39, %v6148_v11 }
 0x7a8   : > { %6458 = vst.msk [vmem:[#allocation2 + $0x58] sm:$0xff] %vm351_vm8, %v6445_v47  ;;  %v6407_v52 = vadd.f32 %v11930_v30, %v6391_v41  ;;  %v6547_v50 = vsel %vm455_vm1, %v6544_v58, %v6546_v38  ;;  %v6666_v13 = vrot.slane %v6664_v54, 2  ;;  %v6786_v42 = vrot.slane %v6664_v54, 3 }
 0x7a9   : > { %8348 = vmatmul.msk.bf16.gmra.mxu1 %vm351_vm8, %v6547_v50  ;;  %v6669_v25 = vrot.slane %v6667_v48, 3  ;;  %v6787_v27 = vrot.slane %v6667_v48, 4  ;;  %v6488_v28 = vpack.c.bf16 %v6472_v23, %v6472_v23  ;;  %v7154_v62 = vrot.slane %v6667_v48, 1  ;;  %v12705_v50 = vld [vmem:[#allocation7_spill] sm:$0xff] }
 0x7aa   : > { %v6420_v26 = vadd.f32 %v8736_v40, %v6407_v52 }
 0x7ab   : > { %v6358_v18 = vpop.f32.mrf.mxu0  ;;  %v12207_v19 = vor.u32 %v6669_v25, %v6666_v13  ;;  %v12209_v24 = vor.u32 %v6787_v27, %v6786_v42  ;;  %v6528_v51 = vunpack.c.l.b16 %v6488_v28  ;;  %v12213_v58 = vsel %vm1010_vm5, %v12142_v60, %v7154_v62  ;;  %v12706_v25 = vld [vmem:[#allocation11_spill] sm:$0xff] }
 0x7ac   : > { %v6433_v1 = vmax.f32 %v6420_v26, 0.0  ;;  %v6376_v17 = vadd.f32 %v6358_v18, %v6255_v33  ;;  %v7156_v59 = vor.u32 %v7154_v62, %v6664_v54 }
 0x7ad   : > { %v6671_v53 = vsel %vm538_vm3, %v12132_v8, %v12207_v19  ;;  %v6789_v39 = vsel %vm670_vm4, %v12134_v49, %v12209_v24  ;;  %v12221_v14 = vpack.c.b16 %v6528_v51, %v6527_v57 }
 0x7ae   : > { %v6446_v21 = vmul.f32 %v6433_v1, %v12704_v29  ;;  %v6392_v46 = vmul.f32 %v11924_v36, %v6376_v17  ;;  %8363 = vmatmul.msk.bf16.gmra.mxu2 %vm351_vm8, %v6671_v53  ;;  %8382 = vmatmul.msk.bf16.gmra.mxu3 %vm351_vm8, %v6789_v39  ;;  %v8738_v29 = vld [vmem:[#allocation2 + $0x70] sm:$0xff] }
 0x7af   : > { %v6937_v60 = vshrl.u32 %v12221_v14, 16  ;;  %v6940_v16 = vshll.u32 %v12221_v14, 16  ;;  %v6473_v0 = vld [vmem:[#allocation2 + $0x58] sm:$0xff]  ;;  %v7391_v8 = vrot.slane %v12221_v14, 1 }
 0x7b0   : > { %6459 = vst.msk [vmem:[#allocation2 + $0x60] sm:$0xff] %vm351_vm8, %v6446_v21  ;;  %v6408_v49 = vadd.f32 %v11930_v30, %v6392_v46  ;;  %v6489_v57 = vpack.c.bf16 %v6473_v0, %v6473_v0 }
 0x7b1   : > { %v6939_v31 = vrot.slane %v6937_v60, 3  ;;  %v6942_v22 = vrot.slane %v6940_v16, 4  ;;  %v7275_v12 = vrot.slane %v6940_v16, 1  ;;  %v12237_v34 = vsel %vm1227_vm6, %v7389_v37, %v7391_v8 }
 0x7b2   : > { %v6421_v20 = vadd.f32 %v8737_v5, %v6408_v49  ;;  %v6529_v55 = vunpack.c.l.b16 %v6489_v57  ;;  %v7504_v47 = vrot.slane %v6937_v60, 1  ;;  %v7505_v23 = vrot.slane %v6940_v16, 2  ;;  %v12707_v5 = vld [vmem:[#allocation12_spill] sm:$0xff] }
 0x7b3   : > { %v6361_v41 = vpop.f32.mrf.mxu0  ;;  %v12239_v54 = vor.u32 %v6942_v22, %v6939_v31  ;;  %v12242_v11 = vsel %vm1010_vm5, %v7274_v9, %v7275_v12  ;;  %v7277_v48 = vor.u32 %v7275_v12, %v6937_v60 }
 0x7b4   : > { %v6434_v52 = vmax.f32 %v6421_v20, 0.0  ;;  %v6377_v13 = vadd.f32 %v6361_v41, %v12705_v50  ;;  %v12245_v42 = vpack.c.b16 %v6529_v55, %v6528_v51  ;;  %v12250_v37 = vor.u32 %v7505_v23, %v7504_v47 }
 0x7b5   : > { %v6944_v10 = vsel %vm670_vm4, %v12171_v63, %v12239_v54 }
 0x7b6   : > { %v6447_v27 = vmul.f32 %v6434_v52, %v12706_v25  ;;  %v6393_v28 = vmul.f32 %v11924_v36, %v6377_v13  ;;  %8401 = vmatmul.msk.bf16.gmra.mxu0 %vm351_vm8, %v6944_v10  ;;  %v6548_v9 = vrot.slane %v12245_v42, 3  ;;  %v6673_v62 = vshrl.u32 %v12245_v42, 16 }
 0x7b7   : > { %v6676_v33 = vshll.u32 %v12245_v42, 16  ;;  %v6474_v40 = vld [vmem:[#allocation2 + $0x60] sm:$0xff]  ;;  %v12261_v26 = vsel %vm1323_vm7, %v12180_v56, %v12250_v37  ;;  %v6477_v56 = vld [vmem:[#allocation2 + $0x78] sm:$0xff] }
 0x7b8   : > { %6460 = vst.msk [vmem:[#allocation2 + $0x68] sm:$0xff] %vm351_vm8, %v6447_v27  ;;  %v6409_v63 = vadd.f32 %v11930_v30, %v6393_v28  ;;  %v6549_v36 = vsel %vm455_vm1, %v6546_v38, %v6548_v9  ;;  %v6675_v18 = vrot.slane %v6673_v62, 2  ;;  %v6790_v51 = vrot.slane %v6673_v62, 3 }
 0x7b9   : > { %8349 = vmatmul.msk.bf16.gmra.mxu1 %vm351_vm8, %v6549_v36  ;;  %v6678_v1 = vrot.slane %v6676_v33, 3  ;;  %v6791_v17 = vrot.slane %v6676_v33, 4  ;;  %v6490_v53 = vpack.c.bf16 %v6474_v40, %v6474_v40  ;;  %v7157_v39 = vrot.slane %v6676_v33, 1 }
 0x7ba   : > { %v6422_v21 = vadd.f32 %v8738_v29, %v6409_v63  ;;  %v6493_v57 = vpack.c.bf16 %v6477_v56, %v6477_v56 }
 0x7bb   : > { %v12271_v46 = vor.u32 %v6678_v1, %v6675_v18  ;;  %v12273_v30 = vor.u32 %v6791_v17, %v6790_v51  ;;  %v6530_v60 = vunpack.c.l.b16 %v6490_v53  ;;  %v6363_v16 = vpop.f32.mrf.mxu0  ;;  %v12276_v0 = vsel %vm1010_vm5, %v7156_v59, %v7157_v39  ;;  %v8585_v59 = vld [vmem:[%s12598_s7 + $0x58] sm:$0xff] }
 0x7bc   : > { %v6435_v38 = vmax.f32 %v6422_v21, 0.0  ;;  %v7159_v49 = vor.u32 %v7157_v39, %v6673_v62  ;;  %7209 = vmatpush.bf16.msrb.mxu2 %v8585_v59  ;;  %v7265_v52 = vunpack.c.l.b16 %v6493_v57  ;;  %v8589_v16 = vld [vmem:[%s12598_s7 + $0x78] sm:$0xff] }
 0x7bd   : > { %v6680_v31 = vsel %vm538_vm3, %v12207_v19, %v12271_v46  ;;  %v6793_v22 = vsel %vm670_vm4, %v12209_v24, %v12273_v30  ;;  %v12284_v12 = vpack.c.b16 %v6530_v60, %v6529_v55  ;;  %v8587_v19 = vld [vmem:[%s12598_s7 + $0x68] sm:$0xff]  ;;  %7438 = vmatpush.bf16.msrb.mxu0 %v8589_v16 }
 0x7be   : > { %v6448_v20 = vmul.f32 %v6435_v38, %v12707_v5  ;;  %8364 = vmatmul.msk.bf16.gmra.mxu2 %vm351_vm8, %v6680_v31  ;;  %8383 = vmatmul.msk.bf16.gmra.mxu3 %vm351_vm8, %v6793_v22  ;;  %v12316_v14 = vpack.c.b16 %v7265_v52, %v7265_v52  ;;  %v8584_v38 = vld [vmem:[%s12598_s7 + $0x50] sm:$0xff]  ;;  %v8586_v31 = vld [vmem:[%s12598_s7 + $0x60] sm:$0xff] }
 0x7bf   : > { %v6946_v47 = vshrl.u32 %v12284_v12, 16  ;;  %v6949_v24 = vshll.u32 %v12284_v12, 16  ;;  %v6475_v55 = vld [vmem:[#allocation2 + $0x68] sm:$0xff]  ;;  %v7393_v41 = vrot.slane %v12284_v12, 1  ;;  %7331 = vmatpush.bf16.msrb.mxu3 %v8587_v19 }
 0x7c0   : > { %6461 = vst.msk [vmem:[#allocation2 + $0x70] sm:$0xf] %vm368_vm9, %v6448_v20  ;;  %v6491_v23 = vpack.c.bf16 %v6475_v55, %v6475_v55  ;;  %v7285_v22 = vshll.u32 %v12316_v14, 16  ;;  %v7289_v5 = vshrl.u32 %v12316_v14, 16  ;;  %7210 = vmatpush.bf16.msrb.mxu2 %v8584_v38 }
 0x7c1   : > { %v6948_v50 = vrot.slane %v6946_v47, 3  ;;  %v6951_v13 = vrot.slane %v6949_v24, 4  ;;  %v7278_v10 = vrot.slane %v6949_v24, 1  ;;  %v12304_v25 = vsel %vm1227_vm6, %v7391_v8, %v7393_v41 }
 0x7c2   : > { %v6531_v27 = vunpack.c.l.b16 %v6491_v23  ;;  %v7508_v28 = vrot.slane %v6946_v47, 1  ;;  %v7509_v62 = vrot.slane %v6949_v24, 2 }
 0x7c3   : > { %v12306_v33 = vor.u32 %v6951_v13, %v6948_v50  ;;  %v12309_v40 = vsel %vm1010_vm5, %v7277_v48, %v7278_v10  ;;  %v7280_v63 = vor.u32 %v7278_v10, %v6946_v47  ;;  %7332 = vmatpush.bf16.msrb.mxu3 %v8586_v31  ;;  %v7517_v50 = vrot.slane %v7285_v22, 2 }
 0x7c4   : > { %v12311_v36 = vpack.c.b16 %v6531_v27, %v6530_v60  ;;  %v7510_v18 = vor.u32 %v7509_v62, %v7508_v28 }
 0x7c5   : > { %v6953_v51 = vsel %vm670_vm4, %v12239_v54, %v12306_v33 }
 0x7c6   : > { %8402 = vmatmul.msk.bf16.gmra.mxu0 %vm351_vm8, %v6953_v51  ;;  %v6550_v8 = vrot.slane %v12311_v36, 3  ;;  %v6682_v1 = vshrl.u32 %v12311_v36, 16  ;;  %v6685_v17 = vshll.u32 %v12311_v36, 16  ;;  %v12324_v48 = vsel %vm1323_vm7, %v12250_v37, %v7510_v18  ;;  %v8591_v37 = vld [vmem:[%s12598_s7 + $0x88] sm:$0xff] }
 0x7c7   : > { %v6476_v53 = vld [vmem:[#allocation2 + $0x70] sm:$0xff]  ;;  %7559 = vmatpush.bf16.msrb.mxu1 %v8591_v37 }
 0x7c8   : > { %v6551_v39 = vsel %vm455_vm1, %v6548_v9, %v6550_v8  ;;  %v6684_v54 = vrot.slane %v6682_v1, 2  ;;  %v6687_v56 = vrot.slane %v6685_v17, 3  ;;  %v6794_v29 = vrot.slane %v6682_v1, 3 }
 0x7c9   : > { %8350 = vmatmul.msk.bf16.gmra.mxu1 %vm351_vm8, %v6551_v39  ;;  %v6795_v21 = vrot.slane %v6685_v17, 4  ;;  %v6492_v60 = vpack.c.bf16 %v6476_v53, %v6476_v53  ;;  %v7160_v9 = vrot.slane %v6685_v17, 1 }
 0x7ca   : > { %v6688_v57 = vor.u32 %v6687_v56, %v6684_v54 }
 0x7cb   : > { %v6796_v20 = vor.u32 %v6795_v21, %v6794_v29  ;;  %v6893_v59 = vunpack.c.l.b16 %v6492_v60  ;;  %v12345_v19 = vsel %vm1010_vm5, %v7159_v49, %v7160_v9  ;;  %v7162_v47 = vor.u32 %v7160_v9, %v6682_v1  ;;  %v8588_v49 = vld [vmem:[%s12598_s7 + $0x70] sm:$0xff] }
 0x7cc   : > { %v6689_v24 = vsel %vm538_vm3, %v12271_v46, %v6688_v57  ;;  %v7516_v46 = vrot.slane %v7289_v5, 1  ;;  %7439 = vmatpush.bf16.msrb.mxu0 %v8588_v49 }
 0x7cd   : > { %v6797_v55 = vsel %vm670_vm4, %v12273_v30, %v6796_v20  ;;  %v12351_v23 = vpack.c.b16 %v6893_v59, %v6531_v27  ;;  %v12353_v52 = vpack.c.b16 %v6893_v59, %v6893_v59 }
 0x7ce   : > { %8365 = vmatmul.msk.bf16.gmra.mxu2 %vm351_vm8, %v6689_v24  ;;  %8384 = vmatmul.msk.bf16.gmra.mxu3 %vm351_vm8, %v6797_v55  ;;  %v12377_v54 = vor.u32 %v7517_v50, %v7516_v46 }
 0x7cf   : > { %v6955_v30 = vshrl.u32 %v12351_v23, 16  ;;  %v6958_v13 = vshll.u32 %v12351_v23, 16  ;;  %v7395_v10 = vrot.slane %v12351_v23, 1  ;;  %v7163_v27 = vshll.u32 %v12353_v52, 16 }
 0x7d1   : > { %v6957_v28 = vrot.slane %v6955_v30, 3  ;;  %v6960_v62 = vrot.slane %v6958_v13, 4  ;;  %v7281_v51 = vrot.slane %v6958_v13, 1  ;;  %v12373_v1 = vsel %vm1227_vm6, %v7393_v41, %v7395_v10 }
 0x7d2   : > { %v12375_v17 = vrot.slane %v7163_v27, 1  ;;  %v7512_v53 = vrot.slane %v6955_v30, 1  ;;  %v7513_v39 = vrot.slane %v6958_v13, 2 }
 0x7d3   : > { %v6961_v56 = vor.u32 %v6960_v62, %v6957_v28  ;;  %v12380_v29 = vsel %vm1010_vm5, %v7280_v63, %v7281_v51  ;;  %v12382_v21 = vor.u32 %v7281_v51, %v6955_v30 }
 0x7d4   : > { %v12386_v60 = vsel %vm1010_vm5, %v7162_v47, %v12375_v17  ;;  %v7514_v12 = vor.u32 %v7513_v39, %v7512_v53 }
 0x7d5   : > { %v6962_v41 = vsel %vm670_vm4, %v12306_v33, %v6961_v56 }
 0x7d6   : > { %8403 = vmatmul.msk.bf16.gmra.mxu0 %vm351_vm8, %v6962_v41  ;;  %v12392_v16 = vsel %vm1323_vm7, %v7510_v18, %v7514_v12  ;;  %v12396_v37 = vsel %vm1323_vm7, %v7514_v12, %v12377_v54 }
 0x7d9   : > { %8351 = vmatmul.msk.bf16.gmra.mxu1 %vm351_vm8, %v6550_v8 }
 0x7de   : > { %8366 = vmatmul.msk.bf16.gmra.mxu2 %vm351_vm8, %v6688_v57  ;;  %8385 = vmatmul.msk.bf16.gmra.mxu3 %vm351_vm8, %v6796_v20 }
 0x7e6   : > { %8404 = vmatmul.msk.bf16.gmra.mxu0 %vm351_vm8, %v6961_v56 }
 0x7e9   : > { %8417 = vmatmul.msk.bf16.vlgmr.msra.gmra.mxu1 %vm351_vm8, %v11984_v44 }
 0x7ee   : > { %8436 = vmatmul.msk.bf16.vlgmr.msrb.gmra.mxu2 %vm351_vm8, %v12059_v3  ;;  %8455 = vmatmul.msk.bf16.vlgmr.msrb.gmra.mxu3 %vm351_vm8, %v12095_v61 }
 0x7f6   : > { %8474 = vmatmul.msk.bf16.vlgmr.msrb.gmra.mxu0 %vm351_vm8, %v12088_v2  ;;  %v6594_v33 = vpop.f32.mrf.mxu1  ;;  %v8590_v2 = vld [vmem:[%s12598_s7 + $0x80] sm:$0xff] }
 0x7f7   : > { %7560 = vmatpush.bf16.msrb.mxu1 %v8590_v2 }
 0x7f9   : > { %8418 = vmatmul.msk.bf16.gmra.mxu1 %vm351_vm8, %v12030_v7 }
 0x7fe   : > { %8437 = vmatmul.msk.bf16.gmra.mxu2 %vm351_vm8, %v12138_v35  ;;  %8456 = vmatmul.msk.bf16.gmra.mxu3 %vm351_vm8, %v12175_v43  ;;  %v6596_v44 = vpop.f32.mrf.mxu1 }
 0x801   : > { %v6732_v63 = vpop.f32.mrf.mxu2  ;;  %v6840_v18 = vpop.f32.mrf.mxu3 }
 0x802   : > { %v6733_v3 = vadd.f32 %v6732_v63, %v6594_v33 }
 0x803   : > { %v7005_v8 = vpop.f32.mrf.mxu0 }
 0x804   : > { %v6874_v38 = vadd.f32 %v6840_v18, %v6733_v3 }
 0x806   : > { %v12419_v61 = vadd.f32 %v7005_v8, %v6874_v38  ;;  %8475 = vmatmul.msk.bf16.gmra.mxu0 %vm351_vm8, %v12168_v6  ;;  %v6599_v7 = vpop.f32.mrf.mxu1 }
 0x809   : > { %v6734_v35 = vpop.f32.mrf.mxu2  ;;  %v6842_v9 = vpop.f32.mrf.mxu3  ;;  %8419 = vmatmul.msk.bf16.gmra.mxu1 %vm351_vm8, %v12100_v32 }
 0x80a   : > { %v6735_v43 = vadd.f32 %v6734_v35, %v6596_v44 }
 0x80b   : > { %v7007_v57 = vpop.f32.mrf.mxu0 }
 0x80c   : > { %v6875_v31 = vadd.f32 %v6842_v9, %v6735_v43 }
 0x80e   : > { %v12425_v20 = vadd.f32 %v7007_v57, %v6875_v31  ;;  %8438 = vmatmul.msk.bf16.gmra.mxu2 %vm351_vm8, %v12213_v58  ;;  %8457 = vmatmul.msk.bf16.gmra.mxu3 %vm351_vm8, %v12242_v11  ;;  %v6601_v59 = vpop.f32.mrf.mxu1 }
 0x811   : > { %v6737_v6 = vpop.f32.mrf.mxu2  ;;  %v6845_v47 = vpop.f32.mrf.mxu3 }
 0x812   : > { %v6738_v24 = vadd.f32 %v6737_v6, %v6599_v7 }
 0x813   : > { %v7010_v55 = vpop.f32.mrf.mxu0 }
 0x814   : > { %v6876_v49 = vadd.f32 %v6845_v47, %v6738_v24 }
 0x816   : > { %v12431_v46 = vadd.f32 %v7010_v55, %v6876_v49  ;;  %8476 = vmatmul.msk.bf16.gmra.mxu0 %vm351_vm8, %v12237_v34  ;;  %v6604_v32 = vpop.f32.mrf.mxu1 }
 0x819   : > { %v6739_v50 = vpop.f32.mrf.mxu2  ;;  %v6847_v30 = vpop.f32.mrf.mxu3  ;;  %8420 = vmatmul.msk.bf16.gmra.mxu1 %vm351_vm8, %v12178_v4 }
 0x81a   : > { %v6740_v58 = vadd.f32 %v6739_v50, %v6601_v59 }
 0x81b   : > { %v7012_v13 = vpop.f32.mrf.mxu0 }
 0x81c   : > { %v6877_v11 = vadd.f32 %v6847_v30, %v6740_v58  ;;  %v7167_v30 = vshrl.u32 %v12353_v52, 16 }
 0x81e   : > { %v12437_v27 = vadd.f32 %v7012_v13, %v6877_v11  ;;  %8439 = vmatmul.msk.bf16.gmra.mxu2 %vm351_vm8, %v12276_v0  ;;  %8458 = vmatmul.msk.bf16.gmra.mxu3 %vm351_vm8, %v12309_v40  ;;  %v6606_v28 = vpop.f32.mrf.mxu1 }
 0x821   : > { %v6742_v62 = vpop.f32.mrf.mxu2  ;;  %v6850_v34 = vpop.f32.mrf.mxu3 }
 0x822   : > { %v6743_v51 = vadd.f32 %v6742_v62, %v6604_v32 }
 0x823   : > { %v7015_v53 = vpop.f32.mrf.mxu0 }
 0x824   : > { %v6878_v39 = vadd.f32 %v6850_v34, %v6743_v51 }
 0x826   : > { %v12443_v56 = vadd.f32 %v7015_v53, %v6878_v39  ;;  %8477 = vmatmul.msk.bf16.gmra.mxu0 %vm351_vm8, %v12304_v25  ;;  %v6609_v4 = vpop.f32.mrf.mxu1 }
 0x829   : > { %v6744_v12 = vpop.f32.mrf.mxu2  ;;  %v6852_v41 = vpop.f32.mrf.mxu3  ;;  %8421 = vmatmul.msk.bf16.gmra.mxu1 %vm351_vm8, %v12245_v42 }
 0x82a   : > { %v6745_v0 = vadd.f32 %v6744_v12, %v6606_v28 }
 0x82b   : > { %v7017_v33 = vpop.f32.mrf.mxu0 }
 0x82c   : > { %v6879_v40 = vadd.f32 %v6852_v41, %v6745_v0 }
 0x82e   : > { %v12449_v44 = vadd.f32 %v7017_v33, %v6879_v40  ;;  %8440 = vmatmul.msk.bf16.gmra.mxu2 %vm351_vm8, %v12345_v19  ;;  %8459 = vmatmul.msk.bf16.gmra.mxu3 %vm351_vm8, %v12380_v29  ;;  %v6611_v63 = vpop.f32.mrf.mxu1  ;;  %v7287_v19 = vrot.slane %v7285_v22, 1 }
 0x830   : > { %v7288_v57 = vsel %vm1010_vm5, %v12382_v21, %v7287_v19  ;;  %v7291_v58 = vor.u32 %v7289_v5, %v7287_v19 }
 0x831   : > { %v6747_v18 = vpop.f32.mrf.mxu2  ;;  %v6855_v25 = vpop.f32.mrf.mxu3 }
 0x832   : > { %v6748_v3 = vadd.f32 %v6747_v18, %v6609_v4 }
 0x833   : > { %v7020_v8 = vpop.f32.mrf.mxu0 }
 0x834   : > { %v6880_v38 = vadd.f32 %v6855_v25, %v6748_v3 }
 0x836   : > { %v12455_v2 = vadd.f32 %v7020_v8, %v6880_v38  ;;  %8478 = vmatmul.msk.bf16.gmra.mxu0 %vm351_vm8, %v12373_v1  ;;  %v6614_v42 = vpop.f32.mrf.mxu1 }
 0x839   : > { %v6749_v7 = vpop.f32.mrf.mxu2  ;;  %v6857_v35 = vpop.f32.mrf.mxu3  ;;  %8422 = vmatmul.msk.bf16.gmra.mxu1 %vm351_vm8, %v12311_v36  ;;  %v7397_v36 = vrot.slane %v12316_v14, 1 }
 0x83a   : > { %v6750_v29 = vadd.f32 %v6749_v7, %v6611_v63 }
 0x83b   : > { %v7022_v9 = vpop.f32.mrf.mxu0  ;;  %v7398_v55 = vsel %vm1227_vm6, %v7395_v10, %v7397_v36  ;;  %v7169_v10 = vor.u32 %v7167_v30, %v12375_v17 }
 0x83c   : > { %v6881_v43 = vadd.f32 %v6857_v35, %v6750_v29 }
 0x83e   : > { %v12465_v31 = vadd.f32 %v7022_v9, %v6881_v43  ;;  %8441 = vmatmul.msk.bf16.gmra.mxu2 %vm351_vm8, %v12386_v60  ;;  %8460 = vmatmul.msk.bf16.gmra.mxu3 %vm351_vm8, %v7288_v57  ;;  %v6616_v1 = vpop.f32.mrf.mxu1 }
 0x841   : > { %v6752_v59 = vpop.f32.mrf.mxu2  ;;  %v6860_v6 = vpop.f32.mrf.mxu3 }
 0x842   : > { %v6753_v47 = vadd.f32 %v6752_v59, %v6614_v42 }
 0x843   : > { %v7025_v22 = vpop.f32.mrf.mxu0 }
 0x844   : > { %v6882_v24 = vadd.f32 %v6860_v6, %v6753_v47 }
 0x846   : > { %v12474_v21 = vadd.f32 %v7025_v22, %v6882_v24  ;;  %8479 = vmatmul.msk.bf16.gmra.mxu0 %vm351_vm8, %v7398_v55  ;;  %v6619_v49 = vpop.f32.mrf.mxu1 }
 0x849   : > { %v6754_v60 = vpop.f32.mrf.mxu2  ;;  %v6862_v32 = vpop.f32.mrf.mxu3  ;;  %8423 = vmatmul.msk.bf16.gmra.mxu1 %vm351_vm8, %v12353_v52 }
 0x84a   : > { %v6755_v50 = vadd.f32 %v6754_v60, %v6616_v1 }
 0x84b   : > { %v7027_v13 = vpop.f32.mrf.mxu0 }
 0x84c   : > { %v6883_v23 = vadd.f32 %v6862_v32, %v6755_v50 }
 0x84e   : > { %v12483_v11 = vadd.f32 %v7027_v13, %v6883_v23  ;;  %8442 = vmatmul.msk.bf16.gmra.mxu2 %vm351_vm8, %v7169_v10  ;;  %v6621_v28 = vpop.f32.mrf.mxu1  ;;  %8461 = vmatmul.msk.bf16.gmra.mxu3 %vm351_vm8, %v7291_v58 }
 0x851   : > { %v6757_v62 = vpop.f32.mrf.mxu2  ;;  %v6865_v34 = vpop.f32.mrf.mxu3 }
 0x852   : > { %v6758_v51 = vadd.f32 %v6757_v62, %v6619_v49 }
 0x853   : > { %v7030_v53 = vpop.f32.mrf.mxu0 }
 0x854   : > { %v6884_v39 = vadd.f32 %v6865_v34, %v6758_v51 }
 0x856   : > { %v12487_v52 = vadd.f32 %v7030_v53, %v6884_v39  ;;  %v6624_v14 = vpop.f32.mrf.mxu1  ;;  %8480 = vmatmul.msk.bf16.gmra.mxu0 %vm351_vm8, %v7397_v36 }
 0x859   : > { %v6759_v5 = vpop.f32.mrf.mxu2  ;;  %v6867_v4 = vpop.f32.mrf.mxu3  ;;  %8493 = vmatmul.msk.bf16.vlgmr.msrb.gmra.mxu1 %vm351_vm8, %v12118_v45 }
 0x85a   : > { %v6760_v17 = vadd.f32 %v6759_v5, %v6621_v28 }
 0x85b   : > { %v7032_v12 = vpop.f32.mrf.mxu0 }
 0x85c   : > { %v6885_v41 = vadd.f32 %v6867_v4, %v6760_v17 }
 0x85e   : > { %v12492_v0 = vadd.f32 %v7032_v12, %v6885_v41  ;;  %v6626_v33 = vpop.f32.mrf.mxu1 }
 0x861   : > { %v6762_v40 = vpop.f32.mrf.mxu2  ;;  %v6870_v63 = vpop.f32.mrf.mxu3 }
 0x862   : > { %v6763_v18 = vadd.f32 %v6762_v40, %v6624_v14 }
 0x863   : > { %v7035_v25 = vpop.f32.mrf.mxu0 }
 0x864   : > { %v6886_v3 = vadd.f32 %v6870_v63, %v6763_v18 }
 0x866   : > { %v12494_v8 = vadd.f32 %v7035_v25, %v6886_v3  ;;  %v7094_v38 = vpop.f32.mrf.mxu1 }
 0x867   : > { %v7128_v42 = vadd.f32 %v7094_v38, %v12419_v61 }
 0x869   : > { %v6764_v7 = vpop.f32.mrf.mxu2  ;;  %v6872_v35 = vpop.f32.mrf.mxu3  ;;  %8494 = vmatmul.msk.bf16.gmra.mxu1 %vm351_vm8, %v12196_v15 }
 0x86b   : > { %v7037_v45 = vpop.f32.mrf.mxu0 }
 0x86e   : > { %v7096_v19 = vpop.f32.mrf.mxu1 }
 0x86f   : > { %v7129_v29 = vadd.f32 %v7096_v19, %v12425_v20 }
 0x871   : > { %v7212_v9 = vpop.f32.mrf.mxu2  ;;  %v7334_v43 = vpop.f32.mrf.mxu3 }
 0x872   : > { %v7246_v57 = vadd.f32 %v7212_v9, %v7128_v42 }
 0x873   : > { %v7441_v1 = vpop.f32.mrf.mxu0 }
 0x874   : > { %v7368_v59 = vadd.f32 %v7334_v43, %v7246_v57 }
 0x876   : > { %v12500_v6 = vadd.f32 %v7441_v1, %v7368_v59  ;;  %v7099_v36 = vpop.f32.mrf.mxu1 }
 0x877   : > { %v7130_v47 = vadd.f32 %v7099_v36, %v12431_v46 }
 0x879   : > { %v7214_v61 = vpop.f32.mrf.mxu2  ;;  %v7336_v22 = vpop.f32.mrf.mxu3  ;;  %8495 = vmatmul.msk.bf16.gmra.mxu1 %vm351_vm8, %v12261_v26 }
 0x87a   : > { %v7247_v15 = vadd.f32 %v7214_v61, %v7129_v29 }
 0x87b   : > { %v7443_v24 = vpop.f32.mrf.mxu0 }
 0x87c   : > { %v7369_v55 = vadd.f32 %v7336_v22, %v7247_v15 }
 0x87e   : > { %v12505_v49 = vadd.f32 %v7443_v24, %v7369_v55  ;;  %v7101_v20 = vpop.f32.mrf.mxu1 }
 0x87f   : > { %v7131_v60 = vadd.f32 %v7101_v20, %v12437_v27 }
 0x881   : > { %v7217_v32 = vpop.f32.mrf.mxu2  ;;  %v7339_v50 = vpop.f32.mrf.mxu3 }
 0x882   : > { %v7248_v30 = vadd.f32 %v7217_v32, %v7130_v47 }
 0x883   : > { %v7446_v58 = vpop.f32.mrf.mxu0 }
 0x884   : > { %v7370_v13 = vadd.f32 %v7339_v50, %v7248_v30 }
 0x886   : > { %v12508_v23 = vadd.f32 %v7446_v58, %v7370_v13  ;;  %v7104_v46 = vpop.f32.mrf.mxu1 }
 0x887   : > { %v7132_v10 = vadd.f32 %v7104_v46, %v12443_v56 }
 0x889   : > { %v7219_v28 = vpop.f32.mrf.mxu2  ;;  %v7341_v26 = vpop.f32.mrf.mxu3  ;;  %8496 = vmatmul.msk.bf16.gmra.mxu1 %vm351_vm8, %v12324_v48 }
 0x88a   : > { %v7249_v62 = vadd.f32 %v7219_v28, %v7131_v60 }
 0x88b   : > { %v7448_v34 = vpop.f32.mrf.mxu0 }
 0x88c   : > { %v7371_v51 = vadd.f32 %v7341_v26, %v7249_v62 }
 0x88e   : > { %v12513_v53 = vadd.f32 %v7448_v34, %v7371_v51  ;;  %v7106_v27 = vpop.f32.mrf.mxu1 }
 0x88f   : > { %v7133_v39 = vadd.f32 %v7106_v27, %v12449_v44 }
 0x891   : > { %v7222_v14 = vpop.f32.mrf.mxu2  ;;  %v7344_v5 = vpop.f32.mrf.mxu3 }
 0x892   : > { %v7250_v4 = vadd.f32 %v7222_v14, %v7132_v10 }
 0x893   : > { %v7451_v17 = vpop.f32.mrf.mxu0 }
 0x894   : > { %v7372_v12 = vadd.f32 %v7344_v5, %v7250_v4 }
 0x896   : > { %v12516_v41 = vadd.f32 %v7451_v17, %v7372_v12  ;;  %v7109_v56 = vpop.f32.mrf.mxu1 }
 0x897   : > { %v7134_v33 = vadd.f32 %v7109_v56, %v12455_v2 }
 0x899   : > { %v7224_v40 = vpop.f32.mrf.mxu2  ;;  %v7346_v48 = vpop.f32.mrf.mxu3  ;;  %8497 = vmatmul.msk.bf16.gmra.mxu1 %vm351_vm8, %v12392_v16 }
 0x89a   : > { %v7251_v63 = vadd.f32 %v7224_v40, %v7133_v39 }
 0x89b   : > { %v7453_v18 = vpop.f32.mrf.mxu0 }
 0x89c   : > { %v7373_v25 = vadd.f32 %v7346_v48, %v7251_v63  ;;  %v8712_v63 = vld [vmem:[%s12599_s8] ss:$0 sm:$0xff] }
 0x89e   : > { %v12521_v3 = vadd.f32 %v7453_v18, %v7373_v25  ;;  %v7111_v44 = vpop.f32.mrf.mxu1 }
 0x89f   : > { %v7135_v38 = vadd.f32 %v7111_v44, %v12465_v31 }
 0x8a1   : > { %v7227_v42 = vpop.f32.mrf.mxu2  ;;  %v7349_v7 = vpop.f32.mrf.mxu3 }
 0x8a2   : > { %v7252_v35 = vadd.f32 %v7227_v42, %v7134_v33 }
 0x8a3   : > { %v7456_v45 = vpop.f32.mrf.mxu0 }
 0x8a4   : > { %v7374_v19 = vadd.f32 %v7349_v7, %v7252_v35 }
 0x8a6   : > { %v12524_v29 = vadd.f32 %v7456_v45, %v7374_v19  ;;  %v7114_v2 = vpop.f32.mrf.mxu1 }
 0x8a7   : > { %v7136_v9 = vadd.f32 %v7114_v2, %v12474_v21 }
 0x8a9   : > { %v7229_v43 = vpop.f32.mrf.mxu2  ;;  %v7351_v16 = vpop.f32.mrf.mxu3  ;;  %8498 = vmatmul.msk.bf16.gmra.mxu1 %vm351_vm8, %v12396_v37 }
 0x8aa   : > { %v7253_v57 = vadd.f32 %v7229_v43, %v7135_v38 }
 0x8ab   : > { %v7458_v1 = vpop.f32.mrf.mxu0 }
 0x8ac   : > { %v7375_v59 = vadd.f32 %v7351_v16, %v7253_v57 }
 0x8ae   : > { %v12529_v36 = vadd.f32 %v7458_v1, %v7375_v59  ;;  %v7116_v31 = vpop.f32.mrf.mxu1 }
 0x8af   : > { %v7137_v47 = vadd.f32 %v7116_v31, %v12483_v11 }
 0x8b1   : > { %v7232_v61 = vpop.f32.mrf.mxu2  ;;  %v7354_v22 = vpop.f32.mrf.mxu3 }
 0x8b2   : > { %v7254_v15 = vadd.f32 %v7232_v61, %v7136_v9 }
 0x8b3   : > { %v7461_v24 = vpop.f32.mrf.mxu0 }
 0x8b4   : > { %v7376_v55 = vadd.f32 %v7354_v22, %v7254_v15 }
 0x8b6   : > { %v12532_v20 = vadd.f32 %v7461_v24, %v7376_v55  ;;  %v7119_v21 = vpop.f32.mrf.mxu1 }
 0x8b7   : > { %v7138_v60 = vadd.f32 %v7119_v21, %v12487_v52 }
 0x8b9   : > { %v7234_v32 = vpop.f32.mrf.mxu2  ;;  %v7356_v37 = vpop.f32.mrf.mxu3  ;;  %8499 = vmatmul.msk.bf16.gmra.mxu1 %vm351_vm8, %v12377_v54 }
 0x8ba   : > { %v7255_v50 = vadd.f32 %v7234_v32, %v7137_v47 }
 0x8bb   : > { %v7463_v30 = vpop.f32.mrf.mxu0 }
 0x8bc   : > { %v7377_v58 = vadd.f32 %v7356_v37, %v7255_v50 }
 0x8be   : > { %v12537_v13 = vadd.f32 %v7463_v30, %v7377_v58  ;;  %v7121_v11 = vpop.f32.mrf.mxu1 }
 0x8bf   : > { %v7139_v46 = vadd.f32 %v7121_v11, %v12492_v0 }
 0x8c1   : > { %v7237_v10 = vpop.f32.mrf.mxu2  ;;  %v7359_v28 = vpop.f32.mrf.mxu3 }
 0x8c2   : > { %v7256_v26 = vadd.f32 %v7237_v10, %v7138_v60 }
 0x8c3   : > { %v7466_v62 = vpop.f32.mrf.mxu0 }
 0x8c4   : > { %v7378_v34 = vadd.f32 %v7359_v28, %v7256_v26 }
 0x8c6   : > { %v12540_v52 = vadd.f32 %v7466_v62, %v7378_v34  ;;  %v7124_v51 = vpop.f32.mrf.mxu1 }
 0x8c7   : > { %v7140_v27 = vadd.f32 %v7124_v51, %v12494_v8 }
 0x8c9   : > { %v7239_v54 = vpop.f32.mrf.mxu2  ;;  %v7361_v39 = vpop.f32.mrf.mxu3 }
 0x8ca   : > { %v7257_v14 = vadd.f32 %v7239_v54, %v7139_v46 }
 0x8cb   : > { %v7468_v5 = vpop.f32.mrf.mxu0 }
 0x8cc   : > { %v7379_v4 = vadd.f32 %v7361_v39, %v7257_v14 }
 0x8ce   : > { %v7486_v17 = vadd.f32 %v7468_v5, %v7379_v4  ;;  %v7126_v12 = vpop.f32.mrf.mxu1 }
 0x8d1   : > { %v7242_v56 = vpop.f32.mrf.mxu2  ;;  %v7364_v0 = vpop.f32.mrf.mxu3 }
 0x8d2   : > { %v7258_v33 = vadd.f32 %v7242_v56, %v7140_v27 }
 0x8d3   : > { %v7471_v40 = vpop.f32.mrf.mxu0 }
 0x8d4   : > { %v7380_v48 = vadd.f32 %v7364_v0, %v7258_v33 }
 0x8d6   : > { %v7487_v18 = vadd.f32 %v7471_v40, %v7380_v48  ;;  %v7562_v25 = vpop.f32.mrf.mxu1 }
 0x8d7   : > { %v7596_v8 = vadd.f32 %v7562_v25, %v12500_v6 }
 0x8d9   : > { %v7612_v44 = vadd.f32 %v8712_v63, %v7596_v8  ;;  %v7244_v38 = vpop.f32.mrf.mxu2  ;;  %v7366_v42 = vpop.f32.mrf.mxu3 }
 0x8db   : > { %7626 = vst.msk [vmem:[%s12551_s10] sm:$0xff] %vm7625_vm10, %v7612_v44  ;;  %v7473_v7 = vpop.f32.mrf.mxu0 }
 0x8de   : > { %v7564_v35 = vpop.f32.mrf.mxu1 }
 0x8df   : > { %v7597_v6 = vadd.f32 %v7564_v35, %v12505_v49 }
 0x8e1   : > { %v7613_v45 = vadd.f32 %v8712_v63, %v7597_v6 }
 0x8e3   : > { %7627 = vst.msk [vmem:[%s12551_s10 + $0x8] sm:$0xff] %vm7625_vm10, %v7613_v45 }
 0x8e6   : > { %v7567_v19 = vpop.f32.mrf.mxu1 }
 0x8e7   : > { %v7598_v2 = vadd.f32 %v7567_v19, %v12508_v23 }
 0x8e9   : > { %v7614_v9 = vadd.f32 %v8712_v63, %v7598_v2 }
 0x8eb   : > { %7628 = vst.msk [vmem:[%s12551_s10 + $0x10] sm:$0xff] %vm7625_vm10, %v7614_v9 }
 0x8ee   : > { %v7569_v43 = vpop.f32.mrf.mxu1 }
 0x8ef   : > { %v7599_v16 = vadd.f32 %v7569_v43, %v12513_v53 }
 0x8f1   : > { %v7615_v57 = vadd.f32 %v8712_v63, %v7599_v16 }
 0x8f3   : > { %7629 = vst.msk [vmem:[%s12551_s10 + $0x18] sm:$0xff] %vm7625_vm10, %v7615_v57 }
 0x8f6   : > { %v7572_v1 = vpop.f32.mrf.mxu1 }
 0x8f7   : > { %v7600_v49 = vadd.f32 %v7572_v1, %v12516_v41 }
 0x8f9   : > { %v7616_v59 = vadd.f32 %v8712_v63, %v7600_v49 }
 0x8fb   : > { %7630 = vst.msk [vmem:[%s12551_s10 + $0x20] sm:$0xff] %vm7625_vm10, %v7616_v59 }
 0x8fe   : > { %v7574_v31 = vpop.f32.mrf.mxu1 }
 0x8ff   : > { %v7601_v23 = vadd.f32 %v7574_v31, %v12521_v3 }
 0x901   : > { %v7617_v47 = vadd.f32 %v8712_v63, %v7601_v23 }
 0x903   : > { %7631 = vst.msk [vmem:[%s12551_s10 + $0x28] sm:$0xff] %vm7625_vm10, %v7617_v47 }
 0x906   : > { %v7577_v61 = vpop.f32.mrf.mxu1 }
 0x907   : > { %v7602_v53 = vadd.f32 %v7577_v61, %v12524_v29 }
 0x909   : > { %v7618_v22 = vadd.f32 %v8712_v63, %v7602_v53 }
 0x90b   : > { %7632 = vst.msk [vmem:[%s12551_s10 + $0x30] sm:$0xff] %vm7625_vm10, %v7618_v22 }
 0x90e   : > { %v7579_v15 = vpop.f32.mrf.mxu1 }
 0x90f   : > { %v7603_v41 = vadd.f32 %v7579_v15, %v12529_v36 }
 0x911   : > { %v7619_v24 = vadd.f32 %v8712_v63, %v7603_v41 }
 0x913   : > { %7633 = vst.msk [vmem:[%s12551_s10 + $0x38] sm:$0xff] %vm7625_vm10, %v7619_v24 }
 0x916   : > { %v7582_v55 = vpop.f32.mrf.mxu1 }
 0x917   : > { %v7604_v3 = vadd.f32 %v7582_v55, %v12532_v20 }
 0x919   : > { %v7620_v21 = vadd.f32 %v8712_v63, %v7604_v3 }
 0x91b   : > { %7634 = vst.msk [vmem:[%s12551_s10 + $0x40] sm:$0xff] %vm7625_vm10, %v7620_v21 }
 0x91e   : > { %v7584_v60 = vpop.f32.mrf.mxu1 }
 0x91f   : > { %v7605_v29 = vadd.f32 %v7584_v60, %v12537_v13 }
 0x921   : > { %v7621_v32 = vadd.f32 %v8712_v63, %v7605_v29 }
 0x923   : > { %7635 = vst.msk [vmem:[%s12551_s10 + $0x48] sm:$0xff] %vm7625_vm10, %v7621_v32 }
 0x926   : > { %v7587_v37 = vpop.f32.mrf.mxu1 }
 0x927   : > { %v7606_v36 = vadd.f32 %v7587_v37, %v12540_v52 }
 0x929   : > { %v7622_v50 = vadd.f32 %v8712_v63, %v7606_v36 }
 0x92b   : > { %7636 = vst.msk [vmem:[%s12551_s10 + $0x50] sm:$0xff] %vm7625_vm10, %v7622_v50 }
 0x92e   : > { %v7589_v30 = vpop.f32.mrf.mxu1 }
 0x92f   : > { %v7607_v58 = vadd.f32 %v7589_v30, %v7486_v17 }
 0x931   : > { %v7623_v11 = vadd.f32 %v8712_v63, %v7607_v58 }
 0x933   : > { %7637 = vst.msk [vmem:[%s12551_s10 + $0x58] sm:$0xff] %vm7625_vm10, %v7623_v11 }
 0x936   : > { %v7592_v20 = vpop.f32.mrf.mxu1 }
 0x937   : > { %v7608_v46 = vadd.f32 %v7592_v20, %v7487_v18 }
 0x939   : > { %v7624_v10 = vadd.f32 %v8712_v63, %v7608_v46 }
 0x93b   : > { %7639 = vst.msk [vmem:[%s12551_s10 + $0x60] sm:$0xf] %vm7638_vm11, %v7624_v10 }
 0x93e   : > { %v7594_v13 = vpop.f32.mrf.mxu1 }
 0x93f PF: > { %s20_s30 = sadd.s32 1, %s8779_s30  }
 0x940   : > { %p17_p7 = scmp.ge.s32.totalorder %s20_s30, 4  }
 0x942   :  { %19 = sbr.rel (!%p17_p7) target bundleno = 1 (0x1), region = 148 }
 0x947   :  { %7661 = vsyncpa [#allocation5], 1 }
 0x948   :  { %7663 = vsyncpa [#allocation5 + $0x1], 1 }

</bundles_post_ra>
